<compile_context>
chip_gen: v5e
topology: v5e:2x2
jax: 0.10.0
libtpu: 0.0.40
codegen_flags: <defaults>
</compile_context>

<pallas_src>
import functools

import jax
import jax.numpy as jnp
from jax.experimental import pallas as pl
from jax.experimental.pallas import tpu as pltpu


# ---------------------------------------------------------------------------
# VMEM budget / tiling helpers
# ---------------------------------------------------------------------------

def _round_up(x, m):
    return ((x + m - 1) // m) * m


@functools.lru_cache(maxsize=None)
def _vmem_limit_bytes():
    """Generation-aware scoped-VMEM limit (v7x has only 64 MiB physical per core)."""
    try:
        cap = int(pltpu.get_tpu_info().vmem_capacity_bytes)
    except Exception:
        cap = 128 * 1024 * 1024
    if cap <= 64 * 1024 * 1024:          # v7x-class
        return 36 * 1024 * 1024
    return 72 * 1024 * 1024              # v5e / v6e (128 MiB physical)


def _pick_tile(total, max_tile, mult):
    """Tile <= max_tile (multiple of `mult`, or == total) with a balanced, even
    number of grid steps whenever more than one step is needed (v7x megacore)."""
    total, max_tile, mult = int(total), int(max_tile), int(mult)
    if max_tile >= total:
        # Fits in one step; still prefer two balanced parallel steps when free.
        if total >= 2 * mult and total % (2 * mult) == 0:
            return total // 2
        return total
    max_tile = max(mult, (max_tile // mult) * mult)
    steps = pl.cdiv(total, max_tile)
    if steps % 2:
        steps += 1
    tile = _round_up(pl.cdiv(total, steps), mult)
    return min(tile, max_tile)


# ---------------------------------------------------------------------------
# Kernel 1: qkv projection (no bias), one bf16 matmul -> six dense bf16 outputs
# ---------------------------------------------------------------------------

def _qkv_kernel(x_ref, w_ref, *out_refs):
    acc = jnp.dot(x_ref[...].astype(jnp.bfloat16), w_ref[...],
                  preferred_element_type=jnp.float32)          # [tm, 6*Dh] f32
    dh = out_refs[0].shape[-1]
    for i, o_ref in enumerate(out_refs):                       # q_s,q_t,k_s,k_t,v_s,v_t
        o_ref[...] = acc[:, i * dh:(i + 1) * dh].astype(o_ref.dtype)


def pallas_qkv(x2d, w_bf16, dh):
    """x2d: [M, D] f32, w_bf16: [D, 3D] bf16 -> six bf16 [M, Dh] arrays."""
    M, D = x2d.shape
    three_d = w_bf16.shape[1]
    limit = _vmem_limit_bytes()
    w_bytes = D * three_d * 2                                   # resident, single-buffered
    per_row = 2 * D * x2d.dtype.itemsize + 2 * three_d * 2      # dbl-buffered x + outputs
    budget = max(per_row * 8, int(limit * 0.6) - w_bytes)
    tm = _pick_tile(M, max(8, budget // per_row), 8)
    grid = (pl.cdiv(M, tm),)

    out_sd = jax.ShapeDtypeStruct((M, dh), jnp.bfloat16)
    out_spec = pl.BlockSpec((tm, dh), lambda i: (i, 0))
    return pl.pallas_call(
        _qkv_kernel,
        out_shape=(out_sd,) * 6,
        grid=grid,
        in_specs=[
            pl.BlockSpec((tm, D), lambda i: (i, 0)),
            pl.BlockSpec((D, three_d), lambda i: (0, 0),
                         pipeline_mode=pl.Buffered(1)),          # resident weight
        ],
        out_specs=(out_spec,) * 6,
        compiler_params=pltpu.CompilerParams(
            dimension_semantics=("parallel",),
            vmem_limit_bytes=limit),
    )(x2d, w_bf16)


# ---------------------------------------------------------------------------
# Kernel 2: grouped multi-head attention
#   q/k/v blocks: [G_blk, L, heads*d] bf16; per-head MXU matmuls, f32 softmax,
#   f32 VMEM scratch accumulator, one dense store.
# ---------------------------------------------------------------------------

def _grouped_attn_kernel(q_ref, k_ref, v_ref, o_ref, acc_ref, *, heads, scale):
    q = q_ref[...] * scale               # one dense VPU pass (scale hoisted), stays bf16
    k = k_ref[...]
    v = v_ref[...]
    d = q.shape[-1] // heads
    for hh in range(heads):              # static unroll; per-head MXU matmuls
        sl = slice(hh * d, (hh + 1) * d)
        s = jnp.einsum('gqd,gkd->gqk', q[:, :, sl], k[:, :, sl],
                       preferred_element_type=jnp.float32)       # [G_blk, L, L] f32
        s_max = jnp.max(s, axis=-1, keepdims=True)
        p = jnp.exp(s - s_max)
        p = p * pl.reciprocal(jnp.sum(p, axis=-1, keepdims=True), approx=True)
        acc_ref[:, :, sl] = jnp.einsum('gqk,gkd->gqd',
                                       p.astype(v.dtype), v[:, :, sl],
                                       preferred_element_type=jnp.float32)
    # Single lane-dense store over heads*d.
    o_ref[...] = acc_ref[...].astype(o_ref.dtype)


def pallas_grouped_attention(q, k, v, *, heads, scale):
    """q/k/v: [G, L, heads*d] bf16; independent softmax attention per (group, head)."""
    G, L, Dh = q.shape
    limit = _vmem_limit_bytes()
    bpe = q.dtype.itemsize
    # q/k/v/o double-buffered + loaded values + f32 scratch + f32 score/prob tensors.
    per_group = 12 * L * Dh * bpe + 4 * L * Dh + 12 * L * L
    gb = _pick_tile(G, max(1, int(limit * 0.5) // per_group), 1)
    grid = (pl.cdiv(G, gb),)

    spec = pl.BlockSpec((gb, L, Dh), lambda i: (i, 0, 0))
    kern = functools.partial(_grouped_attn_kernel, heads=heads, scale=scale)
    return pl.pallas_call(
        kern,
        out_shape=jax.ShapeDtypeStruct((G, L, Dh), q.dtype),
        grid=grid,
        in_specs=[spec, spec, spec],
        out_specs=spec,
        scratch_shapes=[pltpu.VMEM((gb, L, Dh), jnp.float32)],
        compiler_params=pltpu.CompilerParams(
            dimension_semantics=("parallel",),
            vmem_limit_bytes=limit),
    )(q, k, v)


# ---------------------------------------------------------------------------
# Kernel 3: fused concat + output projection  (out = x_s @ Wp[:Dh] + x_t @ Wp[Dh:] + b)
# ---------------------------------------------------------------------------

def _concat_proj_kernel(x1_ref, x2_ref, w1_ref, w2_ref, b_ref, o_ref):
    acc = jnp.dot(x1_ref[...], w1_ref[...], preferred_element_type=jnp.float32)
    acc = acc + jnp.dot(x2_ref[...], w2_ref[...], preferred_element_type=jnp.float32)
    acc = acc + b_ref[...].astype(jnp.float32)
    o_ref[...] = acc.astype(o_ref.dtype)


def pallas_concat_proj(x1, x2, w_bf16, b, out_dtype):
    """concat([x1, x2], -1) @ w + b without materializing the concat."""
    M, K1 = x1.shape
    K2 = x2.shape[1]
    Nout = w_bf16.shape[1]
    w1, w2 = w_bf16[:K1], w_bf16[K1:]
    limit = _vmem_limit_bytes()
    w_bytes = (K1 + K2) * Nout * 2 + Nout * 4
    per_row = 2 * (K1 + K2) * x1.dtype.itemsize + 2 * Nout * 4
    budget = max(per_row * 8, int(limit * 0.6) - w_bytes)
    tm = _pick_tile(M, max(8, budget // per_row), 8)
    grid = (pl.cdiv(M, tm),)

    return pl.pallas_call(
        _concat_proj_kernel,
        out_shape=jax.ShapeDtypeStruct((M, Nout), out_dtype),
        grid=grid,
        in_specs=[
            pl.BlockSpec((tm, K1), lambda i: (i, 0)),
            pl.BlockSpec((tm, K2), lambda i: (i, 0)),
            pl.BlockSpec((K1, Nout), lambda i: (0, 0), pipeline_mode=pl.Buffered(1)),
            pl.BlockSpec((K2, Nout), lambda i: (0, 0), pipeline_mode=pl.Buffered(1)),
            pl.BlockSpec((1, Nout), lambda i: (0, 0), pipeline_mode=pl.Buffered(1)),
        ],
        out_specs=pl.BlockSpec((tm, Nout), lambda i: (i, 0)),
        compiler_params=pltpu.CompilerParams(
            dimension_semantics=("parallel",),
            vmem_limit_bytes=limit),
    )(x1, x2, w1, w2, b.reshape(1, Nout))


# ---------------------------------------------------------------------------
# Forward pass (glue reshapes in plain JAX, hot paths in Pallas)
# ---------------------------------------------------------------------------

def attention_factorize_dot_prod(x, params, num_heads):
    """Replicates AttentionFactorizeDotProd.forward(x, kv_subsample=False)."""
    N, T, S, D = x.shape
    head_dim = D // num_heads
    scale = head_dim ** (-0.5)
    Dh = D // 2
    h = num_heads // 2
    M = N * T * S

    qkv_w = params["qkv_w"].astype(jnp.bfloat16)
    proj_w = params["proj_w"].astype(jnp.bfloat16)

    # qkv projection (qkv_bias=False): six separate bf16 [M, Dh] outputs, no XLA slices.
    q_s, q_t, k_s, k_t, v_s, v_t = pallas_qkv(x.reshape(M, D), qkv_w, Dh)

    # ---- spatial attention: groups (n, t), sequence S (pure reshape, no copy) ----
    x_s = pallas_grouped_attention(
        q_s.reshape(N * T, S, Dh), k_s.reshape(N * T, S, Dh),
        v_s.reshape(N * T, S, Dh), heads=h, scale=scale)
    x_s = x_s.reshape(M, Dh)

    # ---- temporal attention: groups (n, s), sequence T ----
    # TODO(synk): fold this T<->S permutation into the attention BlockSpec index_map
    #             (blocks (1, T, sb, Dh) over the [N,T,S,Dh] layout) to drop these
    #             bf16 HBM transpose round-trips.
    def to_t(a):  # [M, Dh] -> [N*S, T, Dh]
        return a.reshape(N, T, S, Dh).transpose(0, 2, 1, 3).reshape(N * S, T, Dh)

    x_t = pallas_grouped_attention(to_t(q_t), to_t(k_t), to_t(v_t),
                                   heads=h, scale=scale)
    x_t = x_t.reshape(N, S, T, Dh).transpose(0, 2, 1, 3).reshape(M, Dh)

    # fused concat + output projection (proj_drop p=0.0 -> identity)
    out = pallas_concat_proj(x_s, x_t, proj_w, params["proj_b"], x.dtype)
    return out.reshape(N, T, S, D)


# ---------------------------------------------------------------------------
# Pure-JAX f32 reference (mirrors the PyTorch einsums exactly) for validation
# ---------------------------------------------------------------------------

def _reference(x, params, num_heads):
    N, T, S, D = x.shape
    head_dim = D // num_heads
    scale = head_dim ** (-0.5)
    Dh = D // 2
    h = num_heads // 2
    d = Dh // h

    qkv = x.reshape(-1, D) @ params["qkv_w"]          # qkv_bias=False
    qkv = qkv.reshape(N, T, S, 3 * D)
    q_s, q_t, k_s, k_t, v_s, v_t = [qkv[..., i * Dh:(i + 1) * Dh] for i in range(6)]

    def spatial(q, k, v):
        q = q.reshape(N, T, S, h, d)
        k = k.reshape(N, T, S, h, d)
        v = v.reshape(N, T, S, h, d)
        attn = jnp.einsum('ntqhd,ntkhd->ntqkh', q, k) * scale
        attn = jax.nn.softmax(attn, axis=-2)
        o = jnp.einsum('ntqkh,ntkhd->ntqhd', attn, v)
        return o.reshape(N, T, S, Dh)

    def temporal(q, k, v):
        q = q.reshape(N, T, S, h, d)
        k = k.reshape(N, T, S, h, d)
        v = v.reshape(N, T, S, h, d)
        attn = jnp.einsum('nqshd,nkshd->nqksh', q, k) * scale
        attn = jax.nn.softmax(attn, axis=-3)
        o = jnp.einsum('nqksh,nkshd->nqshd', attn, v)
        return o.reshape(N, T, S, Dh)

    xc = jnp.concatenate([spatial(q_s, k_s, v_s), temporal(q_t, k_t, v_t)], axis=-1)
    out = xc.reshape(-1, D) @ params["proj_w"] + params["proj_b"]
    return out.reshape(N, T, S, D)


# ---------------------------------------------------------------------------
# Main
# ---------------------------------------------------------------------------

if __name__ == "__main__":
    key = jax.random.PRNGKey(0)
    N, T, S, D = 2, 8, 16, 32
    num_heads = 8

    k_x, k_qkv, k_pw, k_pb = jax.random.split(key, 4)
    x = jax.random.normal(k_x, (N, T, S, D), dtype=jnp.float32)

    params = {
        # qkv: Linear(D, 3D, bias=False) -> stored as [D, 3D] for x @ W
        "qkv_w": 0.02 * jax.random.normal(k_qkv, (D, 3 * D), dtype=jnp.float32),
        # proj: Linear(D, D, bias=True)
        "proj_w": 0.02 * jax.random.normal(k_pw, (D, D), dtype=jnp.float32),
        "proj_b": 0.01 * jax.random.normal(k_pb, (D,), dtype=jnp.float32),
    }

    fwd = jax.jit(functools.partial(attention_factorize_dot_prod, num_heads=num_heads))
    out = jax.block_until_ready(fwd(x, params))

    ref = _reference(x, params, num_heads)
    assert out.shape == (N, T, S, D)
    # Tolerance covers bf16 MXU operands (f32 accumulation) and the
    # pl.reciprocal(approx=True) softmax normalization.
    assert jnp.allclose(out, ref, atol=3e-3, rtol=3e-2), "mismatch vs reference"

    print("KERNEL_OK")
</pallas_src>

<mosaic_0001>
module attributes {stable_mosaic.version = 11 : i64} {
  func.func @_qkv_kernel(%arg0: i32, %arg1: memref<128x32xf32, #tpu.memory_space<vmem>>, %arg2: memref<32x96xbf16, #tpu.memory_space<vmem>>, %arg3: memref<128x16xbf16, #tpu.memory_space<vmem>>, %arg4: memref<128x16xbf16, #tpu.memory_space<vmem>>, %arg5: memref<128x16xbf16, #tpu.memory_space<vmem>>, %arg6: memref<128x16xbf16, #tpu.memory_space<vmem>>, %arg7: memref<128x16xbf16, #tpu.memory_space<vmem>>, %arg8: memref<128x16xbf16, #tpu.memory_space<vmem>>) attributes {dimension_semantics = [#tpu.dimension_semantics<parallel>], iteration_bounds = array<i64: 2>, scalar_prefetch = 0 : i64, scratch_operands = 0 : i64, tpu.core_type = #tpu.core_type<tc>, window_params = [{transform_indices = @transform_0, window_bounds = array<i64: 128, 32>}, {pipeline_mode = #tpu.pipeline_mode<synchronous>, transform_indices = @transform_1, window_bounds = array<i64: 32, 96>}, {transform_indices = @transform_2, window_bounds = array<i64: 128, 16>}, {transform_indices = @transform_3, window_bounds = array<i64: 128, 16>}, {transform_indices = @transform_4, window_bounds = array<i64: 128, 16>}, {transform_indices = @transform_5, window_bounds = array<i64: 128, 16>}, {transform_indices = @transform_6, window_bounds = array<i64: 128, 16>}, {transform_indices = @transform_7, window_bounds = array<i64: 128, 16>}]} {
    %c0 = arith.constant 0 : index
    %c0_0 = arith.constant 0 : index
    %0 = vector.load %arg1[%c0, %c0_0] : memref<128x32xf32, #tpu.memory_space<vmem>>, vector<128x32xf32>
    %1 = arith.truncf %0 : vector<128x32xf32> to vector<128x32xbf16>
    %c0_1 = arith.constant 0 : index
    %c0_2 = arith.constant 0 : index
    %2 = vector.load %arg2[%c0_1, %c0_2] : memref<32x96xbf16, #tpu.memory_space<vmem>>, vector<32x96xbf16>
    %cst = arith.constant dense<0.000000e+00> : vector<128x96xf32>
    %3 = tpu.matmul %1, %2, %cst {dimension_numbers = #tpu.dot_dimension_numbers<[1], [0], [0], [1], [0, 0, 1, 1], [], []>} : vector<128x32xbf16>, vector<32x96xbf16>, vector<128x96xf32> -> vector<128x96xf32>
    %4 = vector.extract_strided_slice %3 {offsets = [0, 0], sizes = [128, 16], strides = [1, 1]} : vector<128x96xf32> to vector<128x16xf32>
    %5 = arith.truncf %4 : vector<128x16xf32> to vector<128x16xbf16>
    %c0_3 = arith.constant 0 : index
    %c0_4 = arith.constant 0 : index
    %6 = vector.load %arg3[%c0_3, %c0_4] : memref<128x16xbf16, #tpu.memory_space<vmem>>, vector<128x16xbf16>
    tpu.vector_store %arg3[%c0_3, %c0_4], %5 {strides = array<i32>} : memref<128x16xbf16, #tpu.memory_space<vmem>>, vector<128x16xbf16>,
    %7 = vector.extract_strided_slice %3 {offsets = [0, 16], sizes = [128, 16], strides = [1, 1]} : vector<128x96xf32> to vector<128x16xf32>
    %8 = arith.truncf %7 : vector<128x16xf32> to vector<128x16xbf16>
    %c0_5 = arith.constant 0 : index
    %c0_6 = arith.constant 0 : index
    %9 = vector.load %arg4[%c0_5, %c0_6] : memref<128x16xbf16, #tpu.memory_space<vmem>>, vector<128x16xbf16>
    tpu.vector_store %arg4[%c0_5, %c0_6], %8 {strides = array<i32>} : memref<128x16xbf16, #tpu.memory_space<vmem>>, vector<128x16xbf16>,
    %10 = vector.extract_strided_slice %3 {offsets = [0, 32], sizes = [128, 16], strides = [1, 1]} : vector<128x96xf32> to vector<128x16xf32>
    %11 = arith.truncf %10 : vector<128x16xf32> to vector<128x16xbf16>
    %c0_7 = arith.constant 0 : index
    %c0_8 = arith.constant 0 : index
    %12 = vector.load %arg5[%c0_7, %c0_8] : memref<128x16xbf16, #tpu.memory_space<vmem>>, vector<128x16xbf16>
    tpu.vector_store %arg5[%c0_7, %c0_8], %11 {strides = array<i32>} : memref<128x16xbf16, #tpu.memory_space<vmem>>, vector<128x16xbf16>,
    %13 = vector.extract_strided_slice %3 {offsets = [0, 48], sizes = [128, 16], strides = [1, 1]} : vector<128x96xf32> to vector<128x16xf32>
    %14 = arith.truncf %13 : vector<128x16xf32> to vector<128x16xbf16>
    %c0_9 = arith.constant 0 : index
    %c0_10 = arith.constant 0 : index
    %15 = vector.load %arg6[%c0_9, %c0_10] : memref<128x16xbf16, #tpu.memory_space<vmem>>, vector<128x16xbf16>
    tpu.vector_store %arg6[%c0_9, %c0_10], %14 {strides = array<i32>} : memref<128x16xbf16, #tpu.memory_space<vmem>>, vector<128x16xbf16>,
    %16 = vector.extract_strided_slice %3 {offsets = [0, 64], sizes = [128, 16], strides = [1, 1]} : vector<128x96xf32> to vector<128x16xf32>
    %17 = arith.truncf %16 : vector<128x16xf32> to vector<128x16xbf16>
    %c0_11 = arith.constant 0 : index
    %c0_12 = arith.constant 0 : index
    %18 = vector.load %arg7[%c0_11, %c0_12] : memref<128x16xbf16, #tpu.memory_space<vmem>>, vector<128x16xbf16>
    tpu.vector_store %arg7[%c0_11, %c0_12], %17 {strides = array<i32>} : memref<128x16xbf16, #tpu.memory_space<vmem>>, vector<128x16xbf16>,
    %19 = vector.extract_strided_slice %3 {offsets = [0, 80], sizes = [128, 16], strides = [1, 1]} : vector<128x96xf32> to vector<128x16xf32>
    %20 = arith.truncf %19 : vector<128x16xf32> to vector<128x16xbf16>
    %c0_13 = arith.constant 0 : index
    %c0_14 = arith.constant 0 : index
    %21 = vector.load %arg8[%c0_13, %c0_14] : memref<128x16xbf16, #tpu.memory_space<vmem>>, vector<128x16xbf16>
    tpu.vector_store %arg8[%c0_13, %c0_14], %20 {strides = array<i32>} : memref<128x16xbf16, #tpu.memory_space<vmem>>, vector<128x16xbf16>,
    return
  }
  func.func @transform_0(%arg0: i32) -> (i32, i32) {
    %c0_i32 = arith.constant 0 : i32
    %c0_i32_0 = arith.constant 0 : i32
    return %arg0, %c0_i32 : i32, i32
  }
  func.func @transform_1(%arg0: i32) -> (i32, i32) {
    %c0_i32 = arith.constant 0 : i32
    %c0_i32_0 = arith.constant 0 : i32
    %c0_i32_1 = arith.constant 0 : i32
    return %c0_i32, %c0_i32_0 : i32, i32
  }
  func.func @transform_2(%arg0: i32) -> (i32, i32) {
    %c0_i32 = arith.constant 0 : i32
    %c0_i32_0 = arith.constant 0 : i32
    return %arg0, %c0_i32 : i32, i32
  }
  func.func @transform_3(%arg0: i32) -> (i32, i32) {
    %c0_i32 = arith.constant 0 : i32
    %c0_i32_0 = arith.constant 0 : i32
    return %arg0, %c0_i32 : i32, i32
  }
  func.func @transform_4(%arg0: i32) -> (i32, i32) {
    %c0_i32 = arith.constant 0 : i32
    %c0_i32_0 = arith.constant 0 : i32
    return %arg0, %c0_i32 : i32, i32
  }
  func.func @transform_5(%arg0: i32) -> (i32, i32) {
    %c0_i32 = arith.constant 0 : i32
    %c0_i32_0 = arith.constant 0 : i32
    return %arg0, %c0_i32 : i32, i32
  }
  func.func @transform_6(%arg0: i32) -> (i32, i32) {
    %c0_i32 = arith.constant 0 : i32
    %c0_i32_0 = arith.constant 0 : i32
    return %arg0, %c0_i32 : i32, i32
  }
  func.func @transform_7(%arg0: i32) -> (i32, i32) {
    %c0_i32 = arith.constant 0 : i32
    %c0_i32_0 = arith.constant 0 : i32
    return %arg0, %c0_i32 : i32, i32
  }
}

module attributes {stable_mosaic.version = 11 : i64} {
  func.func @_grouped_attn_kernel(%arg0: i32, %arg1: memref<16x8x16xbf16, #tpu.memory_space<vmem>>, %arg2: memref<16x8x16xbf16, #tpu.memory_space<vmem>>, %arg3: memref<16x8x16xbf16, #tpu.memory_space<vmem>>, %arg4: memref<16x8x16xbf16, #tpu.memory_space<vmem>>, %arg5: memref<16x8x16xf32, #tpu.memory_space<vmem>>) attributes {dimension_semantics = [#tpu.dimension_semantics<parallel>], iteration_bounds = array<i64: 2>, scalar_prefetch = 0 : i64, scratch_operands = 1 : i64, tpu.core_type = #tpu.core_type<tc>, window_params = [{transform_indices = @transform_0, window_bounds = array<i64: 16, 8, 16>}, {transform_indices = @transform_1, window_bounds = array<i64: 16, 8, 16>}, {transform_indices = @transform_2, window_bounds = array<i64: 16, 8, 16>}, {transform_indices = @transform_3, window_bounds = array<i64: 16, 8, 16>}]} {
    %c0 = arith.constant 0 : index
    %c0_0 = arith.constant 0 : index
    %c0_1 = arith.constant 0 : index
    %0 = vector.load %arg1[%c0, %c0_0, %c0_1] : memref<16x8x16xbf16, #tpu.memory_space<vmem>>, vector<16x8x16xbf16>
    %cst = arith.constant 5.000000e-01 : bf16
    %1 = vector.broadcast %cst : bf16 to vector<16x8x16xbf16>
    %2 = arith.mulf %0, %1 : vector<16x8x16xbf16>
    %c0_2 = arith.constant 0 : index
    %c0_3 = arith.constant 0 : index
    %c0_4 = arith.constant 0 : index
    %3 = vector.load %arg2[%c0_2, %c0_3, %c0_4] : memref<16x8x16xbf16, #tpu.memory_space<vmem>>, vector<16x8x16xbf16>
    %c0_5 = arith.constant 0 : index
    %c0_6 = arith.constant 0 : index
    %c0_7 = arith.constant 0 : index
    %4 = vector.load %arg3[%c0_5, %c0_6, %c0_7] : memref<16x8x16xbf16, #tpu.memory_space<vmem>>, vector<16x8x16xbf16>
    %5 = vector.extract_strided_slice %2 {offsets = [0, 0, 0], sizes = [16, 8, 4], strides = [1, 1, 1]} : vector<16x8x16xbf16> to vector<16x8x4xbf16>
    %6 = vector.extract_strided_slice %3 {offsets = [0, 0, 0], sizes = [16, 8, 4], strides = [1, 1, 1]} : vector<16x8x16xbf16> to vector<16x8x4xbf16>
    "tpu.trace_start"() <{level = 10 : i32, message = "gqd,gkd->gqk"}> : () -> ()
    %cst_8 = arith.constant dense<0.000000e+00> : vector<16x8x8xf32>
    %7 = tpu.matmul %5, %6, %cst_8 {dimension_numbers = #tpu.dot_dimension_numbers<[2], [2], [1], [1], [0, 0, 0, 1, 1, 1], [0], [0]>} : vector<16x8x4xbf16>, vector<16x8x4xbf16>, vector<16x8x8xf32> -> vector<16x8x8xf32>
    "tpu.trace_stop"() : () -> ()
    %cst_9 = arith.constant dense<0xFF800000> : vector<16x8xf32>
    %8 = vector.multi_reduction <maximumf>, %7, %cst_9 [2] : vector<16x8x8xf32> to vector<16x8xf32>
    %9 = vector.shape_cast %8 : vector<16x8xf32> to vector<16x8x1xf32>
    %10 = vector.broadcast %9 : vector<16x8x1xf32> to vector<16x8x8xf32>
    %11 = arith.subf %7, %10 : vector<16x8x8xf32>
    %12 = math.exp %11 : vector<16x8x8xf32>
    %cst_10 = arith.constant dense<0.000000e+00> : vector<16x8xf32>
    %13 = vector.multi_reduction <add>, %12, %cst_10 [2] : vector<16x8x8xf32> to vector<16x8xf32>
    %14 = vector.shape_cast %13 : vector<16x8xf32> to vector<16x8x1xf32>
    %15 = tpu.reciprocal %14 {approx = true} : vector<16x8x1xf32> -> vector<16x8x1xf32>
    %16 = vector.broadcast %15 : vector<16x8x1xf32> to vector<16x8x8xf32>
    %17 = arith.mulf %12, %16 : vector<16x8x8xf32>
    %18 = arith.truncf %17 : vector<16x8x8xf32> to vector<16x8x8xbf16>
    %19 = vector.extract_strided_slice %4 {offsets = [0, 0, 0], sizes = [16, 8, 4], strides = [1, 1, 1]} : vector<16x8x16xbf16> to vector<16x8x4xbf16>
    "tpu.trace_start"() <{level = 10 : i32, message = "gqk,gkd->gqd"}> : () -> ()
    %cst_11 = arith.constant dense<0.000000e+00> : vector<16x8x4xf32>
    %20 = tpu.matmul %18, %19, %cst_11 {dimension_numbers = #tpu.dot_dimension_numbers<[2], [1], [1], [2], [0, 0, 0, 1, 1, 2], [0], [0]>} : vector<16x8x8xbf16>, vector<16x8x4xbf16>, vector<16x8x4xf32> -> vector<16x8x4xf32>
    "tpu.trace_stop"() : () -> ()
    %c0_12 = arith.constant 0 : index
    %c0_13 = arith.constant 0 : index
    %c0_14 = arith.constant 0 : index
    %21 = vector.load %arg5[%c0_12, %c0_13, %c0_14] : memref<16x8x16xf32, #tpu.memory_space<vmem>>, vector<16x8x4xf32>
    tpu.vector_store %arg5[%c0_12, %c0_13, %c0_14], %20 {strides = array<i32>} : memref<16x8x16xf32, #tpu.memory_space<vmem>>, vector<16x8x4xf32>,
    %22 = vector.extract_strided_slice %2 {offsets = [0, 0, 4], sizes = [16, 8, 4], strides = [1, 1, 1]} : vector<16x8x16xbf16> to vector<16x8x4xbf16>
    %23 = vector.extract_strided_slice %3 {offsets = [0, 0, 4], sizes = [16, 8, 4], strides = [1, 1, 1]} : vector<16x8x16xbf16> to vector<16x8x4xbf16>
    "tpu.trace_start"() <{level = 10 : i32, message = "gqd,gkd->gqk"}> : () -> ()
    %cst_15 = arith.constant dense<0.000000e+00> : vector<16x8x8xf32>
    %24 = tpu.matmul %22, %23, %cst_15 {dimension_numbers = #tpu.dot_dimension_numbers<[2], [2], [1], [1], [0, 0, 0, 1, 1, 1], [0], [0]>} : vector<16x8x4xbf16>, vector<16x8x4xbf16>, vector<16x8x8xf32> -> vector<16x8x8xf32>
    "tpu.trace_stop"() : () -> ()
    %cst_16 = arith.constant dense<0xFF800000> : vector<16x8xf32>
    %25 = vector.multi_reduction <maximumf>, %24, %cst_16 [2] : vector<16x8x8xf32> to vector<16x8xf32>
    %26 = vector.shape_cast %25 : vector<16x8xf32> to vector<16x8x1xf32>
    %27 = vector.broadcast %26 : vector<16x8x1xf32> to vector<16x8x8xf32>
    %28 = arith.subf %24, %27 : vector<16x8x8xf32>
    %29 = math.exp %28 : vector<16x8x8xf32>
    %cst_17 = arith.constant dense<0.000000e+00> : vector<16x8xf32>
    %30 = vector.multi_reduction <add>, %29, %cst_17 [2] : vector<16x8x8xf32> to vector<16x8xf32>
    %31 = vector.shape_cast %30 : vector<16x8xf32> to vector<16x8x1xf32>
    %32 = tpu.reciprocal %31 {approx = true} : vector<16x8x1xf32> -> vector<16x8x1xf32>
    %33 = vector.broadcast %32 : vector<16x8x1xf32> to vector<16x8x8xf32>
    %34 = arith.mulf %29, %33 : vector<16x8x8xf32>
    %35 = arith.truncf %34 : vector<16x8x8xf32> to vector<16x8x8xbf16>
    %36 = vector.extract_strided_slice %4 {offsets = [0, 0, 4], sizes = [16, 8, 4], strides = [1, 1, 1]} : vector<16x8x16xbf16> to vector<16x8x4xbf16>
    "tpu.trace_start"() <{level = 10 : i32, message = "gqk,gkd->gqd"}> : () -> ()
    %cst_18 = arith.constant dense<0.000000e+00> : vector<16x8x4xf32>
    %37 = tpu.matmul %35, %36, %cst_18 {dimension_numbers = #tpu.dot_dimension_numbers<[2], [1], [1], [2], [0, 0, 0, 1, 1, 2], [0], [0]>} : vector<16x8x8xbf16>, vector<16x8x4xbf16>, vector<16x8x4xf32> -> vector<16x8x4xf32>
    "tpu.trace_stop"() : () -> ()
    %c0_19 = arith.constant 0 : index
    %c0_20 = arith.constant 0 : index
    %c4 = arith.constant 4 : index
    %38 = vector.load %arg5[%c0_19, %c0_20, %c4] : memref<16x8x16xf32, #tpu.memory_space<vmem>>, vector<16x8x4xf32>
    tpu.vector_store %arg5[%c0_19, %c0_20, %c4], %37 {strides = array<i32>} : memref<16x8x16xf32, #tpu.memory_space<vmem>>, vector<16x8x4xf32>,
    %39 = vector.extract_strided_slice %2 {offsets = [0, 0, 8], sizes = [16, 8, 4], strides = [1, 1, 1]} : vector<16x8x16xbf16> to vector<16x8x4xbf16>
    %40 = vector.extract_strided_slice %3 {offsets = [0, 0, 8], sizes = [16, 8, 4], strides = [1, 1, 1]} : vector<16x8x16xbf16> to vector<16x8x4xbf16>
    "tpu.trace_start"() <{level = 10 : i32, message = "gqd,gkd->gqk"}> : () -> ()
    %cst_21 = arith.constant dense<0.000000e+00> : vector<16x8x8xf32>
    %41 = tpu.matmul %39, %40, %cst_21 {dimension_numbers = #tpu.dot_dimension_numbers<[2], [2], [1], [1], [0, 0, 0, 1, 1, 1], [0], [0]>} : vector<16x8x4xbf16>, vector<16x8x4xbf16>, vector<16x8x8xf32> -> vector<16x8x8xf32>
    "tpu.trace_stop"() : () -> ()
    %cst_22 = arith.constant dense<0xFF800000> : vector<16x8xf32>
    %42 = vector.multi_reduction <maximumf>, %41, %cst_22 [2] : vector<16x8x8xf32> to vector<16x8xf32>
    %43 = vector.shape_cast %42 : vector<16x8xf32> to vector<16x8x1xf32>
    %44 = vector.broadcast %43 : vector<16x8x1xf32> to vector<16x8x8xf32>
    %45 = arith.subf %41, %44 : vector<16x8x8xf32>
    %46 = math.exp %45 : vector<16x8x8xf32>
    %cst_23 = arith.constant dense<0.000000e+00> : vector<16x8xf32>
    %47 = vector.multi_reduction <add>, %46, %cst_23 [2] : vector<16x8x8xf32> to vector<16x8xf32>
    %48 = vector.shape_cast %47 : vector<16x8xf32> to vector<16x8x1xf32>
    %49 = tpu.reciprocal %48 {approx = true} : vector<16x8x1xf32> -> vector<16x8x1xf32>
    %50 = vector.broadcast %49 : vector<16x8x1xf32> to vector<16x8x8xf32>
    %51 = arith.mulf %46, %50 : vector<16x8x8xf32>
    %52 = arith.truncf %51 : vector<16x8x8xf32> to vector<16x8x8xbf16>
    %53 = vector.extract_strided_slice %4 {offsets = [0, 0, 8], sizes = [16, 8, 4], strides = [1, 1, 1]} : vector<16x8x16xbf16> to vector<16x8x4xbf16>
    "tpu.trace_start"() <{level = 10 : i32, message = "gqk,gkd->gqd"}> : () -> ()
    %cst_24 = arith.constant dense<0.000000e+00> : vector<16x8x4xf32>
    %54 = tpu.matmul %52, %53, %cst_24 {dimension_numbers = #tpu.dot_dimension_numbers<[2], [1], [1], [2], [0, 0, 0, 1, 1, 2], [0], [0]>} : vector<16x8x8xbf16>, vector<16x8x4xbf16>, vector<16x8x4xf32> -> vector<16x8x4xf32>
    "tpu.trace_stop"() : () -> ()
    %c0_25 = arith.constant 0 : index
    %c0_26 = arith.constant 0 : index
    %c8 = arith.constant 8 : index
    %55 = vector.load %arg5[%c0_25, %c0_26, %c8] : memref<16x8x16xf32, #tpu.memory_space<vmem>>, vector<16x8x4xf32>
    tpu.vector_store %arg5[%c0_25, %c0_26, %c8], %54 {strides = array<i32>} : memref<16x8x16xf32, #tpu.memory_space<vmem>>, vector<16x8x4xf32>,
    %56 = vector.extract_strided_slice %2 {offsets = [0, 0, 12], sizes = [16, 8, 4], strides = [1, 1, 1]} : vector<16x8x16xbf16> to vector<16x8x4xbf16>
    %57 = vector.extract_strided_slice %3 {offsets = [0, 0, 12], sizes = [16, 8, 4], strides = [1, 1, 1]} : vector<16x8x16xbf16> to vector<16x8x4xbf16>
    "tpu.trace_start"() <{level = 10 : i32, message = "gqd,gkd->gqk"}> : () -> ()
    %cst_27 = arith.constant dense<0.000000e+00> : vector<16x8x8xf32>
    %58 = tpu.matmul %56, %57, %cst_27 {dimension_numbers = #tpu.dot_dimension_numbers<[2], [2], [1], [1], [0, 0, 0, 1, 1, 1], [0], [0]>} : vector<16x8x4xbf16>, vector<16x8x4xbf16>, vector<16x8x8xf32> -> vector<16x8x8xf32>
    "tpu.trace_stop"() : () -> ()
    %cst_28 = arith.constant dense<0xFF800000> : vector<16x8xf32>
    %59 = vector.multi_reduction <maximumf>, %58, %cst_28 [2] : vector<16x8x8xf32> to vector<16x8xf32>
    %60 = vector.shape_cast %59 : vector<16x8xf32> to vector<16x8x1xf32>
    %61 = vector.broadcast %60 : vector<16x8x1xf32> to vector<16x8x8xf32>
    %62 = arith.subf %58, %61 : vector<16x8x8xf32>
    %63 = math.exp %62 : vector<16x8x8xf32>
    %cst_29 = arith.constant dense<0.000000e+00> : vector<16x8xf32>
    %64 = vector.multi_reduction <add>, %63, %cst_29 [2] : vector<16x8x8xf32> to vector<16x8xf32>
    %65 = vector.shape_cast %64 : vector<16x8xf32> to vector<16x8x1xf32>
    %66 = tpu.reciprocal %65 {approx = true} : vector<16x8x1xf32> -> vector<16x8x1xf32>
    %67 = vector.broadcast %66 : vector<16x8x1xf32> to vector<16x8x8xf32>
    %68 = arith.mulf %63, %67 : vector<16x8x8xf32>
    %69 = arith.truncf %68 : vector<16x8x8xf32> to vector<16x8x8xbf16>
    %70 = vector.extract_strided_slice %4 {offsets = [0, 0, 12], sizes = [16, 8, 4], strides = [1, 1, 1]} : vector<16x8x16xbf16> to vector<16x8x4xbf16>
    "tpu.trace_start"() <{level = 10 : i32, message = "gqk,gkd->gqd"}> : () -> ()
    %cst_30 = arith.constant dense<0.000000e+00> : vector<16x8x4xf32>
    %71 = tpu.matmul %69, %70, %cst_30 {dimension_numbers = #tpu.dot_dimension_numbers<[2], [1], [1], [2], [0, 0, 0, 1, 1, 2], [0], [0]>} : vector<16x8x8xbf16>, vector<16x8x4xbf16>, vector<16x8x4xf32> -> vector<16x8x4xf32>
    "tpu.trace_stop"() : () -> ()
    %c0_31 = arith.constant 0 : index
    %c0_32 = arith.constant 0 : index
    %c12 = arith.constant 12 : index
    %72 = vector.load %arg5[%c0_31, %c0_32, %c12] : memref<16x8x16xf32, #tpu.memory_space<vmem>>, vector<16x8x4xf32>
    tpu.vector_store %arg5[%c0_31, %c0_32, %c12], %71 {strides = array<i32>} : memref<16x8x16xf32, #tpu.memory_space<vmem>>, vector<16x8x4xf32>,
    %c0_33 = arith.constant 0 : index
    %c0_34 = arith.constant 0 : index
    %c0_35 = arith.constant 0 : index
    %73 = vector.load %arg5[%c0_33, %c0_34, %c0_35] : memref<16x8x16xf32, #tpu.memory_space<vmem>>, vector<16x8x16xf32>
    %74 = arith.truncf %73 : vector<16x8x16xf32> to vector<16x8x16xbf16>
    %c0_36 = arith.constant 0 : index
    %c0_37 = arith.constant 0 : index
    %c0_38 = arith.constant 0 : index
    %75 = vector.load %arg4[%c0_36, %c0_37, %c0_38] : memref<16x8x16xbf16, #tpu.memory_space<vmem>>, vector<16x8x16xbf16>
    tpu.vector_store %arg4[%c0_36, %c0_37, %c0_38], %74 {strides = array<i32>} : memref<16x8x16xbf16, #tpu.memory_space<vmem>>, vector<16x8x16xbf16>,
    return
  }
  func.func @transform_0(%arg0: i32) -> (i32, i32, i32) {
    %c0_i32 = arith.constant 0 : i32
    %c0_i32_0 = arith.constant 0 : i32
    %c0_i32_1 = arith.constant 0 : i32
    return %arg0, %c0_i32, %c0_i32_0 : i32, i32, i32
  }
  func.func @transform_1(%arg0: i32) -> (i32, i32, i32) {
    %c0_i32 = arith.constant 0 : i32
    %c0_i32_0 = arith.constant 0 : i32
    %c0_i32_1 = arith.constant 0 : i32
    return %arg0, %c0_i32, %c0_i32_0 : i32, i32, i32
  }
  func.func @transform_2(%arg0: i32) -> (i32, i32, i32) {
    %c0_i32 = arith.constant 0 : i32
    %c0_i32_0 = arith.constant 0 : i32
    %c0_i32_1 = arith.constant 0 : i32
    return %arg0, %c0_i32, %c0_i32_0 : i32, i32, i32
  }
  func.func @transform_3(%arg0: i32) -> (i32, i32, i32) {
    %c0_i32 = arith.constant 0 : i32
    %c0_i32_0 = arith.constant 0 : i32
    %c0_i32_1 = arith.constant 0 : i32
    return %arg0, %c0_i32, %c0_i32_0 : i32, i32, i32
  }
}

module attributes {stable_mosaic.version = 11 : i64} {
  func.func @_grouped_attn_kernel(%arg0: i32, %arg1: memref<8x16x16xbf16, #tpu.memory_space<vmem>>, %arg2: memref<8x16x16xbf16, #tpu.memory_space<vmem>>, %arg3: memref<8x16x16xbf16, #tpu.memory_space<vmem>>, %arg4: memref<8x16x16xbf16, #tpu.memory_space<vmem>>, %arg5: memref<8x16x16xf32, #tpu.memory_space<vmem>>) attributes {dimension_semantics = [#tpu.dimension_semantics<parallel>], iteration_bounds = array<i64: 2>, scalar_prefetch = 0 : i64, scratch_operands = 1 : i64, tpu.core_type = #tpu.core_type<tc>, window_params = [{transform_indices = @transform_0, window_bounds = array<i64: 8, 16, 16>}, {transform_indices = @transform_1, window_bounds = array<i64: 8, 16, 16>}, {transform_indices = @transform_2, window_bounds = array<i64: 8, 16, 16>}, {transform_indices = @transform_3, window_bounds = array<i64: 8, 16, 16>}]} {
    %c0 = arith.constant 0 : index
    %c0_0 = arith.constant 0 : index
    %c0_1 = arith.constant 0 : index
    %0 = vector.load %arg1[%c0, %c0_0, %c0_1] : memref<8x16x16xbf16, #tpu.memory_space<vmem>>, vector<8x16x16xbf16>
    %cst = arith.constant 5.000000e-01 : bf16
    %1 = vector.broadcast %cst : bf16 to vector<8x16x16xbf16>
    %2 = arith.mulf %0, %1 : vector<8x16x16xbf16>
    %c0_2 = arith.constant 0 : index
    %c0_3 = arith.constant 0 : index
    %c0_4 = arith.constant 0 : index
    %3 = vector.load %arg2[%c0_2, %c0_3, %c0_4] : memref<8x16x16xbf16, #tpu.memory_space<vmem>>, vector<8x16x16xbf16>
    %c0_5 = arith.constant 0 : index
    %c0_6 = arith.constant 0 : index
    %c0_7 = arith.constant 0 : index
    %4 = vector.load %arg3[%c0_5, %c0_6, %c0_7] : memref<8x16x16xbf16, #tpu.memory_space<vmem>>, vector<8x16x16xbf16>
    %5 = vector.extract_strided_slice %2 {offsets = [0, 0, 0], sizes = [8, 16, 4], strides = [1, 1, 1]} : vector<8x16x16xbf16> to vector<8x16x4xbf16>
    %6 = vector.extract_strided_slice %3 {offsets = [0, 0, 0], sizes = [8, 16, 4], strides = [1, 1, 1]} : vector<8x16x16xbf16> to vector<8x16x4xbf16>
    "tpu.trace_start"() <{level = 10 : i32, message = "gqd,gkd->gqk"}> : () -> ()
    %cst_8 = arith.constant dense<0.000000e+00> : vector<8x16x16xf32>
    %7 = tpu.matmul %5, %6, %cst_8 {dimension_numbers = #tpu.dot_dimension_numbers<[2], [2], [1], [1], [0, 0, 0, 1, 1, 1], [0], [0]>} : vector<8x16x4xbf16>, vector<8x16x4xbf16>, vector<8x16x16xf32> -> vector<8x16x16xf32>
    "tpu.trace_stop"() : () -> ()
    %cst_9 = arith.constant dense<0xFF800000> : vector<8x16xf32>
    %8 = vector.multi_reduction <maximumf>, %7, %cst_9 [2] : vector<8x16x16xf32> to vector<8x16xf32>
    %9 = vector.shape_cast %8 : vector<8x16xf32> to vector<8x16x1xf32>
    %10 = vector.broadcast %9 : vector<8x16x1xf32> to vector<8x16x16xf32>
    %11 = arith.subf %7, %10 : vector<8x16x16xf32>
    %12 = math.exp %11 : vector<8x16x16xf32>
    %cst_10 = arith.constant dense<0.000000e+00> : vector<8x16xf32>
    %13 = vector.multi_reduction <add>, %12, %cst_10 [2] : vector<8x16x16xf32> to vector<8x16xf32>
    %14 = vector.shape_cast %13 : vector<8x16xf32> to vector<8x16x1xf32>
    %15 = tpu.reciprocal %14 {approx = true} : vector<8x16x1xf32> -> vector<8x16x1xf32>
    %16 = vector.broadcast %15 : vector<8x16x1xf32> to vector<8x16x16xf32>
    %17 = arith.mulf %12, %16 : vector<8x16x16xf32>
    %18 = arith.truncf %17 : vector<8x16x16xf32> to vector<8x16x16xbf16>
    %19 = vector.extract_strided_slice %4 {offsets = [0, 0, 0], sizes = [8, 16, 4], strides = [1, 1, 1]} : vector<8x16x16xbf16> to vector<8x16x4xbf16>
    "tpu.trace_start"() <{level = 10 : i32, message = "gqk,gkd->gqd"}> : () -> ()
    %cst_11 = arith.constant dense<0.000000e+00> : vector<8x16x4xf32>
    %20 = tpu.matmul %18, %19, %cst_11 {dimension_numbers = #tpu.dot_dimension_numbers<[2], [1], [1], [2], [0, 0, 0, 1, 1, 2], [0], [0]>} : vector<8x16x16xbf16>, vector<8x16x4xbf16>, vector<8x16x4xf32> -> vector<8x16x4xf32>
    "tpu.trace_stop"() : () -> ()
    %c0_12 = arith.constant 0 : index
    %c0_13 = arith.constant 0 : index
    %c0_14 = arith.constant 0 : index
    %21 = vector.load %arg5[%c0_12, %c0_13, %c0_14] : memref<8x16x16xf32, #tpu.memory_space<vmem>>, vector<8x16x4xf32>
    tpu.vector_store %arg5[%c0_12, %c0_13, %c0_14], %20 {strides = array<i32>} : memref<8x16x16xf32, #tpu.memory_space<vmem>>, vector<8x16x4xf32>,
    %22 = vector.extract_strided_slice %2 {offsets = [0, 0, 4], sizes = [8, 16, 4], strides = [1, 1, 1]} : vector<8x16x16xbf16> to vector<8x16x4xbf16>
    %23 = vector.extract_strided_slice %3 {offsets = [0, 0, 4], sizes = [8, 16, 4], strides = [1, 1, 1]} : vector<8x16x16xbf16> to vector<8x16x4xbf16>
    "tpu.trace_start"() <{level = 10 : i32, message = "gqd,gkd->gqk"}> : () -> ()
    %cst_15 = arith.constant dense<0.000000e+00> : vector<8x16x16xf32>
    %24 = tpu.matmul %22, %23, %cst_15 {dimension_numbers = #tpu.dot_dimension_numbers<[2], [2], [1], [1], [0, 0, 0, 1, 1, 1], [0], [0]>} : vector<8x16x4xbf16>, vector<8x16x4xbf16>, vector<8x16x16xf32> -> vector<8x16x16xf32>
    "tpu.trace_stop"() : () -> ()
    %cst_16 = arith.constant dense<0xFF800000> : vector<8x16xf32>
    %25 = vector.multi_reduction <maximumf>, %24, %cst_16 [2] : vector<8x16x16xf32> to vector<8x16xf32>
    %26 = vector.shape_cast %25 : vector<8x16xf32> to vector<8x16x1xf32>
    %27 = vector.broadcast %26 : vector<8x16x1xf32> to vector<8x16x16xf32>
    %28 = arith.subf %24, %27 : vector<8x16x16xf32>
    %29 = math.exp %28 : vector<8x16x16xf32>
    %cst_17 = arith.constant dense<0.000000e+00> : vector<8x16xf32>
    %30 = vector.multi_reduction <add>, %29, %cst_17 [2] : vector<8x16x16xf32> to vector<8x16xf32>
    %31 = vector.shape_cast %30 : vector<8x16xf32> to vector<8x16x1xf32>
    %32 = tpu.reciprocal %31 {approx = true} : vector<8x16x1xf32> -> vector<8x16x1xf32>
    %33 = vector.broadcast %32 : vector<8x16x1xf32> to vector<8x16x16xf32>
    %34 = arith.mulf %29, %33 : vector<8x16x16xf32>
    %35 = arith.truncf %34 : vector<8x16x16xf32> to vector<8x16x16xbf16>
    %36 = vector.extract_strided_slice %4 {offsets = [0, 0, 4], sizes = [8, 16, 4], strides = [1, 1, 1]} : vector<8x16x16xbf16> to vector<8x16x4xbf16>
    "tpu.trace_start"() <{level = 10 : i32, message = "gqk,gkd->gqd"}> : () -> ()
    %cst_18 = arith.constant dense<0.000000e+00> : vector<8x16x4xf32>
    %37 = tpu.matmul %35, %36, %cst_18 {dimension_numbers = #tpu.dot_dimension_numbers<[2], [1], [1], [2], [0, 0, 0, 1, 1, 2], [0], [0]>} : vector<8x16x16xbf16>, vector<8x16x4xbf16>, vector<8x16x4xf32> -> vector<8x16x4xf32>
    "tpu.trace_stop"() : () -> ()
    %c0_19 = arith.constant 0 : index
    %c0_20 = arith.constant 0 : index
    %c4 = arith.constant 4 : index
    %38 = vector.load %arg5[%c0_19, %c0_20, %c4] : memref<8x16x16xf32, #tpu.memory_space<vmem>>, vector<8x16x4xf32>
    tpu.vector_store %arg5[%c0_19, %c0_20, %c4], %37 {strides = array<i32>} : memref<8x16x16xf32, #tpu.memory_space<vmem>>, vector<8x16x4xf32>,
    %39 = vector.extract_strided_slice %2 {offsets = [0, 0, 8], sizes = [8, 16, 4], strides = [1, 1, 1]} : vector<8x16x16xbf16> to vector<8x16x4xbf16>
    %40 = vector.extract_strided_slice %3 {offsets = [0, 0, 8], sizes = [8, 16, 4], strides = [1, 1, 1]} : vector<8x16x16xbf16> to vector<8x16x4xbf16>
    "tpu.trace_start"() <{level = 10 : i32, message = "gqd,gkd->gqk"}> : () -> ()
    %cst_21 = arith.constant dense<0.000000e+00> : vector<8x16x16xf32>
    %41 = tpu.matmul %39, %40, %cst_21 {dimension_numbers = #tpu.dot_dimension_numbers<[2], [2], [1], [1], [0, 0, 0, 1, 1, 1], [0], [0]>} : vector<8x16x4xbf16>, vector<8x16x4xbf16>, vector<8x16x16xf32> -> vector<8x16x16xf32>
    "tpu.trace_stop"() : () -> ()
    %cst_22 = arith.constant dense<0xFF800000> : vector<8x16xf32>
    %42 = vector.multi_reduction <maximumf>, %41, %cst_22 [2] : vector<8x16x16xf32> to vector<8x16xf32>
    %43 = vector.shape_cast %42 : vector<8x16xf32> to vector<8x16x1xf32>
    %44 = vector.broadcast %43 : vector<8x16x1xf32> to vector<8x16x16xf32>
    %45 = arith.subf %41, %44 : vector<8x16x16xf32>
    %46 = math.exp %45 : vector<8x16x16xf32>
    %cst_23 = arith.constant dense<0.000000e+00> : vector<8x16xf32>
    %47 = vector.multi_reduction <add>, %46, %cst_23 [2] : vector<8x16x16xf32> to vector<8x16xf32>
    %48 = vector.shape_cast %47 : vector<8x16xf32> to vector<8x16x1xf32>
    %49 = tpu.reciprocal %48 {approx = true} : vector<8x16x1xf32> -> vector<8x16x1xf32>
    %50 = vector.broadcast %49 : vector<8x16x1xf32> to vector<8x16x16xf32>
    %51 = arith.mulf %46, %50 : vector<8x16x16xf32>
    %52 = arith.truncf %51 : vector<8x16x16xf32> to vector<8x16x16xbf16>
    %53 = vector.extract_strided_slice %4 {offsets = [0, 0, 8], sizes = [8, 16, 4], strides = [1, 1, 1]} : vector<8x16x16xbf16> to vector<8x16x4xbf16>
    "tpu.trace_start"() <{level = 10 : i32, message = "gqk,gkd->gqd"}> : () -> ()
    %cst_24 = arith.constant dense<0.000000e+00> : vector<8x16x4xf32>
    %54 = tpu.matmul %52, %53, %cst_24 {dimension_numbers = #tpu.dot_dimension_numbers<[2], [1], [1], [2], [0, 0, 0, 1, 1, 2], [0], [0]>} : vector<8x16x16xbf16>, vector<8x16x4xbf16>, vector<8x16x4xf32> -> vector<8x16x4xf32>
    "tpu.trace_stop"() : () -> ()
    %c0_25 = arith.constant 0 : index
    %c0_26 = arith.constant 0 : index
    %c8 = arith.constant 8 : index
    %55 = vector.load %arg5[%c0_25, %c0_26, %c8] : memref<8x16x16xf32, #tpu.memory_space<vmem>>, vector<8x16x4xf32>
    tpu.vector_store %arg5[%c0_25, %c0_26, %c8], %54 {strides = array<i32>} : memref<8x16x16xf32, #tpu.memory_space<vmem>>, vector<8x16x4xf32>,
    %56 = vector.extract_strided_slice %2 {offsets = [0, 0, 12], sizes = [8, 16, 4], strides = [1, 1, 1]} : vector<8x16x16xbf16> to vector<8x16x4xbf16>
    %57 = vector.extract_strided_slice %3 {offsets = [0, 0, 12], sizes = [8, 16, 4], strides = [1, 1, 1]} : vector<8x16x16xbf16> to vector<8x16x4xbf16>
    "tpu.trace_start"() <{level = 10 : i32, message = "gqd,gkd->gqk"}> : () -> ()
    %cst_27 = arith.constant dense<0.000000e+00> : vector<8x16x16xf32>
    %58 = tpu.matmul %56, %57, %cst_27 {dimension_numbers = #tpu.dot_dimension_numbers<[2], [2], [1], [1], [0, 0, 0, 1, 1, 1], [0], [0]>} : vector<8x16x4xbf16>, vector<8x16x4xbf16>, vector<8x16x16xf32> -> vector<8x16x16xf32>
    "tpu.trace_stop"() : () -> ()
    %cst_28 = arith.constant dense<0xFF800000> : vector<8x16xf32>
    %59 = vector.multi_reduction <maximumf>, %58, %cst_28 [2] : vector<8x16x16xf32> to vector<8x16xf32>
    %60 = vector.shape_cast %59 : vector<8x16xf32> to vector<8x16x1xf32>
    %61 = vector.broadcast %60 : vector<8x16x1xf32> to vector<8x16x16xf32>
    %62 = arith.subf %58, %61 : vector<8x16x16xf32>
    %63 = math.exp %62 : vector<8x16x16xf32>
    %cst_29 = arith.constant dense<0.000000e+00> : vector<8x16xf32>
    %64 = vector.multi_reduction <add>, %63, %cst_29 [2] : vector<8x16x16xf32> to vector<8x16xf32>
    %65 = vector.shape_cast %64 : vector<8x16xf32> to vector<8x16x1xf32>
    %66 = tpu.reciprocal %65 {approx = true} : vector<8x16x1xf32> -> vector<8x16x1xf32>
    %67 = vector.broadcast %66 : vector<8x16x1xf32> to vector<8x16x16xf32>
    %68 = arith.mulf %63, %67 : vector<8x16x16xf32>
    %69 = arith.truncf %68 : vector<8x16x16xf32> to vector<8x16x16xbf16>
    %70 = vector.extract_strided_slice %4 {offsets = [0, 0, 12], sizes = [8, 16, 4], strides = [1, 1, 1]} : vector<8x16x16xbf16> to vector<8x16x4xbf16>
    "tpu.trace_start"() <{level = 10 : i32, message = "gqk,gkd->gqd"}> : () -> ()
    %cst_30 = arith.constant dense<0.000000e+00> : vector<8x16x4xf32>
    %71 = tpu.matmul %69, %70, %cst_30 {dimension_numbers = #tpu.dot_dimension_numbers<[2], [1], [1], [2], [0, 0, 0, 1, 1, 2], [0], [0]>} : vector<8x16x16xbf16>, vector<8x16x4xbf16>, vector<8x16x4xf32> -> vector<8x16x4xf32>
    "tpu.trace_stop"() : () -> ()
    %c0_31 = arith.constant 0 : index
    %c0_32 = arith.constant 0 : index
    %c12 = arith.constant 12 : index
    %72 = vector.load %arg5[%c0_31, %c0_32, %c12] : memref<8x16x16xf32, #tpu.memory_space<vmem>>, vector<8x16x4xf32>
    tpu.vector_store %arg5[%c0_31, %c0_32, %c12], %71 {strides = array<i32>} : memref<8x16x16xf32, #tpu.memory_space<vmem>>, vector<8x16x4xf32>,
    %c0_33 = arith.constant 0 : index
    %c0_34 = arith.constant 0 : index
    %c0_35 = arith.constant 0 : index
    %73 = vector.load %arg5[%c0_33, %c0_34, %c0_35] : memref<8x16x16xf32, #tpu.memory_space<vmem>>, vector<8x16x16xf32>
    %74 = arith.truncf %73 : vector<8x16x16xf32> to vector<8x16x16xbf16>
    %c0_36 = arith.constant 0 : index
    %c0_37 = arith.constant 0 : index
    %c0_38 = arith.constant 0 : index
    %75 = vector.load %arg4[%c0_36, %c0_37, %c0_38] : memref<8x16x16xbf16, #tpu.memory_space<vmem>>, vector<8x16x16xbf16>
    tpu.vector_store %arg4[%c0_36, %c0_37, %c0_38], %74 {strides = array<i32>} : memref<8x16x16xbf16, #tpu.memory_space<vmem>>, vector<8x16x16xbf16>,
    return
  }
  func.func @transform_0(%arg0: i32) -> (i32, i32, i32) {
    %c0_i32 = arith.constant 0 : i32
    %c0_i32_0 = arith.constant 0 : i32
    %c0_i32_1 = arith.constant 0 : i32
    return %arg0, %c0_i32, %c0_i32_0 : i32, i32, i32
  }
  func.func @transform_1(%arg0: i32) -> (i32, i32, i32) {
    %c0_i32 = arith.constant 0 : i32
    %c0_i32_0 = arith.constant 0 : i32
    %c0_i32_1 = arith.constant 0 : i32
    return %arg0, %c0_i32, %c0_i32_0 : i32, i32, i32
  }
  func.func @transform_2(%arg0: i32) -> (i32, i32, i32) {
    %c0_i32 = arith.constant 0 : i32
    %c0_i32_0 = arith.constant 0 : i32
    %c0_i32_1 = arith.constant 0 : i32
    return %arg0, %c0_i32, %c0_i32_0 : i32, i32, i32
  }
  func.func @transform_3(%arg0: i32) -> (i32, i32, i32) {
    %c0_i32 = arith.constant 0 : i32
    %c0_i32_0 = arith.constant 0 : i32
    %c0_i32_1 = arith.constant 0 : i32
    return %arg0, %c0_i32, %c0_i32_0 : i32, i32, i32
  }
}

module attributes {stable_mosaic.version = 11 : i64} {
  func.func @_concat_proj_kernel(%arg0: i32, %arg1: memref<128x16xbf16, #tpu.memory_space<vmem>>, %arg2: memref<128x16xbf16, #tpu.memory_space<vmem>>, %arg3: memref<16x32xbf16, #tpu.memory_space<vmem>>, %arg4: memref<16x32xbf16, #tpu.memory_space<vmem>>, %arg5: memref<1x32xf32, #tpu.memory_space<vmem>>, %arg6: memref<128x32xf32, #tpu.memory_space<vmem>>) attributes {dimension_semantics = [#tpu.dimension_semantics<parallel>], iteration_bounds = array<i64: 2>, scalar_prefetch = 0 : i64, scratch_operands = 0 : i64, tpu.core_type = #tpu.core_type<tc>, window_params = [{transform_indices = @transform_0, window_bounds = array<i64: 128, 16>}, {transform_indices = @transform_1, window_bounds = array<i64: 128, 16>}, {pipeline_mode = #tpu.pipeline_mode<synchronous>, transform_indices = @transform_2, window_bounds = array<i64: 16, 32>}, {pipeline_mode = #tpu.pipeline_mode<synchronous>, transform_indices = @transform_3, window_bounds = array<i64: 16, 32>}, {pipeline_mode = #tpu.pipeline_mode<synchronous>, transform_indices = @transform_4, window_bounds = array<i64: 1, 32>}, {transform_indices = @transform_5, window_bounds = array<i64: 128, 32>}]} {
    %c0 = arith.constant 0 : index
    %c0_0 = arith.constant 0 : index
    %0 = vector.load %arg1[%c0, %c0_0] : memref<128x16xbf16, #tpu.memory_space<vmem>>, vector<128x16xbf16>
    %c0_1 = arith.constant 0 : index
    %c0_2 = arith.constant 0 : index
    %1 = vector.load %arg3[%c0_1, %c0_2] : memref<16x32xbf16, #tpu.memory_space<vmem>>, vector<16x32xbf16>
    %cst = arith.constant dense<0.000000e+00> : vector<128x32xf32>
    %2 = tpu.matmul %0, %1, %cst {dimension_numbers = #tpu.dot_dimension_numbers<[1], [0], [0], [1], [0, 0, 1, 1], [], []>} : vector<128x16xbf16>, vector<16x32xbf16>, vector<128x32xf32> -> vector<128x32xf32>
    %c0_3 = arith.constant 0 : index
    %c0_4 = arith.constant 0 : index
    %3 = vector.load %arg2[%c0_3, %c0_4] : memref<128x16xbf16, #tpu.memory_space<vmem>>, vector<128x16xbf16>
    %c0_5 = arith.constant 0 : index
    %c0_6 = arith.constant 0 : index
    %4 = vector.load %arg4[%c0_5, %c0_6] : memref<16x32xbf16, #tpu.memory_space<vmem>>, vector<16x32xbf16>
    %cst_7 = arith.constant dense<0.000000e+00> : vector<128x32xf32>
    %5 = tpu.matmul %3, %4, %cst_7 {dimension_numbers = #tpu.dot_dimension_numbers<[1], [0], [0], [1], [0, 0, 1, 1], [], []>} : vector<128x16xbf16>, vector<16x32xbf16>, vector<128x32xf32> -> vector<128x32xf32>
    %6 = arith.addf %2, %5 : vector<128x32xf32>
    %c0_8 = arith.constant 0 : index
    %c0_9 = arith.constant 0 : index
    %7 = vector.load %arg5[%c0_8, %c0_9] : memref<1x32xf32, #tpu.memory_space<vmem>>, vector<1x32xf32>
    %8 = vector.broadcast %7 : vector<1x32xf32> to vector<128x32xf32>
    %9 = arith.addf %6, %8 : vector<128x32xf32>
    %c0_10 = arith.constant 0 : index
    %c0_11 = arith.constant 0 : index
    %10 = vector.load %arg6[%c0_10, %c0_11] : memref<128x32xf32, #tpu.memory_space<vmem>>, vector<128x32xf32>
    tpu.vector_store %arg6[%c0_10, %c0_11], %9 {strides = array<i32>} : memref<128x32xf32, #tpu.memory_space<vmem>>, vector<128x32xf32>,
    return
  }
  func.func @transform_0(%arg0: i32) -> (i32, i32) {
    %c0_i32 = arith.constant 0 : i32
    %c0_i32_0 = arith.constant 0 : i32
    return %arg0, %c0_i32 : i32, i32
  }
  func.func @transform_1(%arg0: i32) -> (i32, i32) {
    %c0_i32 = arith.constant 0 : i32
    %c0_i32_0 = arith.constant 0 : i32
    return %arg0, %c0_i32 : i32, i32
  }
  func.func @transform_2(%arg0: i32) -> (i32, i32) {
    %c0_i32 = arith.constant 0 : i32
    %c0_i32_0 = arith.constant 0 : i32
    %c0_i32_1 = arith.constant 0 : i32
    return %c0_i32, %c0_i32_0 : i32, i32
  }
  func.func @transform_3(%arg0: i32) -> (i32, i32) {
    %c0_i32 = arith.constant 0 : i32
    %c0_i32_0 = arith.constant 0 : i32
    %c0_i32_1 = arith.constant 0 : i32
    return %c0_i32, %c0_i32_0 : i32, i32
  }
  func.func @transform_4(%arg0: i32) -> (i32, i32) {
    %c0_i32 = arith.constant 0 : i32
    %c0_i32_0 = arith.constant 0 : i32
    %c0_i32_1 = arith.constant 0 : i32
    return %c0_i32, %c0_i32_0 : i32, i32
  }
  func.func @transform_5(%arg0: i32) -> (i32, i32) {
    %c0_i32 = arith.constant 0 : i32
    %c0_i32_0 = arith.constant 0 : i32
    return %arg0, %c0_i32 : i32, i32
  }
}

</mosaic_0001>

<bundles_post_ra>
// kernel: attention_factorize_dot_prod.4
= control target key start
LH: loop header
LB: loop body
LE: loop exit
PB: predicated region body
PF: predicated region fallthrough
CT: control target
= control target key end

     0   :  { %13 = vsyncpa [#allocation3], 0  ;;  %s1839_s0 = inlined_call_operand.hbm [shape: f32[256,32], index: 0, kind: input, shape index: {}]   ;;  %s1840_s1 = inlined_call_operand.vmem [shape: bf16[32,96], index: 1, kind: input, shape index: {}]   ;;  %s1841_s2 = inlined_call_operand.vmem [shape: bf16[256,16], index: 2, kind: output, shape index: {0}]   ;;  %s1842_s3 = inlined_call_operand.vmem [shape: bf16[256,16], index: 3, kind: output, shape index: {1}]   ;;  %s1843_s4 = inlined_call_operand.vmem [shape: bf16[256,16], index: 4, kind: output, shape index: {2}]   ;;  %s1844_s5 = inlined_call_operand.vmem [shape: bf16[256,16], index: 5, kind: output, shape index: {3}]   ;;  %s1845_s6 = inlined_call_operand.vmem [shape: bf16[256,16], index: 6, kind: output, shape index: {4}]   ;;  %s1846_s7 = inlined_call_operand.vmem [shape: bf16[256,16], index: 7, kind: output, shape index: {5}]  }
   0x1   :  { %15 = vsyncpa [#allocation3 + $0x1], 0  ;;  %s1297_s24 = smov 0   ;;  %s1299_s25 = smov 0  }
   0x2   :  { %s1301_s26 = smov 0   ;;  %s1303_s27 = smov 0  }
   0x3 LB: > { %s1090_s28 = sadd.s32 4294967295, %s1248_s27   ;;  %s1317_s29 = sadd.s32 1, %s1248_s27   ;;  %s1248_s27 = sphi %s1303_s27, %s1853_s27   ;;  %s1244_s26 = sphi %s1301_s26, %s1852_s26   ;;  %s1240_s25 = sphi %s1299_s25, %s1851_s25   ;;  %s1236_s24 = sphi %s1297_s24, %s1850_s24  }
   0x4   : > { %s25_s30 = ssub.s32 %s1248_s27, %s1317_s29  ;;  %s28_s8 = sadd.s32 1, %s1244_s26 }
   0x5   : > { %p26_p0 = scmp.eq.s32.totalorder %s25_s30, 0  ;;  %p35_p1 = scmp.ne.s32.totalorder %s1244_s26, %s1240_s25 }
   0x6   : > { %p36_p2 = scmp.eq.s32.totalorder %s1248_s27, 0  ;;  %p41_p3 = scmp.ne.s32.totalorder %s1240_s25, %s1236_s24 }
   0x7   : > { %s1327_s9 = scalar_select %p26_p0, %s1244_s26, %s28_s8  }
   0x8   : > { %p1329_p4 = por %p36_p2, %p35_p1  ;;  %p42_p5 = scmp.eq.s32.totalorder %s1090_s28, 0 }
   0x9   : > { %p1144_p6 = scmp.lt.s32.totalorder %s1248_s27, 2  ;;  %s245_s12 = sand.u32 1, %s1244_s26  }
   0xa   : > { %p1336_p7 = por %p42_p5, %p41_p3  ;;  %s1094_s13 = sshll.u32 %s245_s12, 7 }
   0xb   : > { %s1129_s14 = sshll.u32 %s1248_s27, 7  ;;  %s249_s18 = scalar_lea.vmem [#allocation2], %s1094_s13 }
   0xc   : > { %s254_s17 = scalar_lea.hbm %s1839_s0, %s1129_s14  ;;  %s257_s19 = sshll.u32 %s249_s18, 4  ;;  %s258_s19 = int_to_ptr.vmem [resolvable:$true] %s257_s19 }
   0xd   : > { %s255_s20 = sshll.u32 %s254_s17, 4  ;;  %p1347_p8 = pnand %p1144_p6, %p1329_p4  ;;  %s256_s20 = int_to_ptr.hbm [resolvable:$true] %s255_s20 }
   0xe   : > { %p1097_p9 = scmp.ge.s32.totalorder %s1248_s27, 1  ;;  %s246_s22 = scalar_lea.sflag [#allocation3], %s245_s12 }
   0xf   : > { %s1184_s23 = sshra.s32 %s256_s20, 4  ;;  %p1188_p11 = pneg %p1347_p8  ;;  %s1185_s23 = int_to_ptr.hbm [resolvable:$true] %s1184_s23 }
  0x10   : > { %s1186_s24 = scalar_lea.hbm %s1185_s23, 128  ;;  %s1191_s13 = scalar_lea.hbm %s1839_s0, 256 }
  0x11   : > { %p1187_p10 = scmp.ne.s32.totalorder %s1185_s23, %s1186_s24  ;;  %p1192_p0 = scmp.lt.s32.totalorder %s1185_s23, %s1839_s0 }
  0x12   : > { %p1193_p1 = scmp.lt.s32.totalorder %s1191_s13, %s1186_s24 }
  0x13   : > { %p1189_p12 = pnand %p1188_p11, %p1187_p10 }
  0x14   : > { %p1194_p2 = por %p1193_p1, %p1192_p0 }
  0x15   : > { %p1190_p13 = pneg %p1189_p12 }
  0x17   : > { %p1195_p3 = pnand %p1194_p2, %p1190_p13 }
  0x19   : > { %1198 = shalt.err (!%p1195_p3)
}
  0x1a   : > { %s1250_s12 = smov 128   ;;  %s1251_s15 = smov 8  }
  0x1b   : > { %1143 = dma.hbm_to_vmem [thread:$0]  (!%p1347_p8), %s256_s20, 2048, %s258_s19, %s246_s22, %s1250_s12, %s1250_s12, %s1251_s15  }
  0x1c   : > { %p265_p4 = scmp.lt.s32.totalorder %s1248_s27, 3 }
  0x1e   : > { %p266_p5 = pnand %p1097_p9, %p265_p4 }
  0x1f   : > { %s271_s16 = sand.u32 (!%p266_p5), 1, %s1240_s25  }
  0x20   : > { %269 = sbr.rel (%p266_p5) target bundleno = 499 (0x1f3), region = 28  ;;  %s1098_s17 = sshll.u32 (!%p266_p5), %s271_s16, 7 }
  0x21   : > { %s272_s18 = scalar_lea.sflag (!%p266_p5), [#allocation3], %s271_s16  ;;  %s1366_s23 = scalar_lea.vmem (!%p266_p5), [#allocation2], %s1098_s17 }
  0x25   : > { %1231 = dma.done.wait (%p1336_p7), %s272_s18, 2048  }
  0x26   : > { %1233 = vsyncadd (%p1336_p7), %s272_s18, 4294965248  ;;  %v1131_v0 = vld [vmem:[%s1840_s1 + $0x8] sm:$0xff]  ;;  %v1130_v1 = vld [vmem:[%s1840_s1] sm:$0xff]  ;;  %vm410_vm0 = vcmask 261120   ;;  %s1099_s11 = sshll.u32 %s1090_s28, 4  ;;  %vm500_vm1 = vcmask 125952  }
  0x27   : > { %v370_v2 = vld [vmem:[%s1366_s23] sm:$0xff]  ;;  %v371_v3 = vld [vmem:[%s1366_s23 + $0x8] sm:$0xff]  ;;  %441 = vmatpush.bf16.msra.mxu0 %v1131_v0  ;;  %1132 = vmatpush.bf16.msra.mxu1 %v1131_v0  ;;  %v372_v14 = vld [vmem:[%s1366_s23 + $0x10] sm:$0xff]  ;;  %p334_p6 = scmp.lt.s32.totalorder %s1099_s11, 31  ;;  %s1252_s27 = smov 112  }
  0x28   : > { %v374_v4 = vld [vmem:[%s1366_s23 + $0x20] sm:$0xff]  ;;  %v375_v5 = vld [vmem:[%s1366_s23 + $0x28] sm:$0xff]  ;;  %1134 = vmatpush.bf16.msra.mxu3 %v1131_v0  ;;  %1133 = vmatpush.bf16.msra.mxu2 %v1131_v0  ;;  %v386_v10 = vpack.c.bf16 %v371_v3, %v370_v2  ;;  %v373_v15 = vld [vmem:[%s1366_s23 + $0x18] sm:$0xff]  ;;  %s1253_s28 = smov 96   ;;  %s1254_s10 = smov 64  }
  0x29   : > { %v382_v6 = vld [vmem:[%s1366_s23 + $0x60] sm:$0xff]  ;;  %v383_v7 = vld [vmem:[%s1366_s23 + $0x68] sm:$0xff]  ;;  %v388_v11 = vpack.c.bf16 %v375_v5, %v374_v4  ;;  %v376_v16 = vld [vmem:[%s1366_s23 + $0x30] sm:$0xff]  ;;  %v387_v22 = vpack.c.bf16 %v373_v15, %v372_v14  ;;  %s1855_s11 = smov (!%p334_p6, %s1099_s11), 31  ;;  %s1255_s14 = smov 80  }
  0x2a   : > { %v378_v8 = vld [vmem:[%s1366_s23 + $0x40] sm:$0xff]  ;;  %v379_v9 = vld [vmem:[%s1366_s23 + $0x48] sm:$0xff]  ;;  %v392_v12 = vpack.c.bf16 %v383_v7, %v382_v6  ;;  %v377_v17 = vld [vmem:[%s1366_s23 + $0x38] sm:$0xff]  ;;  %s1404_s21 = sshll.u32 %s1855_s11, 2  ;;  %s1256_s12 = smov 48  }
  0x2b   : > { %442 = vmatpush.bf16.msra.mxu0 %v1130_v1  ;;  %1135 = vmatpush.bf16.msra.mxu1 %v1130_v1  ;;  %v390_v13 = vpack.c.bf16 %v379_v9, %v378_v8  ;;  %v380_v18 = vld [vmem:[%s1366_s23 + $0x50] sm:$0xff]  ;;  %v381_v19 = vld [vmem:[%s1366_s23 + $0x58] sm:$0xff]  ;;  %v389_v23 = vpack.c.bf16 %v377_v17, %v376_v16  ;;  %s1410_s13 = scalar_lea.vmem %s1841_s2, %s1404_s21  ;;  %s1550_s17 = scalar_lea.vmem %s1842_s3, %s1404_s21 }
  0x2c   : > { %1137 = vmatpush.bf16.msra.mxu3 %v1130_v1  ;;  %1136 = vmatpush.bf16.msra.mxu2 %v1130_v1  ;;  %v384_v20 = vld [vmem:[%s1366_s23 + $0x70] sm:$0xff]  ;;  %v385_v21 = vld [vmem:[%s1366_s23 + $0x78] sm:$0xff]  ;;  %v391_v24 = vpack.c.bf16 %v381_v19, %v380_v18  ;;  %s1564_s24 = scalar_lea.vmem %s1843_s4, %s1404_s21  ;;  %s1578_s20 = scalar_lea.vmem %s1844_s5, %s1404_s21 }
  0x2d   : > { %v393_v25 = vpack.c.bf16 %v385_v21, %v384_v20  ;;  %s1606_s8 = scalar_lea.vmem %s1845_s6, %s1404_s21  ;;  %s1624_s16 = scalar_lea.vmem %s1846_s7, %s1404_s21 }
  0x2e   : > { %1119 = vmatmul.msk.bf16.vlgmr.msra.gmra.mxu0 %vm410_vm0, %v386_v10  ;;  %1121 = vmatmul.msk.bf16.vlgmr.msra.gmra.mxu1 %vm410_vm0, %v388_v11 }
  0x2f   : > { %1125 = vmatmul.msk.bf16.vlgmr.msra.gmra.mxu3 %vm410_vm0, %v392_v12  ;;  %1123 = vmatmul.msk.bf16.vlgmr.msra.gmra.mxu2 %vm410_vm0, %v390_v13 }
  0x3e   : > { %1120 = vmatmul.msk.bf16.gmra.mxu0 %vm410_vm0, %v387_v22  ;;  %1122 = vmatmul.msk.bf16.gmra.mxu1 %vm410_vm0, %v389_v23 }
  0x3f   : > { %1124 = vmatmul.msk.bf16.gmra.mxu2 %vm410_vm0, %v391_v24  ;;  %1126 = vmatmul.msk.bf16.gmra.mxu3 %vm410_vm0, %v393_v25 }
  0xab   : > { %v444_v26 = vpop.f32.mrf.mxu0  ;;  %v454_v27 = vpop.f32.mrf.mxu1 }
  0xac   : > { %v484_v28 = vpack.c.bf16 %v444_v26, %v444_v26  ;;  %v1412_v29 = vpack.c.bf16 %v454_v27, %v454_v27 }
  0xae   : > { %501 = vst.msk [vmem:[%s1410_s13] sm:$0xf] %vm500_vm1, %v484_v28  ;;  %541 = vrot.lane.b32.xlu2 %v1412_v29, %s1252_s27  ;;  %597 = vrot.lane.b32.xlu1 %v484_v28, %s1253_s28 }
  0xaf   : > { %505 = vst.msk [vmem:[%s1410_s13 + $0x10] sm:$0xf] %vm500_vm1, %v1412_v29  ;;  %533 = vrot.lane.b32.xlu0 %v484_v28, %s1252_s27 }
  0xb2   : > { %v474_v30 = vpop.f32.mrf.mxu3  ;;  %v464_v31 = vpop.f32.mrf.mxu2 }
  0xb3   : > { %v446_v32 = vpop.f32.mrf.mxu0  ;;  %v456_v33 = vpop.f32.mrf.mxu1  ;;  %v1423_v34 = vpack.c.bf16 %v474_v30, %v474_v30  ;;  %v1436_v37 = vpack.c.bf16 %v464_v31, %v464_v31 }
  0xb4   : > { %v485_v35 = vpack.c.bf16 %v446_v32, %v446_v32  ;;  %v1425_v36 = vpack.c.bf16 %v456_v33, %v456_v33 }
  0xb5   : > { %513 = vst.msk [vmem:[%s1410_s13 + $0x30] sm:$0xf] %vm500_vm1, %v1423_v34 }
  0xb6   : > { %502 = vst.msk [vmem:[%s1410_s13 + $0x4] sm:$0xf] %vm500_vm1, %v485_v35  ;;  %605 = vrot.lane.b32.xlu2 %v1412_v29, %s1253_s28  ;;  %733 = vrot.lane.b32.xlu1 %v1412_v29, %s1254_s10 }
  0xb7   : > { %506 = vst.msk [vmem:[%s1410_s13 + $0x14] sm:$0xf] %vm500_vm1, %v1425_v36  ;;  %669 = vrot.lane.b32.xlu0 %v1412_v29, %s1255_s14 }
  0xb8   : > { %509 = vst.msk [vmem:[%s1410_s13 + $0x20] sm:$0xf] %vm500_vm1, %v1436_v37 }
  0xba   : > { %v476_v38 = vpop.f32.mrf.mxu3  ;;  %v466_v39 = vpop.f32.mrf.mxu2 }
  0xbb   : > { %v1446_v40 = vpack.c.bf16 %v476_v38, %v476_v38  ;;  %v1448_v41 = vpack.c.bf16 %v466_v39, %v466_v39  ;;  %v449_v42 = vpop.f32.mrf.mxu0  ;;  %v459_v45 = vpop.f32.mrf.mxu1 }
  0xbc   : > { %v1471_v43 = vpack.c.bf16 %v449_v42, %v449_v42  ;;  %v1484_v47 = vpack.c.bf16 %v459_v45, %v459_v45 }
  0xbd   : > { %514 = vst.msk [vmem:[%s1410_s13 + $0x34] sm:$0xf] %vm500_vm1, %v1446_v40 }
  0xbe   : > { %661 = vrot.lane.b32.xlu2 %v484_v28, %s1255_s14  ;;  %789 = vrot.lane.b32.xlu1 %v484_v28, %s1256_s12  ;;  %510 = vst.msk [vmem:[%s1410_s13 + $0x24] sm:$0xf] %vm500_vm1, %v1448_v41 }
  0xbf   : > { %725 = vrot.lane.b32.xlu0 %v484_v28, %s1254_s10  ;;  %503 = vst.msk [vmem:[%s1410_s13 + $0x8] sm:$0xf] %vm500_vm1, %v1471_v43 }
  0xc0   : > { %507 = vst.msk [vmem:[%s1410_s13 + $0x18] sm:$0xf] %vm500_vm1, %v1484_v47 }
  0xc2   : > { %v469_v50 = vpop.f32.mrf.mxu2  ;;  %v479_v53 = vpop.f32.mrf.mxu3 }
  0xc3   : > { %v451_v44 = vpop.f32.mrf.mxu0  ;;  %v461_v48 = vpop.f32.mrf.mxu1  ;;  %v1506_v51 = vpack.c.bf16 %v469_v50, %v469_v50  ;;  %v1518_v55 = vpack.c.bf16 %v479_v53, %v479_v53 }
  0xc4   : > { %v1482_v46 = vpack.c.bf16 %v451_v44, %v451_v44  ;;  %v1496_v49 = vpack.c.bf16 %v461_v48, %v461_v48 }
  0xc5   : > { %511 = vst.msk [vmem:[%s1410_s13 + $0x28] sm:$0xf] %vm500_vm1, %v1506_v51 }
  0xc6   : > { %549 = vrot.lane.b32.xlu2 %v1436_v37, %s1252_s27  ;;  %621 = vrot.lane.b32.xlu1 %v1423_v34, %s1253_s28  ;;  %504 = vst.msk [vmem:[%s1410_s13 + $0xc] sm:$0xf] %vm500_vm1, %v1482_v46 }
  0xc7   : > { %557 = vrot.lane.b32.xlu0 %v1423_v34, %s1252_s27  ;;  %508 = vst.msk [vmem:[%s1410_s13 + $0x1c] sm:$0xf] %vm500_vm1, %v1496_v49 }
  0xc8   : > { %515 = vst.msk [vmem:[%s1410_s13 + $0x38] sm:$0xf] %vm500_vm1, %v1518_v55 }
  0xca   : > { %v471_v52 = vpop.f32.mrf.mxu2  ;;  %v481_v56 = vpop.f32.mrf.mxu3 }
  0xcb   : > { %v1516_v54 = vpack.c.bf16 %v471_v52, %v471_v52  ;;  %v1531_v57 = vpack.c.bf16 %v481_v56, %v481_v56 }
  0xcd   : > { %512 = vst.msk [vmem:[%s1410_s13 + $0x2c] sm:$0xf] %vm500_vm1, %v1516_v54 }
  0xce   : > { %685 = vrot.lane.b32.xlu2 %v1423_v34, %s1255_s14  ;;  %677 = vrot.lane.b32.xlu1 %v1436_v37, %s1255_s14  ;;  %516 = vst.msk [vmem:[%s1410_s13 + $0x3c] sm:$0xf] %vm500_vm1, %v1531_v57 }
  0xcf   : > { %613 = vrot.lane.b32.xlu0 %v1436_v37, %s1253_s28 }
  0xd6   : > { %741 = vrot.lane.b32.xlu2 %v1436_v37, %s1254_s10  ;;  %671 = vrot.lane.b32.xlu1 %v1425_v36, %s1255_s14 }
  0xd7   : > { %749 = vrot.lane.b32.xlu0 %v1423_v34, %s1254_s10 }
  0xde   : > { %543 = vrot.lane.b32.xlu2 %v1425_v36, %s1252_s27  ;;  %727 = vrot.lane.b32.xlu1 %v485_v35, %s1254_s10 }
  0xdf   : > { %535 = vrot.lane.b32.xlu0 %v485_v35, %s1252_s27 }
  0xe6   : > { %559 = vrot.lane.b32.xlu1 %v1446_v40, %s1252_s27  ;;  %599 = vrot.lane.b32.xlu2 %v485_v35, %s1253_s28 }
  0xe7   : > { %607 = vrot.lane.b32.xlu0 %v1425_v36, %s1253_s28 }
  0xee   : > { %615 = vrot.lane.b32.xlu1 %v1448_v41, %s1253_s28  ;;  %735 = vrot.lane.b32.xlu2 %v1425_v36, %s1254_s10 }
  0xef   : > { %663 = vrot.lane.b32.xlu0 %v485_v35, %s1255_s14 }
  0xf6   : > { %751 = vrot.lane.b32.xlu1 %v1446_v40, %s1254_s10  ;;  %791 = vrot.lane.b32.xlu2 %v485_v35, %s1256_s12 }
  0xf7   : > { %551 = vrot.lane.b32.xlu0 %v1448_v41, %s1252_s27 }
  0xfe   : > { %623 = vrot.lane.b32.xlu2 %v1446_v40, %s1253_s28  ;;  %537 = vrot.lane.b32.xlu1 %v1471_v43, %s1252_s27 }
  0xff   : > { %687 = vrot.lane.b32.xlu0 %v1446_v40, %s1255_s14 }
 0x106   : > { %679 = vrot.lane.b32.xlu2 %v1448_v41, %s1255_s14  ;;  %609 = vrot.lane.b32.xlu1 %v1484_v47, %s1253_s28 }
 0x107   : > { %743 = vrot.lane.b32.xlu0 %v1448_v41, %s1254_s10 }
 0x108   : > { %v542_v58 = vpop.permute.xlu2 %541 }
 0x109   : > { %585 = vst.msk [vmem:[%s1550_s17 + $0x10] sm:$0xf] %vm500_vm1, %v542_v58 }
 0x10e   : > { %673 = vrot.lane.b32.xlu2 %v1484_v47, %s1255_s14  ;;  %665 = vrot.lane.b32.xlu1 %v1471_v43, %s1255_s14 }
 0x10f   : > { %545 = vrot.lane.b32.xlu0 %v1484_v47, %s1252_s27 }
 0x110   : > { %v606_v59 = vpop.permute.xlu2 %605 }
 0x111   : > { %649 = vst.msk [vmem:[%s1564_s24 + $0x10] sm:$0xf] %vm500_vm1, %v606_v59 }
 0x116   : > { %729 = vrot.lane.b32.xlu2 %v1471_v43, %s1254_s10  ;;  %553 = vrot.lane.b32.xlu1 %v1506_v51, %s1252_s27 }
 0x117   : > { %601 = vrot.lane.b32.xlu0 %v1471_v43, %s1253_s28 }
 0x118   : > { %v662_v60 = vpop.permute.xlu2 %661 }
 0x119   : > { %709 = vst.msk [vmem:[%s1578_s20] sm:$0xf] %vm500_vm1, %v662_v60 }
 0x11e   : > { %561 = vrot.lane.b32.xlu2 %v1518_v55, %s1252_s27  ;;  %689 = vrot.lane.b32.xlu1 %v1518_v55, %s1255_s14 }
 0x11f   : > { %737 = vrot.lane.b32.xlu0 %v1484_v47, %s1254_s10 }
 0x120   : > { %v550_v61 = vpop.permute.xlu2 %549  ;;  %v598_v62 = vpop.permute.xlu1 %597 }
 0x121   : > { %589 = vst.msk [vmem:[%s1550_s17 + $0x20] sm:$0xf] %vm500_vm1, %v550_v61  ;;  %v534_v63 = vpop.permute.xlu0 %533 }
 0x122   : > { %645 = vst.msk [vmem:[%s1564_s24] sm:$0xf] %vm500_vm1, %v598_v62 }
 0x123   : > { %581 = vst.msk [vmem:[%s1550_s17] sm:$0xf] %vm500_vm1, %v534_v63 }
 0x126   : > { %617 = vrot.lane.b32.xlu2 %v1506_v51, %s1253_s28  ;;  %745 = vrot.lane.b32.xlu1 %v1506_v51, %s1254_s10 }
 0x127   : > { %625 = vrot.lane.b32.xlu0 %v1518_v55, %s1253_s28 }
 0x128   : > { %v686_v0 = vpop.permute.xlu2 %685  ;;  %v734_v1 = vpop.permute.xlu1 %733 }
 0x129   : > { %721 = vst.msk [vmem:[%s1578_s20 + $0x30] sm:$0xf] %vm500_vm1, %v686_v0  ;;  %v670_v2 = vpop.permute.xlu0 %669 }
 0x12a   : > { %777 = vst.msk [vmem:[%s1606_s8 + $0x10] sm:$0xf] %vm500_vm1, %v734_v1 }
 0x12b   : > { %713 = vst.msk [vmem:[%s1578_s20 + $0x10] sm:$0xf] %vm500_vm1, %v670_v2 }
 0x12e   : > { %753 = vrot.lane.b32.xlu2 %v1518_v55, %s1254_s10  ;;  %539 = vrot.lane.b32.xlu1 %v1482_v46, %s1252_s27 }
 0x12f   : > { %681 = vrot.lane.b32.xlu0 %v1506_v51, %s1255_s14 }
 0x130   : > { %v742_v3 = vpop.permute.xlu2 %741  ;;  %v790_v4 = vpop.permute.xlu1 %789 }
 0x131   : > { %781 = vst.msk [vmem:[%s1606_s8 + $0x20] sm:$0xf] %vm500_vm1, %v742_v3  ;;  %v726_v5 = vpop.permute.xlu0 %725 }
 0x132   : > { %837 = vst.msk [vmem:[%s1624_s16] sm:$0xf] %vm500_vm1, %v790_v4 }
 0x133   : > { %773 = vst.msk [vmem:[%s1606_s8] sm:$0xf] %vm500_vm1, %v726_v5 }
 0x136   : > { %611 = vrot.lane.b32.xlu2 %v1496_v49, %s1253_s28  ;;  %547 = vrot.lane.b32.xlu1 %v1496_v49, %s1252_s27 }
 0x137   : > { %675 = vrot.lane.b32.xlu0 %v1496_v49, %s1255_s14 }
 0x138   : > { %v544_v6 = vpop.permute.xlu2 %543  ;;  %v622_v7 = vpop.permute.xlu1 %621 }
 0x139   : > { %586 = vst.msk [vmem:[%s1550_s17 + $0x14] sm:$0xf] %vm500_vm1, %v544_v6  ;;  %v558_v8 = vpop.permute.xlu0 %557 }
 0x13a   : > { %657 = vst.msk [vmem:[%s1564_s24 + $0x30] sm:$0xf] %vm500_vm1, %v622_v7 }
 0x13b   : > { %593 = vst.msk [vmem:[%s1550_s17 + $0x30] sm:$0xf] %vm500_vm1, %v558_v8 }
 0x13e   : > { %667 = vrot.lane.b32.xlu2 %v1482_v46, %s1255_s14  ;;  %603 = vrot.lane.b32.xlu1 %v1482_v46, %s1253_s28 }
 0x13f   : > { %731 = vrot.lane.b32.xlu0 %v1482_v46, %s1254_s10 }
 0x140   : > { %v678_v9 = vpop.permute.xlu1 %677  ;;  %v600_v10 = vpop.permute.xlu2 %599 }
 0x141   : > { %717 = vst.msk [vmem:[%s1578_s20 + $0x20] sm:$0xf] %vm500_vm1, %v678_v9  ;;  %v614_v11 = vpop.permute.xlu0 %613 }
 0x142   : > { %653 = vst.msk [vmem:[%s1564_s24 + $0x20] sm:$0xf] %vm500_vm1, %v614_v11 }
 0x143   : > { %646 = vst.msk [vmem:[%s1564_s24 + $0x4] sm:$0xf] %vm500_vm1, %v600_v10 }
 0x146   : > { %555 = vrot.lane.b32.xlu2 %v1516_v54, %s1252_s27  ;;  %739 = vrot.lane.b32.xlu1 %v1496_v49, %s1254_s10 }
 0x147   : > { %563 = vrot.lane.b32.xlu0 %v1531_v57, %s1252_s27 }
 0x148   : > { %v672_v12 = vpop.permute.xlu1 %671  ;;  %v736_v13 = vpop.permute.xlu2 %735 }
 0x149   : > { %714 = vst.msk [vmem:[%s1578_s20 + $0x14] sm:$0xf] %vm500_vm1, %v672_v12  ;;  %v750_v14 = vpop.permute.xlu0 %749 }
 0x14a   : > { %785 = vst.msk [vmem:[%s1606_s8 + $0x30] sm:$0xf] %vm500_vm1, %v750_v14 }
 0x14b   : > { %778 = vst.msk [vmem:[%s1606_s8 + $0x14] sm:$0xf] %vm500_vm1, %v736_v13 }
 0x14e   : > { %691 = vrot.lane.b32.xlu2 %v1531_v57, %s1255_s14  ;;  %627 = vrot.lane.b32.xlu1 %v1531_v57, %s1253_s28 }
 0x14f   : > { %619 = vrot.lane.b32.xlu0 %v1516_v54, %s1253_s28 }
 0x150   : > { %v728_v15 = vpop.permute.xlu1 %727  ;;  %v792_v16 = vpop.permute.xlu2 %791 }
 0x151   : > { %774 = vst.msk [vmem:[%s1606_s8 + $0x4] sm:$0xf] %vm500_vm1, %v728_v15  ;;  %v536_v17 = vpop.permute.xlu0 %535 }
 0x152   : > { %838 = vst.msk [vmem:[%s1624_s16 + $0x4] sm:$0xf] %vm500_vm1, %v792_v16 }
 0x153   : > { %582 = vst.msk [vmem:[%s1550_s17 + $0x4] sm:$0xf] %vm500_vm1, %v536_v17 }
 0x156   : > { %747 = vrot.lane.b32.xlu2 %v1516_v54, %s1254_s10  ;;  %683 = vrot.lane.b32.xlu1 %v1516_v54, %s1255_s14 }
 0x157   : > { %755 = vrot.lane.b32.xlu0 %v1531_v57, %s1254_s10 }
 0x158   : > { %v560_v18 = vpop.permute.xlu1 %559  ;;  %v624_v19 = vpop.permute.xlu2 %623 }
 0x159   : > { %594 = vst.msk [vmem:[%s1550_s17 + $0x34] sm:$0xf] %vm500_vm1, %v560_v18  ;;  %v608_v20 = vpop.permute.xlu0 %607 }
 0x15a   : > { %658 = vst.msk [vmem:[%s1564_s24 + $0x34] sm:$0xf] %vm500_vm1, %v624_v19 }
 0x15b   : > { %650 = vst.msk [vmem:[%s1564_s24 + $0x14] sm:$0xf] %vm500_vm1, %v608_v20 }
 0x15e   : > { %797 = vrot.lane.b32.xlu2 %v1412_v29, %s1256_s12  ;;  %795 = vrot.lane.b32.xlu1 %v1482_v46, %s1256_s12 }
 0x15f   : > { %793 = vrot.lane.b32.xlu0 %v1471_v43, %s1256_s12 }
 0x160   : > { %v616_v21 = vpop.permute.xlu1 %615  ;;  %v680_v22 = vpop.permute.xlu2 %679 }
 0x161   : > { %654 = vst.msk [vmem:[%s1564_s24 + $0x24] sm:$0xf] %vm500_vm1, %v616_v21  ;;  %v664_v23 = vpop.permute.xlu0 %663 }
 0x162   : > { %718 = vst.msk [vmem:[%s1578_s20 + $0x24] sm:$0xf] %vm500_vm1, %v680_v22 }
 0x163   : > { %710 = vst.msk [vmem:[%s1578_s20 + $0x4] sm:$0xf] %vm500_vm1, %v664_v23 }
 0x166   : > { %803 = vrot.lane.b32.xlu2 %v1496_v49, %s1256_s12  ;;  %801 = vrot.lane.b32.xlu1 %v1484_v47, %s1256_s12 }
 0x167   : > { %799 = vrot.lane.b32.xlu0 %v1425_v36, %s1256_s12 }
 0x168   : > { %v752_v24 = vpop.permute.xlu1 %751  ;;  %v674_v25 = vpop.permute.xlu2 %673 }
 0x169   : > { %786 = vst.msk [vmem:[%s1606_s8 + $0x34] sm:$0xf] %vm500_vm1, %v752_v24  ;;  %v552_v26 = vpop.permute.xlu0 %551 }
 0x16a   : > { %715 = vst.msk [vmem:[%s1578_s20 + $0x18] sm:$0xf] %vm500_vm1, %v674_v25 }
 0x16b   : > { %590 = vst.msk [vmem:[%s1550_s17 + $0x24] sm:$0xf] %vm500_vm1, %v552_v26 }
 0x16e   : > { %809 = vrot.lane.b32.xlu2 %v1506_v51, %s1256_s12  ;;  %807 = vrot.lane.b32.xlu1 %v1448_v41, %s1256_s12 }
 0x16f   : > { %805 = vrot.lane.b32.xlu0 %v1436_v37, %s1256_s12 }
 0x170   : > { %v730_v27 = vpop.permute.xlu2 %729  ;;  %v538_v28 = vpop.permute.xlu1 %537 }
 0x171   : > { %v688_v29 = vpop.permute.xlu0 %687  ;;  %775 = vst.msk [vmem:[%s1606_s8 + $0x8] sm:$0xf] %vm500_vm1, %v730_v27 }
 0x172   : > { %722 = vst.msk [vmem:[%s1578_s20 + $0x34] sm:$0xf] %vm500_vm1, %v688_v29 }
 0x173   : > { %583 = vst.msk [vmem:[%s1550_s17 + $0x8] sm:$0xf] %vm500_vm1, %v538_v28 }
 0x176   : > { %815 = vrot.lane.b32.xlu2 %v1446_v40, %s1256_s12  ;;  %813 = vrot.lane.b32.xlu1 %v1423_v34, %s1256_s12 }
 0x177   : > { %811 = vrot.lane.b32.xlu0 %v1516_v54, %s1256_s12 }
 0x178   : > { %v562_v30 = vpop.permute.xlu2 %561  ;;  %v610_v31 = vpop.permute.xlu1 %609 }
 0x179   : > { %v744_v32 = vpop.permute.xlu0 %743  ;;  %595 = vst.msk [vmem:[%s1550_s17 + $0x38] sm:$0xf] %vm500_vm1, %v562_v30 }
 0x17a   : > { %782 = vst.msk [vmem:[%s1606_s8 + $0x24] sm:$0xf] %vm500_vm1, %v744_v32 }
 0x17b   : > { %651 = vst.msk [vmem:[%s1564_s24 + $0x18] sm:$0xf] %vm500_vm1, %v610_v31 }
 0x17e   : > { %819 = vrot.lane.b32.xlu1 %v1531_v57, %s1256_s12 }
 0x17f   : > { %817 = vrot.lane.b32.xlu0 %v1518_v55, %s1256_s12 }
 0x180   : > { %v618_v33 = vpop.permute.xlu2 %617  ;;  %v666_v34 = vpop.permute.xlu1 %665 }
 0x181   : > { %v546_v35 = vpop.permute.xlu0 %545  ;;  %655 = vst.msk [vmem:[%s1564_s24 + $0x28] sm:$0xf] %vm500_vm1, %v618_v33 }
 0x182   : > { %587 = vst.msk [vmem:[%s1550_s17 + $0x18] sm:$0xf] %vm500_vm1, %v546_v35 }
 0x183   : > { %711 = vst.msk [vmem:[%s1578_s20 + $0x8] sm:$0xf] %vm500_vm1, %v666_v34 }
 0x188   : > { %v754_v36 = vpop.permute.xlu2 %753  ;;  %v554_v37 = vpop.permute.xlu1 %553 }
 0x189   : > { %787 = vst.msk [vmem:[%s1606_s8 + $0x38] sm:$0xf] %vm500_vm1, %v754_v36  ;;  %v602_v38 = vpop.permute.xlu0 %601 }
 0x18a   : > { %647 = vst.msk [vmem:[%s1564_s24 + $0x8] sm:$0xf] %vm500_vm1, %v602_v38 }
 0x18b   : > { %591 = vst.msk [vmem:[%s1550_s17 + $0x28] sm:$0xf] %vm500_vm1, %v554_v37 }
 0x190   : > { %v612_v39 = vpop.permute.xlu2 %611  ;;  %v690_v40 = vpop.permute.xlu1 %689 }
 0x191   : > { %652 = vst.msk [vmem:[%s1564_s24 + $0x1c] sm:$0xf] %vm500_vm1, %v612_v39  ;;  %v738_v41 = vpop.permute.xlu0 %737 }
 0x192   : > { %779 = vst.msk [vmem:[%s1606_s8 + $0x18] sm:$0xf] %vm500_vm1, %v738_v41 }
 0x193   : > { %723 = vst.msk [vmem:[%s1578_s20 + $0x38] sm:$0xf] %vm500_vm1, %v690_v40 }
 0x198   : > { %v746_v42 = vpop.permute.xlu1 %745  ;;  %v668_v43 = vpop.permute.xlu2 %667 }
 0x199   : > { %v626_v44 = vpop.permute.xlu0 %625  ;;  %783 = vst.msk [vmem:[%s1606_s8 + $0x28] sm:$0xf] %vm500_vm1, %v746_v42 }
 0x19a   : > { %659 = vst.msk [vmem:[%s1564_s24 + $0x38] sm:$0xf] %vm500_vm1, %v626_v44 }
 0x19b   : > { %712 = vst.msk [vmem:[%s1578_s20 + $0xc] sm:$0xf] %vm500_vm1, %v668_v43 }
 0x1a0   : > { %v556_v45 = vpop.permute.xlu2 %555  ;;  %v540_v46 = vpop.permute.xlu1 %539 }
 0x1a1   : > { %v682_v47 = vpop.permute.xlu0 %681  ;;  %592 = vst.msk [vmem:[%s1550_s17 + $0x2c] sm:$0xf] %vm500_vm1, %v556_v45 }
 0x1a2   : > { %719 = vst.msk [vmem:[%s1578_s20 + $0x28] sm:$0xf] %vm500_vm1, %v682_v47 }
 0x1a3   : > { %584 = vst.msk [vmem:[%s1550_s17 + $0xc] sm:$0xf] %vm500_vm1, %v540_v46 }
 0x1a8   : > { %v692_v48 = vpop.permute.xlu2 %691  ;;  %v548_v49 = vpop.permute.xlu1 %547 }
 0x1a9   : > { %v676_v50 = vpop.permute.xlu0 %675  ;;  %724 = vst.msk [vmem:[%s1578_s20 + $0x3c] sm:$0xf] %vm500_vm1, %v692_v48 }
 0x1aa   : > { %716 = vst.msk [vmem:[%s1578_s20 + $0x1c] sm:$0xf] %vm500_vm1, %v676_v50 }
 0x1ab   : > { %588 = vst.msk [vmem:[%s1550_s17 + $0x1c] sm:$0xf] %vm500_vm1, %v548_v49 }
 0x1b0   : > { %v748_v51 = vpop.permute.xlu2 %747  ;;  %v604_v52 = vpop.permute.xlu1 %603 }
 0x1b1   : > { %v732_v53 = vpop.permute.xlu0 %731  ;;  %784 = vst.msk [vmem:[%s1606_s8 + $0x2c] sm:$0xf] %vm500_vm1, %v748_v51 }
 0x1b2   : > { %776 = vst.msk [vmem:[%s1606_s8 + $0xc] sm:$0xf] %vm500_vm1, %v732_v53 }
 0x1b3   : > { %648 = vst.msk [vmem:[%s1564_s24 + $0xc] sm:$0xf] %vm500_vm1, %v604_v52 }
 0x1b8   : > { %v798_v54 = vpop.permute.xlu2 %797  ;;  %v740_v55 = vpop.permute.xlu1 %739 }
 0x1b9   : > { %v564_v56 = vpop.permute.xlu0 %563  ;;  %841 = vst.msk [vmem:[%s1624_s16 + $0x10] sm:$0xf] %vm500_vm1, %v798_v54 }
 0x1ba   : > { %596 = vst.msk [vmem:[%s1550_s17 + $0x3c] sm:$0xf] %vm500_vm1, %v564_v56 }
 0x1bb   : > { %780 = vst.msk [vmem:[%s1606_s8 + $0x1c] sm:$0xf] %vm500_vm1, %v740_v55 }
 0x1c0   : > { %v804_v57 = vpop.permute.xlu2 %803  ;;  %v628_v58 = vpop.permute.xlu1 %627 }
 0x1c1   : > { %v620_v59 = vpop.permute.xlu0 %619  ;;  %844 = vst.msk [vmem:[%s1624_s16 + $0x1c] sm:$0xf] %vm500_vm1, %v804_v57 }
 0x1c2   : > { %656 = vst.msk [vmem:[%s1564_s24 + $0x2c] sm:$0xf] %vm500_vm1, %v620_v59 }
 0x1c3   : > { %660 = vst.msk [vmem:[%s1564_s24 + $0x3c] sm:$0xf] %vm500_vm1, %v628_v58 }
 0x1c8   : > { %v810_v60 = vpop.permute.xlu2 %809  ;;  %v684_v61 = vpop.permute.xlu1 %683 }
 0x1c9   : > { %v756_v62 = vpop.permute.xlu0 %755  ;;  %847 = vst.msk [vmem:[%s1624_s16 + $0x28] sm:$0xf] %vm500_vm1, %v810_v60 }
 0x1ca   : > { %788 = vst.msk [vmem:[%s1606_s8 + $0x3c] sm:$0xf] %vm500_vm1, %v756_v62 }
 0x1cb   : > { %720 = vst.msk [vmem:[%s1578_s20 + $0x2c] sm:$0xf] %vm500_vm1, %v684_v61 }
 0x1d0   : > { %v816_v63 = vpop.permute.xlu2 %815  ;;  %v796_v0 = vpop.permute.xlu1 %795 }
 0x1d1   : > { %v794_v1 = vpop.permute.xlu0 %793  ;;  %850 = vst.msk [vmem:[%s1624_s16 + $0x34] sm:$0xf] %vm500_vm1, %v816_v63 }
 0x1d2   : > { %839 = vst.msk [vmem:[%s1624_s16 + $0x8] sm:$0xf] %vm500_vm1, %v794_v1 }
 0x1d3   : > { %840 = vst.msk [vmem:[%s1624_s16 + $0xc] sm:$0xf] %vm500_vm1, %v796_v0 }
 0x1d8   : > { %v802_v2 = vpop.permute.xlu1 %801 }
 0x1d9   : > { %v800_v3 = vpop.permute.xlu0 %799  ;;  %843 = vst.msk [vmem:[%s1624_s16 + $0x18] sm:$0xf] %vm500_vm1, %v802_v2 }
 0x1da   : > { %842 = vst.msk [vmem:[%s1624_s16 + $0x14] sm:$0xf] %vm500_vm1, %v800_v3 }
 0x1e0   : > { %v808_v4 = vpop.permute.xlu1 %807 }
 0x1e1   : > { %v806_v5 = vpop.permute.xlu0 %805  ;;  %846 = vst.msk [vmem:[%s1624_s16 + $0x24] sm:$0xf] %vm500_vm1, %v808_v4 }
 0x1e2   : > { %845 = vst.msk [vmem:[%s1624_s16 + $0x20] sm:$0xf] %vm500_vm1, %v806_v5 }
 0x1e8   : > { %v814_v6 = vpop.permute.xlu1 %813 }
 0x1e9   : > { %v812_v7 = vpop.permute.xlu0 %811  ;;  %849 = vst.msk [vmem:[%s1624_s16 + $0x30] sm:$0xf] %vm500_vm1, %v814_v6 }
 0x1ea   : > { %848 = vst.msk [vmem:[%s1624_s16 + $0x2c] sm:$0xf] %vm500_vm1, %v812_v7 }
 0x1f0   : > { %v820_v8 = vpop.permute.xlu1 %819 }
 0x1f1   : > { %v818_v9 = vpop.permute.xlu0 %817  ;;  %852 = vst.msk [vmem:[%s1624_s16 + $0x3c] sm:$0xf] %vm500_vm1, %v820_v8 }
 0x1f2   : > { %851 = vst.msk [vmem:[%s1624_s16 + $0x38] sm:$0xf] %vm500_vm1, %v818_v9 }
 0x1f3 PF: > { %p18_p7 = scmp.ge.s32.totalorder %s1317_s29, 4   ;;  %s1850_s24 = smov %s1240_s25 }
 0x1f4   : > { %s1851_s25 = smov %s1244_s26  ;;  %s1852_s26 = smov %s1327_s9 }
 0x1f5   : > { %s1853_s27 = smov %s1317_s29  ;;  %20 = sbr.rel (!%p18_p7) target bundleno = 3 (0x3), region = 128 }
 0x1fa   :  { %960 = vsyncpa [#allocation3], 1 }
 0x1fb   :  { %962 = vsyncpa [#allocation3 + $0x1], 1 }

// kernel: attention_factorize_dot_prod.7
= control target key start
LH: loop header
LB: loop body
LE: loop exit
PB: predicated region body
PF: predicated region fallthrough
CT: control target
= control target key end

     0   :  { %10 = vsyncpa [#allocation3], 0  ;;  %s1081_s0 = inlined_call_operand.vmem [shape: bf16[256,16], index: 0, kind: input, shape index: {}]   ;;  %s1082_s1 = inlined_call_operand.vmem [shape: bf16[256,16], index: 1, kind: input, shape index: {}]   ;;  %s1083_s2 = inlined_call_operand.vmem [shape: bf16[16,32], index: 2, kind: input, shape index: {}]   ;;  %s1084_s3 = inlined_call_operand.vmem [shape: bf16[16,32], index: 3, kind: input, shape index: {}]   ;;  %s1085_s4 = inlined_call_operand.vmem [shape: f32[1,32], index: 4, kind: input, shape index: {}]   ;;  %s1086_s5 = inlined_call_operand.hbm [shape: f32[256,32], index: 5, kind: output, shape index: {}]  }
   0x1   :  { %12 = vsyncpa [#allocation3 + $0x1], 0  ;;  %s912_s18 = smov 0   ;;  %s914_s19 = smov 0  }
   0x2   :  { %s916_s20 = smov 0   ;;  %s918_s21 = smov 0  }
   0x3 LB: > { %s933_s22 = sadd.s32 4294967295, %s878_s21   ;;  %s651_s23 = sadd.s32 4294967294, %s878_s21   ;;  %s878_s21 = sphi %s918_s21, %s1092_s21   ;;  %s874_s20 = sphi %s916_s20, %s1091_s20   ;;  %s870_s19 = sphi %s914_s19, %s1090_s19   ;;  %s866_s18 = sphi %s912_s18, %s1089_s18  }
   0x4   : > { %s937_s24 = sadd.s32 1, %s878_s21   ;;  %s140_s25 = sadd.s32 1, %s874_s20 }
   0x5   : > { %s137_s26 = ssub.s32 %s878_s21, %s937_s24  ;;  %p150_p0 = scmp.ne.s32.totalorder %s874_s20, %s870_s19 }
   0x6   : > { %p138_p1 = scmp.eq.s32.totalorder %s137_s26, 0  ;;  %p151_p2 = scmp.eq.s32.totalorder %s933_s22, 1 }
   0x7   : > { %p156_p3 = scmp.ne.s32.totalorder %s870_s19, %s866_s18  ;;  %p157_p4 = scmp.eq.s32.totalorder %s651_s23, 1 }
   0x8   : > { %s948_s27 = scalar_select %p138_p1, %s874_s20, %s140_s25  }
   0x9   : > { %p950_p5 = por %p151_p2, %p150_p0  ;;  %p954_p6 = por %p157_p4, %p156_p3 }
   0xa   : > { %p654_p7 = scmp.ge.s32.totalorder %s878_s21, 1  ;;  %p202_p8 = scmp.lt.s32.totalorder %s878_s21, 3 }
   0xc   : > { %p203_p9 = pnand %p654_p7, %p202_p8 }
   0xd   : > { %s656_s9 = sshll.u32 (!%p203_p9), %s933_s22, 4  ;;  %s232_s17 = sand.u32 (!%p203_p9), 1, %s870_s19  }
   0xe   : > { %206 = sbr.rel (%p203_p9) target bundleno = 222 (0xde), region = 40  ;;  %p236_p10 = scmp.lt.s32.totalorder (!%p203_p9), %s656_s9, 31 }
   0xf   : > { %s655_s23 = sshll.u32 (!%p203_p9), %s232_s17, 7  ;;  %s771_s6 = sshll.u32 (!%p203_p9), %s933_s22, 7 }
  0x10   : > { %s998_s30 = scalar_lea.vmem (!%p203_p9), [#allocation2], %s655_s23  ;;  %s562_s11 = scalar_lea.sflag (!%p203_p9), [#allocation3], %s232_s17 }
  0x13   : > { %v770_v0 = vld [vmem:[%s1084_s3] sm:$0xff]  ;;  %s1094_s9 = smov (!%p236_p10, %s656_s9), 31  ;;  %vm331_vm0 = vcmask 130048   ;;  %vm544_vm1 = vcmask 261120  }
  0x14   : > { %v761_v1 = vld [vmem:[%s1083_s2] sm:$0xff]  ;;  %363 = vmatpush.bf16.msra.mxu0 %v770_v0  ;;  %772 = vmatpush.bf16.msra.mxu2 %v770_v0  ;;  %s657_s10 = sshll.u32 %s1094_s9, 2  ;;  %s573_s9 = scalar_lea.hbm %s1086_s5, %s771_s6 }
  0x15   : > { %482 = vmatpush.bf16.msra.mxu1 %v761_v1  ;;  %773 = vmatpush.bf16.msra.mxu3 %v761_v1  ;;  %s245_s13 = scalar_lea.vmem %s1082_s1, %s657_s10  ;;  %s239_s16 = scalar_lea.vmem %s1081_s0, %s657_s10  ;;  %v995_v19 = vld [vmem:[%s1085_s4] ss:$0 sm:$0xff] }
  0x16   : > { %v762_v2 = vld [vmem:[%s245_s13] sm:$0xff]  ;;  %v763_v6 = vld [vmem:[%s245_s13 + $0x8] sm:$0xff]  ;;  %v764_v10 = vld [vmem:[%s245_s13 + $0x10] sm:$0xff]  ;;  %s574_s10 = sshll.u32 %s998_s30, 4  ;;  %s576_s22 = sshll.u32 %s573_s9, 4  ;;  %s575_s10 = int_to_ptr.vmem [resolvable:$true] %s574_s10  ;;  %s577_s22 = int_to_ptr.hbm [resolvable:$true] %s576_s22 }
  0x17   : > { %v766_v3 = vld [vmem:[%s245_s13 + $0x20] sm:$0xff]  ;;  %696 = vmatmul.msk.bf16.vlgmr.msra.gmra.mxu0 %vm331_vm0, %v762_v2  ;;  %v767_v7 = vld [vmem:[%s245_s13 + $0x28] sm:$0xff]  ;;  %v768_v11 = vld [vmem:[%s245_s13 + $0x30] sm:$0xff]  ;;  %s830_s12 = sshra.s32 %s577_s22, 4  ;;  %s831_s12 = int_to_ptr.hbm [resolvable:$true] %s830_s12 }
  0x18   : > { %v753_v4 = vld [vmem:[%s239_s16] sm:$0xff]  ;;  %700 = vmatmul.msk.bf16.vlgmr.msra.gmra.mxu2 %vm331_vm0, %v766_v3  ;;  %v754_v8 = vld [vmem:[%s239_s16 + $0x8] sm:$0xff]  ;;  %v755_v12 = vld [vmem:[%s239_s16 + $0x10] sm:$0xff]  ;;  %p837_p0 = scmp.lt.s32.totalorder %s831_s12, %s1086_s5 }
  0x19   : > { %v757_v5 = vld [vmem:[%s239_s16 + $0x20] sm:$0xff]  ;;  %740 = vmatmul.msk.bf16.vlgmr.msra.gmra.mxu1 %vm331_vm0, %v753_v4  ;;  %v758_v9 = vld [vmem:[%s239_s16 + $0x28] sm:$0xff]  ;;  %v759_v13 = vld [vmem:[%s239_s16 + $0x30] sm:$0xff] }
  0x1a   : > { %744 = vmatmul.msk.bf16.vlgmr.msra.gmra.mxu3 %vm331_vm0, %v757_v5  ;;  %v765_v14 = vld [vmem:[%s245_s13 + $0x18] sm:$0xff] }
  0x1b   : > { %v769_v15 = vld [vmem:[%s245_s13 + $0x38] sm:$0xff]  ;;  %s832_s13 = scalar_lea.hbm %s831_s12, 128 }
  0x1c   : > { %v756_v16 = vld [vmem:[%s239_s16 + $0x18] sm:$0xff]  ;;  %p833_p11 = scmp.ne.s32.totalorder %s831_s12, %s832_s13 }
  0x1d   : > { %v760_v17 = vld [vmem:[%s239_s16 + $0x38] sm:$0xff]  ;;  %s836_s16 = scalar_lea.hbm %s1086_s5, 256 }
  0x1e   : > { %p834_p12 = pnand %p833_p11, %p950_p5  ;;  %p838_p1 = scmp.lt.s32.totalorder %s836_s16, %s832_s13 }
  0x20   : > { %p835_p13 = pneg %p834_p12  ;;  %p839_p2 = por %p838_p1, %p837_p0 }
  0x22   : > { %p840_p3 = pnand %p839_p2, %p835_p13 }
  0x27   : > { %697 = vmatmul.msk.bf16.gmra.mxu0 %vm331_vm0, %v763_v6 }
  0x28   : > { %701 = vmatmul.msk.bf16.gmra.mxu2 %vm331_vm0, %v767_v7 }
  0x29   : > { %741 = vmatmul.msk.bf16.gmra.mxu1 %vm331_vm0, %v754_v8 }
  0x2a   : > { %745 = vmatmul.msk.bf16.gmra.mxu3 %vm331_vm0, %v758_v9 }
  0x37   : > { %698 = vmatmul.msk.bf16.gmra.mxu0 %vm331_vm0, %v764_v10 }
  0x38   : > { %702 = vmatmul.msk.bf16.gmra.mxu2 %vm331_vm0, %v768_v11 }
  0x39   : > { %742 = vmatmul.msk.bf16.gmra.mxu1 %vm331_vm0, %v755_v12 }
  0x3a   : > { %746 = vmatmul.msk.bf16.gmra.mxu3 %vm331_vm0, %v759_v13 }
  0x47   : > { %699 = vmatmul.msk.bf16.gmra.mxu0 %vm331_vm0, %v765_v14 }
  0x48   : > { %703 = vmatmul.msk.bf16.gmra.mxu2 %vm331_vm0, %v769_v15 }
  0x49   : > { %743 = vmatmul.msk.bf16.gmra.mxu1 %vm331_vm0, %v756_v16 }
  0x4a   : > { %747 = vmatmul.msk.bf16.gmra.mxu3 %vm331_vm0, %v760_v17 }
  0x94   : > { %v365_v18 = vpop.f32.mrf.mxu0 }
  0x96   : > { %v484_v20 = vpop.f32.mrf.mxu1 }
  0x97   : > { %v485_v21 = vadd.f32 %v484_v20, %v365_v18 }
  0x99   : > { %v528_v22 = vadd.f32 %v995_v19, %v485_v21 }
  0x9b   : > { %545 = vst.msk [vmem:[%s998_s30] sm:$0xff] %vm544_vm1, %v528_v22  ;;  %v385_v23 = vpop.f32.mrf.mxu2 }
  0x9c   : > { %v367_v26 = vpop.f32.mrf.mxu0 }
  0x9d   : > { %v504_v24 = vpop.f32.mrf.mxu3 }
  0x9e   : > { %v505_v25 = vadd.f32 %v504_v24, %v385_v23  ;;  %v486_v27 = vpop.f32.mrf.mxu1 }
  0x9f   : > { %v487_v29 = vadd.f32 %v486_v27, %v367_v26 }
  0xa0   : > { %v536_v28 = vadd.f32 %v995_v19, %v505_v25 }
  0xa1   : > { %v529_v30 = vadd.f32 %v995_v19, %v487_v29 }
  0xa2   : > { %553 = vst.msk [vmem:[%s998_s30 + $0x40] sm:$0xff] %vm544_vm1, %v536_v28 }
  0xa3   : > { %546 = vst.msk [vmem:[%s998_s30 + $0x8] sm:$0xff] %vm544_vm1, %v529_v30  ;;  %v387_v31 = vpop.f32.mrf.mxu2 }
  0xa4   : > { %v370_v34 = vpop.f32.mrf.mxu0 }
  0xa5   : > { %v506_v32 = vpop.f32.mrf.mxu3 }
  0xa6   : > { %v507_v33 = vadd.f32 %v506_v32, %v387_v31  ;;  %v489_v35 = vpop.f32.mrf.mxu1 }
  0xa7   : > { %v490_v37 = vadd.f32 %v489_v35, %v370_v34 }
  0xa8   : > { %v537_v36 = vadd.f32 %v995_v19, %v507_v33 }
  0xa9   : > { %v530_v38 = vadd.f32 %v995_v19, %v490_v37 }
  0xaa   : > { %554 = vst.msk [vmem:[%s998_s30 + $0x48] sm:$0xff] %vm544_vm1, %v537_v36 }
  0xab   : > { %547 = vst.msk [vmem:[%s998_s30 + $0x10] sm:$0xff] %vm544_vm1, %v530_v38  ;;  %v390_v39 = vpop.f32.mrf.mxu2 }
  0xac   : > { %v372_v42 = vpop.f32.mrf.mxu0 }
  0xad   : > { %v509_v40 = vpop.f32.mrf.mxu3 }
  0xae   : > { %v510_v41 = vadd.f32 %v509_v40, %v390_v39  ;;  %v491_v43 = vpop.f32.mrf.mxu1 }
  0xaf   : > { %v492_v45 = vadd.f32 %v491_v43, %v372_v42 }
  0xb0   : > { %v538_v44 = vadd.f32 %v995_v19, %v510_v41 }
  0xb1   : > { %v531_v46 = vadd.f32 %v995_v19, %v492_v45 }
  0xb2   : > { %555 = vst.msk [vmem:[%s998_s30 + $0x50] sm:$0xff] %vm544_vm1, %v538_v44 }
  0xb3   : > { %548 = vst.msk [vmem:[%s998_s30 + $0x18] sm:$0xff] %vm544_vm1, %v531_v46  ;;  %v392_v47 = vpop.f32.mrf.mxu2 }
  0xb4   : > { %v375_v50 = vpop.f32.mrf.mxu0 }
  0xb5   : > { %v511_v48 = vpop.f32.mrf.mxu3 }
  0xb6   : > { %v512_v49 = vadd.f32 %v511_v48, %v392_v47  ;;  %v494_v51 = vpop.f32.mrf.mxu1 }
  0xb7   : > { %v495_v53 = vadd.f32 %v494_v51, %v375_v50 }
  0xb8   : > { %v539_v52 = vadd.f32 %v995_v19, %v512_v49 }
  0xb9   : > { %v532_v54 = vadd.f32 %v995_v19, %v495_v53 }
  0xba   : > { %556 = vst.msk [vmem:[%s998_s30 + $0x58] sm:$0xff] %vm544_vm1, %v539_v52 }
  0xbb   : > { %549 = vst.msk [vmem:[%s998_s30 + $0x20] sm:$0xff] %vm544_vm1, %v532_v54  ;;  %v395_v55 = vpop.f32.mrf.mxu2 }
  0xbc   : > { %v377_v58 = vpop.f32.mrf.mxu0 }
  0xbd   : > { %v514_v56 = vpop.f32.mrf.mxu3 }
  0xbe   : > { %v515_v57 = vadd.f32 %v514_v56, %v395_v55  ;;  %v496_v59 = vpop.f32.mrf.mxu1 }
  0xbf   : > { %v497_v61 = vadd.f32 %v496_v59, %v377_v58 }
  0xc0   : > { %v540_v60 = vadd.f32 %v995_v19, %v515_v57 }
  0xc1   : > { %v533_v62 = vadd.f32 %v995_v19, %v497_v61 }
  0xc2   : > { %557 = vst.msk [vmem:[%s998_s30 + $0x60] sm:$0xff] %vm544_vm1, %v540_v60 }
  0xc3   : > { %550 = vst.msk [vmem:[%s998_s30 + $0x28] sm:$0xff] %vm544_vm1, %v533_v62  ;;  %v397_v63 = vpop.f32.mrf.mxu2 }
  0xc4   : > { %v380_v2 = vpop.f32.mrf.mxu0 }
  0xc5   : > { %v516_v0 = vpop.f32.mrf.mxu3 }
  0xc6   : > { %v517_v1 = vadd.f32 %v516_v0, %v397_v63  ;;  %v499_v3 = vpop.f32.mrf.mxu1 }
  0xc7   : > { %v500_v5 = vadd.f32 %v499_v3, %v380_v2 }
  0xc8   : > { %v541_v4 = vadd.f32 %v995_v19, %v517_v1 }
  0xc9   : > { %v534_v6 = vadd.f32 %v995_v19, %v500_v5 }
  0xca   : > { %558 = vst.msk [vmem:[%s998_s30 + $0x68] sm:$0xff] %vm544_vm1, %v541_v4 }
  0xcb   : > { %551 = vst.msk [vmem:[%s998_s30 + $0x30] sm:$0xff] %vm544_vm1, %v534_v6  ;;  %v400_v7 = vpop.f32.mrf.mxu2 }
  0xcc   : > { %v382_v10 = vpop.f32.mrf.mxu0 }
  0xcd   : > { %v519_v8 = vpop.f32.mrf.mxu3 }
  0xce   : > { %v520_v9 = vadd.f32 %v519_v8, %v400_v7  ;;  %v501_v11 = vpop.f32.mrf.mxu1 }
  0xcf   : > { %v502_v13 = vadd.f32 %v501_v11, %v382_v10 }
  0xd0   : > { %v542_v12 = vadd.f32 %v995_v19, %v520_v9 }
  0xd1   : > { %v535_v14 = vadd.f32 %v995_v19, %v502_v13 }
  0xd2   : > { %559 = vst.msk [vmem:[%s998_s30 + $0x70] sm:$0xff] %vm544_vm1, %v542_v12 }
  0xd3   : > { %552 = vst.msk [vmem:[%s998_s30 + $0x38] sm:$0xff] %vm544_vm1, %v535_v14  ;;  %v402_v15 = vpop.f32.mrf.mxu2 }
  0xd5   : > { %v521_v16 = vpop.f32.mrf.mxu3 }
  0xd6   : > { %v522_v17 = vadd.f32 %v521_v16, %v402_v15 }
  0xd8   : > { %v543_v18 = vadd.f32 %v995_v19, %v522_v17 }
  0xda   : > { %560 = vst.msk [vmem:[%s998_s30 + $0x78] sm:$0xff] %vm544_vm1, %v543_v18 }
  0xdb   : > { %843 = shalt.err (!%p840_p3)
}
  0xdc   : > { %s880_s17 = smov 128   ;;  %s881_s26 = smov 8  }
  0xdd   : > { %774 = dma.vmem_to_hbm [thread:$0]  (%p950_p5), %s575_s10, 2048, %s577_s22, %s562_s11, %s880_s17, %s880_s17, %s881_s26  }
  0xde PF: > { %p780_p4 = scmp.ge.s32.totalorder %s878_s21, 2  ;;  %s591_s30 = sand.u32 1, %s866_s18  }
  0xdf   : > { %s592_s6 = scalar_lea.sflag [#allocation3], %s591_s30 }
  0xe0   : > { %p777_p7 = pnand %p780_p4, %p954_p6 }
  0xe2   : > { %p778_p8 = pneg %p777_p7 }
  0xe4   : > { %861 = dma.done.wait (%p778_p8), %s592_s6, 2048  }
  0xe5   : > { %863 = vsyncadd (%p778_p8), %s592_s6, 4294965248  ;;  %p15_p9 = scmp.ge.s32.totalorder %s937_s24, 4   ;;  %s1089_s18 = smov %s870_s19 }
  0xe6   : > { %s1090_s19 = smov %s874_s20  ;;  %s1091_s20 = smov %s948_s27 }
  0xe7   : > { %s1092_s21 = smov %s937_s24  ;;  %17 = sbr.rel (!%p15_p9) target bundleno = 3 (0x3), region = 78 }
  0xec   :  { %598 = vsyncpa [#allocation3], 1 }
  0xed   :  { %600 = vsyncpa [#allocation3 + $0x1], 1 }

// kernel: attention_factorize_dot_prod.5
= control target key start
LH: loop header
LB: loop body
LE: loop exit
PB: predicated region body
PF: predicated region fallthrough
CT: control target
= control target key end

     0   :  { %s3652_s12 = smov 0   ;;  %s4981_s0 = inlined_call_operand.vmem [shape: bf16[16,16,16], index: 0, kind: input, shape index: {}]   ;;  %s4982_s1 = inlined_call_operand.vmem [shape: bf16[16,16,16], index: 1, kind: input, shape index: {}]   ;;  %s4983_s2 = inlined_call_operand.vmem [shape: bf16[16,16,16], index: 2, kind: input, shape index: {}]   ;;  %s4984_s3 = inlined_call_operand.vmem [shape: bf16[16,16,16], index: 3, kind: output, shape index: {}]  }
   0x1 LB: > { %s3126_s13 = sadd.s32 4294967295, %s3624_s12   ;;  %p3130_p0 = scmp.ge.s32.totalorder %s3624_s12, 1  ;;  %s3624_s12 = sphi %s3652_s12, %s13_s12  }
   0x2   : > { %p163_p1 = scmp.lt.s32.totalorder %s3624_s12, 3 }
   0x4   : > { %p164_p2 = pnand %p3130_p0, %p163_p1 }
   0x6   : > { %167 = sbr.rel (%p164_p2) target bundleno = 2437 (0x985), region = 32 }
   0xb   : > { %s3131_s14 = sshll.u32 %s3126_s13, 3  ;;  %vm336_vm0 = vcmask 31744   ;;  %s3626_s22 = smov 124   ;;  %vm567_vm1 = vcmask 130048   ;;  %vm1648_vm2 = vcmask 64544   ;;  %vm2313_vm3 = vcmask 97344  }
   0xc   : > { %p202_p3 = scmp.lt.s32.totalorder %s3131_s14, 15  ;;  %s3627_s26 = smov 120   ;;  %vm2978_vm4 = vcmask 130144   ;;  %vm3027_vm5 = vcmask 125952  }
   0xd   : > { %s3628_s27 = smov 116   ;;  %s3629_s28 = smov 4  }
   0xe   : > { %s4989_s14 = smov (!%p202_p3, %s3131_s14), 15  ;;  %s3630_s29 = smov 8  }
   0xf   : > { %s3660_s15 = sshll.u32 %s4989_s14, 3  ;;  %s3631_s30 = smov 12  }
  0x10   : > { %s3666_s18 = scalar_lea.vmem %s4982_s1, %s3660_s15  ;;  %s3679_s21 = scalar_lea.vmem %s4981_s0, %s3660_s15 }
  0x11   : > { %v3669_v0 = vld [vmem:[%s3666_s18] sm:$0xff]  ;;  %v3672_v1 = vld [vmem:[%s3666_s18 + $0x8] sm:$0xff]  ;;  %v3279_v2 = vld [vmem:[%s3666_s18 + $0x10] sm:$0xff]  ;;  %s3877_s25 = scalar_lea.vmem %s4983_s2, %s3660_s15  ;;  %s4914_s6 = scalar_lea.vmem %s4984_s3, %s3660_s15 }
  0x12   : > { %v3280_v3 = vld [vmem:[%s3666_s18 + $0x18] sm:$0xff]  ;;  %v3294_v4 = vld [vmem:[%s3679_s21] sm:$0xff]   ;;  %v3325_v5 = vld [vmem:[%s3679_s21 + $0x8] sm:$0xff]   ;;  %v341_v6 = vsel %vm336_vm0, %v3669_v0, 0  ;;  %v371_v7 = vsel %vm336_vm0, %v3672_v1, 0  ;;  %v401_v8 = vsel %vm336_vm0, %v3279_v2, 0  ;;  %1050 = vrot.lane.b32.xlu2 %v3279_v2, %s3626_s22 }
  0x13   : > { %v3295_v9 = vunpack.c.l.bf16 %v3294_v4  ;;  %v3326_v10 = vld [vmem:[%s3679_s21 + $0x10] sm:$0xff]   ;;  %v3327_v11 = vld [vmem:[%s3679_s21 + $0x18] sm:$0xff]   ;;  %350 = vmatpush.bf16.xpose.msra.mxu0 %v341_v6  ;;  %380 = vmatpush.bf16.xpose.msra.mxu1 %v371_v7  ;;  %v431_v12 = vsel %vm336_vm0, %v3280_v3, 0  ;;  %v3296_v13 = vunpack.c.h.bf16 %v3294_v4  ;;  %v3299_v14 = vunpack.c.l.bf16 %v3325_v5  ;;  %v3695_v28 = vld [vmem:[%s3666_s18 + $0x20] sm:$0xff] }
  0x14   : > { %v3300_v15 = vunpack.c.h.bf16 %v3325_v5  ;;  %410 = vmatpush.bf16.xpose.msra.mxu2 %v401_v8  ;;  %440 = vmatpush.bf16.xpose.msra.mxu3 %v431_v12  ;;  %v3303_v17 = vunpack.c.l.bf16 %v3326_v10  ;;  %v3304_v18 = vunpack.c.h.bf16 %v3326_v10  ;;  %v3307_v19 = vunpack.c.l.bf16 %v3327_v11  ;;  %v3698_v33 = vld [vmem:[%s3666_s18 + $0x28] sm:$0xff]  ;;  %v3283_v38 = vld [vmem:[%s3666_s18 + $0x30] sm:$0xff]  ;;  %v3702_v39 = vld [vmem:[%s3666_s18 + $0x38] sm:$0xff] }
  0x15   : > { %v262_v16 = vmul.f32 0.5, %v3295_v9  ;;  %v263_v20 = vmul.f32 0.5, %v3296_v13  ;;  %v264_v21 = vmul.f32 0.5, %v3299_v14  ;;  %v3308_v23 = vunpack.c.h.bf16 %v3327_v11  ;;  %1074 = vrot.lane.b32.xlu0 %v3280_v3, %s3626_s22  ;;  %v3328_v44 = vld [vmem:[%s3679_s21 + $0x20] sm:$0xff]   ;;  %v3329_v49 = vld [vmem:[%s3679_s21 + $0x28] sm:$0xff]   ;;  %v3330_v54 = vld [vmem:[%s3679_s21 + $0x30] sm:$0xff]  }
  0x16   : > { %v265_v22 = vmul.f32 0.5, %v3300_v15  ;;  %v266_v25 = vmul.f32 0.5, %v3303_v17  ;;  %v267_v26 = vmul.f32 0.5, %v3304_v18  ;;  %v268_v27 = vmul.f32 0.5, %v3307_v19  ;;  %v3331_v55 = vld [vmem:[%s3679_s21 + $0x38] sm:$0xff]  }
  0x17   : > { %v278_v24 = vpack.c.bf16 %v262_v16, %v262_v16  ;;  %v279_v29 = vpack.c.bf16 %v263_v20, %v263_v20  ;;  %v280_v30 = vpack.c.bf16 %v264_v21, %v264_v21  ;;  %v269_v32 = vmul.f32 0.5, %v3308_v23 }
  0x18   : > { %v281_v31 = vpack.c.bf16 %v265_v22, %v265_v22  ;;  %v282_v35 = vpack.c.bf16 %v266_v25, %v266_v25  ;;  %v283_v36 = vpack.c.bf16 %v267_v26, %v267_v26  ;;  %v284_v37 = vpack.c.bf16 %v268_v27, %v268_v27 }
  0x19   : > { %v328_v34 = vunpack.c.l.b16 %v278_v24  ;;  %v329_v40 = vunpack.c.l.b16 %v279_v29  ;;  %v359_v41 = vunpack.c.l.b16 %v280_v30  ;;  %v285_v43 = vpack.c.bf16 %v269_v32, %v269_v32 }
  0x1a   : > { %v360_v42 = vunpack.c.l.b16 %v281_v31  ;;  %v389_v45 = vunpack.c.l.b16 %v282_v35  ;;  %v390_v46 = vunpack.c.l.b16 %v283_v36  ;;  %v419_v47 = vunpack.c.l.b16 %v284_v37 }
  0x1b   : > { %v461_v48 = vsel %vm336_vm0, %v3695_v28, 0  ;;  %v3708_v50 = vpack.c.b16 %v329_v40, %v328_v34  ;;  %v420_v52 = vunpack.c.l.b16 %v285_v43  ;;  %v491_v53 = vsel %vm336_vm0, %v3698_v33, 0 }
  0x1c   : > { %v3710_v51 = vpack.c.b16 %v360_v42, %v359_v41  ;;  %470 = vmatpush.bf16.xpose.msrb.mxu0 %v461_v48  ;;  %v3716_v56 = vpack.c.b16 %v390_v46, %v389_v45  ;;  %500 = vmatpush.bf16.xpose.msrb.mxu1 %v491_v53  ;;  %v521_v57 = vsel %vm336_vm0, %v3283_v38, 0  ;;  %v551_v58 = vsel %vm336_vm0, %v3702_v39, 0 }
  0x1d   : > { %v3311_v59 = vunpack.c.l.bf16 %v3328_v44  ;;  %3147 = vmatmul.msk.bf16.vlgmr.msra.gmra.mxu0 %vm336_vm0, %v3708_v50  ;;  %v3725_v60 = vpack.c.b16 %v420_v52, %v419_v47  ;;  %v3312_v61 = vunpack.c.h.bf16 %v3328_v44  ;;  %v3315_v62 = vunpack.c.l.bf16 %v3329_v49  ;;  %560 = vmatpush.bf16.xpose.msrb.mxu3 %v551_v58 }
  0x1e   : > { %3152 = vmatmul.msk.bf16.vlgmr.msra.gmra.mxu1 %vm336_vm0, %v3710_v51  ;;  %v3316_v63 = vunpack.c.h.bf16 %v3329_v49  ;;  %3157 = vmatmul.msk.bf16.vlgmr.msra.gmra.mxu2 %vm336_vm0, %v3716_v56  ;;  %v3319_v3 = vunpack.c.l.bf16 %v3330_v54  ;;  %v3320_v4 = vunpack.c.h.bf16 %v3330_v54  ;;  %v3323_v5 = vunpack.c.l.bf16 %v3331_v55 }
  0x1f   : > { %v270_v2 = vmul.f32 0.5, %v3311_v59  ;;  %3162 = vmatmul.msk.bf16.vlgmr.msra.gmra.mxu3 %vm336_vm0, %v3725_v60  ;;  %530 = vmatpush.bf16.xpose.msrb.mxu2 %v521_v57  ;;  %v271_v6 = vmul.f32 0.5, %v3312_v61  ;;  %v272_v7 = vmul.f32 0.5, %v3315_v62  ;;  %v3324_v9 = vunpack.c.h.bf16 %v3331_v55 }
  0x20   : > { %v273_v8 = vmul.f32 0.5, %v3316_v63  ;;  %v274_v11 = vmul.f32 0.5, %v3319_v3  ;;  %v275_v12 = vmul.f32 0.5, %v3320_v4  ;;  %v276_v13 = vmul.f32 0.5, %v3323_v5  ;;  %1072 = vrot.lane.b32.xlu2 %v3725_v60, %s3626_s22  ;;  %1048 = vrot.lane.b32.xlu1 %v3716_v56, %s3626_s22 }
  0x21   : > { %v286_v10 = vpack.c.bf16 %v270_v2, %v270_v2  ;;  %v287_v14 = vpack.c.bf16 %v271_v6, %v271_v6  ;;  %v288_v15 = vpack.c.bf16 %v272_v7, %v272_v7  ;;  %v277_v17 = vmul.f32 0.5, %v3324_v9  ;;  %1146 = vrot.lane.b32.xlu0 %v3283_v38, %s3626_s22 }
  0x22   : > { %v289_v16 = vpack.c.bf16 %v273_v8, %v273_v8  ;;  %v290_v18 = vpack.c.bf16 %v274_v11, %v274_v11  ;;  %v291_v19 = vpack.c.bf16 %v275_v12, %v275_v12  ;;  %v292_v20 = vpack.c.bf16 %v276_v13, %v276_v13 }
  0x23   : > { %v293_v21 = vpack.c.bf16 %v277_v17, %v277_v17  ;;  %v449_v22 = vunpack.c.l.b16 %v286_v10  ;;  %v450_v23 = vunpack.c.l.b16 %v287_v14  ;;  %v479_v24 = vunpack.c.l.b16 %v288_v15 }
  0x24   : > { %v480_v25 = vunpack.c.l.b16 %v289_v16  ;;  %v509_v26 = vunpack.c.l.b16 %v290_v18  ;;  %v510_v27 = vunpack.c.l.b16 %v291_v19  ;;  %v539_v29 = vunpack.c.l.b16 %v292_v20 }
  0x25   : > { %v540_v30 = vunpack.c.l.b16 %v293_v21  ;;  %v3740_v31 = vpack.c.b16 %v450_v23, %v449_v22 }
  0x26   : > { %v3742_v32 = vpack.c.b16 %v480_v25, %v479_v24  ;;  %v3746_v34 = vpack.c.b16 %v510_v27, %v509_v26 }
  0x27   : > { %v3748_v35 = vpack.c.b16 %v540_v30, %v539_v29 }
  0x28   : > { %1170 = vrot.lane.b32.xlu2 %v3702_v39, %s3626_s22  ;;  %1002 = vrot.lane.b32.xlu1 %v3669_v0, %s3626_s22 }
  0x29   : > { %1026 = vrot.lane.b32.xlu0 %v3672_v1, %s3626_s22 }
  0x2d   : > { %3167 = vmatmul.msk.bf16.vlgmr.msrb.gmra.mxu0 %vm336_vm0, %v3740_v31 }
  0x2e   : > { %3172 = vmatmul.msk.bf16.vlgmr.msrb.gmra.mxu1 %vm336_vm0, %v3742_v32  ;;  %3177 = vmatmul.msk.bf16.vlgmr.msrb.gmra.mxu2 %vm336_vm0, %v3746_v34 }
  0x2f   : > { %3182 = vmatmul.msk.bf16.vlgmr.msrb.gmra.mxu3 %vm336_vm0, %v3748_v35 }
  0x30   : > { %1144 = vrot.lane.b32.xlu2 %v3746_v34, %s3626_s22 }
  0x6c   : > { %v3818_v8 = vpop.permute.xlu2 %1050 }
  0x7a   : > { %v3820_v9 = vpop.permute.xlu2 %1072 }
  0x82   : > { %v3824_v11 = vpop.permute.xlu2 %1170 }
  0x87   : > { %v3822_v10 = vpop.permute.xlu0 %1074 }
  0x8a   : > { %v3830_v14 = vpop.permute.xlu2 %1144 }
  0x92   : > { %v3826_v12 = vpop.permute.xlu1 %1048 }
  0x93   : > { %v3828_v13 = vpop.permute.xlu0 %1146 }
  0x9a   : > { %v352_v0 = vpop.f32.mrf.mxu0  ;;  %v3832_v15 = vpop.permute.xlu1 %1002 }
  0x9b   : > { %v382_v1 = vpop.f32.mrf.mxu1  ;;  %v568_v37 = vsel %vm567_vm1, %v352_v0, -inf  ;;  %v3834_v16 = vpop.permute.xlu0 %1026 }
  0x9c   : > { %v574_v36 = vsel %vm567_vm1, %v382_v1, -inf  ;;  %569 = vmax.xlane.f32.xlu2 %v568_v37 }
  0x9d   : > { %575 = vmax.xlane.f32.xlu1 %v574_v36 }
  0xa1   : > { %v3762_v38 = vpop.f32.mrf.mxu2 }
  0xa2   : > { %v3764_v39 = vpop.f32.mrf.mxu3  ;;  %v580_v40 = vsel %vm567_vm1, %v3762_v38, -inf  ;;  %v3768_v41 = vpop.f32.mrf.mxu0 }
  0xa3   : > { %581 = vmax.xlane.f32.xlu0 %v580_v40  ;;  %v3770_v42 = vpop.f32.mrf.mxu1  ;;  %v586_v43 = vsel %vm567_vm1, %v3764_v39, -inf  ;;  %v571_v47 = vsel %vm567_vm1, %v3768_v41, -inf }
  0xa4   : > { %v577_v44 = vsel %vm567_vm1, %v3770_v42, -inf }
  0xa5   : > { %587 = vmax.xlane.f32.xlu1 %v586_v43  ;;  %578 = vmax.xlane.f32.xlu2 %v577_v44 }
  0xa9   : > { %v3776_v45 = vpop.f32.mrf.mxu2 }
  0xaa   : > { %v3778_v46 = vpop.f32.mrf.mxu3  ;;  %v3782_v48 = vpop.f32.mrf.mxu0  ;;  %v583_v57 = vsel %vm567_vm1, %v3776_v45, -inf }
  0xab   : > { %v3784_v49 = vpop.f32.mrf.mxu1  ;;  %572 = vmax.xlane.f32.xlu0 %v571_v47  ;;  %v589_v52 = vsel %vm567_vm1, %v3778_v46, -inf  ;;  %v592_v62 = vsel %vm567_vm1, %v3782_v48, -inf }
  0xac   : > { %v598_v53 = vsel %vm567_vm1, %v3784_v49, -inf }
  0xad   : > { %590 = vmax.xlane.f32.xlu1 %v589_v52  ;;  %599 = vmax.xlane.f32.xlu2 %v598_v53 }
  0xb1   : > { %v3790_v54 = vpop.f32.mrf.mxu2 }
  0xb2   : > { %v3792_v55 = vpop.f32.mrf.mxu3  ;;  %v3796_v58 = vpop.f32.mrf.mxu0  ;;  %v604_v59 = vsel %vm567_vm1, %v3790_v54, -inf }
  0xb3   : > { %584 = vmax.xlane.f32.xlu0 %v583_v57  ;;  %v595_v61 = vsel %vm567_vm1, %v3796_v58, -inf  ;;  %v610_v5 = vsel %vm567_vm1, %v3792_v55, -inf  ;;  %v3814_v6 = vpop.f32.mrf.mxu1 }
  0xb4   : > { %v601_v7 = vsel %vm567_vm1, %v3814_v6, -inf }
  0xb5   : > { %596 = vmax.xlane.f32.xlu1 %v595_v61  ;;  %605 = vmax.xlane.f32.xlu2 %v604_v59 }
  0xb9   : > { %v3804_v63 = vpop.f32.mrf.mxu2 }
  0xba   : > { %v3806_v2 = vpop.f32.mrf.mxu3  ;;  %v607_v4 = vsel %vm567_vm1, %v3804_v63, -inf }
  0xbb   : > { %593 = vmax.xlane.f32.xlu0 %v592_v62  ;;  %v613_v3 = vsel %vm567_vm1, %v3806_v2, -inf }
  0xbd   : > { %614 = vmax.xlane.f32.xlu1 %v613_v3  ;;  %608 = vmax.xlane.f32.xlu2 %v607_v4 }
  0xc3   : > { %611 = vmax.xlane.f32.xlu0 %v610_v5 }
  0xcb   : > { %602 = vmax.xlane.f32.xlu0 %v601_v7 }
 0x10f   : > { %v570_v18 = vpop.xlane.xlu2 %569 }
 0x110   : > { %v576_v17 = vpop.xlane.xlu1 %575  ;;  %v616_v20 = vsub.f32 %v352_v0, %v570_v18 }
 0x111   : > { %v618_v19 = vsub.f32 %v382_v1, %v576_v17 }
 0x112   : > { %v632_v22 = vmul.f32 1.442695, %v616_v20 }
 0x113   : > { %v636_v21 = vmul.f32 1.442695, %v618_v19 }
 0x115   : > { %3346 = vpow2.f32 %v636_v21 }
 0x116   : > { %3348 = vpow2.f32 %v632_v22  ;;  %v582_v23 = vpop.xlane.xlu0 %581 }
 0x117   : > { %v620_v24 = vsub.f32 %v3762_v38, %v582_v23 }
 0x118   : > { %v588_v25 = vpop.xlane.xlu1 %587  ;;  %v579_v27 = vpop.xlane.xlu2 %578 }
 0x119   : > { %v622_v26 = vsub.f32 %v3764_v39, %v588_v25  ;;  %v640_v29 = vmul.f32 1.442695, %v620_v24  ;;  %v619_v37 = vsub.f32 %v3770_v42, %v579_v27 }
 0x11b   : > { %v3838_v30 = vpop.eup %3346  ;;  %v644_v36 = vmul.f32 1.442695, %v622_v26  ;;  %3350 = vpow2.f32 %v640_v29  ;;  %v638_v38 = vmul.f32 1.442695, %v619_v37 }
 0x11c   : > { %v3841_v40 = vpop.eup %3348  ;;  %v670_v0 = vsel %vm567_vm1, %v3838_v30, 0.0 }
 0x11d   : > { %3352 = vpow2.f32 %v644_v36  ;;  %671 = vadd.xlane.f32.xlu2 %v670_v0  ;;  %v664_v1 = vsel %vm567_vm1, %v3841_v40, 0.0 }
 0x11e   : > { %665 = vadd.xlane.f32.xlu0 %v664_v1  ;;  %v573_v39 = vpop.xlane.xlu0 %572  ;;  %3354 = vpow2.f32 %v638_v38 }
 0x11f   : > { %v617_v43 = vsub.f32 %v3768_v41, %v573_v39 }
 0x120   : > { %v591_v44 = vpop.xlane.xlu1 %590  ;;  %v600_v47 = vpop.xlane.xlu2 %599 }
 0x121   : > { %v3848_v52 = vpop.eup %3350  ;;  %v634_v42 = vmul.f32 1.442695, %v617_v43  ;;  %v623_v53 = vsub.f32 %v3778_v46, %v591_v44  ;;  %v626_v59 = vsub.f32 %v3784_v49, %v600_v47 }
 0x122   : > { %v676_v61 = vsel %vm567_vm1, %v3848_v52, 0.0 }
 0x123   : > { %v3851_v57 = vpop.eup %3352  ;;  %3356 = vpow2.f32 %v634_v42  ;;  %677 = vadd.xlane.f32.xlu1 %v676_v61  ;;  %v646_v62 = vmul.f32 1.442695, %v623_v53  ;;  %v652_v3 = vmul.f32 1.442695, %v626_v59 }
 0x124   : > { %v682_v41 = vsel %vm567_vm1, %v3851_v57, 0.0  ;;  %v3859_v46 = vpop.eup %3354 }
 0x125   : > { %3358 = vpow2.f32 %v646_v62  ;;  %v673_v20 = vsel %vm567_vm1, %v3859_v46, 0.0 }
 0x126   : > { %683 = vadd.xlane.f32.xlu0 %v682_v41  ;;  %v585_v4 = vpop.xlane.xlu0 %584  ;;  %3360 = vpow2.f32 %v652_v3 }
 0x127   : > { %v621_v5 = vsub.f32 %v3776_v45, %v585_v4 }
 0x128   : > { %v606_v7 = vpop.xlane.xlu2 %605 }
 0x129   : > { %v3861_v17 = vpop.eup %3356  ;;  %v642_v49 = vmul.f32 1.442695, %v621_v5  ;;  %v628_v18 = vsub.f32 %v3790_v54, %v606_v7 }
 0x12a   : > { %v667_v19 = vsel %vm567_vm1, %v3861_v17, 0.0 }
 0x12b   : > { %3362 = vpow2.f32 %v642_v49  ;;  %668 = vadd.xlane.f32.xlu1 %v667_v19  ;;  %v656_v45 = vmul.f32 1.442695, %v628_v18  ;;  %v3868_v22 = vpop.eup %3358  ;;  %v3930_v49 = vld [vmem:[%s3877_s25] sm:$0xff]  ;;  %v3934_v18 = vld [vmem:[%s3877_s25 + $0x8] sm:$0xff] }
 0x12c   : > { %v3871_v24 = vpop.eup %3360  ;;  %v685_v27 = vsel %vm567_vm1, %v3868_v22, 0.0  ;;  %781 = vmatpush.bf16.msra.mxu0 %v3930_v49  ;;  %v3937_v19 = vld [vmem:[%s3877_s25 + $0x20] sm:$0xff]  ;;  %809 = vmatpush.bf16.msra.mxu1 %v3934_v18 }
 0x12d   : > { %3364 = vpow2.f32 %v656_v45  ;;  %v694_v29 = vsel %vm567_vm1, %v3871_v24, 0.0  ;;  %v3942_v45 = vld [vmem:[%s3877_s25 + $0x28] sm:$0xff] }
 0x12e   : > { %674 = vadd.xlane.f32.xlu0 %v673_v20  ;;  %v594_v21 = vpop.xlane.xlu0 %593 }
 0x12f   : > { %v624_v23 = vsub.f32 %v3782_v48, %v594_v21  ;;  %v3886_v48 = vld [vmem:[%s3877_s25 + $0x18] sm:$0xff] }
 0x130   : > { %865 = vmatpush.bf16.msra.mxu3 %v3886_v48  ;;  %v609_v59 = vpop.xlane.xlu2 %608  ;;  %893 = vmatpush.bf16.msrb.mxu0 %v3937_v19 }
 0x131   : > { %v3879_v54 = vpop.eup %3362  ;;  %v648_v25 = vmul.f32 1.442695, %v624_v23  ;;  %v629_v61 = vsub.f32 %v3804_v63, %v609_v59  ;;  %921 = vmatpush.bf16.msrb.mxu1 %v3942_v45  ;;  %v3946_v23 = vld [vmem:[%s3877_s25 + $0x10] sm:$0xff] }
 0x132   : > { %v679_v26 = vsel %vm567_vm1, %v3879_v54, 0.0  ;;  %837 = vmatpush.bf16.msra.mxu2 %v3946_v23 }
 0x133   : > { %3366 = vpow2.f32 %v648_v25  ;;  %680 = vadd.xlane.f32.xlu2 %v679_v26  ;;  %686 = vadd.xlane.f32.xlu1 %v685_v27  ;;  %v3891_v37 = vpop.eup %3364  ;;  %v658_v62 = vmul.f32 1.442695, %v629_v61  ;;  %v3952_v25 = vld [vmem:[%s3877_s25 + $0x30] sm:$0xff]  ;;  %v3955_v26 = vld [vmem:[%s3877_s25 + $0x38] sm:$0xff] }
 0x134   : > { %v700_v39 = vsel %vm567_vm1, %v3891_v37, 0.0  ;;  %977 = vmatpush.bf16.msrb.mxu3 %v3955_v26 }
 0x136   : > { %695 = vadd.xlane.f32.xlu0 %v694_v29  ;;  %v612_v36 = vpop.xlane.xlu0 %611  ;;  %949 = vmatpush.bf16.msrb.mxu2 %v3952_v25 }
 0x137   : > { %v630_v0 = vsub.f32 %v3792_v55, %v612_v36  ;;  %v597_v55 = vpop.xlane.xlu1 %596 }
 0x138   : > { %v625_v42 = vsub.f32 %v3796_v58, %v597_v55 }
 0x139   : > { %v3894_v1 = vpop.eup %3366  ;;  %v660_v38 = vmul.f32 1.442695, %v630_v0 }
 0x13a   : > { %v688_v43 = vsel %vm567_vm1, %v3894_v1, 0.0  ;;  %v650_v53 = vmul.f32 1.442695, %v625_v42 }
 0x13b   : > { %3368 = vpow2.f32 %v660_v38  ;;  %701 = vadd.xlane.f32.xlu2 %v700_v39  ;;  %689 = vadd.xlane.f32.xlu1 %v688_v43 }
 0x13c   : > { %3370 = vpow2.f32 %v650_v53 }
 0x13d   : > { %3372 = vpow2.f32 %v658_v62 }
 0x13e   : > { %v603_v41 = vpop.xlane.xlu0 %602 }
 0x13f   : > { %v615_v20 = vpop.xlane.xlu1 %614 }
 0x141   : > { %v3900_v44 = vpop.eup %3368 }
 0x142   : > { %v706_v47 = vsel %vm567_vm1, %v3900_v44, 0.0  ;;  %v3917_v3 = vpop.eup %3370 }
 0x143   : > { %707 = vadd.xlane.f32.xlu1 %v706_v47  ;;  %v691_v5 = vsel %vm567_vm1, %v3917_v3, 0.0  ;;  %v3921_v58 = vpop.eup %3372 }
 0x14a   : > { %1000 = vrot.lane.b32.xlu0 %v3708_v50, %s3626_s22 }
 0x152   : > { %1122 = vrot.lane.b32.xlu0 %v3698_v33, %s3626_s22  ;;  %v627_v33 = vsub.f32 %v3814_v6, %v603_v41  ;;  %v703_v6 = vsel %vm567_vm1, %v3921_v58, 0.0 }
 0x153   : > { %1024 = vrot.lane.b32.xlu2 %v3710_v51, %s3626_s22 }
 0x154   : > { %v654_v4 = vmul.f32 1.442695, %v627_v33 }
 0x156   : > { %3374 = vpow2.f32 %v654_v4 }
 0x15a   : > { %1464 = vrot.lane.b32.xlu0 %v3886_v48, %s3626_s22 }
 0x15c   : > { %1168 = vrot.lane.b32.xlu1 %v3748_v35, %s3626_s22  ;;  %v3923_v63 = vpop.eup %3374 }
 0x15d   : > { %v697_v7 = vsel %vm567_vm1, %v3923_v63, 0.0 }
 0x17c   : > { %692 = vadd.xlane.f32.xlu2 %v691_v5 }
 0x184   : > { %704 = vadd.xlane.f32.xlu0 %v703_v6 }
 0x186   : > { %698 = vadd.xlane.f32.xlu1 %v697_v7 }
 0x190   : > { %v672_v29 = vpop.xlane.xlu2 %671 }
 0x191   : > { %v666_v21 = vpop.xlane.xlu0 %665 }
 0x192   : > { %3376 = vrcp.f32 %v666_v21 }
 0x193   : > { %3378 = vrcp.f32 %v672_v29 }
 0x194   : > { %1096 = vrot.lane.b32.xlu2 %v3740_v31, %s3626_s22 }
 0x196   : > { %v678_v27 = vpop.xlane.xlu1 %677 }
 0x198   : > { %1564 = vrot.lane.b32.xlu0 %v3955_v26, %s3626_s22  ;;  %v3377_v38 = vpop.eup %3376 }
 0x199   : > { %v684_v36 = vpop.xlane.xlu0 %683  ;;  %v3379_v43 = vpop.eup %3378  ;;  %v728_v47 = vmul.f32 %v3377_v38, %v3841_v40 }
 0x19a   : > { %v730_v55 = vmul.f32 %v3379_v43, %v3838_v30  ;;  %v1008_v43 = vsel %vm336_vm0, %v3832_v15, 0 }
 0x19b   : > { %v744_v59 = vpack.c.bf16 %v728_v47, %v728_v47 }
 0x19c   : > { %v746_v4 = vpack.c.bf16 %v730_v55, %v730_v55 }
 0x19d   : > { %v762_v6 = vunpack.c.l.b16 %v744_v59 }
 0x19e   : > { %v669_v0 = vpop.xlane.xlu1 %668  ;;  %v790_v29 = vunpack.c.l.b16 %v746_v4 }
 0x19f   : > { %3380 = vrcp.f32 %v669_v0  ;;  %1098 = vrot.lane.b32.xlu1 %v3695_v28, %s3626_s22 }
 0x1a0   : > { %3382 = vrcp.f32 %v678_v27 }
 0x1a1   : > { %v675_v39 = vpop.xlane.xlu0 %674 }
 0x1a2   : > { %3384 = vrcp.f32 %v675_v39 }
 0x1a3   : > { %3386 = vrcp.f32 %v684_v36 }
 0x1a5   : > { %v3381_v42 = vpop.eup %3380 }
 0x1a6   : > { %v3383_v53 = vpop.eup %3382  ;;  %v729_v61 = vmul.f32 %v3381_v42, %v3861_v17  ;;  %v681_v41 = vpop.xlane.xlu2 %680  ;;  %v631_v17 = vsub.f32 %v3806_v2, %v615_v20 }
 0x1a7   : > { %v687_v33 = vpop.xlane.xlu1 %686  ;;  %3388 = vrcp.f32 %v681_v41  ;;  %1120 = vrot.lane.b32.xlu1 %v3742_v32, %s3626_s22  ;;  %v732_v30 = vmul.f32 %v3383_v53, %v3848_v52 }
 0x1a8   : > { %v3385_v62 = vpop.eup %3384  ;;  %v745_v5 = vpack.c.bf16 %v729_v61, %v729_v61  ;;  %3390 = vrcp.f32 %v687_v33  ;;  %v662_v52 = vmul.f32 1.442695, %v631_v17 }
 0x1a9   : > { %v3387_v28 = vpop.eup %3386  ;;  %v731_v40 = vmul.f32 %v3385_v62, %v3859_v46  ;;  %v748_v47 = vpack.c.bf16 %v732_v30, %v732_v30  ;;  %v696_v4 = vpop.xlane.xlu0 %695 }
 0x1aa   : > { %v763_v7 = vunpack.c.l.b16 %v745_v5  ;;  %v734_v27 = vmul.f32 %v3387_v28, %v3851_v57  ;;  %v1032_v57 = vsel %vm336_vm0, %v3834_v16, 0  ;;  %3392 = vpow2.f32 %v662_v52 }
 0x1ab   : > { %v747_v21 = vpack.c.bf16 %v731_v40, %v731_v40  ;;  %v818_v53 = vunpack.c.l.b16 %v748_v47  ;;  %v1080_v16 = vsel %vm336_vm0, %v3822_v10, 0 }
 0x1ac   : > { %v764_v36 = vpack.c.b16 %v763_v7, %v762_v6  ;;  %v750_v42 = vpack.c.bf16 %v734_v27, %v734_v27 }
 0x1ad   : > { %v791_v0 = vunpack.c.l.b16 %v747_v21  ;;  %v3389_v38 = vpop.eup %3388 }
 0x1ae   : > { %v3391_v39 = vpop.eup %3390  ;;  %v733_v55 = vmul.f32 %v3389_v38, %v3879_v54  ;;  %3187 = vmatmul.msk.bf16.vlgmr.msra.gmra.mxu0 %vm567_vm1, %v764_v36  ;;  %v846_v59 = vunpack.c.l.b16 %v750_v42  ;;  %v702_v5 = vpop.xlane.xlu2 %701 }
 0x1af   : > { %v792_v46 = vpack.c.b16 %v791_v0, %v790_v29  ;;  %v735_v2 = vmul.f32 %v3391_v39, %v3868_v22  ;;  %1017 = vmatpush.bf16.xpose.msra.mxu0 %v1008_v43  ;;  %1439 = vrot.lane.b32.xlu1 %v3946_v23, %s3626_s22  ;;  %v1056_v22 = vsel %vm336_vm0, %v3818_v8, 0  ;;  %v690_v40 = vpop.xlane.xlu1 %689 }
 0x1b0   : > { %v749_v20 = vpack.c.bf16 %v733_v55, %v733_v55  ;;  %v3988_v62 = vpop.eup %3392  ;;  %3394 = vrcp.f32 %v690_v40 }
 0x1b1   : > { %3192 = vmatmul.msk.bf16.vlgmr.msra.gmra.mxu1 %vm567_vm1, %v792_v46  ;;  %v751_v15 = vpack.c.bf16 %v735_v2, %v735_v2  ;;  %v709_v28 = vsel %vm567_vm1, %v3988_v62, 0.0 }
 0x1b2   : > { %1041 = vmatpush.bf16.xpose.msra.mxu1 %v1032_v57  ;;  %v819_v54 = vunpack.c.l.b16 %v749_v20 }
 0x1b3   : > { %v847_v61 = vunpack.c.l.b16 %v751_v15 }
 0x1b4   : > { %v820_v41 = vpack.c.b16 %v819_v54, %v818_v53 }
 0x1b5   : > { %v848_v33 = vpack.c.b16 %v847_v61, %v846_v59 }
 0x1b6   : > { %3197 = vmatmul.msk.bf16.vlgmr.msra.gmra.mxu2 %vm567_vm1, %v820_v41  ;;  %v1025_v30 = vpop.permute.xlu2 %1024  ;;  %v3395_v27 = vpop.eup %3394 }
 0x1b7   : > { %3202 = vmatmul.msk.bf16.vlgmr.msra.gmra.mxu3 %vm567_vm1, %v848_v33  ;;  %1065 = vmatpush.bf16.xpose.msra.mxu2 %v1056_v22  ;;  %v708_v10 = vpop.xlane.xlu1 %707  ;;  %v736_v29 = vmul.f32 %v3395_v27, %v3894_v1 }
 0x1b8   : > { %1089 = vmatpush.bf16.xpose.msra.mxu3 %v1080_v16 }
 0x1b9   : > { %v752_v39 = vpack.c.bf16 %v736_v29, %v736_v29 }
 0x1bb   : > { %v874_v42 = vunpack.c.l.b16 %v752_v39 }
 0x1bc   : > { %v1001_v8 = vpop.permute.xlu0 %1000 }
 0x1bd   : > { %710 = vadd.xlane.f32.xlu2 %v709_v28 }
 0x1c4   : > { %v1123_v6 = vpop.permute.xlu0 %1122 }
 0x1cc   : > { %v3994_v7 = vpop.permute.xlu0 %1464 }
 0x1ce   : > { %v3996_v17 = vpop.permute.xlu1 %1168 }
 0x1d5   : > { %1539 = vrot.lane.b32.xlu2 %v3952_v25, %s3626_s22 }
 0x1ef   : > { %v693_v21 = vpop.xlane.xlu2 %692 }
 0x1f0   : > { %3396 = vrcp.f32 %v693_v21 }
 0x1f1   : > { %3398 = vrcp.f32 %v702_v5 }
 0x1f2   : > { %3400 = vrcp.f32 %v696_v4 }
 0x1f6   : > { %v3397_v36 = vpop.eup %3396 }
 0x1f7   : > { %v705_v0 = vpop.xlane.xlu0 %704  ;;  %v3399_v38 = vpop.eup %3398  ;;  %v737_v43 = vmul.f32 %v3397_v36, %v3917_v3 }
 0x1f8   : > { %3402 = vrcp.f32 %v705_v0  ;;  %v3401_v55 = vpop.eup %3400  ;;  %v740_v52 = vmul.f32 %v3399_v38, %v3891_v37 }
 0x1f9   : > { %v753_v47 = vpack.c.bf16 %v737_v43, %v737_v43  ;;  %v699_v46 = vpop.xlane.xlu1 %698  ;;  %v738_v20 = vmul.f32 %v3401_v55, %v3871_v24  ;;  %v1152_v24 = vsel %vm336_vm0, %v3828_v13, 0  ;;  %v1097_v13 = vpop.permute.xlu2 %1096 }
 0x1fa   : > { %3404 = vrcp.f32 %v699_v46  ;;  %v756_v15 = vpack.c.bf16 %v740_v52, %v740_v52 }
 0x1fb   : > { %v875_v2 = vunpack.c.l.b16 %v753_v47  ;;  %v754_v59 = vpack.c.bf16 %v738_v20, %v738_v20  ;;  %3406 = vrcp.f32 %v708_v10 }
 0x1fc   : > { %v930_v41 = vunpack.c.l.b16 %v756_v15 }
 0x1fd   : > { %v876_v1 = vpack.c.b16 %v875_v2, %v874_v42  ;;  %v902_v16 = vunpack.c.l.b16 %v754_v59 }
 0x1fe   : > { %v3403_v57 = vpop.eup %3402 }
 0x1ff   : > { %v741_v53 = vmul.f32 %v3403_v57, %v3921_v58  ;;  %3207 = vmatmul.msk.bf16.vlgmr.msrb.gmra.mxu0 %vm567_vm1, %v876_v1  ;;  %v1128_v58 = vsel %vm336_vm0, %v1123_v6, 0 }
 0x200   : > { %v3405_v54 = vpop.eup %3404 }
 0x201   : > { %v757_v3 = vpack.c.bf16 %v741_v53, %v741_v53  ;;  %v739_v61 = vmul.f32 %v3405_v54, %v3923_v63  ;;  %v3407_v21 = vpop.eup %3406 }
 0x203   : > { %v931_v33 = vunpack.c.l.b16 %v757_v3  ;;  %v755_v37 = vpack.c.bf16 %v739_v61, %v739_v61 }
 0x205   : > { %v932_v22 = vpack.c.b16 %v931_v33, %v930_v41  ;;  %v903_v28 = vunpack.c.l.b16 %v755_v37 }
 0x207   : > { %3217 = vmatmul.msk.bf16.vlgmr.msrb.gmra.mxu2 %vm567_vm1, %v932_v22  ;;  %v904_v4 = vpack.c.b16 %v903_v28, %v902_v16 }
 0x208   : > { %1161 = vmatpush.bf16.xpose.msrb.mxu2 %v1152_v24 }
 0x209   : > { %3212 = vmatmul.msk.bf16.vlgmr.msrb.gmra.mxu1 %vm567_vm1, %v904_v4 }
 0x20a   : > { %1137 = vmatpush.bf16.xpose.msrb.mxu1 %v1128_v58 }
 0x20f   : > { %3223 = vmatmul.msk.bf16.vlgmr.msra.gmra.mxu0 %vm336_vm0, %v1001_v8 }
 0x211   : > { %v1099_v63 = vpop.permute.xlu1 %1098 }
 0x212   : > { %v1104_v5 = vsel %vm336_vm0, %v1099_v63, 0 }
 0x213   : > { %1113 = vmatpush.bf16.xpose.msrb.mxu0 %v1104_v5 }
 0x217   : > { %3225 = vmatmul.msk.bf16.vlgmr.msra.gmra.mxu2 %vm336_vm0, %v3826_v12 }
 0x219   : > { %3224 = vmatmul.msk.bf16.vlgmr.msra.gmra.mxu1 %vm336_vm0, %v1025_v30  ;;  %v1121_v27 = vpop.permute.xlu1 %1120  ;;  %v742_v30 = vmul.f32 %v3407_v21, %v3900_v44  ;;  %v1176_v44 = vsel %vm336_vm0, %v3824_v11, 0 }
 0x21b   : > { %v758_v10 = vpack.c.bf16 %v742_v30, %v742_v30  ;;  %v1565_v30 = vpop.permute.xlu0 %1564 }
 0x21d   : > { %v958_v43 = vunpack.c.l.b16 %v758_v10 }
 0x21f   : > { %3227 = vmatmul.msk.bf16.vlgmr.msrb.gmra.mxu0 %vm336_vm0, %v1097_v13 }
 0x221   : > { %v1440_v5 = vpop.permute.xlu1 %1439 }
 0x222   : > { %1452 = vmatpush.bf16.msra.mxu2 %v1440_v5 }
 0x227   : > { %3229 = vmatmul.msk.bf16.vlgmr.msrb.gmra.mxu2 %vm336_vm0, %v3830_v14 }
 0x229   : > { %3228 = vmatmul.msk.bf16.vlgmr.msrb.gmra.mxu1 %vm336_vm0, %v1121_v27 }
 0x22b   : > { %v783_v40 = vpop.f32.mrf.mxu0 }
 0x22c   : > { %984 = vst.msk [vmem:[#allocation2] sm:$0xff] %vm336_vm0, %v783_v40  ;;  %v4083_v40 = vld [vmem:[%s3666_s18 + $0x10] sm:$0xff] }
 0x22e   : > { %v811_v8 = vpop.f32.mrf.mxu1 }
 0x22f   : > { %986 = vst.msk [vmem:[#allocation2 + $0x10] sm:$0xff] %vm336_vm0, %v811_v8 }
 0x230   : > { %v711_v6 = vpop.xlane.xlu2 %710 }
 0x231   : > { %3408 = vrcp.f32 %v711_v6 }
 0x233   : > { %v785_v12 = vpop.f32.mrf.mxu0 }
 0x234   : > { %985 = vst.msk [vmem:[#allocation2 + $0x8] sm:$0xff] %vm336_vm0, %v785_v12 }
 0x236   : > { %v813_v29 = vpop.f32.mrf.mxu1 }
 0x237   : > { %987 = vst.msk [vmem:[#allocation2 + $0x18] sm:$0xff] %vm336_vm0, %v813_v29  ;;  %v3409_v14 = vpop.eup %3408 }
 0x238   : > { %v743_v36 = vmul.f32 %v3409_v14, %v3988_v62 }
 0x239   : > { %v839_v0 = vpop.f32.mrf.mxu2 }
 0x23a   : > { %v759_v38 = vpack.c.bf16 %v743_v36, %v743_v36  ;;  %988 = vst.msk [vmem:[#allocation2 + $0x20] sm:$0xff] %vm336_vm0, %v839_v0  ;;  %v867_v39 = vpop.f32.mrf.mxu3  ;;  %v1540_v0 = vpop.permute.xlu2 %1539 }
 0x23b   : > { %990 = vst.msk [vmem:[#allocation2 + $0x30] sm:$0xff] %vm336_vm0, %v867_v39  ;;  %1552 = vmatpush.bf16.msrb.mxu2 %v1540_v0 }
 0x23c   : > { %v959_v47 = vunpack.c.l.b16 %v759_v38 }
 0x23e   : > { %v960_v46 = vpack.c.b16 %v959_v47, %v958_v43 }
 0x240   : > { %3222 = vmatmul.msk.bf16.vlgmr.msrb.gmra.mxu3 %vm567_vm1, %v960_v46 }
 0x241   : > { %1185 = vmatpush.bf16.xpose.msrb.mxu3 %v1176_v44  ;;  %v841_v55 = vpop.f32.mrf.mxu2 }
 0x242   : > { %989 = vst.msk [vmem:[#allocation2 + $0x28] sm:$0xff] %vm336_vm0, %v841_v55  ;;  %v869_v62 = vpop.f32.mrf.mxu3 }
 0x243   : > { %991 = vst.msk [vmem:[#allocation2 + $0x38] sm:$0xff] %vm336_vm0, %v869_v62 }
 0x250   : > { %3226 = vmatmul.msk.bf16.vlgmr.msra.gmra.mxu3 %vm336_vm0, %v3820_v9 }
 0x251   : > { %1477 = vmatpush.bf16.msra.mxu3 %v3994_v7 }
 0x260   : > { %3230 = vmatmul.msk.bf16.vlgmr.msrb.gmra.mxu3 %vm336_vm0, %v3996_v17 }
 0x261   : > { %1577 = vmatpush.bf16.msrb.mxu3 %v1565_v30 }
 0x27c   : > { %v895_v52 = vpop.f32.mrf.mxu0 }
 0x27d   : > { %992 = vst.msk [vmem:[#allocation2 + $0x40] sm:$0xff] %vm336_vm0, %v895_v52 }
 0x284   : > { %v897_v11 = vpop.f32.mrf.mxu0 }
 0x285   : > { %993 = vst.msk [vmem:[#allocation2 + $0x48] sm:$0xff] %vm336_vm0, %v897_v11 }
 0x286   : > { %v923_v42 = vpop.f32.mrf.mxu1 }
 0x287   : > { %994 = vst.msk [vmem:[#allocation2 + $0x50] sm:$0xff] %vm336_vm0, %v923_v42 }
 0x28a   : > { %v951_v2 = vpop.f32.mrf.mxu2 }
 0x28b   : > { %996 = vst.msk [vmem:[#allocation2 + $0x60] sm:$0xff] %vm336_vm0, %v951_v2 }
 0x28c   : > { %v4041_v57 = vpop.f32.mrf.mxu0 }
 0x28d   : > { %v1192_v9 = vsel %vm567_vm1, %v4041_v57, -inf }
 0x28e   : > { %1193 = vmax.xlane.f32.xlu1 %v1192_v9  ;;  %v925_v7 = vpop.f32.mrf.mxu1 }
 0x28f   : > { %995 = vst.msk [vmem:[#allocation2 + $0x58] sm:$0xff] %vm336_vm0, %v925_v7 }
 0x292   : > { %v953_v17 = vpop.f32.mrf.mxu2 }
 0x293   : > { %997 = vst.msk [vmem:[#allocation2 + $0x68] sm:$0xff] %vm336_vm0, %v953_v17 }
 0x294   : > { %v4047_v20 = vpop.f32.mrf.mxu0 }
 0x295   : > { %v1195_v1 = vsel %vm567_vm1, %v4047_v20, -inf }
 0x296   : > { %1196 = vmax.xlane.f32.xlu0 %v1195_v1  ;;  %v1043_v15 = vpop.f32.mrf.mxu1 }
 0x297   : > { %v1198_v53 = vsel %vm567_vm1, %v1043_v15, -inf }
 0x298   : > { %1199 = vmax.xlane.f32.xlu2 %v1198_v53 }
 0x29a   : > { %v4052_v54 = vpop.f32.mrf.mxu2 }
 0x29b   : > { %v1204_v59 = vsel %vm567_vm1, %v4052_v54, -inf }
 0x29c   : > { %v4054_v3 = vpop.f32.mrf.mxu0 }
 0x29d   : > { %v1216_v22 = vsel %vm567_vm1, %v4054_v3, -inf }
 0x29e   : > { %1205 = vmax.xlane.f32.xlu0 %v1204_v59  ;;  %v4058_v61 = vpop.f32.mrf.mxu1 }
 0x29f   : > { %v1201_v41 = vsel %vm567_vm1, %v4058_v61, -inf }
 0x2a0   : > { %1202 = vmax.xlane.f32.xlu1 %v1201_v41 }
 0x2a2   : > { %v4062_v33 = vpop.f32.mrf.mxu2 }
 0x2a3   : > { %v1207_v37 = vsel %vm567_vm1, %v4062_v33, -inf }
 0x2a4   : > { %1208 = vmax.xlane.f32.xlu2 %v1207_v37  ;;  %v4068_v16 = vpop.f32.mrf.mxu0 }
 0x2a5   : > { %v1219_v28 = vsel %vm567_vm1, %v4068_v16, -inf }
 0x2a6   : > { %1217 = vmax.xlane.f32.xlu0 %v1216_v22  ;;  %v4089_v6 = vpop.f32.mrf.mxu1 }
 0x2a7   : > { %v1222_v21 = vsel %vm567_vm1, %v4089_v6, -inf }
 0x2aa   : > { %v4072_v24 = vpop.f32.mrf.mxu2 }
 0x2ab   : > { %v1228_v4 = vsel %vm567_vm1, %v4072_v24, -inf }
 0x2ac   : > { %1220 = vmax.xlane.f32.xlu2 %v1219_v28 }
 0x2ae   : > { %v4097_v29 = vpop.f32.mrf.mxu1 }
 0x2af   : > { %v1225_v10 = vsel %vm567_vm1, %v4097_v29, -inf }
 0x2b2   : > { %v4099_v14 = vpop.f32.mrf.mxu2 }
 0x2b3   : > { %v1231_v36 = vsel %vm567_vm1, %v4099_v14, -inf }
 0x2b4   : > { %1229 = vmax.xlane.f32.xlu2 %v1228_v4 }
 0x2c3   : > { %v979_v58 = vpop.f32.mrf.mxu3 }
 0x2c4   : > { %998 = vst.msk [vmem:[#allocation2 + $0x70] sm:$0xff] %vm336_vm0, %v979_v58 }
 0x2cb   : > { %v981_v63 = vpop.f32.mrf.mxu3 }
 0x2cc   : > { %1414 = vrot.lane.b32.xlu2 %v3934_v18, %s3626_s22  ;;  %999 = vst.msk [vmem:[#allocation2 + $0x78] sm:$0xff] %vm336_vm0, %v981_v63 }
 0x2d3   : > { %v4080_v13 = vpop.f32.mrf.mxu3 }
 0x2d4   : > { %1715 = vrot.lane.b32.xlu2 %v4083_v40, %s3627_s26  ;;  %v1210_v8 = vsel %vm567_vm1, %v4080_v13, -inf }
 0x2d5   : > { %1211 = vmax.xlane.f32.xlu1 %v1210_v8 }
 0x2db   : > { %v4093_v27 = vpop.f32.mrf.mxu3 }
 0x2dc   : > { %v1213_v12 = vsel %vm567_vm1, %v4093_v27, -inf }
 0x2dd   : > { %1214 = vmax.xlane.f32.xlu0 %v1213_v12  ;;  %1223 = vmax.xlane.f32.xlu1 %v1222_v21 }
 0x2e3   : > { %v4105_v38 = vpop.f32.mrf.mxu3 }
 0x2e4   : > { %v1234_v39 = vsel %vm567_vm1, %v4105_v38, -inf }
 0x2e5   : > { %1232 = vmax.xlane.f32.xlu1 %v1231_v36  ;;  %1226 = vmax.xlane.f32.xlu0 %v1225_v10 }
 0x2eb   : > { %v4109_v43 = vpop.f32.mrf.mxu3 }
 0x2ec   : > { %v1237_v47 = vsel %vm567_vm1, %v4109_v43, -inf }
 0x2ed   : > { %1235 = vmax.xlane.f32.xlu0 %v1234_v39 }
 0x2fd   : > { %1238 = vmax.xlane.f32.xlu2 %v1237_v47 }
 0x2fe   : > { %1389 = vrot.lane.b32.xlu1 %v3930_v49, %s3626_s22 }
 0x301   : > { %v1194_v46 = vpop.xlane.xlu1 %1193 }
 0x302   : > { %v1240_v9 = vsub.f32 %v4041_v57, %v1194_v46 }
 0x304   : > { %v1256_v53 = vmul.f32 1.442695, %v1240_v9 }
 0x309   : > { %v1197_v44 = vpop.xlane.xlu0 %1196 }
 0x30a   : > { %v1241_v52 = vsub.f32 %v4047_v20, %v1197_v44 }
 0x30b   : > { %v1200_v55 = vpop.xlane.xlu2 %1199 }
 0x30c   : > { %v1242_v62 = vsub.f32 %v1043_v15, %v1200_v55  ;;  %v1258_v42 = vmul.f32 1.442695, %v1241_v52 }
 0x30e   : > { %v1260_v11 = vmul.f32 1.442695, %v1242_v62 }
 0x310   : > { %3410 = vpow2.f32 %v1260_v11 }
 0x311   : > { %3412 = vpow2.f32 %v1258_v42  ;;  %v1206_v15 = vpop.xlane.xlu0 %1205 }
 0x312   : > { %3414 = vpow2.f32 %v1256_v53  ;;  %v1244_v20 = vsub.f32 %v4052_v54, %v1206_v15 }
 0x313   : > { %v1203_v2 = vpop.xlane.xlu1 %1202 }
 0x314   : > { %v1243_v17 = vsub.f32 %v4058_v61, %v1203_v2  ;;  %v1264_v37 = vmul.f32 1.442695, %v1244_v20 }
 0x316   : > { %v4117_v7 = vpop.eup %3410  ;;  %v1262_v59 = vmul.f32 1.442695, %v1243_v17 }
 0x317   : > { %v1294_v1 = vsel %vm567_vm1, %v4117_v7, 0.0  ;;  %v4122_v41 = vpop.eup %3412  ;;  %v1209_v22 = vpop.xlane.xlu2 %1208 }
 0x318   : > { %1295 = vadd.xlane.f32.xlu2 %v1294_v1  ;;  %3416 = vpow2.f32 %v1262_v59  ;;  %v1291_v57 = vsel %vm567_vm1, %v4122_v41, 0.0  ;;  %v4127_v61 = vpop.eup %3414  ;;  %v1245_v62 = vsub.f32 %v4062_v33, %v1209_v22 }
 0x319   : > { %3418 = vpow2.f32 %v1264_v37  ;;  %v1288_v4 = vsel %vm567_vm1, %v4127_v61, 0.0  ;;  %v1218_v12 = vpop.xlane.xlu0 %1217 }
 0x31a   : > { %v1248_v36 = vsub.f32 %v4054_v3, %v1218_v12 }
 0x31c   : > { %v1272_v39 = vmul.f32 1.442695, %v1248_v36 }
 0x31e   : > { %v4129_v28 = vpop.eup %3416 }
 0x31f   : > { %v1297_v58 = vsel %vm567_vm1, %v4129_v28, 0.0  ;;  %v4135_v54 = vpop.eup %3418  ;;  %v1221_v63 = vpop.xlane.xlu2 %1220 }
 0x320   : > { %1292 = vadd.xlane.f32.xlu2 %v1291_v57  ;;  %v1300_v5 = vsel %vm567_vm1, %v4135_v54, 0.0  ;;  %v1249_v1 = vsub.f32 %v4068_v16, %v1221_v63 }
 0x322   : > { %v1274_v59 = vmul.f32 1.442695, %v1249_v1 }
 0x327   : > { %v1230_v8 = vpop.xlane.xlu2 %1229 }
 0x328   : > { %1289 = vadd.xlane.f32.xlu1 %v1288_v4  ;;  %1298 = vadd.xlane.f32.xlu2 %v1297_v58  ;;  %v1252_v57 = vsub.f32 %v4072_v24, %v1230_v8 }
 0x32a   : > { %v1280_v37 = vmul.f32 1.442695, %v1252_v57 }
 0x32f   : > { %v1415_v21 = vpop.permute.xlu2 %1414 }
 0x330   : > { %1301 = vadd.xlane.f32.xlu2 %v1300_v5  ;;  %1427 = vmatpush.bf16.msra.mxu1 %v1415_v21  ;;  %v4183_v21 = vld [vmem:[%s3666_s18 + $0x18] sm:$0xff] }
 0x337   : > { %v4175_v63 = vpop.permute.xlu2 %1715 }
 0x348   : > { %1514 = vrot.lane.b32.xlu2 %v3942_v45, %s3626_s22  ;;  %v1212_v30 = vpop.xlane.xlu1 %1211 }
 0x349   : > { %v1246_v10 = vsub.f32 %v4080_v13, %v1212_v30  ;;  %v1266_v13 = vmul.f32 1.442695, %v1245_v62 }
 0x34b   : > { %v1268_v0 = vmul.f32 1.442695, %v1246_v10 }
 0x34d   : > { %3420 = vpow2.f32 %v1268_v0 }
 0x34e   : > { %3422 = vpow2.f32 %v1272_v39  ;;  %v4200_v39 = vld [vmem:[%s3666_s18] sm:$0xff] }
 0x350   : > { %v1224_v47 = vpop.xlane.xlu1 %1223  ;;  %v1215_v11 = vpop.xlane.xlu0 %1214 }
 0x351   : > { %v1250_v46 = vsub.f32 %v4089_v6, %v1224_v47  ;;  %v1247_v33 = vsub.f32 %v4093_v27, %v1215_v11 }
 0x353   : > { %v4144_v44 = vpop.eup %3420  ;;  %v1276_v55 = vmul.f32 1.442695, %v1250_v46  ;;  %v1270_v9 = vmul.f32 1.442695, %v1247_v33  ;;  %v4213_v33 = vld [vmem:[%s3666_s18 + $0x20] sm:$0xff] }
 0x354   : > { %v1306_v45 = vsel %vm567_vm1, %v4144_v44, 0.0  ;;  %v4149_v52 = vpop.eup %3422 }
 0x355   : > { %1307 = vadd.xlane.f32.xlu0 %v1306_v45  ;;  %3424 = vpow2.f32 %v1276_v55  ;;  %v1312_v6 = vsel %vm567_vm1, %v4149_v52, 0.0 }
 0x356   : > { %3426 = vpow2.f32 %v1266_v13 }
 0x357   : > { %3428 = vpow2.f32 %v1270_v9 }
 0x358   : > { %v1227_v53 = vpop.xlane.xlu0 %1226  ;;  %v1233_v20 = vpop.xlane.xlu1 %1232  ;;  %3430 = vpow2.f32 %v1274_v59 }
 0x359   : > { %3432 = vpow2.f32 %v1280_v37  ;;  %v1253_v8 = vsub.f32 %v4099_v14, %v1233_v20  ;;  %v1251_v46 = vsub.f32 %v4097_v29, %v1227_v53 }
 0x35b   : > { %v4151_v3 = vpop.eup %3424  ;;  %v1282_v12 = vmul.f32 1.442695, %v1253_v8  ;;  %v1278_v62 = vmul.f32 1.442695, %v1251_v46 }
 0x35c   : > { %v1318_v42 = vsel %vm567_vm1, %v4151_v3, 0.0  ;;  %v4158_v2 = vpop.eup %3426 }
 0x35d   : > { %1313 = vadd.xlane.f32.xlu0 %v1312_v6  ;;  %1319 = vadd.xlane.f32.xlu1 %v1318_v42  ;;  %v1303_v17 = vsel %vm567_vm1, %v4158_v2, 0.0  ;;  %v4163_v15 = vpop.eup %3428 }
 0x35e   : > { %v1309_v27 = vsel %vm567_vm1, %v4163_v15, 0.0  ;;  %v4170_v16 = vpop.eup %3430 }
 0x35f   : > { %v1315_v24 = vsel %vm567_vm1, %v4170_v16, 0.0  ;;  %v4179_v5 = vpop.eup %3432 }
 0x360   : > { %v1236_v22 = vpop.xlane.xlu0 %1235 }
 0x361   : > { %v1254_v58 = vsub.f32 %v4105_v38, %v1236_v22  ;;  %v1324_v38 = vsel %vm567_vm1, %v4179_v5, 0.0 }
 0x365   : > { %1304 = vadd.xlane.f32.xlu1 %v1303_v17 }
 0x370   : > { %v1390_v4 = vpop.permute.xlu1 %1389  ;;  %v4189_v30 = vpop.xlane.xlu2 %1238 }
 0x371   : > { %1310 = vadd.xlane.f32.xlu2 %v1309_v27  ;;  %1489 = vrot.lane.b32.xlu0 %v3937_v19, %s3626_s22  ;;  %v1284_v19 = vmul.f32 1.442695, %v1254_v58 }
 0x372   : > { %1402 = vmatpush.bf16.msra.mxu0 %v1390_v4 }
 0x373   : > { %3434 = vpow2.f32 %v1284_v19  ;;  %v4225_v19 = vld [vmem:[%s3666_s18 + $0x30] sm:$0xff] }
 0x374   : > { %3436 = vpow2.f32 %v1282_v12 }
 0x379   : > { %1316 = vadd.xlane.f32.xlu2 %v1315_v24  ;;  %1713 = vrot.lane.b32.xlu0 %v3716_v56, %s3627_s26  ;;  %v4191_v10 = vpop.eup %3434 }
 0x37a   : > { %v1330_v14 = vsel %vm567_vm1, %v4191_v10, 0.0  ;;  %v4197_v0 = vpop.eup %3436 }
 0x37b   : > { %v1327_v47 = vsel %vm567_vm1, %v4197_v0, 0.0 }
 0x37e   : > { %1739 = vrot.lane.b32.xlu1 %v4183_v21, %s3627_s26 }
 0x381   : > { %1325 = vadd.xlane.f32.xlu2 %v1324_v38  ;;  %v4239_v38 = vld [vmem:[%s3666_s18 + $0x38] sm:$0xff] }
 0x386   : > { %1737 = vrot.lane.b32.xlu1 %v3725_v60, %s3627_s26 }
 0x389   : > { %1331 = vadd.xlane.f32.xlu2 %v1330_v14 }
 0x38b   : > { %v1296_v36 = vpop.xlane.xlu2 %1295 }
 0x38c   : > { %3438 = vrcp.f32 %v1296_v36 }
 0x38e   : > { %1667 = vrot.lane.b32.xlu1 %v4200_v39, %s3627_s26 }
 0x391   : > { %1328 = vadd.xlane.f32.xlu2 %v1327_v47 }
 0x392   : > { %v3439_v11 = vpop.eup %3438 }
 0x393   : > { %v1293_v55 = vpop.xlane.xlu2 %1292  ;;  %v1354_v29 = vmul.f32 %v3439_v11, %v4117_v7 }
 0x394   : > { %3440 = vrcp.f32 %v1293_v55 }
 0x395   : > { %3442 = vpow2.f32 %v1278_v62  ;;  %v1370_v59 = vpack.c.bf16 %v1354_v29, %v1354_v29 }
 0x396   : > { %1833 = vrot.lane.b32.xlu1 %v3748_v35, %s3627_s26 }
 0x397   : > { %v1411_v22 = vunpack.c.l.b16 %v1370_v59 }
 0x39a   : > { %v3441_v6 = vpop.eup %3440 }
 0x39b   : > { %v1299_v45 = vpop.xlane.xlu2 %1298  ;;  %v1290_v13 = vpop.xlane.xlu1 %1289  ;;  %v1353_v9 = vmul.f32 %v3441_v6, %v4122_v41 }
 0x39c   : > { %3444 = vrcp.f32 %v1299_v45  ;;  %v4209_v42 = vpop.eup %3442 }
 0x39d   : > { %3446 = vrcp.f32 %v1290_v13  ;;  %v1321_v1 = vsel %vm567_vm1, %v4209_v42, 0.0  ;;  %v1369_v57 = vpack.c.bf16 %v1353_v9, %v1353_v9 }
 0x39e   : > { %1763 = vrot.lane.b32.xlu1 %v4213_v33, %s3627_s26 }
 0x39f   : > { %v1387_v41 = vunpack.c.l.b16 %v1369_v57 }
 0x3a2   : > { %v3445_v17 = vpop.eup %3444 }
 0x3a3   : > { %v3447_v53 = vpop.eup %3446  ;;  %v1355_v20 = vmul.f32 %v3445_v17, %v4129_v28  ;;  %1322 = vadd.xlane.f32.xlu0 %v1321_v1  ;;  %v1302_v8 = vpop.xlane.xlu2 %1301 }
 0x3a4   : > { %v1352_v7 = vmul.f32 %v3447_v53, %v4127_v61  ;;  %v4234_v61 = vld [vmem:[%s3666_s18 + $0x8] sm:$0xff]  ;;  %3448 = vrcp.f32 %v1302_v8 }
 0x3a5   : > { %v1371_v27 = vpack.c.bf16 %v1355_v20, %v1355_v20 }
 0x3a6   : > { %v1368_v37 = vpack.c.bf16 %v1352_v7, %v1352_v7  ;;  %1785 = vrot.lane.b32.xlu1 %v3742_v32, %s3627_s26  ;;  %v1255_v7 = vsub.f32 %v4109_v43, %v4189_v30 }
 0x3a7   : > { %v1412_v4 = vunpack.c.l.b16 %v1371_v27 }
 0x3a8   : > { %v1386_v58 = vunpack.c.l.b16 %v1368_v37 }
 0x3a9   : > { %v1413_v24 = vpack.c.b16 %v1412_v4, %v1411_v22  ;;  %1811 = vrot.lane.b32.xlu2 %v4225_v19, %s3627_s26 }
 0x3aa   : > { %v1388_v28 = vpack.c.b16 %v1387_v41, %v1386_v58  ;;  %v3449_v36 = vpop.eup %3448  ;;  %v1286_v58 = vmul.f32 1.442695, %v1255_v7 }
 0x3ab   : > { %3232 = vmatmul.msk.bf16.vlgmr.msra.gmra.mxu1 %vm567_vm1, %v1413_v24  ;;  %v1515_v12 = vpop.permute.xlu2 %1514  ;;  %v1356_v46 = vmul.f32 %v3449_v36, %v4135_v54  ;;  %v1721_v54 = vsel %vm336_vm0, %v4175_v63, 0 }
 0x3ac   : > { %3231 = vmatmul.msk.bf16.vlgmr.msra.gmra.mxu0 %vm567_vm1, %v1388_v28  ;;  %1527 = vmatpush.bf16.msrb.mxu1 %v1515_v12 }
 0x3ad   : > { %v1372_v62 = vpack.c.bf16 %v1356_v46, %v1356_v46 }
 0x3ae   : > { %2104 = vrot.lane.b32.xlu1 %v3946_v23, %s3627_s26  ;;  %v4252_v23 = vld [vmem:[%s3666_s18 + $0x28] sm:$0xff] }
 0x3af   : > { %v1436_v29 = vunpack.c.l.b16 %v1372_v62 }
 0x3b1   : > { %1691 = vrot.lane.b32.xlu2 %v4234_v61, %s3627_s26 }
 0x3b6   : > { %2054 = vrot.lane.b32.xlu1 %v3930_v49, %s3627_s26 }
 0x3b7   : > { %1835 = vrot.lane.b32.xlu0 %v4239_v38, %s3627_s26 }
 0x3b9   : > { %1665 = vrot.lane.b32.xlu2 %v3708_v50, %s3627_s26 }
 0x3be   : > { %2204 = vrot.lane.b32.xlu1 %v3952_v25, %s3627_s26 }
 0x3bf   : > { %1809 = vrot.lane.b32.xlu0 %v3746_v34, %s3627_s26 }
 0x3c1   : > { %1787 = vrot.lane.b32.xlu2 %v4252_v23, %s3627_s26 }
 0x3c7   : > { %1689 = vrot.lane.b32.xlu0 %v3710_v51, %s3627_s26 }
 0x3c8   : > { %v1308_v49 = vpop.xlane.xlu0 %1307 }
 0x3c9   : > { %2079 = vrot.lane.b32.xlu2 %v3934_v18, %s3627_s26 }
 0x3cf   : > { %1761 = vrot.lane.b32.xlu0 %v3740_v31, %s3627_s26 }
 0x3d0   : > { %v4262_v14 = vpop.xlane.xlu1 %1319  ;;  %v1314_v47 = vpop.xlane.xlu0 %1313 }
 0x3d1   : > { %2380 = vrot.lane.b32.xlu2 %v4083_v40, %s3628_s27 }
 0x3d7   : > { %2129 = vrot.lane.b32.xlu0 %v3886_v48, %s3627_s26 }
 0x3d8   : > { %v1305_v25 = vpop.xlane.xlu1 %1304 }
 0x3d9   : > { %3450 = vrcp.f32 %v1305_v25 }
 0x3da   : > { %3452 = vrcp.f32 %v1308_v49 }
 0x3df   : > { %v3451_v55 = vpop.eup %3450 }
 0x3e0   : > { %v1357_v18 = vmul.f32 %v3451_v55, %v4158_v2  ;;  %v3453_v6 = vpop.eup %3452 }
 0x3e1   : > { %v1358_v17 = vmul.f32 %v3453_v6, %v4144_v44 }
 0x3e2   : > { %v1373_v45 = vpack.c.bf16 %v1357_v18, %v1357_v18 }
 0x3e3   : > { %v1490_v13 = vpop.permute.xlu0 %1489  ;;  %v1374_v2 = vpack.c.bf16 %v1358_v17, %v1358_v17 }
 0x3e4   : > { %v1311_v11 = vpop.xlane.xlu2 %1310  ;;  %1502 = vmatpush.bf16.msrb.mxu0 %v1490_v13  ;;  %v1437_v9 = vunpack.c.l.b16 %v1373_v45 }
 0x3e5   : > { %3454 = vrcp.f32 %v1311_v11  ;;  %v1461_v27 = vunpack.c.l.b16 %v1374_v2 }
 0x3e6   : > { %3456 = vrcp.f32 %v1314_v47  ;;  %v1438_v48 = vpack.c.b16 %v1437_v9, %v1436_v29 }
 0x3e8   : > { %3233 = vmatmul.msk.bf16.vlgmr.msra.gmra.mxu2 %vm567_vm1, %v1438_v48 }
 0x3e9   : > { %1730 = vmatpush.bf16.xpose.msra.mxu2 %v1721_v54 }
 0x3eb   : > { %v3455_v1 = vpop.eup %3454  ;;  %v1714_v40 = vpop.permute.xlu0 %1713 }
 0x3ec   : > { %v1359_v53 = vmul.f32 %v3455_v1, %v4163_v15  ;;  %v1317_v59 = vpop.xlane.xlu2 %1316  ;;  %v3457_v20 = vpop.eup %3456 }
 0x3ed   : > { %3458 = vrcp.f32 %v1317_v59  ;;  %v1360_v44 = vmul.f32 %v3457_v20, %v4149_v52 }
 0x3ee   : > { %v1375_v57 = vpack.c.bf16 %v1359_v53, %v1359_v53  ;;  %3460 = vpow2.f32 %v1286_v58 }
 0x3ef   : > { %v1376_v24 = vpack.c.bf16 %v1360_v44, %v1360_v44 }
 0x3f0   : > { %v1462_v37 = vunpack.c.l.b16 %v1375_v57  ;;  %v1740_v22 = vpop.permute.xlu1 %1739 }
 0x3f1   : > { %v1745_v4 = vsel %vm336_vm0, %v1740_v22, 0  ;;  %v1486_v43 = vunpack.c.l.b16 %v1376_v24 }
 0x3f2   : > { %v1463_v63 = vpack.c.b16 %v1462_v37, %v1461_v27 }
 0x3f3   : > { %v3459_v41 = vpop.eup %3458 }
 0x3f4   : > { %v1361_v15 = vmul.f32 %v3459_v41, %v4170_v16  ;;  %v1326_v28 = vpop.xlane.xlu2 %1325  ;;  %3234 = vmatmul.msk.bf16.vlgmr.msra.gmra.mxu3 %vm567_vm1, %v1463_v63  ;;  %v4284_v25 = vpop.eup %3460 }
 0x3f5   : > { %1754 = vmatpush.bf16.xpose.msra.mxu3 %v1745_v4  ;;  %3462 = vrcp.f32 %v1326_v28  ;;  %v1333_v16 = vsel %vm567_vm1, %v4284_v25, 0.0 }
 0x3f6   : > { %v1377_v8 = vpack.c.bf16 %v1361_v15, %v1361_v15 }
 0x3f8   : > { %v1487_v30 = vunpack.c.l.b16 %v1377_v8  ;;  %v4279_v12 = vpop.permute.xlu1 %1737 }
 0x3fa   : > { %v1488_v52 = vpack.c.b16 %v1487_v30, %v1486_v43 }
 0x3fb   : > { %v3463_v55 = vpop.eup %3462 }
 0x3fc   : > { %v4281_v49 = vpop.xlane.xlu2 %1331  ;;  %3235 = vmatmul.msk.bf16.vlgmr.msrb.gmra.mxu0 %vm567_vm1, %v1488_v52  ;;  %v1364_v62 = vmul.f32 %v3463_v55, %v4179_v5 }
 0x3fe   : > { %v1380_v45 = vpack.c.bf16 %v1364_v62, %v1364_v62 }
 0x400   : > { %v1668_v36 = vpop.permute.xlu1 %1667  ;;  %v1536_v29 = vunpack.c.l.b16 %v1380_v45 }
 0x401   : > { %1334 = vadd.xlane.f32.xlu0 %v1333_v16  ;;  %v1673_v47 = vsel %vm336_vm0, %v1668_v36, 0 }
 0x402   : > { %1682 = vmatpush.bf16.xpose.msra.mxu0 %v1673_v47 }
 0x404   : > { %v1329_v46 = vpop.xlane.xlu2 %1328 }
 0x405   : > { %3464 = vrcp.f32 %v1329_v46 }
 0x406   : > { %3466 = vrcp.f32 %v4262_v14 }
 0x408   : > { %v4294_v48 = vpop.permute.xlu1 %1833 }
 0x40b   : > { %v3465_v18 = vpop.eup %3464 }
 0x40c   : > { %v1365_v13 = vmul.f32 %v3465_v18, %v4197_v0  ;;  %v1812_v11 = vpop.permute.xlu2 %1811  ;;  %v3467_v2 = vpop.eup %3466 }
 0x40d   : > { %v1817_v54 = vsel %vm336_vm0, %v1812_v11, 0  ;;  %v1362_v14 = vmul.f32 %v3467_v2, %v4151_v3 }
 0x40e   : > { %v1381_v6 = vpack.c.bf16 %v1365_v13, %v1365_v13 }
 0x40f   : > { %v1378_v7 = vpack.c.bf16 %v1362_v14, %v1362_v14 }
 0x410   : > { %v1537_v9 = vunpack.c.l.b16 %v1381_v6  ;;  %v1764_v53 = vpop.permute.xlu1 %1763 }
 0x411   : > { %v1769_v59 = vsel %vm336_vm0, %v1764_v53, 0  ;;  %v1511_v37 = vunpack.c.l.b16 %v1378_v7 }
 0x412   : > { %v1538_v17 = vpack.c.b16 %v1537_v9, %v1536_v29  ;;  %1778 = vmatpush.bf16.xpose.msrb.mxu0 %v1769_v59 }
 0x414   : > { %v1692_v1 = vpop.permute.xlu2 %1691  ;;  %3237 = vmatmul.msk.bf16.vlgmr.msrb.gmra.mxu2 %vm567_vm1, %v1538_v17 }
 0x415   : > { %v1697_v5 = vsel %vm336_vm0, %v1692_v1, 0  ;;  %1826 = vmatpush.bf16.xpose.msrb.mxu2 %v1817_v54  ;;  %2229 = vrot.lane.b32.xlu0 %v3955_v26, %s3627_s26 }
 0x416   : > { %v1323_v0 = vpop.xlane.xlu0 %1322  ;;  %1706 = vmatpush.bf16.xpose.msra.mxu1 %v1697_v5 }
 0x417   : > { %3468 = vrcp.f32 %v1323_v0 }
 0x418   : > { %v1786_v24 = vpop.permute.xlu1 %1785  ;;  %3470 = vrcp.f32 %v4281_v49 }
 0x41c   : > { %v1666_v20 = vpop.permute.xlu2 %1665 }
 0x41d   : > { %v3469_v57 = vpop.eup %3468  ;;  %3239 = vmatmul.msk.bf16.vlgmr.msra.gmra.mxu0 %vm336_vm0, %v1666_v20 }
 0x41e   : > { %v1363_v27 = vmul.f32 %v3469_v57, %v4209_v42  ;;  %v3471_v8 = vpop.eup %3470 }
 0x41f   : > { %v1366_v30 = vmul.f32 %v3471_v8, %v4191_v10 }
 0x420   : > { %v1379_v44 = vpack.c.bf16 %v1363_v27, %v1363_v27 }
 0x421   : > { %v1382_v16 = vpack.c.bf16 %v1366_v30, %v1366_v30 }
 0x422   : > { %v1512_v26 = vunpack.c.l.b16 %v1379_v44 }
 0x423   : > { %v1561_v46 = vunpack.c.l.b16 %v1382_v16 }
 0x424   : > { %v1513_v22 = vpack.c.b16 %v1512_v26, %v1511_v37  ;;  %3241 = vmatmul.msk.bf16.vlgmr.msra.gmra.mxu2 %vm336_vm0, %v1714_v40  ;;  %v1788_v63 = vpop.permute.xlu2 %1787 }
 0x425   : > { %v1793_v4 = vsel %vm336_vm0, %v1788_v63, 0 }
 0x426   : > { %3236 = vmatmul.msk.bf16.vlgmr.msrb.gmra.mxu1 %vm567_vm1, %v1513_v22 }
 0x427   : > { %1802 = vmatpush.bf16.xpose.msrb.mxu1 %v1793_v4 }
 0x428   : > { %v4325_v10 = vpop.f32.mrf.mxu1 }
 0x429   : > { %v1836_v3 = vpop.permute.xlu0 %1835  ;;  %v4313_v43 = vpop.f32.mrf.mxu0 }
 0x42a   : > { %v1841_v45 = vsel %vm336_vm0, %v1836_v3, 0  ;;  %v2105_v3 = vpop.permute.xlu1 %2104 }
 0x42b   : > { %2117 = vmatpush.bf16.msra.mxu2 %v2105_v3 }
 0x42c   : > { %v2080_v4 = vpop.permute.xlu2 %2079 }
 0x430   : > { %v4333_v40 = vpop.f32.mrf.mxu1 }
 0x431   : > { %v1810_v41 = vpop.permute.xlu0 %1809  ;;  %v4317_v55 = vpop.f32.mrf.mxu0 }
 0x434   : > { %3245 = vmatmul.msk.bf16.vlgmr.msrb.gmra.mxu2 %vm336_vm0, %v1810_v41 }
 0x439   : > { %v1690_v58 = vpop.permute.xlu0 %1689 }
 0x43a   : > { %3240 = vmatmul.msk.bf16.vlgmr.msra.gmra.mxu1 %vm336_vm0, %v1690_v58  ;;  %v2055_v58 = vpop.permute.xlu1 %2054 }
 0x43b   : > { %2092 = vmatpush.bf16.msra.mxu1 %v2080_v4  ;;  %2067 = vmatpush.bf16.msra.mxu0 %v2055_v58 }
 0x441   : > { %v1762_v42 = vpop.permute.xlu0 %1761 }
 0x442   : > { %3243 = vmatmul.msk.bf16.vlgmr.msrb.gmra.mxu0 %vm336_vm0, %v1762_v42 }
 0x449   : > { %v2130_v15 = vpop.permute.xlu0 %2129 }
 0x44a   : > { %3244 = vmatmul.msk.bf16.vlgmr.msrb.gmra.mxu1 %vm336_vm0, %v1786_v24  ;;  %v2205_v24 = vpop.permute.xlu1 %2204 }
 0x44b   : > { %2217 = vmatpush.bf16.msrb.mxu2 %v2205_v24  ;;  %v4417_v24 = vld [vmem:[%s3877_s25 + $0x20] sm:$0xff] }
 0x46b   : > { %v4335_v6 = vpop.f32.mrf.mxu2 }
 0x473   : > { %v4345_v17 = vpop.f32.mrf.mxu2 }
 0x474   : > { %v1335_v28 = vpop.xlane.xlu0 %1334 }
 0x475   : > { %3472 = vrcp.f32 %v1335_v28 }
 0x477   : > { %v4375_v41 = vpop.f32.mrf.mxu3 }
 0x479   : > { %v4321_v49 = vpop.f32.mrf.mxu0 }
 0x47b   : > { %v3473_v52 = vpop.eup %3472 }
 0x47c   : > { %v1367_v36 = vmul.f32 %v3473_v52, %v4284_v25 }
 0x47e   : > { %v1383_v47 = vpack.c.bf16 %v1367_v36, %v1367_v36 }
 0x47f   : > { %v4377_v42 = vpop.f32.mrf.mxu3 }
 0x480   : > { %v1562_v62 = vunpack.c.l.b16 %v1383_v47 }
 0x481   : > { %v4323_v13 = vpop.f32.mrf.mxu0 }
 0x482   : > { %v1563_v18 = vpack.c.b16 %v1562_v62, %v1561_v46 }
 0x484   : > { %3238 = vmatmul.msk.bf16.vlgmr.msrb.gmra.mxu3 %vm567_vm1, %v1563_v18 }
 0x485   : > { %1850 = vmatpush.bf16.xpose.msrb.mxu3 %v1841_v45 }
 0x487   : > { %v2230_v63 = vpop.permute.xlu0 %2229 }
 0x494   : > { %3242 = vmatmul.msk.bf16.vlgmr.msra.gmra.mxu3 %vm336_vm0, %v4279_v12 }
 0x495   : > { %2142 = vmatpush.bf16.msra.mxu3 %v2130_v15 }
 0x497   : > { %v4347_v54 = vpop.f32.mrf.mxu2 }
 0x49a   : > { %v4329_v25 = vpop.f32.mrf.mxu0 }
 0x49b   : > { %v1857_v11 = vsel %vm567_vm1, %v4329_v25, -inf }
 0x49c   : > { %1858 = vmax.xlane.f32.xlu0 %v1857_v11 }
 0x49f   : > { %v4355_v2 = vpop.f32.mrf.mxu2 }
 0x4a2   : > { %v4337_v29 = vpop.f32.mrf.mxu0 }
 0x4a3   : > { %v1860_v9 = vsel %vm567_vm1, %v4337_v29, -inf  ;;  %v4343_v12 = vpop.f32.mrf.mxu1 }
 0x4a4   : > { %1861 = vmax.xlane.f32.xlu2 %v1860_v9  ;;  %3246 = vmatmul.msk.bf16.vlgmr.msrb.gmra.mxu3 %vm336_vm0, %v4294_v48 }
 0x4a5   : > { %2242 = vmatpush.bf16.msrb.mxu3 %v2230_v63 }
 0x4a7   : > { %v4362_v20 = vpop.f32.mrf.mxu2 }
 0x4a8   : > { %v1869_v22 = vsel %vm567_vm1, %v4362_v20, -inf }
 0x4ab   : > { %v4349_v1 = vpop.f32.mrf.mxu1 }
 0x4af   : > { %v4369_v37 = vpop.f32.mrf.mxu2 }
 0x4b0   : > { %v1872_v26 = vsel %vm567_vm1, %v4369_v37, -inf }
 0x4b7   : > { %v4351_v5 = vpop.f32.mrf.mxu1  ;;  %v4387_v52 = vpop.f32.mrf.mxu2 }
 0x4b8   : > { %v1863_v0 = vsel %vm567_vm1, %v4351_v5, -inf }
 0x4b9   : > { %1864 = vmax.xlane.f32.xlu1 %v1863_v0  ;;  %v1893_v0 = vsel %vm567_vm1, %v4387_v52, -inf }
 0x4bf   : > { %v1710_v53 = vpop.f32.mrf.mxu1  ;;  %v4357_v14 = vpop.f32.mrf.mxu0 }
 0x4c0   : > { %v1866_v48 = vsel %vm567_vm1, %v1710_v53, -inf  ;;  %v1881_v59 = vsel %vm567_vm1, %v4357_v14, -inf  ;;  %v4397_v18 = vpop.f32.mrf.mxu2 }
 0x4c1   : > { %1867 = vmax.xlane.f32.xlu0 %v1866_v48  ;;  %1882 = vmax.xlane.f32.xlu1 %v1881_v59  ;;  %v1896_v48 = vsel %vm567_vm1, %v4397_v18, -inf }
 0x4c7   : > { %v1782_v57 = vpop.f32.mrf.mxu0  ;;  %v4364_v7 = vpop.f32.mrf.mxu1 }
 0x4c8   : > { %v1884_v27 = vsel %vm567_vm1, %v1782_v57, -inf  ;;  %v1887_v44 = vsel %vm567_vm1, %v4364_v7, -inf }
 0x4c9   : > { %1885 = vmax.xlane.f32.xlu0 %v1884_v27  ;;  %1888 = vmax.xlane.f32.xlu2 %v1887_v44 }
 0x4cf   : > { %v4389_v16 = vpop.f32.mrf.mxu1 }
 0x4d0   : > { %v1890_v46 = vsel %vm567_vm1, %v4389_v16, -inf }
 0x4d1   : > { %1873 = vmax.xlane.f32.xlu0 %v1872_v26  ;;  %1870 = vmax.xlane.f32.xlu2 %v1869_v22 }
 0x507   : > { %v4379_v15 = vpop.f32.mrf.mxu3 }
 0x50f   : > { %v4381_v28 = vpop.f32.mrf.mxu3  ;;  %v1859_v62 = vpop.xlane.xlu0 %1858 }
 0x510   : > { %v1905_v45 = vsub.f32 %v4329_v25, %v1859_v62 }
 0x512   : > { %v1921_v59 = vmul.f32 1.442695, %v1905_v45 }
 0x514   : > { %3474 = vpow2.f32 %v1921_v59 }
 0x517   : > { %v4383_v8 = vpop.f32.mrf.mxu3 }
 0x518   : > { %v1875_v30 = vsel %vm567_vm1, %v4383_v8, -inf }
 0x519   : > { %1876 = vmax.xlane.f32.xlu1 %v1875_v30 }
 0x51a   : > { %v4412_v26 = vpop.eup %3474 }
 0x51b   : > { %v1953_v4 = vsel %vm567_vm1, %v4412_v26, 0.0 }
 0x51f   : > { %v4391_v36 = vpop.f32.mrf.mxu3 }
 0x520   : > { %v1878_v47 = vsel %vm567_vm1, %v4391_v36, -inf }
 0x521   : > { %1879 = vmax.xlane.f32.xlu2 %v1878_v47  ;;  %1891 = vmax.xlane.f32.xlu1 %v1890_v46 }
 0x527   : > { %v4400_v11 = vpop.f32.mrf.mxu3 }
 0x528   : > { %v1899_v9 = vsel %vm567_vm1, %v4400_v11, -inf }
 0x529   : > { %1900 = vmax.xlane.f32.xlu0 %v1899_v9  ;;  %1894 = vmax.xlane.f32.xlu2 %v1893_v0 }
 0x52a   : > { %1897 = vmax.xlane.f32.xlu1 %v1896_v48 }
 0x52f   : > { %v4408_v27 = vpop.f32.mrf.mxu3 }
 0x530   : > { %v1902_v25 = vsel %vm567_vm1, %v4408_v27, -inf }
 0x531   : > { %1903 = vmax.xlane.f32.xlu2 %v1902_v25 }
 0x534   : > { %v1868_v44 = vpop.xlane.xlu0 %1867 }
 0x535   : > { %v1908_v22 = vsub.f32 %v1710_v53, %v1868_v44 }
 0x537   : > { %v1927_v63 = vmul.f32 1.442695, %v1908_v22 }
 0x539   : > { %3476 = vpow2.f32 %v1927_v63  ;;  %1954 = vadd.xlane.f32.xlu2 %v1953_v4 }
 0x53c   : > { %v1886_v3 = vpop.xlane.xlu0 %1885 }
 0x53d   : > { %v1914_v58 = vsub.f32 %v1782_v57, %v1886_v3  ;;  %2154 = vrot.lane.b32.xlu0 %v4417_v24, %s3627_s26  ;;  %v4428_v57 = vpop.permute.xlu2 %2380 }
 0x53f   : > { %v4421_v30 = vpop.eup %3476  ;;  %v1939_v47 = vmul.f32 1.442695, %v1914_v58 }
 0x540   : > { %v1962_v46 = vsel %vm567_vm1, %v4421_v30, 0.0 }
 0x541   : > { %3478 = vpow2.f32 %v1939_v47  ;;  %1963 = vadd.xlane.f32.xlu2 %v1962_v46 }
 0x543   : > { %2404 = vrot.lane.b32.xlu1 %v4183_v21, %s3628_s27  ;;  %v1865_v21 = vpop.xlane.xlu1 %1864 }
 0x544   : > { %v1874_v53 = vpop.xlane.xlu0 %1873 }
 0x545   : > { %v1910_v62 = vsub.f32 %v4369_v37, %v1874_v53  ;;  %v1862_v59 = vpop.xlane.xlu2 %1861  ;;  %v1907_v37 = vsub.f32 %v4351_v5, %v1865_v21 }
 0x546   : > { %v1906_v63 = vsub.f32 %v4337_v29, %v1862_v59 }
 0x547   : > { %v4430_v45 = vpop.eup %3478  ;;  %v1931_v9 = vmul.f32 1.442695, %v1910_v62  ;;  %v1925_v22 = vmul.f32 1.442695, %v1907_v37 }
 0x548   : > { %v1980_v0 = vsel %vm567_vm1, %v4430_v45, 0.0  ;;  %v1923_v3 = vmul.f32 1.442695, %v1906_v63 }
 0x549   : > { %3480 = vpow2.f32 %v1931_v9  ;;  %1981 = vadd.xlane.f32.xlu2 %v1980_v0 }
 0x54a   : > { %3482 = vpow2.f32 %v1925_v22 }
 0x54b   : > { %v1883_v58 = vpop.xlane.xlu1 %1882  ;;  %3484 = vpow2.f32 %v1923_v3 }
 0x54c   : > { %v1913_v62 = vsub.f32 %v4357_v14, %v1883_v58 }
 0x54d   : > { %v1889_v44 = vpop.xlane.xlu2 %1888 }
 0x54e   : > { %v1915_v4 = vsub.f32 %v4364_v7, %v1889_v44  ;;  %v1937_v0 = vmul.f32 1.442695, %v1913_v62 }
 0x54f   : > { %v4434_v48 = vpop.eup %3480 }
 0x550   : > { %v1968_v25 = vsel %vm567_vm1, %v4434_v48, 0.0  ;;  %v1941_v47 = vmul.f32 1.442695, %v1915_v4  ;;  %v4441_v53 = vpop.eup %3482 }
 0x551   : > { %1969 = vadd.xlane.f32.xlu2 %v1968_v25  ;;  %v1959_v5 = vsel %vm567_vm1, %v4441_v53, 0.0  ;;  %v4447_v29 = vpop.eup %3484 }
 0x552   : > { %3486 = vpow2.f32 %v1941_v47  ;;  %v1956_v14 = vsel %vm567_vm1, %v4447_v29, 0.0 }
 0x553   : > { %3488 = vpow2.f32 %v1937_v0 }
 0x555   : > { %v1871_v46 = vpop.xlane.xlu2 %1870 }
 0x556   : > { %v1909_v9 = vsub.f32 %v4362_v20, %v1871_v46 }
 0x558   : > { %v1929_v7 = vmul.f32 1.442695, %v1909_v9  ;;  %v4451_v59 = vpop.eup %3486 }
 0x559   : > { %v1983_v20 = vsel %vm567_vm1, %v4451_v59, 0.0  ;;  %v4457_v25 = vpop.eup %3488 }
 0x55a   : > { %3490 = vpow2.f32 %v1929_v7  ;;  %v1977_v37 = vsel %vm567_vm1, %v4457_v25, 0.0 }
 0x560   : > { %v4459_v21 = vpop.eup %3490 }
 0x567   : > { %1960 = vadd.xlane.f32.xlu0 %v1959_v5 }
 0x569   : > { %2356 = vrot.lane.b32.xlu2 %v4234_v61, %s3628_s27  ;;  %v1965_v61 = vsel %vm567_vm1, %v4459_v21, 0.0 }
 0x56d   : > { %1957 = vadd.xlane.f32.xlu1 %v1956_v14 }
 0x56f   : > { %1984 = vadd.xlane.f32.xlu0 %v1983_v20 }
 0x575   : > { %1978 = vadd.xlane.f32.xlu1 %v1977_v37 }
 0x577   : > { %1966 = vadd.xlane.f32.xlu0 %v1965_v61 }
 0x58b   : > { %2378 = vrot.lane.b32.xlu0 %v3716_v56, %s3628_s27 }
 0x58c   : > { %v1877_v44 = vpop.xlane.xlu1 %1876 }
 0x58d   : > { %v1911_v22 = vsub.f32 %v4383_v8, %v1877_v44 }
 0x58f   : > { %v1933_v63 = vmul.f32 1.442695, %v1911_v22 }
 0x591   : > { %3492 = vpow2.f32 %v1933_v63 }
 0x594   : > { %v1880_v4 = vpop.xlane.xlu2 %1879  ;;  %v1892_v47 = vpop.xlane.xlu1 %1891 }
 0x595   : > { %v1916_v8 = vsub.f32 %v4389_v16, %v1892_v47 }
 0x597   : > { %v4468_v3 = vpop.eup %3492  ;;  %v1943_v14 = vmul.f32 1.442695, %v1916_v8 }
 0x598   : > { %v1971_v58 = vsel %vm567_vm1, %v4468_v3, 0.0 }
 0x599   : > { %1972 = vadd.xlane.f32.xlu1 %v1971_v58 }
 0x59c   : > { %v1895_v46 = vpop.xlane.xlu2 %1894  ;;  %v1901_v62 = vpop.xlane.xlu0 %1900 }
 0x59d   : > { %v1917_v9 = vsub.f32 %v4387_v52, %v1895_v46  ;;  %v1919_v56 = vsub.f32 %v4400_v11, %v1901_v62  ;;  %v1898_v7 = vpop.xlane.xlu1 %1897  ;;  %v1912_v52 = vsub.f32 %v4391_v36, %v1880_v4 }
 0x59e   : > { %v1918_v37 = vsub.f32 %v4397_v18, %v1898_v7  ;;  %v4488_v18 = vld [vmem:[%s3877_s25 + $0x28] sm:$0xff] }
 0x59f   : > { %v1945_v5 = vmul.f32 1.442695, %v1917_v9  ;;  %v1949_v0 = vmul.f32 1.442695, %v1919_v56  ;;  %v1935_v16 = vmul.f32 1.442695, %v1912_v52 }
 0x5a0   : > { %v1947_v11 = vmul.f32 1.442695, %v1918_v37 }
 0x5a1   : > { %3494 = vpow2.f32 %v1945_v5 }
 0x5a2   : > { %3496 = vpow2.f32 %v1949_v0 }
 0x5a3   : > { %3498 = vpow2.f32 %v1943_v14 }
 0x5a4   : > { %3500 = vpow2.f32 %v1947_v11  ;;  %v1904_v62 = vpop.xlane.xlu2 %1903 }
 0x5a5   : > { %3502 = vpow2.f32 %v1935_v16 }
 0x5a7   : > { %v4475_v20 = vpop.eup %3494 }
 0x5a8   : > { %v1989_v61 = vsel %vm567_vm1, %v4475_v20, 0.0  ;;  %v4481_v44 = vpop.eup %3496 }
 0x5a9   : > { %1990 = vadd.xlane.f32.xlu2 %v1989_v61  ;;  %v4483_v63 = vpop.eup %3498  ;;  %v1995_v58 = vsel %vm567_vm1, %v4481_v44, 0.0 }
 0x5aa   : > { %v1986_v36 = vsel %vm567_vm1, %v4483_v63, 0.0  ;;  %v4494_v4 = vpop.eup %3500 }
 0x5ab   : > { %v4496_v47 = vpop.eup %3502  ;;  %v1992_v46 = vsel %vm567_vm1, %v4494_v4, 0.0 }
 0x5ac   : > { %v1974_v9 = vsel %vm567_vm1, %v4496_v47, 0.0  ;;  %v1955_v5 = vpop.xlane.xlu2 %1954 }
 0x5af   : > { %v2155_v22 = vpop.permute.xlu0 %2154 }
 0x5b0   : > { %2167 = vmatpush.bf16.msrb.mxu0 %v2155_v22 }
 0x5b1   : > { %1996 = vadd.xlane.f32.xlu2 %v1995_v58 }
 0x5b2   : > { %2179 = vrot.lane.b32.xlu1 %v4488_v18, %s3627_s26 }
 0x5b4   : > { %v1964_v56 = vpop.xlane.xlu2 %1963 }
 0x5b5   : > { %1987 = vadd.xlane.f32.xlu0 %v1986_v36  ;;  %3504 = vrcp.f32 %v1964_v56 }
 0x5b6   : > { %3506 = vrcp.f32 %v1955_v5 }
 0x5b9   : > { %1993 = vadd.xlane.f32.xlu2 %v1992_v46  ;;  %v1920_v46 = vsub.f32 %v4408_v27, %v1904_v62 }
 0x5ba   : > { %2402 = vrot.lane.b32.xlu1 %v3725_v60, %s3628_s27  ;;  %v4514_v60 = vpop.permute.xlu1 %2404 }
 0x5bc   : > { %v1982_v8 = vpop.xlane.xlu2 %1981 }
 0x5bd   : > { %1975 = vadd.xlane.f32.xlu0 %v1974_v9 }
 0x5c2   : > { %2476 = vrot.lane.b32.xlu1 %v4225_v19, %s3628_s27 }
 0x5c4   : > { %v1970_v14 = vpop.xlane.xlu2 %1969 }
 0x5ca   : > { %2354 = vrot.lane.b32.xlu1 %v3710_v51, %s3628_s27  ;;  %v3505_v51 = vpop.eup %3504 }
 0x5d1   : > { %2332 = vrot.lane.b32.xlu0 %v4200_v39, %s3628_s27  ;;  %2330 = vrot.lane.b32.xlu2 %v3708_v50, %s3628_s27  ;;  %v2020_v39 = vmul.f32 %v3505_v51, %v4421_v30  ;;  %v1951_v51 = vmul.f32 1.442695, %v1920_v46 }
 0x5d2   : > { %2428 = vrot.lane.b32.xlu1 %v4213_v33, %s3628_s27  ;;  %v3507_v33 = vpop.eup %3506 }
 0x5d3   : > { %v2036_v7 = vpack.c.bf16 %v2020_v39, %v2020_v39 }
 0x5d5   : > { %v2077_v30 = vunpack.c.l.b16 %v2036_v7  ;;  %v3614_v7 = vld [vmem:[%s3877_s25] sm:$0xff] }
 0x5d9   : > { %2498 = vrot.lane.b32.xlu2 %v3748_v35, %s3628_s27  ;;  %v3612_v35 = vld [vmem:[%s3877_s25 + $0x8] sm:$0xff] }
 0x5da   : > { %v1961_v19 = vpop.xlane.xlu0 %1960  ;;  %2450 = vrot.lane.b32.xlu1 %v3742_v32, %s3628_s27  ;;  %v2017_v32 = vmul.f32 %v3507_v33, %v4412_v26  ;;  %v3613_v26 = vld [vmem:[%s3877_s25 + $0x18] sm:$0xff] }
 0x5db   : > { %3508 = vrcp.f32 %v1961_v19 }
 0x5dc   : > { %v2033_v22 = vpack.c.bf16 %v2017_v32, %v2017_v32 }
 0x5de   : > { %v2051_v56 = vunpack.c.l.b16 %v2033_v22 }
 0x5e0   : > { %v1958_v0 = vpop.xlane.xlu1 %1957 }
 0x5e1   : > { %v3509_v50 = vpop.eup %3508  ;;  %3510 = vrcp.f32 %v1958_v0  ;;  %2426 = vrot.lane.b32.xlu2 %v3740_v31, %s3628_s27 }
 0x5e2   : > { %v2019_v37 = vmul.f32 %v3509_v50, %v4441_v53  ;;  %v1985_v61 = vpop.xlane.xlu0 %1984  ;;  %2744 = vrot.lane.b32.xlu1 %v3612_v35, %s3628_s27  ;;  %3512 = vrcp.f32 %v1970_v14 }
 0x5e4   : > { %v2035_v52 = vpack.c.bf16 %v2019_v37, %v2019_v37 }
 0x5e6   : > { %v2076_v11 = vunpack.c.l.b16 %v2035_v52 }
 0x5e7   : > { %v3511_v16 = vpop.eup %3510 }
 0x5e8   : > { %v2078_v58 = vpack.c.b16 %v2077_v30, %v2076_v11  ;;  %v2018_v36 = vmul.f32 %v3511_v16, %v4447_v29  ;;  %v1979_v53 = vpop.xlane.xlu1 %1978  ;;  %v3513_v5 = vpop.eup %3512  ;;  %v2386_v16 = vsel %vm336_vm0, %v4428_v57, 0 }
 0x5e9   : > { %3514 = vrcp.f32 %v1979_v53  ;;  %2794 = vrot.lane.b32.xlu2 %v3613_v26, %s3628_s27  ;;  %v2022_v29 = vmul.f32 %v3513_v5, %v4434_v48 }
 0x5ea   : > { %3516 = vrcp.f32 %v1982_v8  ;;  %v2034_v31 = vpack.c.bf16 %v2018_v36, %v2018_v36  ;;  %3248 = vmatmul.msk.bf16.vlgmr.msra.gmra.mxu1 %vm567_vm1, %v2078_v58  ;;  %v1967_v9 = vpop.xlane.xlu0 %1966  ;;  %v2357_v58 = vpop.permute.xlu2 %2356 }
 0x5eb   : > { %3518 = vrcp.f32 %v1967_v9  ;;  %v2038_v8 = vpack.c.bf16 %v2022_v29, %v2022_v29  ;;  %v2362_v46 = vsel %vm336_vm0, %v2357_v58, 0  ;;  %v2410_v58 = vsel %vm336_vm0, %v4514_v60, 0 }
 0x5ec   : > { %v2052_v19 = vunpack.c.l.b16 %v2034_v31  ;;  %3520 = vpow2.f32 %v1951_v51 }
 0x5ed   : > { %v2102_v35 = vunpack.c.l.b16 %v2038_v8  ;;  %3522 = vrcp.f32 %v1985_v61 }
 0x5ee   : > { %v2053_v39 = vpack.c.b16 %v2052_v19, %v2051_v56 }
 0x5ef   : > { %v3515_v33 = vpop.eup %3514 }
 0x5f0   : > { %v3517_v27 = vpop.eup %3516  ;;  %3247 = vmatmul.msk.bf16.vlgmr.msra.gmra.mxu0 %vm567_vm1, %v2053_v39  ;;  %v2025_v0 = vmul.f32 %v3515_v33, %v4457_v25 }
 0x5f1   : > { %v3519_v62 = vpop.eup %3518  ;;  %2719 = vrot.lane.b32.xlu2 %v3614_v7, %s3628_s27  ;;  %v2026_v14 = vmul.f32 %v3517_v27, %v4430_v45 }
 0x5f2   : > { %v2021_v50 = vmul.f32 %v3519_v62, %v4459_v21  ;;  %v2041_v48 = vpack.c.bf16 %v2025_v0, %v2025_v0  ;;  %v4539_v52 = vpop.eup %3520 }
 0x5f3   : > { %v2042_v30 = vpack.c.bf16 %v2026_v14, %v2026_v14  ;;  %v1998_v25 = vsel %vm567_vm1, %v4539_v52, 0.0  ;;  %v3523_v26 = vpop.eup %3522 }
 0x5f4   : > { %v2037_v37 = vpack.c.bf16 %v2021_v50, %v2021_v50  ;;  %v2151_v22 = vunpack.c.l.b16 %v2041_v48 }
 0x5f5   : > { %v2152_v45 = vunpack.c.l.b16 %v2042_v30 }
 0x5f6   : > { %v2101_v32 = vunpack.c.l.b16 %v2037_v37 }
 0x5f7   : > { %v2153_v21 = vpack.c.b16 %v2152_v45, %v2151_v22 }
 0x5f8   : > { %v2103_v11 = vpack.c.b16 %v2102_v35, %v2101_v32 }
 0x5fa   : > { %3249 = vmatmul.msk.bf16.vlgmr.msra.gmra.mxu2 %vm567_vm1, %v2103_v11 }
 0x5fb   : > { %2395 = vmatpush.bf16.xpose.msra.mxu2 %v2386_v16  ;;  %1999 = vadd.xlane.f32.xlu0 %v1998_v25 }
 0x5fd   : > { %v4553_v53 = vpop.permute.xlu0 %2378 }
 0x600   : > { %3251 = vmatmul.msk.bf16.vlgmr.msrb.gmra.mxu0 %vm567_vm1, %v2153_v21 }
 0x60c   : > { %v1973_v57 = vpop.xlane.xlu1 %1972 }
 0x60f   : > { %2500 = vrot.lane.b32.xlu0 %v4239_v38, %s3628_s27  ;;  %v3615_v38 = vld [vmem:[%s3877_s25 + $0x10] sm:$0xff] }
 0x617   : > { %2474 = vrot.lane.b32.xlu0 %v3746_v34, %s3628_s27 }
 0x61c   : > { %v1991_v36 = vpop.xlane.xlu2 %1990 }
 0x61d   : > { %3524 = vrcp.f32 %v1991_v36 }
 0x61f   : > { %2452 = vrot.lane.b32.xlu0 %v4252_v23, %s3628_s27  ;;  %v2027_v23 = vmul.f32 %v3523_v26, %v4451_v59 }
 0x621   : > { %v2043_v51 = vpack.c.bf16 %v2027_v23, %v2027_v23 }
 0x623   : > { %v3525_v56 = vpop.eup %3524  ;;  %v2176_v0 = vunpack.c.l.b16 %v2043_v51 }
 0x624   : > { %v2180_v31 = vpop.permute.xlu1 %2179  ;;  %v4556_v9 = vpop.xlane.xlu2 %1996  ;;  %v2029_v27 = vmul.f32 %v3525_v56, %v4475_v20 }
 0x625   : > { %2192 = vmatpush.bf16.msrb.mxu1 %v2180_v31 }
 0x626   : > { %v2045_v14 = vpack.c.bf16 %v2029_v27, %v2029_v27 }
 0x627   : > { %2769 = vrot.lane.b32.xlu0 %v3615_v38, %s3628_s27 }
 0x628   : > { %v1988_v34 = vpop.xlane.xlu0 %1987  ;;  %v2201_v20 = vunpack.c.l.b16 %v2045_v14 }
 0x629   : > { %2371 = vmatpush.bf16.xpose.msra.mxu1 %v2362_v46  ;;  %3526 = vrcp.f32 %v1988_v34 }
 0x62a   : > { %3528 = vrcp.f32 %v1973_v57 }
 0x62c   : > { %v4561_v5 = vpop.permute.xlu1 %2402  ;;  %v1994_v61 = vpop.xlane.xlu2 %1993 }
 0x62d   : > { %3530 = vrcp.f32 %v1994_v61 }
 0x62f   : > { %v3527_v19 = vpop.eup %3526 }
 0x630   : > { %v2028_v29 = vmul.f32 %v3527_v19, %v4483_v63  ;;  %v1976_v39 = vpop.xlane.xlu0 %1975  ;;  %v3529_v33 = vpop.eup %3528 }
 0x631   : > { %3532 = vrcp.f32 %v1976_v39  ;;  %v2023_v50 = vmul.f32 %v3529_v33, %v4468_v3 }
 0x632   : > { %v2044_v62 = vpack.c.bf16 %v2028_v29, %v2028_v29  ;;  %3534 = vrcp.f32 %v4556_v9 }
 0x633   : > { %v3531_v8 = vpop.eup %3530  ;;  %v2039_v30 = vpack.c.bf16 %v2023_v50, %v2023_v50 }
 0x634   : > { %v2177_v59 = vunpack.c.l.b16 %v2044_v62  ;;  %v2477_v7 = vpop.permute.xlu1 %2476  ;;  %v2030_v37 = vmul.f32 %v3531_v8, %v4494_v4  ;;  %v2331_v46 = vpop.permute.xlu2 %2330 }
 0x635   : > { %v2482_v25 = vsel %vm336_vm0, %v2477_v7, 0  ;;  %v2126_v3 = vunpack.c.l.b16 %v2039_v30 }
 0x636   : > { %v2178_v35 = vpack.c.b16 %v2177_v59, %v2176_v0  ;;  %v2046_v32 = vpack.c.bf16 %v2030_v37, %v2030_v37 }
 0x637   : > { %v3533_v48 = vpop.eup %3532 }
 0x638   : > { %v2024_v63 = vmul.f32 %v3533_v48, %v4496_v47  ;;  %3252 = vmatmul.msk.bf16.vlgmr.msrb.gmra.mxu1 %vm567_vm1, %v2178_v35  ;;  %v2202_v11 = vunpack.c.l.b16 %v2046_v32  ;;  %v3535_v26 = vpop.eup %3534 }
 0x639   : > { %v2031_v23 = vmul.f32 %v3535_v26, %v4481_v44 }
 0x63a   : > { %v2040_v16 = vpack.c.bf16 %v2024_v63, %v2024_v63  ;;  %v2203_v22 = vpack.c.b16 %v2202_v11, %v2201_v20 }
 0x63b   : > { %v2047_v56 = vpack.c.bf16 %v2031_v23, %v2031_v23 }
 0x63c   : > { %v2127_v45 = vunpack.c.l.b16 %v2040_v16  ;;  %v2355_v21 = vpop.permute.xlu1 %2354  ;;  %3253 = vmatmul.msk.bf16.vlgmr.msrb.gmra.mxu2 %vm567_vm1, %v2203_v22  ;;  %v2499_v60 = vpop.permute.xlu2 %2498 }
 0x63d   : > { %2491 = vmatpush.bf16.xpose.msrb.mxu2 %v2482_v25  ;;  %v2226_v29 = vunpack.c.l.b16 %v2047_v56 }
 0x63e   : > { %v2128_v4 = vpack.c.b16 %v2127_v45, %v2126_v3 }
 0x640   : > { %3250 = vmatmul.msk.bf16.vlgmr.msra.gmra.mxu3 %vm567_vm1, %v2128_v4 }
 0x641   : > { %2419 = vmatpush.bf16.xpose.msra.mxu3 %v2410_v58 }
 0x643   : > { %v2333_v47 = vpop.permute.xlu0 %2332 }
 0x644   : > { %v2338_v57 = vsel %vm336_vm0, %v2333_v47, 0  ;;  %v2429_v36 = vpop.permute.xlu1 %2428  ;;  %v2427_v38 = vpop.permute.xlu2 %2426 }
 0x645   : > { %2347 = vmatpush.bf16.xpose.msra.mxu0 %v2338_v57  ;;  %v2434_v31 = vsel %vm336_vm0, %v2429_v36, 0 }
 0x648   : > { %3256 = vmatmul.msk.bf16.vlgmr.msra.gmra.mxu1 %vm336_vm0, %v2355_v21 }
 0x64c   : > { %3255 = vmatmul.msk.bf16.vlgmr.msra.gmra.mxu0 %vm336_vm0, %v2331_v46  ;;  %3257 = vmatmul.msk.bf16.vlgmr.msra.gmra.mxu2 %vm336_vm0, %v4553_v53  ;;  %v2795_v23 = vpop.permute.xlu2 %2794 }
 0x64d   : > { %2443 = vmatpush.bf16.xpose.msrb.mxu0 %v2434_v31 }
 0x65c   : > { %3259 = vmatmul.msk.bf16.vlgmr.msrb.gmra.mxu0 %vm336_vm0, %v2427_v38 }
 0x667   : > { %v4592_v8 = vpop.f32.mrf.mxu1 }
 0x66d   : > { %v4594_v0 = vpop.f32.mrf.mxu0 }
 0x66e   : > { %v2000_v34 = vpop.xlane.xlu0 %1999 }
 0x66f   : > { %3536 = vrcp.f32 %v2000_v34  ;;  %v4596_v50 = vpop.f32.mrf.mxu1 }
 0x675   : > { %v3537_v61 = vpop.eup %3536  ;;  %v4598_v59 = vpop.f32.mrf.mxu0 }
 0x676   : > { %v2032_v19 = vmul.f32 %v3537_v61, %v4539_v52  ;;  %v2451_v52 = vpop.permute.xlu1 %2450 }
 0x678   : > { %v2048_v51 = vpack.c.bf16 %v2032_v19, %v2032_v19  ;;  %v2720_v19 = vpop.permute.xlu2 %2719 }
 0x679   : > { %2732 = vmatpush.bf16.msra.mxu0 %v2720_v19 }
 0x67a   : > { %v2227_v39 = vunpack.c.l.b16 %v2048_v51 }
 0x67c   : > { %v2228_v33 = vpack.c.b16 %v2227_v39, %v2226_v29 }
 0x67d   : > { %v4604_v14 = vpop.f32.mrf.mxu2 }
 0x67e   : > { %3254 = vmatmul.msk.bf16.vlgmr.msrb.gmra.mxu3 %vm567_vm1, %v2228_v33 }
 0x681   : > { %v2501_v53 = vpop.permute.xlu0 %2500 }
 0x682   : > { %v2506_v27 = vsel %vm336_vm0, %v2501_v53, 0 }
 0x683   : > { %2515 = vmatpush.bf16.xpose.msrb.mxu3 %v2506_v27 }
 0x685   : > { %v4610_v48 = vpop.f32.mrf.mxu2 }
 0x689   : > { %v2475_v9 = vpop.permute.xlu0 %2474 }
 0x68a   : > { %3261 = vmatmul.msk.bf16.vlgmr.msrb.gmra.mxu2 %vm336_vm0, %v2475_v9 }
 0x68e   : > { %3258 = vmatmul.msk.bf16.vlgmr.msra.gmra.mxu3 %vm336_vm0, %v4561_v5  ;;  %v4602_v5 = vpop.f32.mrf.mxu0 }
 0x68f   : > { %2807 = vmatpush.bf16.msra.mxu3 %v2795_v23 }
 0x691   : > { %v2453_v44 = vpop.permute.xlu0 %2452 }
 0x692   : > { %v2458_v62 = vsel %vm336_vm0, %v2453_v44, 0  ;;  %v2745_v44 = vpop.permute.xlu1 %2744 }
 0x693   : > { %2467 = vmatpush.bf16.xpose.msrb.mxu1 %v2458_v62 }
 0x696   : > { %v4608_v35 = vpop.f32.mrf.mxu0 }
 0x699   : > { %v2770_v56 = vpop.permute.xlu0 %2769 }
 0x69a   : > { %3260 = vmatmul.msk.bf16.vlgmr.msrb.gmra.mxu1 %vm336_vm0, %v2451_v52  ;;  %2782 = vmatpush.bf16.msra.mxu2 %v2770_v56 }
 0x69b   : > { %2757 = vmatpush.bf16.msra.mxu1 %v2745_v44 }
 0x69e   : > { %3262 = vmatmul.msk.bf16.vlgmr.msrb.gmra.mxu3 %vm336_vm0, %v2499_v60 }
 0x6b5   : > { %v4600_v7 = vpop.f32.mrf.mxu1 }
 0x6bd   : > { %v4606_v37 = vpop.f32.mrf.mxu1 }
 0x6bf   : > { %v4616_v63 = vpop.f32.mrf.mxu2 }
 0x6c3   : > { %v4648_v60 = vpop.f32.mrf.mxu3 }
 0x6c5   : > { %v4612_v32 = vpop.f32.mrf.mxu1 }
 0x6c6   : > { %v2528_v30 = vsel %vm567_vm1, %v4612_v32, -inf }
 0x6c7   : > { %2529 = vmax.xlane.f32.xlu0 %v2528_v30  ;;  %v4630_v45 = vpop.f32.mrf.mxu2 }
 0x6c9   : > { %v4618_v20 = vpop.f32.mrf.mxu0 }
 0x6ca   : > { %v2522_v11 = vsel %vm567_vm1, %v4618_v20, -inf }
 0x6cb   : > { %2523 = vmax.xlane.f32.xlu2 %v2522_v11  ;;  %v4650_v38 = vpop.f32.mrf.mxu3 }
 0x6cd   : > { %v4622_v16 = vpop.f32.mrf.mxu1 }
 0x6ce   : > { %v2531_v22 = vsel %vm567_vm1, %v4622_v16, -inf }
 0x6cf   : > { %v4636_v58 = vpop.f32.mrf.mxu2 }
 0x6d0   : > { %v2534_v57 = vsel %vm567_vm1, %v4636_v58, -inf }
 0x6d1   : > { %v4626_v25 = vpop.f32.mrf.mxu0 }
 0x6d2   : > { %v2525_v3 = vsel %vm567_vm1, %v4626_v25, -inf }
 0x6d3   : > { %2526 = vmax.xlane.f32.xlu1 %v2525_v3  ;;  %2532 = vmax.xlane.f32.xlu2 %v2531_v22 }
 0x6d7   : > { %v4644_v46 = vpop.f32.mrf.mxu2 }
 0x6d8   : > { %v2537_v31 = vsel %vm567_vm1, %v4644_v46, -inf }
 0x6d9   : > { %v4632_v21 = vpop.f32.mrf.mxu0 }
 0x6da   : > { %v2546_v4 = vsel %vm567_vm1, %v4632_v21, -inf }
 0x6db   : > { %2547 = vmax.xlane.f32.xlu0 %v2546_v4 }
 0x6e1   : > { %v4638_v47 = vpop.f32.mrf.mxu0 }
 0x6e2   : > { %v2549_v36 = vsel %vm567_vm1, %v4638_v47, -inf }
 0x6e3   : > { %2535 = vmax.xlane.f32.xlu0 %v2534_v57  ;;  %2550 = vmax.xlane.f32.xlu2 %v2549_v36 }
 0x6eb   : > { %2538 = vmax.xlane.f32.xlu2 %v2537_v31 }
 0x701   : > { %v4652_v34 = vpop.f32.mrf.mxu3 }
 0x709   : > { %v4654_v26 = vpop.f32.mrf.mxu3 }
 0x70d   : > { %v4674_v52 = vpop.f32.mrf.mxu2 }
 0x70e   : > { %v2558_v30 = vsel %vm567_vm1, %v4674_v52, -inf }
 0x711   : > { %v4656_v61 = vpop.f32.mrf.mxu3 }
 0x712   : > { %v2540_v53 = vsel %vm567_vm1, %v4656_v61, -inf }
 0x715   : > { %v4680_v22 = vpop.f32.mrf.mxu2 }
 0x716   : > { %v2561_v57 = vsel %vm567_vm1, %v4680_v22, -inf }
 0x717   : > { %v4658_v51 = vpop.f32.mrf.mxu1 }
 0x718   : > { %v2552_v29 = vsel %vm567_vm1, %v4658_v51, -inf }
 0x719   : > { %v4662_v39 = vpop.f32.mrf.mxu3  ;;  %2553 = vmax.xlane.f32.xlu1 %v2552_v29 }
 0x71a   : > { %v2543_v11 = vsel %vm567_vm1, %v4662_v39, -inf }
 0x71f   : > { %v4664_v33 = vpop.f32.mrf.mxu1 }
 0x720   : > { %v2555_v27 = vsel %vm567_vm1, %v4664_v33, -inf }
 0x721   : > { %v4670_v9 = vpop.f32.mrf.mxu3  ;;  %2541 = vmax.xlane.f32.xlu1 %v2540_v53  ;;  %2556 = vmax.xlane.f32.xlu0 %v2555_v27 }
 0x722   : > { %v2564_v62 = vsel %vm567_vm1, %v4670_v9, -inf }
 0x723   : > { %2565 = vmax.xlane.f32.xlu2 %v2564_v62 }
 0x729   : > { %2559 = vmax.xlane.f32.xlu1 %v2558_v30  ;;  %2544 = vmax.xlane.f32.xlu0 %v2543_v11  ;;  %v4682_v3 = vpop.f32.mrf.mxu3 }
 0x72a   : > { %v2567_v4 = vsel %vm567_vm1, %v4682_v3, -inf }
 0x731   : > { %2568 = vmax.xlane.f32.xlu1 %v2567_v4  ;;  %2562 = vmax.xlane.f32.xlu0 %v2561_v57 }
 0x73a   : > { %v2530_v36 = vpop.xlane.xlu0 %2529 }
 0x73b   : > { %v2572_v31 = vsub.f32 %v4612_v32, %v2530_v36 }
 0x73d   : > { %v2590_v23 = vmul.f32 1.442695, %v2572_v31 }
 0x73e   : > { %v2524_v56 = vpop.xlane.xlu2 %2523 }
 0x73f   : > { %3538 = vpow2.f32 %v2590_v23  ;;  %v2570_v19 = vsub.f32 %v4618_v20, %v2524_v56 }
 0x741   : > { %v2586_v29 = vmul.f32 1.442695, %v2570_v19 }
 0x743   : > { %3540 = vpow2.f32 %v2586_v29 }
 0x745   : > { %v4690_v53 = vpop.eup %3538 }
 0x746   : > { %v2533_v27 = vpop.xlane.xlu2 %2532  ;;  %v2527_v44 = vpop.xlane.xlu1 %2526  ;;  %v2624_v62 = vsel %vm567_vm1, %v4690_v53, 0.0 }
 0x747   : > { %v2573_v30 = vsub.f32 %v4622_v16, %v2533_v27  ;;  %v2571_v11 = vsub.f32 %v4626_v25, %v2527_v44  ;;  %2625 = vadd.xlane.f32.xlu2 %v2624_v62 }
 0x749   : > { %v4696_v32 = vpop.eup %3540  ;;  %v2592_v4 = vmul.f32 1.442695, %v2573_v30  ;;  %v2588_v57 = vmul.f32 1.442695, %v2571_v11 }
 0x74a   : > { %v2618_v20 = vsel %vm567_vm1, %v4696_v32, 0.0 }
 0x74b   : > { %3542 = vpow2.f32 %v2592_v4  ;;  %2619 = vadd.xlane.f32.xlu1 %v2618_v20 }
 0x74c   : > { %3544 = vpow2.f32 %v2588_v57 }
 0x74e   : > { %v2548_v36 = vpop.xlane.xlu0 %2547 }
 0x74f   : > { %v2578_v31 = vsub.f32 %v4632_v21, %v2548_v36 }
 0x751   : > { %v4701_v23 = vpop.eup %3542  ;;  %v2602_v56 = vmul.f32 1.442695, %v2578_v31 }
 0x752   : > { %v4703_v16 = vpop.eup %3544  ;;  %v2627_v25 = vsel %vm567_vm1, %v4701_v23, 0.0 }
 0x753   : > { %3546 = vpow2.f32 %v2602_v56  ;;  %2628 = vadd.xlane.f32.xlu1 %v2627_v25  ;;  %v2621_v19 = vsel %vm567_vm1, %v4703_v16, 0.0 }
 0x754   : > { %2622 = vadd.xlane.f32.xlu0 %v2621_v19 }
 0x756   : > { %v2536_v29 = vpop.xlane.xlu0 %2535  ;;  %v2551_v27 = vpop.xlane.xlu2 %2550 }
 0x757   : > { %v2574_v44 = vsub.f32 %v4636_v58, %v2536_v29  ;;  %v2579_v21 = vsub.f32 %v4638_v47, %v2551_v27 }
 0x759   : > { %v4711_v62 = vpop.eup %3546  ;;  %v2594_v30 = vmul.f32 1.442695, %v2574_v44  ;;  %v2604_v11 = vmul.f32 1.442695, %v2579_v21 }
 0x75a   : > { %v2642_v4 = vsel %vm567_vm1, %v4711_v62, 0.0 }
 0x75b   : > { %3548 = vpow2.f32 %v2594_v30  ;;  %2643 = vadd.xlane.f32.xlu2 %v2642_v4 }
 0x75c   : > { %3550 = vpow2.f32 %v2604_v11 }
 0x75e   : > { %v2539_v57 = vpop.xlane.xlu2 %2538 }
 0x75f   : > { %v2575_v20 = vsub.f32 %v4644_v46, %v2539_v57 }
 0x761   : > { %v4716_v36 = vpop.eup %3548  ;;  %v2596_v31 = vmul.f32 1.442695, %v2575_v20 }
 0x762   : > { %v4718_v56 = vpop.eup %3550  ;;  %v2630_v58 = vsel %vm567_vm1, %v4716_v36, 0.0 }
 0x763   : > { %3552 = vpow2.f32 %v2596_v31  ;;  %2631 = vadd.xlane.f32.xlu2 %v2630_v58  ;;  %v2645_v47 = vsel %vm567_vm1, %v4718_v56, 0.0 }
 0x764   : > { %2646 = vadd.xlane.f32.xlu1 %v2645_v47 }
 0x769   : > { %v4724_v25 = vpop.eup %3552 }
 0x76a   : > { %v2633_v19 = vsel %vm567_vm1, %v4724_v25, 0.0 }
 0x76c   : > { %2634 = vadd.xlane.f32.xlu1 %v2633_v19 }
 0x78c   : > { %v2554_v46 = vpop.xlane.xlu1 %2553 }
 0x78d   : > { %v2580_v29 = vsub.f32 %v4658_v51, %v2554_v46 }
 0x78f   : > { %v2606_v27 = vmul.f32 1.442695, %v2580_v29 }
 0x791   : > { %3554 = vpow2.f32 %v2606_v27 }
 0x794   : > { %v2557_v44 = vpop.xlane.xlu0 %2556  ;;  %v2542_v21 = vpop.xlane.xlu1 %2541 }
 0x795   : > { %v2576_v30 = vsub.f32 %v4656_v61, %v2542_v21  ;;  %v2581_v57 = vsub.f32 %v4664_v33, %v2557_v44 }
 0x797   : > { %v4730_v11 = vpop.eup %3554  ;;  %v2598_v4 = vmul.f32 1.442695, %v2576_v30  ;;  %v2608_v31 = vmul.f32 1.442695, %v2581_v57 }
 0x798   : > { %4986 = vst [vmem:[#allocation3_spill] sm:$0xff] %v4730_v11  ;;  %v2648_v20 = vsel %vm567_vm1, %v4730_v11, 0.0 }
 0x799   : > { %2649 = vadd.xlane.f32.xlu0 %v2648_v20  ;;  %3556 = vpow2.f32 %v2598_v4 }
 0x79a   : > { %3558 = vpow2.f32 %v2608_v31 }
 0x79c   : > { %v2545_v58 = vpop.xlane.xlu0 %2544  ;;  %v2560_v47 = vpop.xlane.xlu1 %2559 }
 0x79d   : > { %v2577_v51 = vsub.f32 %v4662_v39, %v2545_v58  ;;  %v2582_v19 = vsub.f32 %v4674_v52, %v2560_v47 }
 0x79f   : > { %v2600_v46 = vmul.f32 1.442695, %v2577_v51  ;;  %v2610_v29 = vmul.f32 1.442695, %v2582_v19  ;;  %v4737_v61 = vpop.eup %3556  ;;  %v2566_v19 = vpop.xlane.xlu2 %2565 }
 0x7a0   : > { %v2636_v33 = vsel %vm567_vm1, %v4737_v61, 0.0  ;;  %v4742_v30 = vpop.eup %3558 }
 0x7a1   : > { %3560 = vpow2.f32 %v2600_v46  ;;  %2637 = vadd.xlane.f32.xlu0 %v2636_v33  ;;  %v2651_v31 = vsel %vm567_vm1, %v4742_v30, 0.0  ;;  %v3616_v33 = vld [vmem:[%s3877_s25 + $0x38] sm:$0xff] }
 0x7a2   : > { %3562 = vpow2.f32 %v2610_v29 }
 0x7a4   : > { %v2563_v27 = vpop.xlane.xlu0 %2562  ;;  %v2569_v21 = vpop.xlane.xlu1 %2568 }
 0x7a5   : > { %v2583_v44 = vsub.f32 %v4680_v22, %v2563_v27  ;;  %v2585_v57 = vsub.f32 %v4682_v3, %v2569_v21 }
 0x7a7   : > { %v4744_v39 = vpop.eup %3560  ;;  %v2612_v52 = vmul.f32 1.442695, %v2583_v44  ;;  %v2616_v58 = vmul.f32 1.442695, %v2585_v57  ;;  %v3617_v44 = vld [vmem:[%s3877_s25 + $0x30] sm:$0xff] }
 0x7a8   : > { %v4746_v4 = vpop.eup %3562  ;;  %v2639_v20 = vsel %vm567_vm1, %v4744_v39, 0.0 }
 0x7a9   : > { %3564 = vpow2.f32 %v2612_v52  ;;  %2640 = vadd.xlane.f32.xlu2 %v2639_v20  ;;  %v2654_v22 = vsel %vm567_vm1, %v4746_v4, 0.0  ;;  %2652 = vadd.xlane.f32.xlu0 %v2651_v31 }
 0x7aa   : > { %2655 = vadd.xlane.f32.xlu1 %v2654_v22  ;;  %3566 = vpow2.f32 %v2616_v58 }
 0x7af   : > { %v4755_v47 = vpop.eup %3564 }
 0x7b0   : > { %v2657_v3 = vsel %vm567_vm1, %v4755_v47, 0.0  ;;  %v4759_v51 = vpop.eup %3566 }
 0x7b1   : > { %v2663_v46 = vsel %vm567_vm1, %v4759_v51, 0.0 }
 0x7b2   : > { %2658 = vadd.xlane.f32.xlu1 %v2657_v3 }
 0x7ba   : > { %2664 = vadd.xlane.f32.xlu1 %v2663_v46  ;;  %v2626_v29 = vpop.xlane.xlu2 %2625 }
 0x7bb   : > { %3568 = vrcp.f32 %v2626_v29 }
 0x7bd   : > { %2894 = vrot.lane.b32.xlu0 %v3616_v33, %s3628_s27 }
 0x7be   : > { %v2620_v27 = vpop.xlane.xlu1 %2619 }
 0x7bf   : > { %3570 = vrcp.f32 %v2620_v27 }
 0x7c1   : > { %2869 = vrot.lane.b32.xlu2 %v3617_v44, %s3628_s27  ;;  %v3569_v52 = vpop.eup %3568 }
 0x7c2   : > { %v2684_v31 = vmul.f32 %v3569_v52, %v4690_v53 }
 0x7c4   : > { %v2700_v46 = vpack.c.bf16 %v2684_v31, %v2684_v31 }
 0x7c5   : > { %v3571_v20 = vpop.eup %3570 }
 0x7c6   : > { %v2629_v21 = vpop.xlane.xlu1 %2628  ;;  %v2682_v22 = vmul.f32 %v3571_v20, %v4696_v32 }
 0x7c7   : > { %v2623_v57 = vpop.xlane.xlu0 %2622  ;;  %3572 = vrcp.f32 %v2629_v21 }
 0x7c8   : > { %3574 = vrcp.f32 %v2623_v57  ;;  %v2698_v27 = vpack.c.bf16 %v2682_v22, %v2682_v22  ;;  %v2741_v57 = vunpack.c.l.b16 %v2700_v46 }
 0x7c9   : > { %1600 = vrot.lane.b32.xlu2 %v4313_v43, %s3629_s28 }
 0x7ca   : > { %v2716_v53 = vunpack.c.l.b16 %v2698_v27 }
 0x7cd   : > { %v3573_v58 = vpop.eup %3572 }
 0x7ce   : > { %v3575_v3 = vpop.eup %3574  ;;  %v2685_v29 = vmul.f32 %v3573_v58, %v4701_v23  ;;  %v2644_v33 = vpop.xlane.xlu2 %2643  ;;  %v2584_v23 = vsub.f32 %v4670_v9, %v2566_v19 }
 0x7cf   : > { %v2683_v44 = vmul.f32 %v3575_v3, %v4703_v16  ;;  %3576 = vrcp.f32 %v2644_v33 }
 0x7d0   : > { %v2701_v21 = vpack.c.bf16 %v2685_v29, %v2685_v29 }
 0x7d1   : > { %v2699_v11 = vpack.c.bf16 %v2683_v44, %v2683_v44  ;;  %1604 = vrot.lane.b32.xlu2 %v4325_v10, %s3629_s28  ;;  %v2614_v10 = vmul.f32 1.442695, %v2584_v23 }
 0x7d2   : > { %v2742_v43 = vunpack.c.l.b16 %v2701_v21 }
 0x7d3   : > { %v2717_v52 = vunpack.c.l.b16 %v2699_v11  ;;  %2819 = vrot.lane.b32.xlu1 %v4417_v24, %s3628_s27 }
 0x7d4   : > { %v2743_v32 = vpack.c.b16 %v2742_v43, %v2741_v57 }
 0x7d5   : > { %v2718_v20 = vpack.c.b16 %v2717_v52, %v2716_v53  ;;  %v3577_v22 = vpop.eup %3576 }
 0x7d6   : > { %3264 = vmatmul.msk.bf16.vlgmr.msra.gmra.mxu1 %vm567_vm1, %v2743_v32  ;;  %v2632_v16 = vpop.xlane.xlu2 %2631  ;;  %v2690_v11 = vmul.f32 %v3577_v22, %v4711_v62 }
 0x7d7   : > { %3263 = vmatmul.msk.bf16.vlgmr.msra.gmra.mxu0 %vm567_vm1, %v2718_v20  ;;  %v2647_v31 = vpop.xlane.xlu1 %2646 }
 0x7d8   : > { %3578 = vrcp.f32 %v2647_v31  ;;  %v2706_v9 = vpack.c.bf16 %v2690_v11, %v2690_v11 }
 0x7d9   : > { %1608 = vrot.lane.b32.xlu2 %v4335_v6, %s3629_s28  ;;  %3580 = vrcp.f32 %v2632_v16 }
 0x7da   : > { %3582 = vpow2.f32 %v2614_v10  ;;  %v4788_v6 = vunpack.c.l.b16 %v2706_v9 }
 0x7db   : > { %1612 = vrot.lane.b32.xlu1 %v4375_v41, %s3629_s28 }
 0x7de   : > { %v3579_v24 = vpop.eup %3578 }
 0x7df   : > { %v2691_v19 = vmul.f32 %v3579_v24, %v4718_v56  ;;  %v2635_v58 = vpop.xlane.xlu1 %2634  ;;  %v3581_v3 = vpop.eup %3580 }
 0x7e0   : > { %3584 = vrcp.f32 %v2635_v58  ;;  %v2686_v29 = vmul.f32 %v3581_v3, %v4716_v36  ;;  %v4795_v41 = vpop.eup %3582 }
 0x7e1   : > { %v2707_v46 = vpack.c.bf16 %v2691_v19, %v2691_v19  ;;  %1614 = vrot.lane.b32.xlu2 %v4377_v42, %s3629_s28  ;;  %v2660_v42 = vsel %vm567_vm1, %v4795_v41, 0.0 }
 0x7e2   : > { %v2702_v27 = vpack.c.bf16 %v2686_v29, %v2686_v29 }
 0x7e3   : > { %v4791_v62 = vunpack.c.l.b16 %v2707_v46  ;;  %1618 = vrot.lane.b32.xlu1 %v4323_v13, %s3629_s28 }
 0x7e4   : > { %v2766_v36 = vunpack.c.l.b16 %v2702_v27  ;;  %v4987_v27 = vld [vmem:[#allocation3_spill] sm:$0xff] }
 0x7e5   : > { %v2818_v56 = vpack.c.b16 %v4791_v62, %v4788_v6 }
 0x7e6   : > { %v3585_v33 = vpop.eup %3584 }
 0x7e7   : > { %v2687_v44 = vmul.f32 %v3585_v33, %v4724_v25  ;;  %2661 = vadd.xlane.f32.xlu0 %v2660_v42 }
 0x7e9   : > { %v2703_v21 = vpack.c.bf16 %v2687_v44, %v2687_v44  ;;  %1620 = vrot.lane.b32.xlu2 %v4343_v12, %s3629_s28 }
 0x7eb   : > { %v2767_v57 = vunpack.c.l.b16 %v2703_v21  ;;  %1624 = vrot.lane.b32.xlu1 %v4347_v54, %s3629_s28 }
 0x7ed   : > { %v2768_v13 = vpack.c.b16 %v2767_v57, %v2766_v36 }
 0x7ef   : > { %3265 = vmatmul.msk.bf16.vlgmr.msra.gmra.mxu2 %vm567_vm1, %v2768_v13 }
 0x7f1   : > { %1626 = vrot.lane.b32.xlu2 %v4355_v2, %s3629_s28 }
 0x7f3   : > { %1630 = vrot.lane.b32.xlu1 %v4381_v28, %s3629_s28 }
 0x7f9   : > { %2265 = vrot.lane.b32.xlu2 %v4594_v0, %s3630_s29 }
 0x7fb   : > { %2269 = vrot.lane.b32.xlu1 %v4592_v8, %s3630_s29  ;;  %2844 = vrot.lane.b32.xlu0 %v4488_v18, %s3628_s27 }
 0x801   : > { %2271 = vrot.lane.b32.xlu2 %v4596_v50, %s3630_s29 }
 0x803   : > { %2275 = vrot.lane.b32.xlu1 %v4610_v48, %s3630_s29  ;;  %1602 = vrot.lane.b32.xlu0 %v4317_v55, %s3629_s28 }
 0x809   : > { %2277 = vrot.lane.b32.xlu2 %v4648_v60, %s3630_s29 }
 0x80b   : > { %2281 = vrot.lane.b32.xlu1 %v4602_v5, %s3630_s29  ;;  %1606 = vrot.lane.b32.xlu0 %v4333_v40, %s3629_s28 }
 0x80c   : > { %v4829_v12 = vpop.xlane.xlu0 %2649 }
 0x811   : > { %2283 = vrot.lane.b32.xlu2 %v4608_v35, %s3630_s29 }
 0x813   : > { %2287 = vrot.lane.b32.xlu1 %v4606_v37, %s3630_s29  ;;  %1610 = vrot.lane.b32.xlu0 %v4345_v17, %s3629_s28 }
 0x814   : > { %v2638_v55 = vpop.xlane.xlu0 %2637 }
 0x815   : > { %3586 = vrcp.f32 %v2638_v55 }
 0x819   : > { %2289 = vrot.lane.b32.xlu2 %v4616_v63, %s3630_s29 }
 0x81b   : > { %2293 = vrot.lane.b32.xlu1 %v4652_v34, %s3630_s29  ;;  %1616 = vrot.lane.b32.xlu0 %v4321_v49, %s3629_s28  ;;  %v3587_v54 = vpop.eup %3586 }
 0x81c   : > { %v2641_v40 = vpop.xlane.xlu2 %2640  ;;  %v2688_v28 = vmul.f32 %v3587_v54, %v4737_v61  ;;  %v2653_v48 = vpop.xlane.xlu0 %2652 }
 0x81d   : > { %3588 = vrcp.f32 %v2641_v40  ;;  %v2656_v2 = vpop.xlane.xlu1 %2655 }
 0x81e   : > { %3590 = vrcp.f32 %v2656_v2  ;;  %v2704_v18 = vpack.c.bf16 %v2688_v28, %v2688_v28 }
 0x820   : > { %v2791_v37 = vunpack.c.l.b16 %v2704_v18 }
 0x821   : > { %2295 = vrot.lane.b32.xlu2 %v4654_v26, %s3630_s29 }
 0x823   : > { %v3589_v17 = vpop.eup %3588  ;;  %1622 = vrot.lane.b32.xlu0 %v4349_v1, %s3629_s28 }
 0x824   : > { %v2689_v8 = vmul.f32 %v3589_v17, %v4744_v39  ;;  %v2870_v0 = vpop.permute.xlu2 %2869  ;;  %v3591_v49 = vpop.eup %3590 }
 0x825   : > { %v2659_v50 = vpop.xlane.xlu1 %2658  ;;  %2882 = vmatpush.bf16.msrb.mxu2 %v2870_v0  ;;  %v2694_v63 = vmul.f32 %v3591_v49, %v4746_v4 }
 0x826   : > { %v2705_v5 = vpack.c.bf16 %v2689_v8, %v2689_v8  ;;  %3592 = vrcp.f32 %v2659_v50 }
 0x827   : > { %v2710_v1 = vpack.c.bf16 %v2694_v63, %v2694_v63 }
 0x828   : > { %v2792_v35 = vunpack.c.l.b16 %v2705_v5 }
 0x829   : > { %v2866_v43 = vunpack.c.l.b16 %v2710_v1 }
 0x82a   : > { %v2793_v60 = vpack.c.b16 %v2792_v35, %v2791_v37 }
 0x82b   : > { %1628 = vrot.lane.b32.xlu0 %v4379_v15, %s3629_s28 }
 0x82c   : > { %v3593_v34 = vpop.eup %3592  ;;  %v1601_v26 = vpop.permute.xlu2 %1600  ;;  %3266 = vmatmul.msk.bf16.vlgmr.msra.gmra.mxu3 %vm567_vm1, %v2793_v60 }
 0x82d   : > { %v2695_v25 = vmul.f32 %v3593_v34, %v4755_v47  ;;  %1649 = vst.msk [vmem:[#allocation2] sm:$0xff] %vm1648_vm2, %v1601_v26  ;;  %v2665_v47 = vpop.xlane.xlu1 %2664 }
 0x82e   : > { %3594 = vrcp.f32 %v2665_v47 }
 0x82f   : > { %v2711_v61 = vpack.c.bf16 %v2695_v25, %v2695_v25  ;;  %v2895_v39 = vpop.permute.xlu0 %2894  ;;  %3596 = vrcp.f32 %v2653_v48 }
 0x830   : > { %2907 = vmatpush.bf16.msrb.mxu3 %v2895_v39 }
 0x831   : > { %v2867_v53 = vunpack.c.l.b16 %v2711_v61 }
 0x833   : > { %v2868_v4 = vpack.c.b16 %v2867_v53, %v2866_v43  ;;  %2267 = vrot.lane.b32.xlu0 %v4598_v59, %s3630_s29 }
 0x834   : > { %v1605_v52 = vpop.permute.xlu2 %1604  ;;  %v3595_v22 = vpop.eup %3594 }
 0x835   : > { %1651 = vst.msk [vmem:[#allocation2 + $0x10] sm:$0xff] %vm1648_vm2, %v1605_v52  ;;  %3269 = vmatmul.msk.bf16.vlgmr.msrb.gmra.mxu2 %vm567_vm1, %v2868_v4  ;;  %v2697_v24 = vmul.f32 %v3595_v22, %v4759_v51  ;;  %v3597_v9 = vpop.eup %3596 }
 0x836   : > { %v2693_v29 = vmul.f32 %v3597_v9, %v4742_v30 }
 0x837   : > { %v2713_v3 = vpack.c.bf16 %v2697_v24, %v2697_v24 }
 0x838   : > { %v2709_v21 = vpack.c.bf16 %v2693_v29, %v2693_v29 }
 0x839   : > { %v2892_v42 = vunpack.c.l.b16 %v2713_v3 }
 0x83b   : > { %2273 = vrot.lane.b32.xlu0 %v4604_v14, %s3630_s29 }
 0x83c   : > { %v1609_v15 = vpop.permute.xlu2 %1608 }
 0x83d   : > { %1653 = vst.msk [vmem:[#allocation2 + $0x20] sm:$0xff] %vm1648_vm2, %v1609_v15 }
 0x843   : > { %2279 = vrot.lane.b32.xlu0 %v4650_v38, %s3630_s29 }
 0x844   : > { %v1615_v32 = vpop.permute.xlu2 %1614 }
 0x845   : > { %1656 = vst.msk [vmem:[#allocation2 + $0x38] sm:$0xff] %vm1648_vm2, %v1615_v32  ;;  %v2820_v20 = vpop.permute.xlu1 %2819 }
 0x846   : > { %2832 = vmatpush.bf16.msrb.mxu0 %v2820_v20 }
 0x849   : > { %3267 = vmatmul.msk.bf16.vlgmr.msrb.gmra.mxu0 %vm567_vm1, %v2818_v56 }
 0x84b   : > { %2285 = vrot.lane.b32.xlu0 %v4600_v7, %s3630_s29 }
 0x84c   : > { %v1621_v59 = vpop.permute.xlu2 %1620 }
 0x84d   : > { %1659 = vst.msk [vmem:[#allocation2 + $0x50] sm:$0xff] %vm1648_vm2, %v1621_v59  ;;  %v1613_v14 = vpop.permute.xlu1 %1612 }
 0x84e   : > { %1655 = vst.msk [vmem:[#allocation2 + $0x30] sm:$0xff] %vm1648_vm2, %v1613_v14 }
 0x853   : > { %v2759_v38 = vpop.f32.mrf.mxu1  ;;  %2291 = vrot.lane.b32.xlu0 %v4630_v45, %s3630_s29 }
 0x854   : > { %v2734_v23 = vpop.f32.mrf.mxu0  ;;  %v1627_v16 = vpop.permute.xlu2 %1626  ;;  %2934 = vrot.lane.b32.xlu2 %v2759_v38, %s3631_s30 }
 0x855   : > { %1662 = vst.msk [vmem:[#allocation2 + $0x68] sm:$0xff] %vm1648_vm2, %v1627_v16  ;;  %v1619_v31 = vpop.permute.xlu1 %1618 }
 0x856   : > { %1658 = vst.msk [vmem:[#allocation2 + $0x48] sm:$0xff] %vm1648_vm2, %v1619_v31 }
 0x85a   : > { %v2662_v7 = vpop.xlane.xlu0 %2661 }
 0x85b   : > { %3598 = vrcp.f32 %v2662_v7  ;;  %2930 = vrot.lane.b32.xlu0 %v2734_v23, %s3631_s30  ;;  %v2761_v6 = vpop.f32.mrf.mxu1 }
 0x85c   : > { %v2736_v10 = vpop.f32.mrf.mxu0  ;;  %v2266_v45 = vpop.permute.xlu2 %2265  ;;  %3600 = vrcp.f32 %v4829_v12 }
 0x85d   : > { %2314 = vst.msk [vmem:[#allocation2] sm:$0xff] %vm2313_vm3, %v2266_v45  ;;  %2932 = vrot.lane.b32.xlu1 %v2736_v10, %s3631_s30  ;;  %v1625_v11 = vpop.permute.xlu1 %1624 }
 0x85e   : > { %1661 = vst.msk [vmem:[#allocation2 + $0x60] sm:$0xff] %vm1648_vm2, %v1625_v11 }
 0x861   : > { %v3599_v19 = vpop.eup %3598 }
 0x862   : > { %v3601_v58 = vpop.eup %3600  ;;  %v2696_v46 = vmul.f32 %v3599_v19, %v4795_v41  ;;  %v2842_v41 = vunpack.c.l.b16 %v2709_v21 }
 0x863   : > { %2936 = vrot.lane.b32.xlu0 %v2761_v6, %s3631_s30  ;;  %v2692_v44 = vmul.f32 %v3601_v58, %v4987_v27 }
 0x864   : > { %v2272_v62 = vpop.permute.xlu2 %2271  ;;  %v2712_v56 = vpack.c.bf16 %v2696_v46, %v2696_v46 }
 0x865   : > { %v1631_v33 = vpop.permute.xlu1 %1630  ;;  %v2708_v57 = vpack.c.bf16 %v2692_v44, %v2692_v44 }
 0x866   : > { %1664 = vst.msk [vmem:[#allocation2 + $0x78] sm:$0xff] %vm1648_vm2, %v1631_v33  ;;  %v2891_v51 = vunpack.c.l.b16 %v2712_v56 }
 0x867   : > { %v2841_v12 = vunpack.c.l.b16 %v2708_v57 }
 0x868   : > { %v2893_v36 = vpack.c.b16 %v2892_v42, %v2891_v51 }
 0x869   : > { %v2843_v40 = vpack.c.b16 %v2842_v41, %v2841_v12 }
 0x86a   : > { %3270 = vmatmul.msk.bf16.vlgmr.msrb.gmra.mxu3 %vm567_vm1, %v2893_v36 }
 0x86c   : > { %v2278_v13 = vpop.permute.xlu2 %2277 }
 0x86d   : > { %2320 = vst.msk [vmem:[#allocation2 + $0x30] sm:$0xff] %vm2313_vm3, %v2278_v13  ;;  %v2270_v30 = vpop.permute.xlu1 %2269  ;;  %v2845_v55 = vpop.permute.xlu0 %2844 }
 0x86e   : > { %2316 = vst.msk [vmem:[#allocation2 + $0x10] sm:$0xff] %vm2313_vm3, %v2270_v30  ;;  %2857 = vmatpush.bf16.msrb.mxu1 %v2845_v55 }
 0x871   : > { %3268 = vmatmul.msk.bf16.vlgmr.msrb.gmra.mxu1 %vm567_vm1, %v2843_v40 }
 0x872   : > { %v2784_v53 = vpop.f32.mrf.mxu2 }
 0x874   : > { %v2284_v54 = vpop.permute.xlu2 %2283 }
 0x875   : > { %2323 = vst.msk [vmem:[#allocation2 + $0x48] sm:$0xff] %vm2313_vm3, %v2284_v54  ;;  %v1603_v2 = vpop.permute.xlu0 %1602  ;;  %v2276_v18 = vpop.permute.xlu1 %2275 }
 0x876   : > { %1650 = vst.msk [vmem:[#allocation2 + $0x8] sm:$0xff] %vm1648_vm2, %v1603_v2 }
 0x87a   : > { %v2786_v47 = vpop.f32.mrf.mxu2 }
 0x87c   : > { %v2290_v28 = vpop.permute.xlu2 %2289 }
 0x87d   : > { %2326 = vst.msk [vmem:[#allocation2 + $0x60] sm:$0xff] %vm2313_vm3, %v2290_v28  ;;  %v1607_v17 = vpop.permute.xlu0 %1606  ;;  %v2282_v50 = vpop.permute.xlu1 %2281 }
 0x87e   : > { %1652 = vst.msk [vmem:[#allocation2 + $0x18] sm:$0xff] %vm1648_vm2, %v1607_v17 }
 0x87f   : > { %2317 = vst.msk [vmem:[#allocation2 + $0x18] sm:$0xff] %vm2313_vm3, %v2272_v62 }
 0x884   : > { %v2296_v8 = vpop.permute.xlu2 %2295 }
 0x885   : > { %2329 = vst.msk [vmem:[#allocation2 + $0x78] sm:$0xff] %vm2313_vm3, %v2296_v8  ;;  %v1611_v0 = vpop.permute.xlu0 %1610  ;;  %v2288_v5 = vpop.permute.xlu1 %2287 }
 0x886   : > { %1654 = vst.msk [vmem:[#allocation2 + $0x28] sm:$0xff] %vm1648_vm2, %v1611_v0 }
 0x887   : > { %2319 = vst.msk [vmem:[#allocation2 + $0x28] sm:$0xff] %vm2313_vm3, %v2276_v18 }
 0x88d   : > { %v1617_v49 = vpop.permute.xlu0 %1616  ;;  %v2294_v48 = vpop.permute.xlu1 %2293 }
 0x88e   : > { %1657 = vst.msk [vmem:[#allocation2 + $0x40] sm:$0xff] %vm1648_vm2, %v1617_v49 }
 0x88f   : > { %2322 = vst.msk [vmem:[#allocation2 + $0x40] sm:$0xff] %vm2313_vm3, %v2282_v50 }
 0x895   : > { %v1623_v37 = vpop.permute.xlu0 %1622 }
 0x896   : > { %1660 = vst.msk [vmem:[#allocation2 + $0x58] sm:$0xff] %vm1648_vm2, %v1623_v37 }
 0x897   : > { %2325 = vst.msk [vmem:[#allocation2 + $0x58] sm:$0xff] %vm2313_vm3, %v2288_v5 }
 0x89d   : > { %v1629_v35 = vpop.permute.xlu0 %1628 }
 0x89e   : > { %1663 = vst.msk [vmem:[#allocation2 + $0x70] sm:$0xff] %vm1648_vm2, %v1629_v35 }
 0x89f   : > { %2328 = vst.msk [vmem:[#allocation2 + $0x70] sm:$0xff] %vm2313_vm3, %v2294_v48 }
 0x8a5   : > { %v2268_v63 = vpop.permute.xlu0 %2267 }
 0x8a6   : > { %2315 = vst.msk [vmem:[#allocation2 + $0x8] sm:$0xff] %vm2313_vm3, %v2268_v63 }
 0x8ad   : > { %v2274_v60 = vpop.permute.xlu0 %2273 }
 0x8ae   : > { %v2935_v34 = vpop.permute.xlu2 %2934  ;;  %2318 = vst.msk [vmem:[#allocation2 + $0x20] sm:$0xff] %vm2313_vm3, %v2274_v60 }
 0x8af   : > { %2981 = vst.msk [vmem:[#allocation2 + $0x10] sm:$0xff] %vm2978_vm4, %v2935_v34  ;;  %v2809_v32 = vpop.f32.mrf.mxu3 }
 0x8b5   : > { %v2280_v26 = vpop.permute.xlu0 %2279 }
 0x8b6   : > { %v2997_v1 = vld [vmem:[#allocation2 + $0x10] sm:$0xff]  ;;  %2321 = vst.msk [vmem:[#allocation2 + $0x38] sm:$0xff] %vm2313_vm3, %v2280_v26 }
 0x8b7   : > { %v3013_v25 = vpack.c.bf16 %v2997_v1, %v2997_v1  ;;  %v2811_v22 = vpop.f32.mrf.mxu3 }
 0x8b8   : > { %v2884_v16 = vpop.f32.mrf.mxu2 }
 0x8b9   : > { %3030 = vst.msk [vmem:[%s4914_s6 + $0x8] sm:$0xf] %vm3027_vm5, %v3013_v25 }
 0x8bd   : > { %v2286_v61 = vpop.permute.xlu0 %2285 }
 0x8be   : > { %2324 = vst.msk [vmem:[#allocation2 + $0x50] sm:$0xff] %vm2313_vm3, %v2286_v61 }
 0x8c0   : > { %v2886_v9 = vpop.f32.mrf.mxu2 }
 0x8c5   : > { %v2292_v39 = vpop.permute.xlu0 %2291 }
 0x8c6   : > { %v2834_v43 = vpop.f32.mrf.mxu0  ;;  %2327 = vst.msk [vmem:[#allocation2 + $0x68] sm:$0xff] %vm2313_vm3, %v2292_v39 }
 0x8c7   : > { %2946 = vrot.lane.b32.xlu2 %v2834_v43, %s3631_s30 }
 0x8cd   : > { %v2931_v4 = vpop.permute.xlu0 %2930 }
 0x8ce   : > { %v2836_v52 = vpop.f32.mrf.mxu0  ;;  %2979 = vst.msk [vmem:[#allocation2] sm:$0xff] %vm2978_vm4, %v2931_v4 }
 0x8cf   : > { %2948 = vrot.lane.b32.xlu0 %v2836_v52, %s3631_s30  ;;  %v2933_v15 = vpop.permute.xlu1 %2932 }
 0x8d0   : > { %2980 = vst.msk [vmem:[#allocation2 + $0x8] sm:$0xff] %vm2978_vm4, %v2933_v15 }
 0x8d5   : > { %v2995_v20 = vld [vmem:[#allocation2] sm:$0xff]  ;;  %v2937_v59 = vpop.permute.xlu0 %2936 }
 0x8d6   : > { %v3011_v14 = vpack.c.bf16 %v2995_v20, %v2995_v20  ;;  %2982 = vst.msk [vmem:[#allocation2 + $0x18] sm:$0xff] %vm2978_vm4, %v2937_v59 }
 0x8d7   : > { %v2996_v38 = vld [vmem:[#allocation2 + $0x8] sm:$0xff]  ;;  %2942 = vrot.lane.b32.xlu0 %v2809_v32, %s3631_s30 }
 0x8d8   : > { %v3012_v23 = vpack.c.bf16 %v2996_v38, %v2996_v38  ;;  %3028 = vst.msk [vmem:[%s4914_s6] sm:$0xf] %vm3027_vm5, %v3011_v14 }
 0x8da   : > { %3029 = vst.msk [vmem:[%s4914_s6 + $0x4] sm:$0xf] %vm3027_vm5, %v3012_v23 }
 0x8dd   : > { %v2998_v31 = vld [vmem:[#allocation2 + $0x18] sm:$0xff] }
 0x8de   : > { %v3014_v7 = vpack.c.bf16 %v2998_v31, %v2998_v31 }
 0x8df   : > { %2954 = vrot.lane.b32.xlu0 %v2884_v16, %s3631_s30 }
 0x8e0   : > { %3031 = vst.msk [vmem:[%s4914_s6 + $0xc] sm:$0xf] %vm3027_vm5, %v3014_v7 }
 0x8ed   : > { %v2909_v10 = vpop.f32.mrf.mxu3 }
 0x8ee   : > { %v2859_v45 = vpop.f32.mrf.mxu1 }
 0x8ef   : > { %2950 = vrot.lane.b32.xlu1 %v2859_v45, %s3631_s30 }
 0x8f5   : > { %v2911_v11 = vpop.f32.mrf.mxu3 }
 0x8f6   : > { %v2861_v24 = vpop.f32.mrf.mxu1  ;;  %2960 = vrot.lane.b32.xlu0 %v2911_v11, %s3631_s30 }
 0x8f7   : > { %2938 = vrot.lane.b32.xlu1 %v2784_v53, %s3631_s30  ;;  %2952 = vrot.lane.b32.xlu2 %v2861_v24, %s3631_s30 }
 0x8ff   : > { %2944 = vrot.lane.b32.xlu1 %v2811_v22, %s3631_s30  ;;  %2940 = vrot.lane.b32.xlu2 %v2786_v47, %s3631_s30 }
 0x907   : > { %2956 = vrot.lane.b32.xlu1 %v2886_v9, %s3631_s30  ;;  %2958 = vrot.lane.b32.xlu2 %v2909_v10, %s3631_s30 }
 0x921   : > { %v2947_v19 = vpop.permute.xlu2 %2946 }
 0x922   : > { %2987 = vst.msk [vmem:[#allocation2 + $0x40] sm:$0xff] %vm2978_vm4, %v2947_v19 }
 0x929   : > { %v3003_v58 = vld [vmem:[#allocation2 + $0x40] sm:$0xff] }
 0x92a   : > { %v3019_v3 = vpack.c.bf16 %v3003_v58, %v3003_v58 }
 0x92c   : > { %3036 = vst.msk [vmem:[%s4914_s6 + $0x20] sm:$0xf] %vm3027_vm5, %v3019_v3 }
 0x941   : > { %v2949_v46 = vpop.permute.xlu0 %2948 }
 0x942   : > { %2988 = vst.msk [vmem:[#allocation2 + $0x48] sm:$0xff] %vm2978_vm4, %v2949_v46 }
 0x949   : > { %v3004_v6 = vld [vmem:[#allocation2 + $0x48] sm:$0xff]  ;;  %v2943_v29 = vpop.permute.xlu0 %2942 }
 0x94a   : > { %v3020_v62 = vpack.c.bf16 %v3004_v6, %v3004_v6  ;;  %2985 = vst.msk [vmem:[#allocation2 + $0x30] sm:$0xff] %vm2978_vm4, %v2943_v29 }
 0x94c   : > { %3037 = vst.msk [vmem:[%s4914_s6 + $0x24] sm:$0xf] %vm3027_vm5, %v3020_v62 }
 0x951   : > { %v3001_v56 = vld [vmem:[#allocation2 + $0x30] sm:$0xff]  ;;  %v2955_v33 = vpop.permute.xlu0 %2954  ;;  %v2953_v44 = vpop.permute.xlu2 %2952 }
 0x952   : > { %v3017_v27 = vpack.c.bf16 %v3001_v56, %v3001_v56  ;;  %2991 = vst.msk [vmem:[#allocation2 + $0x60] sm:$0xff] %vm2978_vm4, %v2955_v33 }
 0x953   : > { %2990 = vst.msk [vmem:[#allocation2 + $0x58] sm:$0xff] %vm2978_vm4, %v2953_v44 }
 0x954   : > { %3034 = vst.msk [vmem:[%s4914_s6 + $0x18] sm:$0xf] %vm3027_vm5, %v3017_v27 }
 0x959   : > { %v3007_v42 = vld [vmem:[#allocation2 + $0x60] sm:$0xff]  ;;  %v2941_v36 = vpop.permute.xlu2 %2940 }
 0x95a   : > { %v3023_v51 = vpack.c.bf16 %v3007_v42, %v3007_v42  ;;  %v3006_v21 = vld [vmem:[#allocation2 + $0x58] sm:$0xff]  ;;  %2984 = vst.msk [vmem:[#allocation2 + $0x28] sm:$0xff] %vm2978_vm4, %v2941_v36 }
 0x95b   : > { %v3022_v57 = vpack.c.bf16 %v3006_v21, %v3006_v21 }
 0x95c   : > { %3040 = vst.msk [vmem:[%s4914_s6 + $0x30] sm:$0xf] %vm3027_vm5, %v3023_v51 }
 0x95d   : > { %3039 = vst.msk [vmem:[%s4914_s6 + $0x2c] sm:$0xf] %vm3027_vm5, %v3022_v57 }
 0x961   : > { %v3000_v41 = vld [vmem:[#allocation2 + $0x28] sm:$0xff]  ;;  %v2959_v13 = vpop.permute.xlu2 %2958  ;;  %v2951_v30 = vpop.permute.xlu1 %2950 }
 0x962   : > { %v3016_v12 = vpack.c.bf16 %v3000_v41, %v3000_v41  ;;  %2993 = vst.msk [vmem:[#allocation2 + $0x70] sm:$0xff] %vm2978_vm4, %v2959_v13 }
 0x963   : > { %2989 = vst.msk [vmem:[#allocation2 + $0x50] sm:$0xff] %vm2978_vm4, %v2951_v30 }
 0x964   : > { %3033 = vst.msk [vmem:[%s4914_s6 + $0x14] sm:$0xf] %vm3027_vm5, %v3016_v12 }
 0x968   : > { %v2961_v55 = vpop.permute.xlu0 %2960 }
 0x969   : > { %v3009_v40 = vld [vmem:[#allocation2 + $0x70] sm:$0xff]  ;;  %2994 = vst.msk [vmem:[#allocation2 + $0x78] sm:$0xff] %vm2978_vm4, %v2961_v55  ;;  %v2939_v54 = vpop.permute.xlu1 %2938 }
 0x96a   : > { %v3025_v2 = vpack.c.bf16 %v3009_v40, %v3009_v40  ;;  %v3005_v28 = vld [vmem:[#allocation2 + $0x50] sm:$0xff]  ;;  %2983 = vst.msk [vmem:[#allocation2 + $0x20] sm:$0xff] %vm2978_vm4, %v2939_v54 }
 0x96b   : > { %v3021_v17 = vpack.c.bf16 %v3005_v28, %v3005_v28 }
 0x96c   : > { %3042 = vst.msk [vmem:[%s4914_s6 + $0x38] sm:$0xf] %vm3027_vm5, %v3025_v2 }
 0x96d   : > { %3038 = vst.msk [vmem:[%s4914_s6 + $0x28] sm:$0xf] %vm3027_vm5, %v3021_v17 }
 0x970   : > { %v3010_v18 = vld [vmem:[#allocation2 + $0x78] sm:$0xff] }
 0x971   : > { %v3026_v8 = vpack.c.bf16 %v3010_v18, %v3010_v18  ;;  %v2999_v0 = vld [vmem:[#allocation2 + $0x20] sm:$0xff]  ;;  %v2945_v50 = vpop.permute.xlu1 %2944 }
 0x972   : > { %v3015_v49 = vpack.c.bf16 %v2999_v0, %v2999_v0  ;;  %2986 = vst.msk [vmem:[#allocation2 + $0x38] sm:$0xff] %vm2978_vm4, %v2945_v50 }
 0x973   : > { %3043 = vst.msk [vmem:[%s4914_s6 + $0x3c] sm:$0xf] %vm3027_vm5, %v3026_v8 }
 0x974   : > { %3032 = vst.msk [vmem:[%s4914_s6 + $0x10] sm:$0xf] %vm3027_vm5, %v3015_v49 }
 0x979   : > { %v3002_v5 = vld [vmem:[#allocation2 + $0x38] sm:$0xff]  ;;  %v2957_v37 = vpop.permute.xlu1 %2956 }
 0x97a   : > { %v3018_v35 = vpack.c.bf16 %v3002_v5, %v3002_v5  ;;  %2992 = vst.msk [vmem:[#allocation2 + $0x68] sm:$0xff] %vm2978_vm4, %v2957_v37 }
 0x97c   : > { %3035 = vst.msk [vmem:[%s4914_s6 + $0x1c] sm:$0xf] %vm3027_vm5, %v3018_v35 }
 0x981   : > { %v3008_v48 = vld [vmem:[#allocation2 + $0x68] sm:$0xff] }
 0x982   : > { %v3024_v63 = vpack.c.bf16 %v3008_v48, %v3008_v48 }
 0x984   : > { %3041 = vst.msk [vmem:[%s4914_s6 + $0x34] sm:$0xf] %vm3027_vm5, %v3024_v63 }
 0x985 PF: > { %s13_s12 = sadd.s32 1, %s3624_s12  }
 0x986   : > { %p10_p4 = scmp.ge.s32.totalorder %s13_s12, 4  }
 0x988   :  { %12 = sbr.rel (!%p10_p4) target bundleno = 1 (0x1), region = 68 }

// kernel: attention_factorize_dot_prod.6
= control target key start
LH: loop header
LB: loop body
LE: loop exit
PB: predicated region body
PF: predicated region fallthrough
CT: control target
= control target key end

     0   :  { %s4824_s12 = smov 0   ;;  %s6785_s0 = inlined_call_operand.vmem [shape: bf16[32,8,16], index: 0, kind: input, shape index: {}]   ;;  %s6786_s1 = inlined_call_operand.vmem [shape: bf16[32,8,16], index: 1, kind: input, shape index: {}]   ;;  %s6787_s2 = inlined_call_operand.vmem [shape: bf16[32,8,16], index: 2, kind: input, shape index: {}]   ;;  %s6788_s3 = inlined_call_operand.vmem [shape: bf16[32,8,16], index: 3, kind: output, shape index: {}]  }
   0x1 LB: > { %s4338_s13 = sadd.s32 4294967295, %s4796_s12   ;;  %p4342_p0 = scmp.ge.s32.totalorder %s4796_s12, 1  ;;  %s4796_s12 = sphi %s4824_s12, %s13_s12  }
   0x2   : > { %p160_p1 = scmp.lt.s32.totalorder %s4796_s12, 3 }
   0x4   : > { %p161_p2 = pnand %p4342_p0, %p160_p1 }
   0x6   : > { %164 = sbr.rel (%p161_p2) target bundleno = 2386 (0x952), region = 32 }
   0xb   : > { %s4343_s14 = sshll.u32 %s4338_s13, 4  ;;  %vm315_vm0 = vcmask 31744   ;;  %s4798_s22 = smov 124   ;;  %vm620_vm1 = vcmask 64512   ;;  %vm816_vm2 = vcmask 1043456   ;;  %vm2238_vm3 = vcmask 64544  }
   0xc   : > { %p195_p3 = scmp.lt.s32.totalorder %s4343_s14, 31  ;;  %s4799_s26 = smov 120   ;;  %vm3215_vm4 = vcmask 97344   ;;  %vm4192_vm5 = vcmask 130144   ;;  %vm4241_vm6 = vcmask 125952  }
   0xd   : > { %s4800_s27 = smov 116   ;;  %s4801_s28 = smov 4  }
   0xe   : > { %s6972_s14 = smov (!%p195_p3, %s4343_s14), 31  ;;  %s4802_s29 = smov 8  }
   0xf   : > { %s4832_s15 = sshll.u32 %s6972_s14, 2  ;;  %s4803_s30 = smov 12  }
  0x10   : > { %s4838_s18 = scalar_lea.vmem %s6786_s1, %s4832_s15  ;;  %s4851_s21 = scalar_lea.vmem %s6785_s0, %s4832_s15 }
  0x11   : > { %v4841_v0 = vld [vmem:[%s4838_s18] sm:$0xf]  ;;  %v4844_v1 = vld [vmem:[%s4838_s18 + $0x4] sm:$0xf]  ;;  %v285_v2 = vld [vmem:[%s4838_s18 + $0x8] sm:$0xf]  ;;  %s5222_s25 = scalar_lea.vmem %s6787_s2, %s4832_s15  ;;  %s6731_s6 = scalar_lea.vmem %s6788_s3, %s4832_s15 }
  0x12   : > { %v320_v3 = vsel %vm315_vm0, %v4841_v0, 0  ;;  %v339_v4 = vsel %vm315_vm0, %v4844_v1, 0  ;;  %v286_v5 = vld [vmem:[%s4838_s18 + $0xc] sm:$0xf]  ;;  %v4482_v6 = vld [vmem:[%s4851_s21] sm:$0xff]   ;;  %v358_v8 = vsel %vm315_vm0, %v285_v2, 0  ;;  %v1198_v9 = vunpack.c.l.b16 %v285_v2 }
  0x13   : > { %v4513_v7 = vld [vmem:[%s4851_s21 + $0x8] sm:$0xff]   ;;  %329 = vmatpush.bf16.xpose.msra.mxu0 %v320_v3  ;;  %348 = vmatpush.bf16.xpose.msra.mxu1 %v339_v4  ;;  %v377_v10 = vsel %vm315_vm0, %v286_v5, 0  ;;  %v1227_v11 = vunpack.c.l.b16 %v286_v5  ;;  %v4863_v12 = vld [vmem:[%s4838_s18 + $0x10] sm:$0xf]  ;;  %v4483_v13 = vunpack.c.l.bf16 %v4482_v6  ;;  %v4484_v14 = vunpack.c.h.bf16 %v4482_v6  ;;  %v4866_v15 = vld [vmem:[%s4838_s18 + $0x14] sm:$0xf] }
  0x14   : > { %367 = vmatpush.bf16.xpose.msra.mxu2 %v358_v8  ;;  %386 = vmatpush.bf16.xpose.msra.mxu3 %v377_v10  ;;  %v4868_v16 = vpack.c.b16 %v1198_v9, %v1198_v9  ;;  %v4487_v18 = vunpack.c.l.bf16 %v4513_v7  ;;  %v4488_v19 = vunpack.c.h.bf16 %v4513_v7  ;;  %v289_v20 = vld [vmem:[%s4838_s18 + $0x18] sm:$0xf]  ;;  %v396_v23 = vsel %vm315_vm0, %v4863_v12, 0  ;;  %v4878_v27 = vld [vmem:[%s4838_s18 + $0x1c] sm:$0xf]  ;;  %v4514_v39 = vld [vmem:[%s4851_s21 + $0x10] sm:$0xff]  }
  0x15   : > { %v4870_v17 = vpack.c.b16 %v1227_v11, %v1227_v11  ;;  %v251_v21 = vmul.f32 0.5, %v4483_v13  ;;  %v252_v22 = vmul.f32 0.5, %v4484_v14  ;;  %v415_v26 = vsel %vm315_vm0, %v4866_v15, 0  ;;  %v4888_v31 = vld [vmem:[%s4838_s18 + $0x20] sm:$0xf]  ;;  %v4515_v42 = vld [vmem:[%s4851_s21 + $0x18] sm:$0xff]  }
  0x16   : > { %v253_v24 = vmul.f32 0.5, %v4487_v18  ;;  %v254_v25 = vmul.f32 0.5, %v4488_v19  ;;  %1200 = vrot.lane.b32.xlu0 %v4868_v16, %s4798_s22  ;;  %v434_v30 = vsel %vm315_vm0, %v289_v20, 0  ;;  %v1314_v34 = vunpack.c.l.b16 %v289_v20  ;;  %v4895_v35 = vld [vmem:[%s4838_s18 + $0x24] sm:$0xf]  ;;  %v4517_v8 = vld [vmem:[%s4851_s21 + $0x28] sm:$0xff]  }
  0x17   : > { %6845 = vst [vmem:[#allocation3_spill] sm:$0xff] %v4870_v17  ;;  %v4882_v28 = vpack.c.bf16 %v251_v21, %v251_v21  ;;  %v4884_v29 = vpack.c.bf16 %v252_v22, %v252_v22  ;;  %1229 = vrot.lane.b32.xlu1 %v4870_v17, %s4798_s22  ;;  %v453_v36 = vsel %vm315_vm0, %v4878_v27, 0  ;;  %v4904_v37 = vld [vmem:[%s4838_s18 + $0x2c] sm:$0xf]  ;;  %v4907_v38 = vld [vmem:[%s4838_s18 + $0x28] sm:$0xf]  ;;  %v4491_v46 = vunpack.c.l.bf16 %v4514_v39 }
  0x18   : > { %v4892_v32 = vpack.c.bf16 %v253_v24, %v253_v24  ;;  %v270_v33 = vpack.c.bf16 %v254_v25, %v254_v25  ;;  %v472_v40 = vsel %vm315_vm0, %v4888_v31, 0  ;;  %v4915_v41 = vpack.c.b16 %v1314_v34, %v1314_v34  ;;  %v4934_v58 = vld [vmem:[%s4838_s18 + $0x30] sm:$0xf]  ;;  %v4937_v59 = vld [vmem:[%s4838_s18 + $0x34] sm:$0xf]  ;;  %v4516_v5 = vld [vmem:[%s4851_s21 + $0x20] sm:$0xff]  }
  0x19   : > { %v491_v43 = vsel %vm315_vm0, %v4895_v35, 0  ;;  %v529_v44 = vsel %vm315_vm0, %v4904_v37, 0  ;;  %v510_v45 = vsel %vm315_vm0, %v4907_v38, 0  ;;  %v4492_v47 = vunpack.c.h.bf16 %v4514_v39  ;;  %v4940_v62 = vld [vmem:[%s4838_s18 + $0x3c] sm:$0xf] }
  0x1a   : > { %4351 = vmatmul.msk.bf16.vlgmr.msra.gmra.mxu0 %vm315_vm0, %v4882_v28  ;;  %4352 = vmatmul.msk.bf16.vlgmr.msra.gmra.mxu1 %vm315_vm0, %v4884_v29  ;;  %6846 = vst [vmem:[#allocation4_spill] sm:$0xff] %v4915_v41  ;;  %v4495_v48 = vunpack.c.l.bf16 %v4515_v42  ;;  %v4496_v49 = vunpack.c.h.bf16 %v4515_v42  ;;  %v1140_v50 = vunpack.c.l.b16 %v4841_v0  ;;  %v255_v51 = vmul.f32 0.5, %v4491_v46  ;;  %v4943_v63 = vld [vmem:[%s4838_s18 + $0x38] sm:$0xf] }
  0x1b   : > { %405 = vmatpush.bf16.xpose.msrb.mxu0 %v396_v23  ;;  %424 = vmatpush.bf16.xpose.msrb.mxu1 %v415_v26  ;;  %v256_v52 = vmul.f32 0.5, %v4492_v47  ;;  %v548_v0 = vsel %vm315_vm0, %v4934_v58, 0  ;;  %v567_v2 = vsel %vm315_vm0, %v4937_v59, 0  ;;  %v605_v3 = vsel %vm315_vm0, %v4940_v62, 0 }
  0x1c   : > { %443 = vmatpush.bf16.xpose.msrb.mxu2 %v434_v30  ;;  %4354 = vmatmul.msk.bf16.vlgmr.msra.gmra.mxu3 %vm315_vm0, %v270_v33  ;;  %v257_v53 = vmul.f32 0.5, %v4495_v48  ;;  %v258_v54 = vmul.f32 0.5, %v4496_v49  ;;  %v4927_v55 = vpack.c.b16 %v1140_v50, %v1140_v50  ;;  %v4929_v56 = vpack.c.bf16 %v255_v51, %v255_v51 }
  0x1d   : > { %4353 = vmatmul.msk.bf16.vlgmr.msra.gmra.mxu2 %vm315_vm0, %v4892_v32  ;;  %462 = vmatpush.bf16.xpose.msrb.mxu3 %v453_v36  ;;  %v4931_v57 = vpack.c.bf16 %v256_v52, %v256_v52  ;;  %v586_v4 = vsel %vm315_vm0, %v4943_v63, 0  ;;  %v1222_v6 = vunpack.c.l.b16 %v270_v33  ;;  %v1193_v7 = vunpack.c.l.b16 %v4892_v32 }
  0x1e   : > { %6847 = vst [vmem:[#allocation5_spill] sm:$0xff] %v4927_v55  ;;  %v273_v60 = vpack.c.bf16 %v257_v53, %v257_v53  ;;  %v274_v61 = vpack.c.bf16 %v258_v54, %v258_v54  ;;  %v4499_v13 = vunpack.c.l.bf16 %v4516_v5  ;;  %v4500_v14 = vunpack.c.h.bf16 %v4516_v5 }
  0x1f   : > { %1316 = vrot.lane.b32.xlu1 %v4915_v41, %s4798_s22  ;;  %v4964_v10 = vpack.c.b16 %v1222_v6, %v1222_v6  ;;  %v4966_v11 = vpack.c.b16 %v1193_v7, %v1193_v7  ;;  %v1343_v19 = vunpack.c.l.b16 %v4878_v27  ;;  %v4504_v20 = vunpack.c.h.bf16 %v4517_v8 }
  0x20   : > { %v1338_v9 = vunpack.c.l.b16 %v274_v61  ;;  %v4503_v21 = vunpack.c.l.bf16 %v4517_v8  ;;  %v1309_v22 = vunpack.c.l.b16 %v273_v60  ;;  %v259_v23 = vmul.f32 0.5, %v4499_v13 }
  0x21   : > { %6848 = vst [vmem:[#allocation6_spill] sm:$0xff] %v4966_v11  ;;  %1224 = vrot.lane.b32.xlu0 %v4964_v10, %s4798_s22  ;;  %1195 = vrot.lane.b32.xlu2 %v4966_v11, %s4798_s22  ;;  %v260_v24 = vmul.f32 0.5, %v4500_v14  ;;  %v4977_v25 = vpack.c.b16 %v1343_v19, %v1343_v19  ;;  %v262_v26 = vmul.f32 0.5, %v4504_v20  ;;  %v1169_v34 = vunpack.c.l.b16 %v4844_v1  ;;  %v4518_v1 = vld [vmem:[%s4851_s21 + $0x30] sm:$0xff]  }
  0x22   : > { %v4968_v18 = vpack.c.b16 %v1338_v9, %v1338_v9  ;;  %v261_v30 = vmul.f32 0.5, %v4503_v21  ;;  %v4979_v27 = vpack.c.b16 %v1309_v22, %v1309_v22  ;;  %v4981_v32 = vpack.c.bf16 %v259_v23, %v259_v23 }
  0x23   : > { %481 = vmatpush.bf16.xpose.msra.mxu0 %v472_v40  ;;  %500 = vmatpush.bf16.xpose.msra.mxu1 %v491_v43  ;;  %6850 = vst [vmem:[#allocation8_spill] sm:$0xff] %v4977_v25  ;;  %v4983_v33 = vpack.c.bf16 %v260_v24, %v260_v24  ;;  %v4986_v36 = vpack.c.bf16 %v262_v26, %v262_v26  ;;  %v1164_v40 = vunpack.c.l.b16 %v4884_v29  ;;  %v4508_v29 = vunpack.c.h.bf16 %v4518_v1 }
  0x24   : > { %519 = vmatpush.bf16.xpose.msra.mxu2 %v510_v45  ;;  %6849 = vst [vmem:[#allocation7_spill] sm:$0xff] %v4968_v18  ;;  %v4988_v39 = vpack.c.bf16 %v261_v30, %v261_v30  ;;  %v4999_v42 = vpack.c.b16 %v1169_v34, %v1169_v34  ;;  %v4507_v45 = vunpack.c.l.bf16 %v4518_v1  ;;  %v1135_v48 = vunpack.c.l.b16 %v4882_v28 }
  0x25   : > { %538 = vmatpush.bf16.xpose.msra.mxu3 %v529_v44  ;;  %6851 = vst [vmem:[#allocation9_spill] sm:$0xff] %v4979_v27  ;;  %v5006_v43 = vpack.c.b16 %v1164_v40, %v1164_v40  ;;  %v4519_v44 = vld [vmem:[%s4851_s21 + $0x38] sm:$0xff]   ;;  %v264_v50 = vmul.f32 0.5, %v4508_v29 }
  0x26   : > { %6852 = vst [vmem:[#allocation10_spill] sm:$0xff] %v4999_v42  ;;  %v4512_v46 = vunpack.c.h.bf16 %v4519_v44  ;;  %v4511_v47 = vunpack.c.l.bf16 %v4519_v44  ;;  %v263_v49 = vmul.f32 0.5, %v4507_v45  ;;  %v5014_v53 = vpack.c.b16 %v1135_v48, %v1135_v48 }
  0x27   : > { %1142 = vrot.lane.b32.xlu1 %v4927_v55, %s4798_s22  ;;  %6853 = vst [vmem:[#allocation11_spill] sm:$0xff] %v5006_v43 }
  0x28   : > { %v266_v51 = vmul.f32 0.5, %v4512_v46  ;;  %v265_v52 = vmul.f32 0.5, %v4511_v47  ;;  %6854 = vst [vmem:[#allocation12_spill] sm:$0xff] %v5014_v53  ;;  %v5016_v54 = vpack.c.bf16 %v263_v49, %v263_v49 }
  0x29   : > { %1345 = vrot.lane.b32.xlu0 %v4977_v25, %s4798_s22  ;;  %1311 = vrot.lane.b32.xlu2 %v4979_v27, %s4798_s22 }
  0x2a   : > { %4355 = vmatmul.msk.bf16.vlgmr.msrb.gmra.mxu0 %vm315_vm0, %v4929_v56  ;;  %4356 = vmatmul.msk.bf16.vlgmr.msrb.gmra.mxu1 %vm315_vm0, %v4931_v57 }
  0x2b   : > { %557 = vmatpush.bf16.xpose.msrb.mxu0 %v548_v0  ;;  %576 = vmatpush.bf16.xpose.msrb.mxu1 %v567_v2  ;;  %v5022_v0 = vpack.c.bf16 %v265_v52, %v265_v52 }
  0x2c   : > { %4358 = vmatmul.msk.bf16.vlgmr.msrb.gmra.mxu3 %vm315_vm0, %v274_v61  ;;  %v5020_v61 = vpack.c.bf16 %v266_v51, %v266_v51 }
  0x2d   : > { %4357 = vmatmul.msk.bf16.vlgmr.msrb.gmra.mxu2 %vm315_vm0, %v273_v60  ;;  %614 = vmatpush.bf16.xpose.msrb.mxu3 %v605_v3  ;;  %v5018_v60 = vpack.c.bf16 %v264_v50, %v264_v50 }
  0x2e   : > { %595 = vmatpush.bf16.xpose.msrb.mxu2 %v586_v4 }
  0x2f   : > { %1340 = vrot.lane.b32.xlu1 %v4968_v18, %s4798_s22 }
  0x31   : > { %1171 = vrot.lane.b32.xlu0 %v4999_v42, %s4798_s22  ;;  %1166 = vrot.lane.b32.xlu2 %v5006_v43, %s4798_s22 }
  0x39   : > { %1137 = vrot.lane.b32.xlu0 %v5014_v53, %s4798_s22 }
  0x3a   : > { %4359 = vmatmul.msk.bf16.vlgmr.msra.gmra.mxu0 %vm315_vm0, %v4981_v32  ;;  %4360 = vmatmul.msk.bf16.vlgmr.msra.gmra.mxu1 %vm315_vm0, %v4983_v33 }
  0x3c   : > { %4362 = vmatmul.msk.bf16.vlgmr.msra.gmra.mxu3 %vm315_vm0, %v4986_v36 }
  0x3d   : > { %4361 = vmatmul.msk.bf16.vlgmr.msra.gmra.mxu2 %vm315_vm0, %v4988_v39 }
  0x4a   : > { %4363 = vmatmul.msk.bf16.vlgmr.msrb.gmra.mxu0 %vm315_vm0, %v5016_v54  ;;  %4364 = vmatmul.msk.bf16.vlgmr.msrb.gmra.mxu1 %vm315_vm0, %v5018_v60 }
  0x4c   : > { %4366 = vmatmul.msk.bf16.vlgmr.msrb.gmra.mxu3 %vm315_vm0, %v5020_v61 }
  0x4d   : > { %4365 = vmatmul.msk.bf16.vlgmr.msrb.gmra.mxu2 %vm315_vm0, %v5022_v0 }
  0x97   : > { %v5034_v28 = vpop.f32.mrf.mxu0  ;;  %v5036_v2 = vpop.f32.mrf.mxu1 }
  0x98   : > { %v621_v3 = vsel %vm620_vm1, %v5034_v28, -inf  ;;  %v624_v6 = vsel %vm620_vm1, %v5036_v2, -inf }
  0x99   : > { %622 = vmax.xlane.f32.xlu2 %v621_v3 }
  0x9f   : > { %v5042_v5 = vpop.f32.mrf.mxu3  ;;  %v352_v7 = vpop.f32.mrf.mxu1 }
  0xa0   : > { %v5040_v4 = vpop.f32.mrf.mxu2  ;;  %v333_v9 = vpop.f32.mrf.mxu0  ;;  %v630_v13 = vsel %vm620_vm1, %v5042_v5, -inf }
  0xa1   : > { %v627_v8 = vsel %vm620_vm1, %v5040_v4, -inf  ;;  %625 = vmax.xlane.f32.xlu2 %v624_v6 }
  0xa2   : > { %628 = vmax.xlane.f32.xlu0 %v627_v8 }
  0xa7   : > { %v390_v19 = vpop.f32.mrf.mxu3  ;;  %v5050_v20 = vpop.f32.mrf.mxu1 }
  0xa8   : > { %v371_v14 = vpop.f32.mrf.mxu2  ;;  %v5052_v21 = vpop.f32.mrf.mxu0  ;;  %v636_v23 = vsel %vm620_vm1, %v5050_v20, -inf }
  0xa9   : > { %v633_v22 = vsel %vm620_vm1, %v5052_v21, -inf }
  0xaa   : > { %631 = vmax.xlane.f32.xlu0 %v630_v13  ;;  %634 = vmax.xlane.f32.xlu2 %v633_v22 }
  0xaf   : > { %v5060_v26 = vpop.f32.mrf.mxu3  ;;  %v428_v34 = vpop.f32.mrf.mxu1 }
  0xb0   : > { %v5058_v24 = vpop.f32.mrf.mxu2  ;;  %v409_v40 = vpop.f32.mrf.mxu0  ;;  %v642_v1 = vsel %vm620_vm1, %v5060_v26, -inf }
  0xb1   : > { %v639_v30 = vsel %vm620_vm1, %v5058_v24, -inf }
  0xb2   : > { %640 = vmax.xlane.f32.xlu1 %v639_v30  ;;  %637 = vmax.xlane.f32.xlu0 %v636_v23 }
  0xb7   : > { %v466_v44 = vpop.f32.mrf.mxu3  ;;  %v5068_v46 = vpop.f32.mrf.mxu1 }
  0xb8   : > { %v447_v45 = vpop.f32.mrf.mxu2  ;;  %v5066_v29 = vpop.f32.mrf.mxu0  ;;  %v648_v47 = vsel %vm620_vm1, %v5068_v46, -inf }
  0xb9   : > { %v645_v48 = vsel %vm620_vm1, %v5066_v29, -inf }
  0xba   : > { %643 = vmax.xlane.f32.xlu1 %v642_v1  ;;  %649 = vmax.xlane.f32.xlu0 %v648_v47  ;;  %v5098_v47 = vpop.permute.xlu0 %1200 }
  0xbb   : > { %646 = vmax.xlane.f32.xlu2 %v645_v48 }
  0xbf   : > { %v5074_v49 = vpop.f32.mrf.mxu3  ;;  %v504_v3 = vpop.f32.mrf.mxu1 }
  0xc0   : > { %v5076_v50 = vpop.f32.mrf.mxu2  ;;  %v654_v51 = vsel %vm620_vm1, %v5074_v49, -inf  ;;  %v485_v52 = vpop.f32.mrf.mxu0 }
  0xc1   : > { %v651_v6 = vsel %vm620_vm1, %v5076_v50, -inf }
  0xc2   : > { %655 = vmax.xlane.f32.xlu1 %v654_v51  ;;  %652 = vmax.xlane.f32.xlu0 %v651_v6  ;;  %v5100_v48 = vpop.permute.xlu0 %1224  ;;  %v5102_v51 = vpop.permute.xlu2 %1195 }
  0xc3   : > { %v5108_v6 = vpop.permute.xlu1 %1229 }
  0xc7   : > { %v542_v7 = vpop.f32.mrf.mxu3  ;;  %v5084_v13 = vpop.f32.mrf.mxu1 }
  0xc8   : > { %v523_v8 = vpop.f32.mrf.mxu2  ;;  %v5082_v9 = vpop.f32.mrf.mxu0  ;;  %v660_v14 = vsel %vm620_vm1, %v5084_v13, -inf }
  0xc9   : > { %v657_v19 = vsel %vm620_vm1, %v5082_v9, -inf }
  0xca   : > { %661 = vmax.xlane.f32.xlu1 %v660_v14  ;;  %658 = vmax.xlane.f32.xlu0 %v657_v19  ;;  %v5104_v52 = vpop.permute.xlu0 %1345  ;;  %v5106_v3 = vpop.permute.xlu2 %1311 }
  0xcb   : > { %v5114_v14 = vpop.permute.xlu1 %1316 }
  0xcf   : > { %v5090_v22 = vpop.f32.mrf.mxu3  ;;  %v580_v1 = vpop.f32.mrf.mxu1 }
  0xd0   : > { %v5092_v23 = vpop.f32.mrf.mxu2  ;;  %v666_v30 = vsel %vm620_vm1, %v5090_v22, -inf  ;;  %v561_v40 = vpop.f32.mrf.mxu0 }
  0xd1   : > { %v663_v34 = vsel %vm620_vm1, %v5092_v23, -inf  ;;  %667 = vmax.xlane.f32.xlu2 %v666_v30 }
  0xd2   : > { %664 = vmax.xlane.f32.xlu1 %v663_v34  ;;  %v5110_v7 = vpop.permute.xlu0 %1171  ;;  %v5112_v8 = vpop.permute.xlu2 %1166 }
  0xd3   : > { %v5119_v1 = vpop.permute.xlu1 %1142 }
  0xd7   : > { %v618_v45 = vpop.f32.mrf.mxu3 }
  0xd8   : > { %v599_v44 = vpop.f32.mrf.mxu2 }
  0xda   : > { %v5116_v19 = vpop.permute.xlu0 %1137 }
  0xdb   : > { %v5127_v55 = vpop.permute.xlu1 %1340 }
 0x10c   : > { %v623_v30 = vpop.xlane.xlu2 %622 }
 0x10d   : > { %v669_v34 = vsub.f32 %v5034_v28, %v623_v30 }
 0x10f   : > { %v685_v40 = vmul.f32 1.442695, %v669_v34 }
 0x111   : > { %4534 = vpow2.f32 %v685_v40 }
 0x114   : > { %v626_v45 = vpop.xlane.xlu2 %625 }
 0x115   : > { %v629_v44 = vpop.xlane.xlu0 %628  ;;  %v670_v53 = vsub.f32 %v5036_v2, %v626_v45 }
 0x116   : > { %v671_v41 = vsub.f32 %v5040_v4, %v629_v44 }
 0x117   : > { %v5122_v43 = vpop.eup %4534  ;;  %v687_v27 = vmul.f32 1.442695, %v670_v53 }
 0x118   : > { %v717_v18 = vsel %vm620_vm1, %v5122_v43, 0.0  ;;  %v689_v28 = vmul.f32 1.442695, %v671_v41 }
 0x119   : > { %4536 = vpow2.f32 %v687_v27  ;;  %718 = vadd.xlane.f32.xlu2 %v717_v18 }
 0x11a   : > { %4538 = vpow2.f32 %v689_v28 }
 0x11d   : > { %v632_v30 = vpop.xlane.xlu0 %631  ;;  %v635_v40 = vpop.xlane.xlu2 %634 }
 0x11e   : > { %v672_v34 = vsub.f32 %v5042_v5, %v632_v30  ;;  %v673_v2 = vsub.f32 %v5052_v21, %v635_v40 }
 0x11f   : > { %v5130_v25 = vpop.eup %4536 }
 0x120   : > { %v691_v42 = vmul.f32 1.442695, %v672_v34  ;;  %v720_v53 = vsel %vm620_vm1, %v5130_v25, 0.0  ;;  %v693_v27 = vmul.f32 1.442695, %v673_v2  ;;  %v5136_v44 = vpop.eup %4538 }
 0x121   : > { %721 = vadd.xlane.f32.xlu0 %v720_v53  ;;  %v723_v21 = vsel %vm620_vm1, %v5136_v44, 0.0 }
 0x122   : > { %4540 = vpow2.f32 %v691_v42 }
 0x123   : > { %4542 = vpow2.f32 %v693_v27 }
 0x125   : > { %v641_v18 = vpop.xlane.xlu1 %640  ;;  %v638_v4 = vpop.xlane.xlu0 %637 }
 0x126   : > { %v674_v41 = vsub.f32 %v5050_v20, %v638_v4  ;;  %v675_v28 = vsub.f32 %v5058_v24, %v641_v18 }
 0x128   : > { %v5138_v5 = vpop.eup %4540  ;;  %v695_v45 = vmul.f32 1.442695, %v674_v41  ;;  %v697_v30 = vmul.f32 1.442695, %v675_v28 }
 0x129   : > { %v726_v42 = vsel %vm620_vm1, %v5138_v5, 0.0  ;;  %724 = vadd.xlane.f32.xlu0 %v723_v21  ;;  %v5146_v53 = vpop.eup %4542 }
 0x12a   : > { %727 = vadd.xlane.f32.xlu1 %v726_v42  ;;  %4544 = vpow2.f32 %v695_v45  ;;  %v729_v45 = vsel %vm620_vm1, %v5146_v53, 0.0 }
 0x12b   : > { %4546 = vpow2.f32 %v697_v30 }
 0x12d   : > { %v644_v34 = vpop.xlane.xlu1 %643  ;;  %v650_v40 = vpop.xlane.xlu0 %649 }
 0x12e   : > { %v676_v20 = vsub.f32 %v5060_v26, %v644_v34  ;;  %v647_v2 = vpop.xlane.xlu2 %646  ;;  %v678_v24 = vsub.f32 %v5068_v46, %v650_v40 }
 0x12f   : > { %v677_v4 = vsub.f32 %v5066_v29, %v647_v2 }
 0x130   : > { %v699_v27 = vmul.f32 1.442695, %v676_v20  ;;  %v5149_v18 = vpop.eup %4544  ;;  %v703_v26 = vmul.f32 1.442695, %v678_v24 }
 0x131   : > { %v732_v41 = vsel %vm620_vm1, %v5149_v18, 0.0  ;;  %730 = vadd.xlane.f32.xlu0 %v729_v45  ;;  %v701_v28 = vmul.f32 1.442695, %v677_v4  ;;  %v5156_v21 = vpop.eup %4546  ;;  %v1425_v45 = vunpack.c.l.b16 %v4988_v39  ;;  %v1372_v39 = vunpack.c.l.b16 %v4888_v31 }
 0x132   : > { %4548 = vpow2.f32 %v699_v27  ;;  %733 = vadd.xlane.f32.xlu1 %v732_v41  ;;  %v735_v34 = vsel %vm620_vm1, %v5156_v21, 0.0  ;;  %v1459_v27 = vunpack.c.l.b16 %v4904_v37  ;;  %v1488_v31 = vunpack.c.l.b16 %v4934_v58 }
 0x133   : > { %4550 = vpow2.f32 %v703_v26  ;;  %v5183_v26 = vpack.c.b16 %v1425_v45, %v1425_v45 }
 0x134   : > { %4552 = vpow2.f32 %v701_v28  ;;  %v5174_v4 = vpack.c.b16 %v1459_v27, %v1459_v27  ;;  %v1280_v28 = vunpack.c.l.b16 %v4931_v57 }
 0x135   : > { %v653_v42 = vpop.xlane.xlu0 %652  ;;  %6856 = vst [vmem:[#allocation14_spill] sm:$0xff] %v5183_v26  ;;  %v656_v45 = vpop.xlane.xlu1 %655 }
 0x136   : > { %v679_v29 = vsub.f32 %v5076_v50, %v653_v42  ;;  %6855 = vst [vmem:[#allocation13_spill] sm:$0xff] %v5174_v4  ;;  %v1256_v42 = vunpack.c.l.b16 %v4863_v12  ;;  %v1570_v12 = vunpack.c.l.b16 %v5020_v61 }
 0x138   : > { %v5158_v46 = vpop.eup %4548  ;;  %v705_v20 = vmul.f32 1.442695, %v679_v29  ;;  %v5189_v29 = vpack.c.b16 %v1280_v28, %v1280_v28  ;;  %v5208_v27 = vpack.c.b16 %v1570_v12, %v1570_v12  ;;  %v680_v28 = vsub.f32 %v5074_v49, %v656_v45 }
 0x139   : > { %v738_v30 = vsel %vm620_vm1, %v5158_v46, 0.0  ;;  %v5165_v40 = vpop.eup %4550 }
 0x13a   : > { %739 = vadd.xlane.f32.xlu2 %v738_v30  ;;  %736 = vadd.xlane.f32.xlu1 %v735_v34  ;;  %v5167_v2 = vpop.eup %4552  ;;  %4554 = vpow2.f32 %v705_v20  ;;  %v744_v24 = vsel %vm620_vm1, %v5165_v40, 0.0  ;;  %6857 = vst [vmem:[#allocation15_spill] sm:$0xff] %v5189_v29  ;;  %v5191_v30 = vpack.c.b16 %v1256_v42, %v1256_v42  ;;  %v1454_v34 = vunpack.c.l.b16 %v4986_v36 }
 0x13b   : > { %v741_v50 = vsel %vm620_vm1, %v5167_v2, 0.0  ;;  %v5199_v20 = vpack.c.b16 %v1372_v39, %v1372_v39  ;;  %6859 = vst [vmem:[#allocation17_spill] sm:$0xff] %v5208_v27  ;;  %v5213_v36 = vpack.c.b16 %v1488_v31, %v1488_v31  ;;  %v707_v39 = vmul.f32 1.442695, %v680_v28  ;;  %v5237_v31 = vld [vmem:[%s5222_s25 + $0x4] sm:$0xf] }
 0x13c   : > { %v5201_v57 = vpack.c.b16 %v1454_v34, %v1454_v34 }
 0x13d   : > { %6858 = vst [vmem:[#allocation16_spill] sm:$0xff] %v5199_v20  ;;  %v659_v34 = vpop.xlane.xlu0 %658  ;;  %4556 = vpow2.f32 %v707_v39  ;;  %v662_v45 = vpop.xlane.xlu1 %661 }
 0x13e   : > { %6860 = vst [vmem:[#allocation18_spill] sm:$0xff] %v5213_v36 }
 0x140   : > { %v5176_v41 = vpop.eup %4554 }
 0x141   : > { %v747_v37 = vsel %vm620_vm1, %v5176_v41, 0.0 }
 0x142   : > { %745 = vadd.xlane.f32.xlu2 %v744_v24  ;;  %742 = vadd.xlane.f32.xlu1 %v741_v50  ;;  %v1512_v24 = vunpack.c.l.b16 %v5018_v60  ;;  %v302_v50 = vld [vmem:[%s5222_s25 + $0xc] sm:$0xf] }
 0x143   : > { %v1863_v58 = vunpack.c.l.b16 %v302_v50 }
 0x144   : > { %v5224_v61 = vpack.c.b16 %v1512_v24, %v1512_v24  ;;  %v837_v24 = vsel %vm816_vm2, %v5237_v31, 0  ;;  %v5247_v28 = vpop.xlane.xlu2 %667 }
 0x145   : > { %1461 = vrot.lane.b32.xlu0 %v5174_v4, %s4798_s22  ;;  %v5232_v42 = vpack.c.b16 %v1863_v58, %v1863_v58  ;;  %846 = vmatpush.bf16.msra.mxu1 %v837_v24  ;;  %v5245_v58 = vld [vmem:[%s5222_s25 + $0x2c] sm:$0xf]  ;;  %v5266_v24 = vld [vmem:[%s5222_s25 + $0x3c] sm:$0xf] }
 0x146   : > { %6861 = vst [vmem:[#allocation19_spill] sm:$0xff] %v5224_v61  ;;  %v2055_v39 = vunpack.c.l.b16 %v5245_v58 }
 0x147   : > { %6862 = vst [vmem:[#allocation20_spill] sm:$0xff] %v5232_v42 }
 0x14a   : > { %748 = vadd.xlane.f32.xlu1 %v747_v37  ;;  %v299_v37 = vld [vmem:[%s5222_s25] sm:$0xf] }
 0x14b   : > { %v818_v60 = vsel %vm816_vm2, %v299_v37, 0  ;;  %v1791_v12 = vunpack.c.l.b16 %v299_v37  ;;  %v875_v37 = vsel %vm816_vm2, %v302_v50, 0  ;;  %v5263_v50 = vpack.c.b16 %v2055_v39, %v2055_v39  ;;  %v5280_v39 = vld [vmem:[%s5222_s25 + $0x14] sm:$0xf] }
 0x14c   : > { %827 = vmatpush.bf16.msra.mxu0 %v818_v60  ;;  %884 = vmatpush.bf16.msra.mxu3 %v875_v37  ;;  %v1430_v37 = vunpack.c.l.b16 %v4907_v38  ;;  %v1285_v38 = vunpack.c.l.b16 %v4866_v15 }
 0x14d   : > { %1427 = vrot.lane.b32.xlu0 %v5183_v26, %s4798_s22  ;;  %v5242_v49 = vpack.c.b16 %v1791_v12, %v1791_v12  ;;  %v682_v12 = vsub.f32 %v5084_v13, %v662_v45  ;;  %6864 = vst [vmem:[#allocation22_spill] sm:$0xff] %v5263_v50  ;;  %v2151_v45 = vunpack.c.l.b16 %v5266_v24 }
 0x14f   : > { %6863 = vst [vmem:[#allocation21_spill] sm:$0xff] %v5242_v49  ;;  %v5292_v15 = vpack.c.b16 %v2151_v45, %v2151_v45  ;;  %v5307_v45 = vld [vmem:[%s5222_s25 + $0x18] sm:$0xf] }
 0x151   : > { %6866 = vst [vmem:[#allocation24_spill] sm:$0xff] %v5292_v15 }
 0x155   : > { %1282 = vrot.lane.b32.xlu0 %v5189_v29, %s4798_s22  ;;  %v5269_v29 = vpack.c.b16 %v1430_v37, %v1430_v37  ;;  %v5294_v37 = vpack.c.b16 %v1285_v38, %v1285_v38 }
 0x157   : > { %6865 = vst [vmem:[#allocation23_spill] sm:$0xff] %v5269_v29 }
 0x158   : > { %6867 = vst [vmem:[#allocation25_spill] sm:$0xff] %v5294_v37 }
 0x15a   : > { %1258 = vrot.lane.b32.xlu2 %v5191_v30, %s4798_s22 }
 0x15d   : > { %1374 = vrot.lane.b32.xlu0 %v5199_v20, %s4798_s22  ;;  %v665_v20 = vpop.xlane.xlu1 %664 }
 0x162   : > { %1456 = vrot.lane.b32.xlu2 %v5201_v57, %s4798_s22 }
 0x163   : > { %1432 = vrot.lane.b32.xlu1 %v5269_v29, %s4798_s22 }
 0x165   : > { %1572 = vrot.lane.b32.xlu0 %v5208_v27, %s4798_s22  ;;  %v711_v27 = vmul.f32 1.442695, %v682_v12  ;;  %v683_v12 = vsub.f32 %v5092_v23, %v665_v20 }
 0x167   : > { %v713_v26 = vmul.f32 1.442695, %v683_v12 }
 0x16b   : > { %1287 = vrot.lane.b32.xlu1 %v5294_v37, %s4798_s22  ;;  %v5343_v37 = vld [vmem:[%s5222_s25 + $0x28] sm:$0xf] }
 0x16d   : > { %1490 = vrot.lane.b32.xlu0 %v5213_v36, %s4798_s22  ;;  %v5250_v36 = vpop.eup %4556 }
 0x175   : > { %1514 = vrot.lane.b32.xlu0 %v5224_v61, %s4798_s22  ;;  %v681_v61 = vsub.f32 %v5082_v9, %v659_v34  ;;  %v5256_v9 = vld [vmem:[%s5222_s25 + $0x8] sm:$0xf] }
 0x176   : > { %v856_v34 = vsel %vm816_vm2, %v5256_v9, 0 }
 0x177   : > { %v709_v60 = vmul.f32 1.442695, %v681_v61  ;;  %865 = vmatpush.bf16.msra.mxu2 %v856_v34  ;;  %v750_v61 = vsel %vm620_vm1, %v5250_v36, 0.0 }
 0x179   : > { %4558 = vpow2.f32 %v709_v60  ;;  %v5277_v60 = vld [vmem:[%s5222_s25 + $0x10] sm:$0xf] }
 0x17a   : > { %v894_v34 = vsel %vm816_vm2, %v5277_v60, 0 }
 0x17b   : > { %903 = vmatpush.bf16.msrb.mxu0 %v894_v34  ;;  %v1251_v34 = vunpack.c.l.b16 %v4929_v56 }
 0x17d   : > { %1865 = vrot.lane.b32.xlu0 %v5232_v42, %s4798_s22 }
 0x17f   : > { %v5271_v13 = vpop.eup %4558 }
 0x185   : > { %1793 = vrot.lane.b32.xlu0 %v5242_v49, %s4798_s22  ;;  %v5297_v49 = vld [vmem:[%s5222_s25 + $0x1c] sm:$0xf] }
 0x186   : > { %v951_v23 = vsel %vm816_vm2, %v5297_v49, 0 }
 0x187   : > { %960 = vmatpush.bf16.msrb.mxu3 %v951_v23  ;;  %v5321_v23 = vld [vmem:[%s5222_s25 + $0x20] sm:$0xf] }
 0x18b   : > { %751 = vadd.xlane.f32.xlu2 %v750_v61  ;;  %v753_v61 = vsel %vm620_vm1, %v5271_v13, 0.0 }
 0x18c   : > { %v719_v42 = vpop.xlane.xlu2 %718 }
 0x18d   : > { %4560 = vrcp.f32 %v719_v42  ;;  %2057 = vrot.lane.b32.xlu0 %v5263_v50, %s4798_s22  ;;  %v913_v42 = vsel %vm816_vm2, %v5280_v39, 0 }
 0x18e   : > { %4562 = vpow2.f32 %v711_v27  ;;  %922 = vmatpush.bf16.msrb.mxu1 %v913_v42 }
 0x193   : > { %754 = vadd.xlane.f32.xlu2 %v753_v61  ;;  %v4561_v50 = vpop.eup %4560 }
 0x194   : > { %v781_v4 = vmul.f32 %v4561_v50, %v5122_v43  ;;  %v722_v27 = vpop.xlane.xlu0 %721  ;;  %v5302_v20 = vpop.eup %4562  ;;  %v932_v43 = vsel %vm816_vm2, %v5307_v45, 0 }
 0x195   : > { %4564 = vrcp.f32 %v722_v27  ;;  %2153 = vrot.lane.b32.xlu0 %v5292_v15, %s4798_s22  ;;  %941 = vmatpush.bf16.msrb.mxu2 %v932_v43  ;;  %v756_v50 = vsel %vm620_vm1, %v5302_v20, 0.0  ;;  %v5318_v27 = vpack.c.b16 %v1251_v34, %v1251_v34 }
 0x196   : > { %v797_v38 = vpack.c.bf16 %v781_v4, %v781_v4  ;;  %4566 = vpow2.f32 %v713_v26  ;;  %v5324_v26 = vld [vmem:[%s5222_s25 + $0x24] sm:$0xf] }
 0x197   : > { %6868 = vst [vmem:[#allocation26_spill] sm:$0xff] %v5318_v27  ;;  %1253 = vrot.lane.b32.xlu1 %v5318_v27, %s4798_s22  ;;  %v989_v56 = vsel %vm816_vm2, %v5324_v26, 0 }
 0x198   : > { %4367 = vmatmul.msk.bf16.vlgmr.msra.gmra.mxu0 %vm620_vm1, %v797_v38  ;;  %v970_v38 = vsel %vm816_vm2, %v5321_v23, 0 }
 0x199   : > { %979 = vmatpush.bf16.msra.mxu0 %v970_v38 }
 0x19b   : > { %757 = vadd.xlane.f32.xlu2 %v756_v50  ;;  %v4565_v42 = vpop.eup %4564 }
 0x19c   : > { %v782_v4 = vmul.f32 %v4565_v42, %v5130_v25  ;;  %v725_v61 = vpop.xlane.xlu0 %724  ;;  %v5326_v43 = vpop.eup %4566  ;;  %v1575_v42 = vunpack.c.l.b16 %v4940_v62  ;;  %v1008_v62 = vsel %vm816_vm2, %v5343_v37, 0 }
 0x19d   : > { %v728_v12 = vpop.xlane.xlu1 %727  ;;  %v759_v25 = vsel %vm620_vm1, %v5326_v43, 0.0 }
 0x19e   : > { %4568 = vrcp.f32 %v728_v12  ;;  %v798_v50 = vpack.c.bf16 %v782_v4, %v782_v4  ;;  %v5340_v27 = vpack.c.b16 %v1575_v42, %v1575_v42 }
 0x19f   : > { %4570 = vrcp.f32 %v725_v61 }
 0x1a0   : > { %4368 = vmatmul.msk.bf16.vlgmr.msra.gmra.mxu1 %vm620_vm1, %v798_v50  ;;  %1577 = vrot.lane.b32.xlu1 %v5340_v27, %s4798_s22 }
 0x1a1   : > { %998 = vmatpush.bf16.msra.mxu1 %v989_v56 }
 0x1a3   : > { %760 = vadd.xlane.f32.xlu2 %v759_v25  ;;  %v5355_v25 = vld [vmem:[%s5222_s25 + $0x34] sm:$0xf] }
 0x1a4   : > { %v4569_v34 = vpop.eup %4568  ;;  %v731_v38 = vpop.xlane.xlu0 %730 }
 0x1a5   : > { %v4571_v12 = vpop.eup %4570  ;;  %v784_v4 = vmul.f32 %v4569_v34, %v5138_v5  ;;  %v734_v15 = vpop.xlane.xlu1 %733 }
 0x1a6   : > { %v783_v61 = vmul.f32 %v4571_v12, %v5136_v44  ;;  %4572 = vrcp.f32 %v734_v15  ;;  %v1541_v44 = vunpack.c.l.b16 %v5022_v0  ;;  %v684_v15 = vsub.f32 %v5090_v22, %v5247_v28 }
 0x1a7   : > { %v800_v29 = vpack.c.bf16 %v784_v4, %v784_v4  ;;  %4574 = vrcp.f32 %v731_v38  ;;  %v1065_v38 = vsel %vm816_vm2, %v5355_v25, 0 }
 0x1a8   : > { %v799_v50 = vpack.c.bf16 %v783_v61, %v783_v61  ;;  %v5357_v34 = vpack.c.b16 %v1541_v44, %v1541_v44  ;;  %v715_v22 = vmul.f32 1.442695, %v684_v15 }
 0x1a9   : > { %4370 = vmatmul.msk.bf16.vlgmr.msra.gmra.mxu3 %vm620_vm1, %v800_v29  ;;  %v5361_v29 = vld [vmem:[%s5222_s25 + $0x30] sm:$0xf] }
 0x1aa   : > { %4369 = vmatmul.msk.bf16.vlgmr.msra.gmra.mxu2 %vm620_vm1, %v799_v50  ;;  %1543 = vrot.lane.b32.xlu1 %v5357_v34, %s4798_s22  ;;  %v1396_v50 = vunpack.c.l.b16 %v4983_v33 }
 0x1ab   : > { %1017 = vmatpush.bf16.msra.mxu2 %v1008_v62 }
 0x1ac   : > { %v4573_v5 = vpop.eup %4572  ;;  %v5374_v44 = vpack.c.b16 %v1396_v50, %v1396_v50 }
 0x1ad   : > { %v740_v56 = vpop.xlane.xlu2 %739  ;;  %v4575_v42 = vpop.eup %4574  ;;  %v786_v12 = vmul.f32 %v4573_v5, %v5149_v18  ;;  %v1046_v18 = vsel %vm816_vm2, %v5361_v29, 0 }
 0x1ae   : > { %v737_v4 = vpop.xlane.xlu1 %736  ;;  %4576 = vrcp.f32 %v740_v56  ;;  %v785_v61 = vmul.f32 %v4575_v42, %v5146_v53  ;;  %v1546_v53 = vunpack.c.l.b16 %v4943_v63  ;;  %v5378_v42 = vld [vmem:[%s5222_s25 + $0x38] sm:$0xf] }
 0x1af   : > { %4578 = vrcp.f32 %v737_v4  ;;  %v802_v0 = vpack.c.bf16 %v786_v12, %v786_v12 }
 0x1b0   : > { %v801_v28 = vpack.c.bf16 %v785_v61, %v785_v61  ;;  %4580 = vpow2.f32 %v715_v22  ;;  %v5381_v61 = vpack.c.b16 %v1546_v53, %v1546_v53 }
 0x1b1   : > { %4372 = vmatmul.msk.bf16.vlgmr.msrb.gmra.mxu1 %vm620_vm1, %v802_v0  ;;  %v1084_v0 = vsel %vm816_vm2, %v5378_v42, 0 }
 0x1b2   : > { %4371 = vmatmul.msk.bf16.vlgmr.msrb.gmra.mxu0 %vm620_vm1, %v801_v28  ;;  %1074 = vmatpush.bf16.msrb.mxu1 %v1065_v38  ;;  %v1401_v38 = vunpack.c.l.b16 %v4895_v35  ;;  %v1148_v35 = vsel %vm315_vm0, %v5119_v1, 0  ;;  %v1206_v1 = vsel %vm315_vm0, %v5098_v47, 0 }
 0x1b3   : > { %1055 = vmatpush.bf16.msrb.mxu0 %v1046_v18  ;;  %1398 = vrot.lane.b32.xlu1 %v5374_v44, %s4798_s22 }
 0x1b4   : > { %v4577_v62 = vpop.eup %4576 }
 0x1b5   : > { %v4579_v5 = vpop.eup %4578  ;;  %v788_v15 = vmul.f32 %v4577_v62, %v5158_v46  ;;  %v746_v56 = vpop.xlane.xlu2 %745 }
 0x1b6   : > { %v787_v12 = vmul.f32 %v4579_v5, %v5156_v21  ;;  %v743_v4 = vpop.xlane.xlu1 %742  ;;  %4582 = vrcp.f32 %v746_v56  ;;  %v5389_v46 = vpop.eup %4580  ;;  %v5398_v5 = vpack.c.b16 %v1401_v38, %v1401_v38  ;;  %v1177_v56 = vsel %vm315_vm0, %v5110_v7, 0 }
 0x1b7   : > { %v804_v33 = vpack.c.bf16 %v788_v15, %v788_v15  ;;  %4584 = vrcp.f32 %v743_v4  ;;  %v762_v62 = vsel %vm620_vm1, %v5389_v46, 0.0  ;;  %v5410_v4 = vpop.permute.xlu0 %1461  ;;  %v1103_v38 = vsel %vm816_vm2, %v5266_v24, 0 }
 0x1b8   : > { %v803_v63 = vpack.c.bf16 %v787_v12, %v787_v12 }
 0x1b9   : > { %4374 = vmatmul.msk.bf16.vlgmr.msrb.gmra.mxu3 %vm620_vm1, %v804_v33 }
 0x1ba   : > { %4373 = vmatmul.msk.bf16.vlgmr.msrb.gmra.mxu2 %vm620_vm1, %v803_v63 }
 0x1bb   : > { %1093 = vmatpush.bf16.msrb.mxu2 %v1084_v0  ;;  %1548 = vrot.lane.b32.xlu2 %v5381_v61, %s4798_s22 }
 0x1bc   : > { %v4583_v21 = vpop.eup %4582 }
 0x1bd   : > { %v4585_v22 = vpop.eup %4584  ;;  %v790_v28 = vmul.f32 %v4583_v21, %v5165_v40  ;;  %v1367_v40 = vunpack.c.l.b16 %v4981_v32  ;;  %v1517_v32 = vunpack.c.l.b16 %v4937_v59  ;;  %v1027_v21 = vsel %vm816_vm2, %v5245_v58, 0 }
 0x1be   : > { %v789_v18 = vmul.f32 %v4585_v22, %v5167_v2  ;;  %v749_v50 = vpop.xlane.xlu1 %748  ;;  %1036 = vmatpush.bf16.msra.mxu3 %v1027_v21  ;;  %v1483_v59 = vunpack.c.l.b16 %v5016_v54  ;;  %v1839_v21 = vunpack.c.l.b16 %v5256_v9  ;;  %v1815_v9 = vunpack.c.l.b16 %v5237_v31 }
 0x1bf   : > { %4586 = vrcp.f32 %v749_v50  ;;  %v806_v53 = vpack.c.bf16 %v790_v28, %v790_v28  ;;  %763 = vadd.xlane.f32.xlu0 %v762_v62  ;;  %v5412_v33 = vpack.c.b16 %v1367_v40, %v1367_v40  ;;  %v5419_v63 = vpop.permute.xlu0 %1427  ;;  %v5422_v0 = vpack.c.b16 %v1517_v32, %v1517_v32  ;;  %v1259_v28 = vpop.permute.xlu2 %1258 }
 0x1c0   : > { %v805_v15 = vpack.c.bf16 %v789_v18, %v789_v18  ;;  %v5435_v22 = vpack.c.b16 %v1483_v59, %v1483_v59 }
 0x1c1   : > { %4376 = vmatmul.msk.bf16.vlgmr.msra.gmra.mxu1 %vm620_vm1, %v806_v53 }
 0x1c2   : > { %4375 = vmatmul.msk.bf16.vlgmr.msra.gmra.mxu0 %vm620_vm1, %v805_v15  ;;  %1186 = vmatpush.bf16.xpose.msra.mxu1 %v1177_v56 }
 0x1c3   : > { %1157 = vmatpush.bf16.xpose.msra.mxu0 %v1148_v35  ;;  %1403 = vrot.lane.b32.xlu2 %v5398_v5, %s4798_s22  ;;  %v1235_v35 = vsel %vm315_vm0, %v5108_v6, 0 }
 0x1c4   : > { %1112 = vmatpush.bf16.msrb.mxu3 %v1103_v38  ;;  %1485 = vrot.lane.b32.xlu1 %v5435_v22, %s4798_s22 }
 0x1c5   : > { %v4587_v2 = vpop.eup %4586 }
 0x1c6   : > { %v791_v12 = vmul.f32 %v4587_v2, %v5176_v41 }
 0x1c7   : > { %v5428_v47 = vpop.permute.xlu0 %1282  ;;  %v5441_v50 = vpop.permute.xlu2 %1456 }
 0x1c8   : > { %v807_v7 = vpack.c.bf16 %v791_v12, %v791_v12 }
 0x1ca   : > { %4377 = vmatmul.msk.bf16.vlgmr.msra.gmra.mxu2 %vm620_vm1, %v807_v7 }
 0x1cb   : > { %1215 = vmatpush.bf16.xpose.msra.mxu2 %v1206_v1  ;;  %1369 = vrot.lane.b32.xlu2 %v5412_v33, %s4798_s22 }
 0x1cf   : > { %v1375_v41 = vpop.permute.xlu0 %1374 }
 0x1d0   : > { %v1380_v31 = vsel %vm315_vm0, %v1375_v41, 0 }
 0x1d3   : > { %1519 = vrot.lane.b32.xlu2 %v5422_v0, %s4798_s22  ;;  %2324 = vrot.lane.b32.xlu0 %v4964_v10, %s4799_s26 }
 0x1d5   : > { %v1433_v2 = vpop.permute.xlu1 %1432 }
 0x1d7   : > { %v5439_v18 = vpop.permute.xlu0 %1572 }
 0x1df   : > { %v5443_v53 = vpop.permute.xlu0 %1490 }
 0x1e7   : > { %v5445_v62 = vpop.permute.xlu0 %1514 }
 0x1ef   : > { %v5451_v12 = vpop.permute.xlu0 %1865 }
 0x1fe   : > { %v752_v58 = vpop.xlane.xlu2 %751 }
 0x1ff   : > { %4588 = vrcp.f32 %v752_v58  ;;  %v5458_v58 = vpack.c.b16 %v1839_v21, %v1839_v21 }
 0x201   : > { %6869 = vst [vmem:[#allocation27_spill] sm:$0xff] %v5458_v58  ;;  %1841 = vrot.lane.b32.xlu1 %v5458_v58, %s4798_s22 }
 0x205   : > { %v4589_v24 = vpop.eup %4588 }
 0x206   : > { %v792_v54 = vmul.f32 %v4589_v24, %v5250_v36  ;;  %v755_v15 = vpop.xlane.xlu2 %754  ;;  %v1264_v36 = vsel %vm315_vm0, %v1259_v28, 0 }
 0x207   : > { %4590 = vrcp.f32 %v755_v15 }
 0x208   : > { %v808_v56 = vpack.c.bf16 %v792_v54, %v792_v54  ;;  %v1288_v54 = vpop.permute.xlu1 %1287 }
 0x209   : > { %v1293_v28 = vsel %vm315_vm0, %v1288_v54, 0  ;;  %v1983_v54 = vunpack.c.l.b16 %v5321_v23 }
 0x20a   : > { %4378 = vmatmul.msk.bf16.vlgmr.msra.gmra.mxu3 %vm620_vm1, %v808_v56 }
 0x20b   : > { %1244 = vmatpush.bf16.xpose.msra.mxu3 %v1235_v35 }
 0x20d   : > { %v4591_v40 = vpop.eup %4590 }
 0x20e   : > { %v793_v7 = vmul.f32 %v4591_v40, %v5271_v13  ;;  %v758_v1 = vpop.xlane.xlu2 %757  ;;  %v5460_v13 = vpop.permute.xlu0 %1793  ;;  %v5471_v40 = vpack.c.b16 %v1815_v9, %v1815_v9 }
 0x20f   : > { %4592 = vrcp.f32 %v758_v1 }
 0x210   : > { %v809_v32 = vpack.c.bf16 %v793_v7, %v793_v7  ;;  %6870 = vst [vmem:[#allocation28_spill] sm:$0xff] %v5471_v40  ;;  %1817 = vrot.lane.b32.xlu1 %v5471_v40, %s4798_s22 }
 0x212   : > { %4379 = vmatmul.msk.bf16.vlgmr.msrb.gmra.mxu0 %vm620_vm1, %v809_v32 }
 0x213   : > { %1273 = vmatpush.bf16.xpose.msrb.mxu0 %v1264_v36  ;;  %v1322_v36 = vsel %vm315_vm0, %v5114_v14, 0  ;;  %v1254_v14 = vpop.permute.xlu1 %1253 }
 0x215   : > { %v4593_v6 = vpop.eup %4592  ;;  %v829_v24 = vpop.f32.mrf.mxu0 }
 0x216   : > { %v794_v38 = vmul.f32 %v4593_v6, %v5302_v20  ;;  %v761_v59 = vpop.xlane.xlu2 %760  ;;  %1118 = vst.msk [vmem:[#allocation2] sm:$0xff] %vm315_vm0, %v829_v24  ;;  %v5479_v21 = vpop.permute.xlu0 %2057 }
 0x217   : > { %4594 = vrcp.f32 %v761_v59 }
 0x218   : > { %v810_v15 = vpack.c.bf16 %v794_v38, %v794_v38 }
 0x21a   : > { %4380 = vmatmul.msk.bf16.vlgmr.msrb.gmra.mxu1 %vm620_vm1, %v810_v15 }
 0x21b   : > { %1302 = vmatpush.bf16.xpose.msrb.mxu1 %v1293_v28  ;;  %v5497_v28 = vpack.c.b16 %v1983_v54, %v1983_v54  ;;  %v5509_v23 = vpop.permute.xlu1 %1577  ;;  %v1351_v54 = vsel %vm315_vm0, %v5104_v52, 0  ;;  %v1799_v52 = vsel %vm816_vm2, %v5460_v13, 0 }
 0x21d   : > { %v4595_v20 = vpop.eup %4594  ;;  %v831_v7 = vpop.f32.mrf.mxu0  ;;  %6871 = vst [vmem:[#allocation29_spill] sm:$0xff] %v5497_v28 }
 0x21e   : > { %v795_v56 = vmul.f32 %v4595_v20, %v5326_v43  ;;  %v5469_v35 = vpop.permute.xlu2 %1548  ;;  %v848_v1 = vpop.f32.mrf.mxu1  ;;  %v1887_v43 = vunpack.c.l.b16 %v5277_v60  ;;  %v1438_v20 = vsel %vm315_vm0, %v1433_v2, 0 }
 0x21f   : > { %1119 = vst.msk [vmem:[#allocation2 + $0x8] sm:$0xff] %vm315_vm0, %v848_v1  ;;  %v5492_v41 = vpop.permute.xlu0 %2153 }
 0x220   : > { %v811_v32 = vpack.c.bf16 %v795_v56, %v795_v56  ;;  %v5485_v38 = vpack.c.b16 %v1887_v43, %v1887_v43 }
 0x222   : > { %4381 = vmatmul.msk.bf16.vlgmr.msrb.gmra.mxu2 %vm620_vm1, %v811_v32  ;;  %4383 = vmatmul.msk.bf16.vlgmr.msra.gmra.mxu0 %vm315_vm0, %v5116_v19 }
 0x223   : > { %1331 = vmatpush.bf16.xpose.msrb.mxu2 %v1322_v36  ;;  %1389 = vmatpush.bf16.xpose.msra.mxu0 %v1380_v31 }
 0x224   : > { %1889 = vrot.lane.b32.xlu1 %v5485_v38, %s4798_s22 }
 0x226   : > { %v1404_v6 = vpop.permute.xlu2 %1403  ;;  %v850_v59 = vpop.f32.mrf.mxu1 }
 0x227   : > { %v1409_v24 = vsel %vm315_vm0, %v1404_v6, 0 }
 0x22a   : > { %4384 = vmatmul.msk.bf16.vlgmr.msra.gmra.mxu1 %vm315_vm0, %v5112_v8  ;;  %v1496_v8 = vsel %vm315_vm0, %v5443_v53, 0 }
 0x22b   : > { %1418 = vmatpush.bf16.xpose.msra.mxu1 %v1409_v24  ;;  %v1544_v24 = vpop.permute.xlu1 %1543 }
 0x22c   : > { %v886_v19 = vpop.f32.mrf.mxu3  ;;  %1985 = vrot.lane.b32.xlu1 %v5497_v28, %s4798_s22 }
 0x22d   : > { %1121 = vst.msk [vmem:[#allocation2 + $0x18] sm:$0xff] %vm315_vm0, %v886_v19  ;;  %v867_v60 = vpop.f32.mrf.mxu2 }
 0x22e   : > { %1120 = vst.msk [vmem:[#allocation2 + $0x10] sm:$0xff] %vm315_vm0, %v867_v60  ;;  %v1370_v15 = vpop.permute.xlu2 %1369  ;;  %v924_v9 = vpop.f32.mrf.mxu1  ;;  %v1554_v60 = vsel %vm315_vm0, %v5469_v35, 0 }
 0x22f   : > { %v905_v56 = vpop.f32.mrf.mxu0  ;;  %1123 = vst.msk [vmem:[#allocation2 + $0x28] sm:$0xff] %vm315_vm0, %v924_v9  ;;  %v2079_v9 = vunpack.c.l.b16 %v5361_v29  ;;  %v1959_v29 = vunpack.c.l.b16 %v5297_v49  ;;  %v1467_v49 = vsel %vm315_vm0, %v5410_v4, 0  ;;  %v1911_v4 = vunpack.c.l.b16 %v5280_v39 }
 0x230   : > { %1122 = vst.msk [vmem:[#allocation2 + $0x20] sm:$0xff] %vm315_vm0, %v905_v56  ;;  %v2127_v39 = vunpack.c.l.b16 %v5378_v42 }
 0x232   : > { %4385 = vmatmul.msk.bf16.vlgmr.msra.gmra.mxu2 %vm315_vm0, %v5102_v51  ;;  %4387 = vmatmul.msk.bf16.vlgmr.msrb.gmra.mxu0 %vm315_vm0, %v1254_v14  ;;  %v764_v7 = vpop.xlane.xlu0 %763 }
 0x233   : > { %1505 = vmatpush.bf16.xpose.msrb.mxu0 %v1496_v8  ;;  %1447 = vmatpush.bf16.xpose.msra.mxu2 %v1438_v20  ;;  %4596 = vrcp.f32 %v764_v7  ;;  %v1399_v13 = vpop.permute.xlu1 %1398 }
 0x234   : > { %v888_v2 = vpop.f32.mrf.mxu3  ;;  %2303 = vrot.lane.b32.xlu1 %v4868_v16, %s4799_s26 }
 0x235   : > { %v869_v1 = vpop.f32.mrf.mxu2 }
 0x236   : > { %v1520_v32 = vpop.permute.xlu2 %1519  ;;  %v926_v36 = vpop.f32.mrf.mxu1 }
 0x237   : > { %v907_v31 = vpop.f32.mrf.mxu0  ;;  %v1525_v43 = vsel %vm315_vm0, %v1520_v32, 0 }
 0x238   : > { %v5582_v31 = vpack.c.b16 %v2127_v39, %v2127_v39 }
 0x239   : > { %v4597_v51 = vpop.eup %4596 }
 0x23a   : > { %4388 = vmatmul.msk.bf16.vlgmr.msrb.gmra.mxu1 %vm315_vm0, %v5428_v47  ;;  %v796_v53 = vmul.f32 %v4597_v51, %v5389_v46  ;;  %v1935_v46 = vunpack.c.l.b16 %v5307_v45  ;;  %v5539_v45 = vpack.c.b16 %v2079_v9, %v2079_v9  ;;  %6877 = vst [vmem:[#allocation35_spill] sm:$0xff] %v5582_v31 }
 0x23b   : > { %1534 = vmatpush.bf16.xpose.msrb.mxu1 %v1525_v43 }
 0x23c   : > { %v962_v6 = vpop.f32.mrf.mxu3  ;;  %v812_v14 = vpack.c.bf16 %v796_v53, %v796_v53  ;;  %2326 = vrot.lane.b32.xlu1 %v4870_v17, %s4799_s26  ;;  %v5535_v35 = vpack.c.b16 %v1935_v46, %v1935_v46  ;;  %6873 = vst [vmem:[#allocation31_spill] sm:$0xff] %v5539_v45 }
 0x23d   : > { %1125 = vst.msk [vmem:[#allocation2 + $0x38] sm:$0xff] %vm315_vm0, %v962_v6  ;;  %v943_v59 = vpop.f32.mrf.mxu2 }
 0x23e   : > { %1124 = vst.msk [vmem:[#allocation2 + $0x30] sm:$0xff] %vm315_vm0, %v943_v59  ;;  %v1000_v19 = vpop.f32.mrf.mxu1  ;;  %4382 = vmatmul.msk.bf16.vlgmr.msrb.gmra.mxu3 %vm620_vm1, %v812_v14  ;;  %1937 = vrot.lane.b32.xlu2 %v5535_v35, %s4798_s22 }
 0x23f   : > { %v981_v47 = vpop.f32.mrf.mxu0  ;;  %1127 = vst.msk [vmem:[#allocation2 + $0x48] sm:$0xff] %vm315_vm0, %v1000_v19  ;;  %1360 = vmatpush.bf16.xpose.msrb.mxu3 %v1351_v54 }
 0x240   : > { %1126 = vst.msk [vmem:[#allocation2 + $0x40] sm:$0xff] %vm315_vm0, %v981_v47 }
 0x241   : > { %6872 = vst [vmem:[#allocation30_spill] sm:$0xff] %v5535_v35 }
 0x242   : > { %4389 = vmatmul.msk.bf16.vlgmr.msrb.gmra.mxu2 %vm315_vm0, %v5106_v3  ;;  %4391 = vmatmul.msk.bf16.vlgmr.msra.gmra.mxu0 %vm315_vm0, %v1370_v15  ;;  %v5544_v3 = vpack.c.b16 %v1959_v29, %v1959_v29  ;;  %v2103_v15 = vunpack.c.l.b16 %v5355_v25  ;;  %v2031_v25 = vunpack.c.l.b16 %v5343_v37  ;;  %v1583_v37 = vsel %vm315_vm0, %v5509_v23, 0 }
 0x243   : > { %1808 = vmatpush.bf16.msra.mxu0 %v1799_v52  ;;  %1563 = vmatpush.bf16.xpose.msrb.mxu2 %v1554_v60 }
 0x244   : > { %v964_v20 = vpop.f32.mrf.mxu3  ;;  %2081 = vrot.lane.b32.xlu1 %v5539_v45, %s4798_s22  ;;  %v5550_v7 = vpack.c.b16 %v2103_v15, %v2103_v15  ;;  %v5562_v32 = vpack.c.b16 %v2031_v25, %v2031_v25 }
 0x245   : > { %v945_v56 = vpop.f32.mrf.mxu2 }
 0x246   : > { %v1002_v8 = vpop.f32.mrf.mxu1  ;;  %1961 = vrot.lane.b32.xlu2 %v5544_v3, %s4798_s22  ;;  %6874 = vst [vmem:[#allocation32_spill] sm:$0xff] %v5550_v7 }
 0x247   : > { %v983_v2 = vpop.f32.mrf.mxu0  ;;  %6875 = vst [vmem:[#allocation33_spill] sm:$0xff] %v5562_v32 }
 0x24a   : > { %4392 = vmatmul.msk.bf16.vlgmr.msra.gmra.mxu1 %vm315_vm0, %v1399_v13 }
 0x24c   : > { %2105 = vrot.lane.b32.xlu1 %v5550_v7, %s4798_s22 }
 0x24d   : > { %v1019_v1 = vpop.f32.mrf.mxu2 }
 0x24e   : > { %1128 = vst.msk [vmem:[#allocation2 + $0x50] sm:$0xff] %vm315_vm0, %v1019_v1  ;;  %4386 = vmatmul.msk.bf16.vlgmr.msra.gmra.mxu3 %vm315_vm0, %v5100_v48  ;;  %2033 = vrot.lane.b32.xlu2 %v5562_v32, %s4798_s22  ;;  %v5569_v48 = vpack.c.b16 %v1911_v4, %v1911_v4 }
 0x24f   : > { %1476 = vmatpush.bf16.xpose.msra.mxu3 %v1467_v49 }
 0x250   : > { %6876 = vst [vmem:[#allocation34_spill] sm:$0xff] %v5569_v48 }
 0x252   : > { %4393 = vmatmul.msk.bf16.vlgmr.msra.gmra.mxu2 %vm315_vm0, %v5419_v63  ;;  %v1486_v63 = vpop.permute.xlu1 %1485 }
 0x253   : > { %4395 = vmatmul.msk.bf16.vlgmr.msrb.gmra.mxu0 %vm315_vm0, %v1486_v63 }
 0x254   : > { %2301 = vrot.lane.b32.xlu1 %v4966_v11, %s4799_s26 }
 0x255   : > { %v1021_v36 = vpop.f32.mrf.mxu2 }
 0x256   : > { %1913 = vrot.lane.b32.xlu2 %v5569_v48, %s4798_s22 }
 0x25a   : > { %4396 = vmatmul.msk.bf16.vlgmr.msrb.gmra.mxu1 %vm315_vm0, %v5445_v62  ;;  %v2007_v62 = vunpack.c.l.b16 %v5324_v26 }
 0x25c   : > { %v5587_v43 = vpack.c.b16 %v2007_v62, %v2007_v62 }
 0x25e   : > { %4390 = vmatmul.msk.bf16.vlgmr.msrb.gmra.mxu3 %vm315_vm0, %v5127_v55  ;;  %2129 = vrot.lane.b32.xlu2 %v5582_v31, %s4798_s22  ;;  %6878 = vst [vmem:[#allocation36_spill] sm:$0xff] %v5587_v43  ;;  %v1871_v55 = vsel %vm816_vm2, %v5451_v12, 0 }
 0x25f   : > { %1592 = vmatpush.bf16.xpose.msrb.mxu3 %v1583_v37 }
 0x262   : > { %4397 = vmatmul.msk.bf16.vlgmr.msrb.gmra.mxu2 %vm315_vm0, %v1544_v24 }
 0x266   : > { %2009 = vrot.lane.b32.xlu2 %v5587_v43, %s4798_s22 }
 0x26e   : > { %4394 = vmatmul.msk.bf16.vlgmr.msra.gmra.mxu3 %vm315_vm0, %v5441_v50 }
 0x26f   : > { %1880 = vmatpush.bf16.msra.mxu3 %v1871_v55 }
 0x273   : > { %v1842_v19 = vpop.permute.xlu1 %1841 }
 0x274   : > { %v1847_v54 = vsel %vm816_vm2, %v1842_v19, 0 }
 0x275   : > { %1856 = vmatpush.bf16.msra.mxu2 %v1847_v54 }
 0x27e   : > { %4398 = vmatmul.msk.bf16.vlgmr.msrb.gmra.mxu3 %vm315_vm0, %v5439_v18 }
 0x282   : > { %v1818_v52 = vpop.permute.xlu1 %1817 }
 0x283   : > { %v1823_v20 = vsel %vm816_vm2, %v1818_v52, 0 }
 0x284   : > { %1832 = vmatpush.bf16.msra.mxu1 %v1823_v20 }
 0x28d   : > { %v1038_v42 = vpop.f32.mrf.mxu3 }
 0x28e   : > { %1129 = vst.msk [vmem:[#allocation2 + $0x58] sm:$0xff] %vm315_vm0, %v1038_v42 }
 0x28f   : > { %v1057_v23 = vpop.f32.mrf.mxu0 }
 0x290   : > { %1130 = vst.msk [vmem:[#allocation2 + $0x60] sm:$0xff] %vm315_vm0, %v1057_v23 }
 0x295   : > { %v1040_v26 = vpop.f32.mrf.mxu3 }
 0x296   : > { %v1890_v15 = vpop.permute.xlu1 %1889 }
 0x297   : > { %v1059_v51 = vpop.f32.mrf.mxu0  ;;  %v1076_v53 = vpop.f32.mrf.mxu1  ;;  %v1895_v49 = vsel %vm816_vm2, %v1890_v15, 0 }
 0x298   : > { %1131 = vst.msk [vmem:[#allocation2 + $0x68] sm:$0xff] %vm315_vm0, %v1076_v53  ;;  %v1938_v2 = vpop.permute.xlu2 %1937  ;;  %1904 = vmatpush.bf16.msrb.mxu0 %v1895_v49 }
 0x299   : > { %v1943_v1 = vsel %vm816_vm2, %v1938_v2, 0 }
 0x29a   : > { %1952 = vmatpush.bf16.msrb.mxu2 %v1943_v1 }
 0x29f   : > { %v1078_v6 = vpop.f32.mrf.mxu1  ;;  %v5600_v12 = vpop.f32.mrf.mxu0 }
 0x2a0   : > { %v1598_v50 = vsel %vm620_vm1, %v5600_v12, -inf  ;;  %v1962_v37 = vpop.permute.xlu2 %1961 }
 0x2a1   : > { %1599 = vmax.xlane.f32.xlu1 %v1598_v50  ;;  %v1967_v63 = vsel %vm816_vm2, %v1962_v37, 0 }
 0x2a2   : > { %1976 = vmatpush.bf16.msrb.mxu3 %v1967_v63 }
 0x2a5   : > { %v1095_v59 = vpop.f32.mrf.mxu2 }
 0x2a6   : > { %1132 = vst.msk [vmem:[#allocation2 + $0x70] sm:$0xff] %vm315_vm0, %v1095_v59 }
 0x2a7   : > { %v1161_v18 = vpop.f32.mrf.mxu0  ;;  %v5605_v24 = vpop.f32.mrf.mxu1 }
 0x2a8   : > { %v1601_v14 = vsel %vm620_vm1, %v5605_v24, -inf  ;;  %v5633_v23 = vpop.permute.xlu2 %2033 }
 0x2a9   : > { %1602 = vmax.xlane.f32.xlu0 %v1601_v14 }
 0x2ad   : > { %v1097_v60 = vpop.f32.mrf.mxu2 }
 0x2af   : > { %v1190_v47 = vpop.f32.mrf.mxu1  ;;  %v5610_v46 = vpop.f32.mrf.mxu0 }
 0x2b0   : > { %v1610_v9 = vsel %vm620_vm1, %v5610_v46, -inf  ;;  %v1914_v50 = vpop.permute.xlu2 %1913  ;;  %v5646_v47 = vpop.permute.xlu1 %1985 }
 0x2b1   : > { %1611 = vmax.xlane.f32.xlu0 %v1610_v9  ;;  %v1919_v59 = vsel %vm816_vm2, %v1914_v50, 0 }
 0x2b2   : > { %1928 = vmatpush.bf16.msrb.mxu1 %v1919_v59 }
 0x2b5   : > { %v5615_v29 = vpop.f32.mrf.mxu2 }
 0x2b6   : > { %v1604_v56 = vsel %vm620_vm1, %v5615_v29, -inf }
 0x2b7   : > { %1605 = vmax.xlane.f32.xlu2 %v1604_v56  ;;  %v5619_v8 = vpop.f32.mrf.mxu1  ;;  %v1277_v13 = vpop.f32.mrf.mxu0 }
 0x2b8   : > { %v1613_v36 = vsel %vm620_vm1, %v5619_v8, -inf  ;;  %v5652_v2 = vpop.permute.xlu1 %2303 }
 0x2bd   : > { %v1219_v25 = vpop.f32.mrf.mxu2 }
 0x2bf   : > { %1614 = vmax.xlane.f32.xlu2 %v1613_v36  ;;  %v1306_v4 = vpop.f32.mrf.mxu1  ;;  %v5635_v51 = vpop.f32.mrf.mxu0 }
 0x2c0   : > { %v1622_v36 = vsel %vm620_vm1, %v5635_v51, -inf  ;;  %v5662_v37 = vpop.permute.xlu1 %2326 }
 0x2c1   : > { %v1114_v39 = vpop.f32.mrf.mxu3 }
 0x2c2   : > { %1133 = vst.msk [vmem:[#allocation2 + $0x78] sm:$0xff] %vm315_vm0, %v1114_v39 }
 0x2c5   : > { %v5627_v62 = vpop.f32.mrf.mxu2 }
 0x2c6   : > { %v1616_v55 = vsel %vm620_vm1, %v5627_v62, -inf }
 0x2c7   : > { %v5631_v42 = vpop.f32.mrf.mxu1  ;;  %1617 = vmax.xlane.f32.xlu0 %v1616_v55  ;;  %v1393_v14 = vpop.f32.mrf.mxu0 }
 0x2c8   : > { %v1625_v9 = vsel %vm620_vm1, %v5631_v42, -inf }
 0x2c9   : > { %v1116_v26 = vpop.f32.mrf.mxu3 }
 0x2cd   : > { %v1335_v53 = vpop.f32.mrf.mxu2 }
 0x2ce   : > { %v5670_v53 = vpop.permute.xlu1 %2081 }
 0x2cf   : > { %v1422_v6 = vpop.f32.mrf.mxu1 }
 0x2d0   : > { %v5650_v56 = vpop.f32.mrf.mxu0 }
 0x2d1   : > { %v5638_v18 = vpop.f32.mrf.mxu3  ;;  %v1634_v50 = vsel %vm620_vm1, %v5650_v56, -inf }
 0x2d2   : > { %v1607_v19 = vsel %vm620_vm1, %v5638_v18, -inf }
 0x2d3   : > { %1608 = vmax.xlane.f32.xlu1 %v1607_v19 }
 0x2d5   : > { %v5642_v54 = vpop.f32.mrf.mxu2 }
 0x2d6   : > { %v1628_v26 = vsel %vm620_vm1, %v5642_v54, -inf  ;;  %v5676_v14 = vpop.permute.xlu1 %2105 }
 0x2d7   : > { %v5644_v60 = vpop.f32.mrf.mxu1 }
 0x2d8   : > { %v1509_v25 = vpop.f32.mrf.mxu0 }
 0x2d9   : > { %v1248_v52 = vpop.f32.mrf.mxu3 }
 0x2da   : > { %v1637_v52 = vsel %vm620_vm1, %v5644_v60, -inf }
 0x2db   : > { %1626 = vmax.xlane.f32.xlu1 %v1625_v9 }
 0x2dd   : > { %v1451_v20 = vpop.f32.mrf.mxu2 }
 0x2de   : > { %v5684_v20 = vpop.permute.xlu1 %2301 }
 0x2df   : > { %v1538_v13 = vpop.f32.mrf.mxu1  ;;  %6879 = vst [vmem:[#allocation37_spill] sm:$0xff] %v5684_v20 }
 0x2e1   : > { %v5654_v15 = vpop.f32.mrf.mxu3 }
 0x2e2   : > { %v1619_v1 = vsel %vm620_vm1, %v5654_v15, -inf }
 0x2e3   : > { %1620 = vmax.xlane.f32.xlu2 %v1619_v1  ;;  %v5686_v1 = vpop.permute.xlu0 %2324 }
 0x2e4   : > { %6880 = vst [vmem:[#allocation38_spill] sm:$0xff] %v5686_v1  ;;  %v6883_v1 = vld [vmem:[#allocation5_spill] sm:$0xff] }
 0x2e5   : > { %v5658_v49 = vpop.f32.mrf.mxu2 }
 0x2e6   : > { %v1640_v6 = vsel %vm620_vm1, %v5658_v49, -inf }
 0x2e9   : > { %v1364_v4 = vpop.f32.mrf.mxu3 }
 0x2eb   : > { %1623 = vmax.xlane.f32.xlu2 %v1622_v36 }
 0x2ed   : > { %v1567_v63 = vpop.f32.mrf.mxu2 }
 0x2ee   : > { %v5689_v63 = vpop.permute.xlu2 %2129 }
 0x2f1   : > { %v5664_v39 = vpop.f32.mrf.mxu3 }
 0x2f2   : > { %v1631_v55 = vsel %vm620_vm1, %v5664_v39, -inf }
 0x2f3   : > { %1632 = vmax.xlane.f32.xlu1 %v1631_v55  ;;  %1629 = vmax.xlane.f32.xlu2 %v1628_v26 }
 0x2f9   : > { %v1480_v59 = vpop.f32.mrf.mxu3 }
 0x2fb   : > { %1641 = vmax.xlane.f32.xlu1 %v1640_v6  ;;  %1635 = vmax.xlane.f32.xlu2 %v1634_v50 }
 0x301   : > { %v5678_v19 = vpop.f32.mrf.mxu3 }
 0x302   : > { %v1643_v9 = vsel %vm620_vm1, %v5678_v19, -inf }
 0x303   : > { %1644 = vmax.xlane.f32.xlu0 %v1643_v9  ;;  %1638 = vmax.xlane.f32.xlu2 %v1637_v52  ;;  %v5696_v9 = vpop.permute.xlu2 %2009 }
 0x309   : > { %v1596_v13 = vpop.f32.mrf.mxu3 }
 0x314   : > { %v1600_v25 = vpop.xlane.xlu1 %1599 }
 0x315   : > { %v1646_v36 = vsub.f32 %v5600_v12, %v1600_v25 }
 0x317   : > { %v1662_v4 = vmul.f32 1.442695, %v1646_v36 }
 0x319   : > { %4598 = vpow2.f32 %v1662_v4 }
 0x31c   : > { %v1603_v55 = vpop.xlane.xlu0 %1602 }
 0x31d   : > { %v1647_v26 = vsub.f32 %v5605_v24, %v1603_v55 }
 0x31f   : > { %v5692_v6 = vpop.eup %4598  ;;  %v1664_v50 = vmul.f32 1.442695, %v1647_v26 }
 0x320   : > { %v1694_v59 = vsel %vm620_vm1, %v5692_v6, 0.0 }
 0x321   : > { %4600 = vpow2.f32 %v1664_v50  ;;  %1695 = vadd.xlane.f32.xlu1 %v1694_v59 }
 0x324   : > { %v1612_v52 = vpop.xlane.xlu0 %1611 }
 0x325   : > { %v1650_v12 = vsub.f32 %v5610_v46, %v1612_v52 }
 0x327   : > { %v5699_v13 = vpop.eup %4600  ;;  %v1670_v25 = vmul.f32 1.442695, %v1650_v12 }
 0x328   : > { %v1697_v36 = vsel %vm620_vm1, %v5699_v13, 0.0 }
 0x329   : > { %4602 = vpow2.f32 %v1670_v25  ;;  %1698 = vadd.xlane.f32.xlu2 %v1697_v36 }
 0x32a   : > { %v1606_v24 = vpop.xlane.xlu2 %1605 }
 0x32b   : > { %v1648_v4 = vsub.f32 %v5615_v29, %v1606_v24  ;;  %v6881_v29 = vld [vmem:[#allocation8_spill] sm:$0xff] }
 0x32d   : > { %v1666_v55 = vmul.f32 1.442695, %v1648_v4  ;;  %v6882_v4 = vld [vmem:[#allocation10_spill] sm:$0xff] }
 0x32f   : > { %v5704_v26 = vpop.eup %4602  ;;  %4604 = vpow2.f32 %v1666_v55 }
 0x330   : > { %v1706_v50 = vsel %vm620_vm1, %v5704_v26, 0.0 }
 0x331   : > { %1707 = vadd.xlane.f32.xlu1 %v1706_v50 }
 0x332   : > { %v1615_v52 = vpop.xlane.xlu2 %1614 }
 0x333   : > { %v1651_v36 = vsub.f32 %v5619_v8, %v1615_v52 }
 0x335   : > { %v5708_v46 = vpop.eup %4604  ;;  %v1672_v55 = vmul.f32 1.442695, %v1651_v36  ;;  %v6885_v36 = vld [vmem:[#allocation9_spill] sm:$0xff] }
 0x336   : > { %v1700_v59 = vsel %vm620_vm1, %v5708_v46, 0.0 }
 0x337   : > { %1701 = vadd.xlane.f32.xlu0 %v1700_v59 }
 0x33a   : > { %v1618_v50 = vpop.xlane.xlu0 %1617 }
 0x346   : > { %v1609_v12 = vpop.xlane.xlu1 %1608 }
 0x347   : > { %v1649_v25 = vsub.f32 %v5638_v18, %v1609_v12  ;;  %v1652_v18 = vsub.f32 %v5627_v62, %v1618_v50  ;;  %v6884_v12 = vld [vmem:[#allocation7_spill] sm:$0xff] }
 0x349   : > { %v1668_v24 = vmul.f32 1.442695, %v1649_v25  ;;  %v1674_v52 = vmul.f32 1.442695, %v1652_v18 }
 0x34a   : > { %2418 = vrot.lane.b32.xlu1 %v6881_v29, %s4799_s26 }
 0x34b   : > { %2280 = vrot.lane.b32.xlu0 %v6882_v4, %s4799_s26  ;;  %4606 = vpow2.f32 %v1668_v24 }
 0x34c   : > { %4608 = vpow2.f32 %v1672_v55 }
 0x34d   : > { %4610 = vpow2.f32 %v1674_v52 }
 0x34e   : > { %v1627_v29 = vpop.xlane.xlu1 %1626 }
 0x34f   : > { %v1655_v52 = vsub.f32 %v5631_v42, %v1627_v29 }
 0x351   : > { %v5720_v59 = vpop.eup %4606 }
 0x352   : > { %2257 = vrot.lane.b32.xlu1 %v6883_v1, %s4799_s26  ;;  %v1703_v8 = vsel %vm620_vm1, %v5720_v59, 0.0  ;;  %v5727_v25 = vpop.eup %4608 }
 0x353   : > { %2416 = vrot.lane.b32.xlu0 %v6884_v12, %s4799_s26  ;;  %1704 = vadd.xlane.f32.xlu2 %v1703_v8  ;;  %v1709_v24 = vsel %vm620_vm1, %v5727_v25, 0.0  ;;  %v5733_v55 = vpop.eup %4610 }
 0x354   : > { %v1712_v50 = vsel %vm620_vm1, %v5733_v55, 0.0 }
 0x356   : > { %v1621_v62 = vpop.xlane.xlu2 %1620 }
 0x357   : > { %v1653_v8 = vsub.f32 %v5654_v15, %v1621_v62  ;;  %v6886_v62 = vld [vmem:[#allocation4_spill] sm:$0xff] }
 0x359   : > { %v1676_v12 = vmul.f32 1.442695, %v1653_v8 }
 0x35a   : > { %2393 = vrot.lane.b32.xlu1 %v6885_v36, %s4799_s26 }
 0x35b   : > { %1710 = vadd.xlane.f32.xlu2 %v1709_v24  ;;  %4612 = vpow2.f32 %v1676_v12  ;;  %v1680_v24 = vmul.f32 1.442695, %v1655_v52 }
 0x35e   : > { %v1624_v18 = vpop.xlane.xlu2 %1623 }
 0x35f   : > { %v1654_v20 = vsub.f32 %v5635_v51, %v1624_v18 }
 0x361   : > { %v1678_v36 = vmul.f32 1.442695, %v1654_v20  ;;  %v5740_v17 = vpop.eup %4612 }
 0x362   : > { %v1715_v15 = vsel %vm620_vm1, %v5740_v17, 0.0 }
 0x363   : > { %1713 = vadd.xlane.f32.xlu2 %v1712_v50  ;;  %4614 = vpow2.f32 %v1678_v36 }
 0x364   : > { %4616 = vpow2.f32 %v1680_v24 }
 0x366   : > { %v1630_v4 = vpop.xlane.xlu2 %1629  ;;  %v1633_v11 = vpop.xlane.xlu1 %1632 }
 0x367   : > { %v1657_v50 = vsub.f32 %v5664_v39, %v1633_v11 }
 0x369   : > { %v1684_v51 = vmul.f32 1.442695, %v1657_v50  ;;  %v5747_v42 = vpop.eup %4614 }
 0x36a   : > { %v5749_v29 = vpop.eup %4616  ;;  %v1718_v36 = vsel %vm620_vm1, %v5747_v42, 0.0 }
 0x36b   : > { %4618 = vpow2.f32 %v1684_v51  ;;  %v1721_v11 = vsel %vm620_vm1, %v5749_v29, 0.0 }
 0x36e   : > { %v1636_v20 = vpop.xlane.xlu2 %1635  ;;  %v1642_v8 = vpop.xlane.xlu1 %1641 }
 0x36f   : > { %v1658_v12 = vsub.f32 %v5650_v56, %v1636_v20  ;;  %v1660_v52 = vsub.f32 %v5658_v49, %v1642_v8 }
 0x371   : > { %v1686_v39 = vmul.f32 1.442695, %v1658_v12  ;;  %v5756_v18 = vpop.eup %4618  ;;  %v1690_v56 = vmul.f32 1.442695, %v1660_v52 }
 0x372   : > { %v1727_v24 = vsel %vm620_vm1, %v5756_v18, 0.0 }
 0x373   : > { %4620 = vpow2.f32 %v1686_v39 }
 0x374   : > { %4622 = vpow2.f32 %v1690_v56  ;;  %v1991_v56 = vsel %vm816_vm2, %v5646_v47, 0 }
 0x376   : > { %v1639_v51 = vpop.xlane.xlu2 %1638 }
 0x377   : > { %v1659_v39 = vsub.f32 %v5644_v60, %v1639_v51 }
 0x379   : > { %v5761_v50 = vpop.eup %4620 }
 0x37a   : > { %v1730_v12 = vsel %vm620_vm1, %v5761_v50, 0.0  ;;  %v5766_v49 = vpop.eup %4622 }
 0x37b   : > { %2395 = vrot.lane.b32.xlu2 %v6886_v62, %s4799_s26 }
 0x37d   : > { %1716 = vadd.xlane.f32.xlu0 %v1715_v15  ;;  %v1656_v15 = vsub.f32 %v5642_v54, %v1630_v4  ;;  %v1736_v54 = vsel %vm620_vm1, %v5766_v49, 0.0  ;;  %v6887_v4 = vld [vmem:[#allocation11_spill] sm:$0xff] }
 0x384   : > { %1719 = vadd.xlane.f32.xlu1 %v1718_v36  ;;  %v1682_v36 = vmul.f32 1.442695, %v1656_v15  ;;  %v1688_v15 = vmul.f32 1.442695, %v1659_v39  ;;  %v2015_v39 = vsel %vm816_vm2, %v5696_v9, 0  ;;  %v2087_v9 = vsel %vm816_vm2, %v5670_v53, 0 }
 0x385   : > { %1722 = vadd.xlane.f32.xlu0 %v1721_v11  ;;  %v2039_v53 = vsel %vm816_vm2, %v5633_v23, 0  ;;  %v6891_v23 = vld [vmem:[#allocation12_spill] sm:$0xff] }
 0x38d   : > { %1728 = vadd.xlane.f32.xlu0 %v1727_v24 }
 0x394   : > { %v1696_v20 = vpop.xlane.xlu1 %1695 }
 0x395   : > { %4624 = vrcp.f32 %v1696_v20  ;;  %1731 = vadd.xlane.f32.xlu0 %v1730_v12  ;;  %v1645_v20 = vpop.xlane.xlu0 %1644 }
 0x396   : > { %4626 = vpow2.f32 %v1682_v36  ;;  %v1661_v51 = vsub.f32 %v5678_v19, %v1645_v20  ;;  %v6888_v20 = vld [vmem:[#allocation23_spill] sm:$0xff] }
 0x39b   : > { %v4625_v11 = vpop.eup %4624 }
 0x39c   : > { %v1758_v8 = vmul.f32 %v4625_v11, %v5692_v6  ;;  %v1699_v52 = vpop.xlane.xlu2 %1698  ;;  %v5777_v60 = vpop.eup %4626 }
 0x39d   : > { %4628 = vrcp.f32 %v1699_v52  ;;  %1737 = vadd.xlane.f32.xlu0 %v1736_v54  ;;  %2278 = vrot.lane.b32.xlu1 %v6887_v4, %s4799_s26  ;;  %v1724_v11 = vsel %vm620_vm1, %v5777_v60, 0.0 }
 0x39e   : > { %v1774_v24 = vpack.c.bf16 %v1758_v8, %v1758_v8  ;;  %4630 = vpow2.f32 %v1688_v15  ;;  %v1692_v8 = vmul.f32 1.442695, %v1661_v51 }
 0x3a0   : > { %4399 = vmatmul.msk.bf16.vlgmr.msra.gmra.mxu0 %vm620_vm1, %v1774_v24 }
 0x3a1   : > { %2000 = vmatpush.bf16.msra.mxu0 %v1991_v56 }
 0x3a3   : > { %v4629_v6 = vpop.eup %4628 }
 0x3a4   : > { %v1759_v12 = vmul.f32 %v4629_v6, %v5699_v13  ;;  %v1708_v36 = vpop.xlane.xlu1 %1707  ;;  %1725 = vadd.xlane.f32.xlu2 %v1724_v11  ;;  %v5788_v19 = vpop.eup %4630 }
 0x3a5   : > { %4632 = vrcp.f32 %v1708_v36  ;;  %2349 = vrot.lane.b32.xlu1 %v5191_v30, %s4799_s26  ;;  %v1733_v24 = vsel %vm620_vm1, %v5788_v19, 0.0  ;;  %v6889_v36 = vld [vmem:[#allocation25_spill] sm:$0xff] }
 0x3a6   : > { %v1775_v47 = vpack.c.bf16 %v1759_v12, %v1759_v12 }
 0x3a8   : > { %4400 = vmatmul.msk.bf16.vlgmr.msra.gmra.mxu1 %vm620_vm1, %v1775_v47 }
 0x3a9   : > { %2024 = vmatpush.bf16.msra.mxu1 %v2015_v39 }
 0x3aa   : > { %v1702_v13 = vpop.xlane.xlu0 %1701 }
 0x3ab   : > { %v4633_v52 = vpop.eup %4632  ;;  %4634 = vrcp.f32 %v1702_v13 }
 0x3ac   : > { %4636 = vpow2.f32 %v1692_v8  ;;  %v1762_v54 = vmul.f32 %v4633_v52, %v5704_v26  ;;  %1734 = vadd.xlane.f32.xlu2 %v1733_v24  ;;  %v2063_v52 = vsel %vm816_vm2, %v5479_v21, 0  ;;  %v2111_v21 = vsel %vm816_vm2, %v5676_v14, 0 }
 0x3ad   : > { %2508 = vrot.lane.b32.xlu1 %v5201_v57, %s4799_s26  ;;  %v2135_v14 = vsel %vm816_vm2, %v5689_v63, 0  ;;  %v6897_v63 = vld [vmem:[#allocation16_spill] sm:$0xff] }
 0x3ae   : > { %v1778_v56 = vpack.c.bf16 %v1762_v54, %v1762_v54  ;;  %v6892_v54 = vld [vmem:[#allocation13_spill] sm:$0xff] }
 0x3b0   : > { %4403 = vmatmul.msk.bf16.vlgmr.msrb.gmra.mxu0 %vm620_vm1, %v1778_v56 }
 0x3b1   : > { %v4635_v15 = vpop.eup %4634  ;;  %2096 = vmatpush.bf16.msrb.mxu0 %v2087_v9  ;;  %2487 = vrot.lane.b32.xlu0 %v6888_v20, %s4799_s26 }
 0x3b2   : > { %v5800_v6 = vpop.eup %4636  ;;  %v1760_v26 = vmul.f32 %v4635_v15, %v5708_v46  ;;  %v6890_v46 = vld [vmem:[#allocation26_spill] sm:$0xff] }
 0x3b3   : > { %v1739_v12 = vsel %vm620_vm1, %v5800_v6, 0.0 }
 0x3b4   : > { %v1776_v51 = vpack.c.bf16 %v1760_v26, %v1760_v26  ;;  %1740 = vadd.xlane.f32.xlu2 %v1739_v12  ;;  %v6893_v26 = vld [vmem:[#allocation21_spill] sm:$0xff] }
 0x3b5   : > { %2579 = vrot.lane.b32.xlu1 %v5381_v61, %s4799_s26 }
 0x3b6   : > { %4401 = vmatmul.msk.bf16.vlgmr.msra.gmra.mxu2 %vm620_vm1, %v1776_v51 }
 0x3b7   : > { %2048 = vmatpush.bf16.msra.mxu2 %v2039_v53 }
 0x3b9   : > { %2372 = vrot.lane.b32.xlu0 %v6889_v36, %s4799_s26 }
 0x3bc   : > { %v5837_v15 = vpop.permute.xlu1 %2418 }
 0x3bd   : > { %2464 = vrot.lane.b32.xlu1 %v5398_v5, %s4799_s26  ;;  %v2281_v51 = vpop.permute.xlu0 %2280 }
 0x3c1   : > { %2347 = vrot.lane.b32.xlu0 %v6890_v46, %s4799_s26 }
 0x3c5   : > { %2439 = vrot.lane.b32.xlu1 %v5412_v33, %s4799_s26 }
 0x3c6   : > { %v1705_v11 = vpop.xlane.xlu2 %1704 }
 0x3c7   : > { %4638 = vrcp.f32 %v1705_v11 }
 0x3c9   : > { %2602 = vrot.lane.b32.xlu0 %v5340_v27, %s4799_s26 }
 0x3cc   : > { %2255 = vrot.lane.b32.xlu2 %v6891_v23, %s4799_s26 }
 0x3cd   : > { %2556 = vrot.lane.b32.xlu1 %v5422_v0, %s4799_s26  ;;  %v4639_v47 = vpop.eup %4638 }
 0x3ce   : > { %v1761_v39 = vmul.f32 %v4639_v47, %v5720_v59  ;;  %v1711_v8 = vpop.xlane.xlu2 %1710  ;;  %v2258_v47 = vpop.permute.xlu1 %2257 }
 0x3cf   : > { %4640 = vrcp.f32 %v1711_v8  ;;  %v5856_v8 = vpop.permute.xlu0 %2416 }
 0x3d0   : > { %v1777_v13 = vpack.c.bf16 %v1761_v39, %v1761_v39  ;;  %v6895_v39 = vld [vmem:[#allocation15_spill] sm:$0xff] }
 0x3d1   : > { %2577 = vrot.lane.b32.xlu0 %v5357_v34, %s4799_s26 }
 0x3d2   : > { %4402 = vmatmul.msk.bf16.vlgmr.msra.gmra.mxu3 %vm620_vm1, %v1777_v13 }
 0x3d3   : > { %2072 = vmatpush.bf16.msra.mxu3 %v2063_v52 }
 0x3d4   : > { %2510 = vrot.lane.b32.xlu2 %v6892_v54, %s4799_s26 }
 0x3d5   : > { %2857 = vrot.lane.b32.xlu1 %v5458_v58, %s4799_s26  ;;  %v4641_v24 = vpop.eup %4640 }
 0x3d6   : > { %v1763_v59 = vmul.f32 %v4641_v24, %v5727_v25  ;;  %v1714_v56 = vpop.xlane.xlu2 %1713  ;;  %v6894_v25 = vld [vmem:[#allocation14_spill] sm:$0xff]  ;;  %v5864_v13 = vpop.permute.xlu1 %2393  ;;  %v6898_v24 = vld [vmem:[#allocation17_spill] sm:$0xff] }
 0x3d7   : > { %4642 = vrcp.f32 %v1714_v56 }
 0x3d8   : > { %v1779_v9 = vpack.c.bf16 %v1763_v59, %v1763_v59 }
 0x3d9   : > { %2462 = vrot.lane.b32.xlu0 %v5374_v44, %s4799_s26 }
 0x3da   : > { %4404 = vmatmul.msk.bf16.vlgmr.msrb.gmra.mxu1 %vm620_vm1, %v1779_v9 }
 0x3db   : > { %2120 = vmatpush.bf16.msrb.mxu1 %v2111_v21 }
 0x3dc   : > { %2485 = vrot.lane.b32.xlu2 %v6894_v25, %s4799_s26 }
 0x3dd   : > { %2815 = vrot.lane.b32.xlu1 %v6893_v26, %s4799_s26  ;;  %v4643_v12 = vpop.eup %4642 }
 0x3de   : > { %v1764_v53 = vmul.f32 %v4643_v12, %v5733_v55  ;;  %v6896_v55 = vld [vmem:[#allocation20_spill] sm:$0xff]  ;;  %v6899_v12 = vld [vmem:[#allocation22_spill] sm:$0xff] }
 0x3e0   : > { %v1780_v11 = vpack.c.bf16 %v1764_v53, %v1764_v53 }
 0x3e1   : > { %2531 = vrot.lane.b32.xlu0 %v5435_v22, %s4799_s26 }
 0x3e2   : > { %4405 = vmatmul.msk.bf16.vlgmr.msrb.gmra.mxu2 %vm620_vm1, %v1780_v11  ;;  %v2159_v11 = vsel %vm816_vm2, %v5492_v41, 0 }
 0x3e3   : > { %2144 = vmatpush.bf16.msrb.mxu2 %v2135_v14 }
 0x3e4   : > { %2370 = vrot.lane.b32.xlu2 %v6895_v39, %s4799_s26 }
 0x3e5   : > { %2941 = vrot.lane.b32.xlu1 %v5535_v35, %s4799_s26 }
 0x3e9   : > { %2878 = vrot.lane.b32.xlu0 %v6896_v55, %s4799_s26 }
 0x3ec   : > { %2441 = vrot.lane.b32.xlu2 %v6897_v63, %s4799_s26 }
 0x3ed   : > { %2962 = vrot.lane.b32.xlu1 %v5544_v3, %s4799_s26 }
 0x3f0   : > { %v1717_v52 = vpop.xlane.xlu0 %1716 }
 0x3f1   : > { %4644 = vrcp.f32 %v1717_v52  ;;  %2899 = vrot.lane.b32.xlu0 %v5485_v38, %s4799_s26  ;;  %v6900_v52 = vld [vmem:[#allocation18_spill] sm:$0xff] }
 0x3f4   : > { %2600 = vrot.lane.b32.xlu2 %v6898_v24, %s4799_s26 }
 0x3f5   : > { %2920 = vrot.lane.b32.xlu1 %v5569_v48, %s4799_s26 }
 0x3f7   : > { %v4645_v59 = vpop.eup %4644  ;;  %v1720_v56 = vpop.xlane.xlu1 %1719 }
 0x3f8   : > { %v1765_v9 = vmul.f32 %v4645_v59, %v5740_v17  ;;  %4646 = vrcp.f32 %v1720_v56  ;;  %v1723_v21 = vpop.xlane.xlu0 %1722 }
 0x3f9   : > { %4648 = vrcp.f32 %v1723_v21  ;;  %3046 = vrot.lane.b32.xlu0 %v6899_v12, %s4799_s26 }
 0x3fa   : > { %v1781_v53 = vpack.c.bf16 %v1765_v9, %v1765_v9 }
 0x3fc   : > { %4406 = vmatmul.msk.bf16.vlgmr.msrb.gmra.mxu3 %vm620_vm1, %v1781_v53  ;;  %2533 = vrot.lane.b32.xlu2 %v6900_v52, %s4799_s26  ;;  %v2263_v53 = vsel %vm315_vm0, %v2258_v47, 0  ;;  %v6902_v47 = vld [vmem:[#allocation24_spill] sm:$0xff] }
 0x3fd   : > { %2168 = vmatpush.bf16.msrb.mxu3 %v2159_v11  ;;  %2983 = vrot.lane.b32.xlu1 %v5497_v28, %s4799_s26  ;;  %v2286_v11 = vsel %vm315_vm0, %v2281_v51, 0 }
 0x3fe   : > { %v4647_v14 = vpop.eup %4646 }
 0x3ff   : > { %v4649_v17 = vpop.eup %4648  ;;  %v1766_v59 = vmul.f32 %v4647_v14, %v5747_v42  ;;  %v6901_v42 = vld [vmem:[#allocation19_spill] sm:$0xff] }
 0x400   : > { %v1767_v56 = vmul.f32 %v4649_v17, %v5749_v29  ;;  %v1729_v21 = vpop.xlane.xlu0 %1728 }
 0x401   : > { %v1782_v9 = vpack.c.bf16 %v1766_v59, %v1766_v59  ;;  %4650 = vrcp.f32 %v1729_v21  ;;  %3109 = vrot.lane.b32.xlu0 %v5582_v31, %s4799_s26  ;;  %v2332_v59 = vsel %vm315_vm0, %v5662_v37, 0 }
 0x402   : > { %v1783_v41 = vpack.c.bf16 %v1767_v56, %v1767_v56  ;;  %v2396_v56 = vpop.permute.xlu2 %2395 }
 0x403   : > { %4407 = vmatmul.msk.bf16.vlgmr.msra.gmra.mxu0 %vm620_vm1, %v1782_v9 }
 0x404   : > { %2272 = vmatpush.bf16.xpose.msra.mxu0 %v2263_v53  ;;  %4408 = vmatmul.msk.bf16.vlgmr.msra.gmra.mxu1 %vm620_vm1, %v1783_v41 }
 0x405   : > { %2295 = vmatpush.bf16.xpose.msra.mxu1 %v2286_v11  ;;  %3301 = vrot.lane.b32.xlu1 %v4964_v10, %s4800_s27 }
 0x406   : > { %2554 = vrot.lane.b32.xlu2 %v6901_v42, %s4799_s26 }
 0x407   : > { %v4651_v29 = vpop.eup %4650 }
 0x408   : > { %v1769_v14 = vmul.f32 %v4651_v29, %v5756_v18  ;;  %v1732_v17 = vpop.xlane.xlu0 %1731 }
 0x409   : > { %4652 = vrcp.f32 %v1732_v17  ;;  %3130 = vrot.lane.b32.xlu0 %v6902_v47, %s4799_s26 }
 0x40a   : > { %v1785_v51 = vpack.c.bf16 %v1769_v14, %v1769_v14 }
 0x40c   : > { %4410 = vmatmul.msk.bf16.vlgmr.msra.gmra.mxu3 %vm620_vm1, %v1785_v51 }
 0x40d   : > { %2341 = vmatpush.bf16.xpose.msra.mxu3 %v2332_v59  ;;  %3255 = vrot.lane.b32.xlu1 %v6887_v4, %s4800_s27 }
 0x40e   : > { %2836 = vrot.lane.b32.xlu2 %v5471_v40, %s4799_s26 }
 0x40f   : > { %v4653_v10 = vpop.eup %4652  ;;  %v5907_v9 = vpop.permute.xlu1 %2278 }
 0x410   : > { %v1770_v18 = vmul.f32 %v4653_v10, %v5761_v50  ;;  %v1738_v4 = vpop.xlane.xlu0 %1737  ;;  %v2309_v10 = vsel %vm315_vm0, %v5652_v2, 0 }
 0x411   : > { %3067 = vrot.lane.b32.xlu0 %v5539_v45, %s4799_s26 }
 0x412   : > { %v1786_v21 = vpack.c.bf16 %v1770_v18, %v1770_v18 }
 0x414   : > { %4411 = vmatmul.msk.bf16.vlgmr.msrb.gmra.mxu0 %vm620_vm1, %v1786_v21 }
 0x416   : > { %3025 = vrot.lane.b32.xlu2 %v5562_v32, %s4799_s26 }
 0x417   : > { %v1726_v37 = vpop.xlane.xlu2 %1725  ;;  %v2350_v41 = vpop.permute.xlu1 %2349 }
 0x418   : > { %4654 = vrcp.f32 %v1726_v37  ;;  %v2355_v50 = vsel %vm315_vm0, %v2350_v41, 0  ;;  %v6905_v41 = vld [vmem:[#allocation3_spill] sm:$0xff] }
 0x419   : > { %3088 = vrot.lane.b32.xlu0 %v5550_v7, %s4799_s26  ;;  %2364 = vmatpush.bf16.xpose.msrb.mxu0 %v2355_v50 }
 0x41d   : > { %v5915_v53 = vpop.f32.mrf.mxu0 }
 0x41e   : > { %6903 = vst [vmem:[#allocation5_spill] sm:$0xff] %v5915_v53  ;;  %3004 = vrot.lane.b32.xlu2 %v5587_v43, %s4799_s26  ;;  %v4655_v11 = vpop.eup %4654 }
 0x41f   : > { %v1768_v29 = vmul.f32 %v4655_v11, %v5777_v60  ;;  %v1735_v14 = vpop.xlane.xlu2 %1734  ;;  %v5922_v59 = vpop.permute.xlu1 %2508 }
 0x420   : > { %4656 = vrcp.f32 %v1735_v14 }
 0x421   : > { %3280 = vrot.lane.b32.xlu0 %v4868_v16, %s4800_s27  ;;  %v1784_v17 = vpack.c.bf16 %v1768_v29, %v1768_v29  ;;  %4658 = vrcp.f32 %v1738_v4 }
 0x423   : > { %v2488_v51 = vpop.permute.xlu0 %2487  ;;  %4409 = vmatmul.msk.bf16.vlgmr.msra.gmra.mxu2 %vm620_vm1, %v1784_v17 }
 0x424   : > { %2318 = vmatpush.bf16.xpose.msra.mxu2 %v2309_v10 }
 0x425   : > { %v1812_v18 = vpop.f32.mrf.mxu0  ;;  %v5926_v21 = vpop.f32.mrf.mxu1 }
 0x426   : > { %6904 = vst [vmem:[#allocation4_spill] sm:$0xff] %v5926_v21  ;;  %3234 = vrot.lane.b32.xlu2 %v6883_v1, %s4800_s27  ;;  %v4657_v60 = vpop.eup %4656 }
 0x427   : > { %v1771_v16 = vmul.f32 %v4657_v60, %v5788_v19  ;;  %v1741_v37 = vpop.xlane.xlu2 %1740  ;;  %v4659_v11 = vpop.eup %4658  ;;  %v6907_v60 = vld [vmem:[#allocation6_spill] sm:$0xff] }
 0x428   : > { %4660 = vrcp.f32 %v1741_v37  ;;  %v2580_v14 = vpop.permute.xlu1 %2579  ;;  %v1772_v1 = vmul.f32 %v4659_v11, %v5766_v49  ;;  %v6909_v11 = vld [vmem:[#allocation10_spill] sm:$0xff] }
 0x429   : > { %3303 = vrot.lane.b32.xlu0 %v6905_v41, %s4800_s27  ;;  %v1787_v50 = vpack.c.bf16 %v1771_v16, %v1771_v16  ;;  %v2424_v41 = vsel %vm315_vm0, %v5837_v15, 0 }
 0x42a   : > { %v1788_v16 = vpack.c.bf16 %v1772_v1, %v1772_v1 }
 0x42b   : > { %v2373_v2 = vpop.permute.xlu0 %2372  ;;  %4412 = vmatmul.msk.bf16.vlgmr.msrb.gmra.mxu1 %vm620_vm1, %v1787_v50  ;;  %v2401_v50 = vsel %vm315_vm0, %v2396_v56, 0 }
 0x42c   : > { %v2378_v29 = vsel %vm315_vm0, %v2373_v2, 0 }
 0x42d   : > { %v1836_v17 = vpop.f32.mrf.mxu1  ;;  %v5935_v4 = vpop.f32.mrf.mxu0  ;;  %2387 = vmatpush.bf16.xpose.msrb.mxu1 %v2378_v29 }
 0x42e   : > { %6906 = vst [vmem:[#allocation11_spill] sm:$0xff] %v5935_v4  ;;  %3232 = vrot.lane.b32.xlu2 %v6891_v23, %s4800_s27  ;;  %v4661_v19 = vpop.eup %4660 }
 0x42f   : > { %v1773_v10 = vmul.f32 %v4661_v19, %v5800_v6  ;;  %v2256_v18 = vpop.permute.xlu2 %2255  ;;  %v2493_v19 = vsel %vm315_vm0, %v2488_v51, 0 }
 0x430   : > { %4415 = vmatmul.msk.bf16.vlgmr.msra.gmra.mxu0 %vm315_vm0, %v2256_v18  ;;  %v2465_v49 = vpop.permute.xlu1 %2464  ;;  %v6910_v18 = vld [vmem:[#allocation37_spill] sm:$0xff] }
 0x431   : > { %3278 = vrot.lane.b32.xlu0 %v6907_v60, %s4800_s27  ;;  %v1789_v37 = vpack.c.bf16 %v1773_v10, %v1773_v10  ;;  %v2470_v29 = vsel %vm315_vm0, %v2465_v49, 0  ;;  %v6911_v60 = vld [vmem:[#allocation38_spill] sm:$0xff] }
 0x433   : > { %4413 = vmatmul.msk.bf16.vlgmr.msrb.gmra.mxu2 %vm620_vm1, %v1788_v16  ;;  %4414 = vmatmul.msk.bf16.vlgmr.msrb.gmra.mxu3 %vm620_vm1, %v1789_v37  ;;  %v2348_v17 = vpop.permute.xlu0 %2347 }
 0x434   : > { %2410 = vmatpush.bf16.xpose.msrb.mxu2 %v2401_v50  ;;  %2433 = vmatpush.bf16.xpose.msrb.mxu3 %v2424_v41  ;;  %v6912_v41 = vld [vmem:[#allocation8_spill] sm:$0xff] }
 0x435   : > { %v1908_v2 = vpop.f32.mrf.mxu0 }
 0x436   : > { %v6913_v2 = vld [vmem:[#allocation9_spill] sm:$0xff] }
 0x437   : > { %v2511_v23 = vpop.permute.xlu2 %2510 }
 0x438   : > { %v2440_v15 = vpop.permute.xlu1 %2439  ;;  %v2516_v10 = vsel %vm315_vm0, %v2511_v23, 0 }
 0x439   : > { %v5950_v6 = vpop.f32.mrf.mxu2  ;;  %3257 = vrot.lane.b32.xlu0 %v6909_v11, %s4800_s27  ;;  %v2585_v11 = vsel %vm315_vm0, %v2580_v14, 0 }
 0x43a   : > { %6908 = vst [vmem:[#allocation23_spill] sm:$0xff] %v5950_v6 }
 0x43b   : > { %4416 = vmatmul.msk.bf16.vlgmr.msra.gmra.mxu1 %vm315_vm0, %v5907_v9  ;;  %v2603_v9 = vpop.permute.xlu0 %2602 }
 0x43c   : > { %2479 = vmatpush.bf16.xpose.msra.mxu1 %v2470_v29  ;;  %v2608_v23 = vsel %vm315_vm0, %v2603_v9, 0 }
 0x43f   : > { %v2486_v1 = vpop.permute.xlu2 %2485 }
 0x440   : > { %4419 = vmatmul.msk.bf16.vlgmr.msrb.gmra.mxu0 %vm315_vm0, %v2348_v17  ;;  %v2557_v16 = vpop.permute.xlu1 %2556 }
 0x441   : > { %v1860_v56 = vpop.f32.mrf.mxu2  ;;  %3372 = vrot.lane.b32.xlu0 %v6886_v62, %s4800_s27  ;;  %v2562_v62 = vsel %vm315_vm0, %v2557_v16, 0 }
 0x443   : > { %4417 = vmatmul.msk.bf16.vlgmr.msra.gmra.mxu2 %vm315_vm0, %v6910_v18  ;;  %4418 = vmatmul.msk.bf16.vlgmr.msra.gmra.mxu3 %vm315_vm0, %v6911_v60  ;;  %v2578_v51 = vpop.permute.xlu0 %2577 }
 0x444   : > { %2502 = vmatpush.bf16.xpose.msra.mxu2 %v2493_v19  ;;  %2525 = vmatpush.bf16.xpose.msra.mxu3 %v2516_v10 }
 0x447   : > { %v2371_v37 = vpop.permute.xlu2 %2370 }
 0x449   : > { %3395 = vrot.lane.b32.xlu0 %v6912_v41, %s4800_s27 }
 0x44b   : > { %4420 = vmatmul.msk.bf16.vlgmr.msrb.gmra.mxu1 %vm315_vm0, %v2371_v37  ;;  %v2463_v19 = vpop.permute.xlu0 %2462 }
 0x44c   : > { %2571 = vmatpush.bf16.xpose.msrb.mxu1 %v2562_v62 }
 0x44f   : > { %v2442_v50 = vpop.permute.xlu2 %2441 }
 0x450   : > { %v2447_v49 = vsel %vm315_vm0, %v2442_v50, 0  ;;  %v2858_v50 = vpop.permute.xlu1 %2857 }
 0x451   : > { %3370 = vrot.lane.b32.xlu0 %v6913_v2, %s4800_s27  ;;  %2456 = vmatpush.bf16.xpose.msra.mxu0 %v2447_v49  ;;  %v2863_v49 = vsel %vm816_vm2, %v2858_v50, 0 }
 0x453   : > { %4421 = vmatmul.msk.bf16.vlgmr.msrb.gmra.mxu2 %vm315_vm0, %v5864_v13  ;;  %4422 = vmatmul.msk.bf16.vlgmr.msrb.gmra.mxu3 %vm315_vm0, %v5856_v8  ;;  %v2532_v60 = vpop.permute.xlu0 %2531 }
 0x454   : > { %2594 = vmatpush.bf16.xpose.msrb.mxu2 %v2585_v11  ;;  %2617 = vmatpush.bf16.xpose.msrb.mxu3 %v2608_v23 }
 0x455   : > { %v5979_v29 = vpop.f32.mrf.mxu3 }
 0x456   : > { %6914 = vst [vmem:[#allocation25_spill] sm:$0xff] %v5979_v29 }
 0x457   : > { %v5981_v17 = vpop.f32.mrf.mxu1  ;;  %v2601_v56 = vpop.permute.xlu2 %2600 }
 0x458   : > { %6915 = vst [vmem:[#allocation26_spill] sm:$0xff] %v5981_v17  ;;  %4423 = vmatmul.msk.bf16.vlgmr.msra.gmra.mxu0 %vm315_vm0, %v2440_v15 }
 0x45b   : > { %4424 = vmatmul.msk.bf16.vlgmr.msra.gmra.mxu1 %vm315_vm0, %v2463_v19  ;;  %v2879_v2 = vpop.permute.xlu0 %2878 }
 0x45c   : > { %v2884_v23 = vsel %vm816_vm2, %v2879_v2, 0 }
 0x45d   : > { %v1884_v10 = vpop.f32.mrf.mxu3 }
 0x45f   : > { %v1932_v14 = vpop.f32.mrf.mxu1  ;;  %v2534_v18 = vpop.permute.xlu2 %2533 }
 0x460   : > { %v2539_v13 = vsel %vm315_vm0, %v2534_v18, 0 }
 0x461   : > { %2548 = vmatpush.bf16.xpose.msrb.mxu0 %v2539_v13 }
 0x463   : > { %4425 = vmatmul.msk.bf16.vlgmr.msra.gmra.mxu2 %vm315_vm0, %v2486_v1  ;;  %4426 = vmatmul.msk.bf16.vlgmr.msra.gmra.mxu3 %vm315_vm0, %v5922_v59  ;;  %v2900_v19 = vpop.permute.xlu0 %2899 }
 0x464   : > { %2893 = vmatpush.bf16.msra.mxu3 %v2884_v23  ;;  %2872 = vmatpush.bf16.msra.mxu2 %v2863_v49  ;;  %v2905_v14 = vsel %vm816_vm2, %v2900_v19, 0 }
 0x465   : > { %v5989_v8 = vpop.f32.mrf.mxu2 }
 0x466   : > { %6916 = vst [vmem:[#allocation12_spill] sm:$0xff] %v5989_v8 }
 0x467   : > { %v2555_v9 = vpop.permute.xlu2 %2554 }
 0x468   : > { %4427 = vmatmul.msk.bf16.vlgmr.msrb.gmra.mxu0 %vm315_vm0, %v2532_v60 }
 0x46b   : > { %4428 = vmatmul.msk.bf16.vlgmr.msrb.gmra.mxu1 %vm315_vm0, %v2555_v9 }
 0x46d   : > { %v1956_v15 = vpop.f32.mrf.mxu2 }
 0x473   : > { %4429 = vmatmul.msk.bf16.vlgmr.msrb.gmra.mxu2 %vm315_vm0, %v2578_v51  ;;  %4430 = vmatmul.msk.bf16.vlgmr.msrb.gmra.mxu3 %vm315_vm0, %v2601_v56  ;;  %v2816_v56 = vpop.permute.xlu1 %2815 }
 0x474   : > { %v2821_v10 = vsel %vm816_vm2, %v2816_v56, 0 }
 0x475   : > { %2830 = vmatpush.bf16.msra.mxu0 %v2821_v10 }
 0x479   : > { %2914 = vmatpush.bf16.msrb.mxu0 %v2905_v14 }
 0x47f   : > { %v5995_v16 = vpop.f32.mrf.mxu3 }
 0x480   : > { %6917 = vst [vmem:[#allocation13_spill] sm:$0xff] %v5995_v16  ;;  %v5997_v37 = vpop.f32.mrf.mxu0 }
 0x481   : > { %6918 = vst [vmem:[#allocation21_spill] sm:$0xff] %v5997_v37  ;;  %v5999_v1 = vpop.f32.mrf.mxu1 }
 0x482   : > { %6919 = vst [vmem:[#allocation14_spill] sm:$0xff] %v5999_v1 }
 0x487   : > { %v1980_v59 = vpop.f32.mrf.mxu3 }
 0x488   : > { %v2004_v41 = vpop.f32.mrf.mxu0 }
 0x489   : > { %v2028_v62 = vpop.f32.mrf.mxu1 }
 0x48f   : > { %v6003_v51 = vpop.f32.mrf.mxu3 }
 0x490   : > { %6920 = vst [vmem:[#allocation15_spill] sm:$0xff] %v6003_v51 }
 0x491   : > { %v6005_v11 = vpop.f32.mrf.mxu0 }
 0x492   : > { %6921 = vst [vmem:[#allocation20_spill] sm:$0xff] %v6005_v11 }
 0x497   : > { %v2076_v18 = vpop.f32.mrf.mxu3 }
 0x499   : > { %v2100_v13 = vpop.f32.mrf.mxu0 }
 0x4a6   : > { %v6009_v60 = vpop.f32.mrf.mxu2 }
 0x4a7   : > { %6922 = vst [vmem:[#allocation16_spill] sm:$0xff] %v6009_v60 }
 0x4a8   : > { %v6011_v9 = vpop.f32.mrf.mxu1 }
 0x4a9   : > { %6923 = vst [vmem:[#allocation17_spill] sm:$0xff] %v6011_v9 }
 0x4ad   : > { %v6013_v15 = vpop.f32.mrf.mxu0 }
 0x4ae   : > { %v2052_v59 = vpop.f32.mrf.mxu2  ;;  %v2623_v41 = vsel %vm620_vm1, %v6013_v15, -inf }
 0x4af   : > { %2624 = vmax.xlane.f32.xlu2 %v2623_v41 }
 0x4b0   : > { %v2124_v62 = vpop.f32.mrf.mxu1 }
 0x4b5   : > { %v2276_v50 = vpop.f32.mrf.mxu0 }
 0x4b6   : > { %v6017_v2 = vpop.f32.mrf.mxu2  ;;  %v6019_v49 = vpop.f32.mrf.mxu3 }
 0x4b7   : > { %6924 = vst [vmem:[#allocation18_spill] sm:$0xff] %v6017_v2  ;;  %v6033_v50 = vpop.permute.xlu0 %3046 }
 0x4b8   : > { %6925 = vst [vmem:[#allocation19_spill] sm:$0xff] %v6019_v49  ;;  %v6021_v23 = vpop.f32.mrf.mxu1 }
 0x4b9   : > { %v2626_v56 = vsel %vm620_vm1, %v6021_v23, -inf }
 0x4ba   : > { %2627 = vmax.xlane.f32.xlu1 %v2626_v56 }
 0x4bd   : > { %v6025_v19 = vpop.f32.mrf.mxu0 }
 0x4be   : > { %v2148_v10 = vpop.f32.mrf.mxu2  ;;  %v2172_v14 = vpop.f32.mrf.mxu3  ;;  %v2635_v18 = vsel %vm620_vm1, %v6025_v19, -inf }
 0x4bf   : > { %v6042_v9 = vpop.permute.xlu0 %3109 }
 0x4c0   : > { %v2299_v13 = vpop.f32.mrf.mxu1 }
 0x4c2   : > { %2636 = vmax.xlane.f32.xlu1 %v2635_v18  ;;  %v2837_v18 = vpop.permute.xlu2 %2836 }
 0x4c3   : > { %v2842_v11 = vsel %vm816_vm2, %v2837_v18, 0 }
 0x4c4   : > { %2851 = vmatpush.bf16.msra.mxu1 %v2842_v11 }
 0x4c5   : > { %v2368_v59 = vpop.f32.mrf.mxu0 }
 0x4c6   : > { %v6029_v41 = vpop.f32.mrf.mxu2  ;;  %v6031_v62 = vpop.f32.mrf.mxu3 }
 0x4c7   : > { %v2629_v10 = vsel %vm620_vm1, %v6029_v41, -inf  ;;  %v2632_v1 = vsel %vm620_vm1, %v6031_v62, -inf }
 0x4c8   : > { %v6035_v49 = vpop.f32.mrf.mxu1 }
 0x4c9   : > { %v2638_v56 = vsel %vm620_vm1, %v6035_v49, -inf }
 0x4ca   : > { %2639 = vmax.xlane.f32.xlu0 %v2638_v56  ;;  %2630 = vmax.xlane.f32.xlu1 %v2629_v10 }
 0x4ce   : > { %v2322_v14 = vpop.f32.mrf.mxu2  ;;  %v2345_v13 = vpop.f32.mrf.mxu3 }
 0x4cf   : > { %v2942_v13 = vpop.permute.xlu1 %2941 }
 0x4d0   : > { %v2391_v59 = vpop.f32.mrf.mxu1  ;;  %v2947_v11 = vsel %vm816_vm2, %v2942_v13, 0 }
 0x4d1   : > { %2956 = vmatpush.bf16.msrb.mxu2 %v2947_v11 }
 0x4d2   : > { %2633 = vmax.xlane.f32.xlu0 %v2632_v1  ;;  %v6059_v1 = vpop.permute.xlu0 %3130 }
 0x4d5   : > { %v6046_v2 = vpop.f32.mrf.mxu0 }
 0x4d6   : > { %v6048_v60 = vpop.f32.mrf.mxu2  ;;  %v6050_v8 = vpop.f32.mrf.mxu3  ;;  %v2647_v56 = vsel %vm620_vm1, %v6046_v2, -inf }
 0x4d7   : > { %v2644_v29 = vsel %vm620_vm1, %v6050_v8, -inf  ;;  %v2641_v37 = vsel %vm620_vm1, %v6048_v60, -inf  ;;  %v2963_v4 = vpop.permute.xlu1 %2962 }
 0x4d8   : > { %v6054_v10 = vpop.f32.mrf.mxu1 }
 0x4d9   : > { %v2650_v14 = vsel %vm620_vm1, %v6054_v10, -inf }
 0x4da   : > { %2651 = vmax.xlane.f32.xlu2 %v2650_v14  ;;  %2648 = vmax.xlane.f32.xlu0 %v2647_v56  ;;  %v2968_v56 = vsel %vm816_vm2, %v2963_v4, 0  ;;  %v6066_v14 = vpop.permute.xlu0 %3067 }
 0x4db   : > { %2977 = vmatpush.bf16.msrb.mxu3 %v2968_v56 }
 0x4dd   : > { %v2460_v18 = vpop.f32.mrf.mxu0 }
 0x4de   : > { %v2414_v59 = vpop.f32.mrf.mxu2  ;;  %v2437_v51 = vpop.f32.mrf.mxu3 }
 0x4e0   : > { %v2483_v16 = vpop.f32.mrf.mxu1 }
 0x4e2   : > { %2645 = vmax.xlane.f32.xlu2 %v2644_v29  ;;  %2642 = vmax.xlane.f32.xlu0 %v2641_v37  ;;  %v2921_v29 = vpop.permute.xlu1 %2920  ;;  %v6083_v21 = vpop.permute.xlu0 %3088 }
 0x4e3   : > { %v2926_v37 = vsel %vm816_vm2, %v2921_v29, 0 }
 0x4e4   : > { %2935 = vmatpush.bf16.msrb.mxu1 %v2926_v37 }
 0x4e5   : > { %v6068_v13 = vpop.f32.mrf.mxu0 }
 0x4e6   : > { %v6070_v11 = vpop.f32.mrf.mxu2  ;;  %v6072_v51 = vpop.f32.mrf.mxu3  ;;  %v2659_v18 = vsel %vm620_vm1, %v6068_v13, -inf }
 0x4e7   : > { %v2656_v16 = vsel %vm620_vm1, %v6072_v51, -inf  ;;  %v2653_v6 = vsel %vm620_vm1, %v6070_v11, -inf }
 0x4e8   : > { %v6078_v59 = vpop.f32.mrf.mxu1  ;;  %2657 = vmax.xlane.f32.xlu1 %v2656_v16 }
 0x4e9   : > { %v2662_v4 = vsel %vm620_vm1, %v6078_v59, -inf }
 0x4ea   : > { %2663 = vmax.xlane.f32.xlu2 %v2662_v4  ;;  %2660 = vmax.xlane.f32.xlu0 %v2659_v18  ;;  %v6105_v47 = vpop.permute.xlu1 %2983 }
 0x4ed   : > { %v2552_v56 = vpop.f32.mrf.mxu0 }
 0x4ee   : > { %v2506_v53 = vpop.f32.mrf.mxu2  ;;  %v2529_v17 = vpop.f32.mrf.mxu3 }
 0x4ef   : > { %v6095_v53 = vpop.permute.xlu0 %3280  ;;  %v6097_v17 = vpop.permute.xlu2 %3025 }
 0x4f0   : > { %v2575_v7 = vpop.f32.mrf.mxu1 }
 0x4f2   : > { %2654 = vmax.xlane.f32.xlu2 %v2653_v6 }
 0x4f6   : > { %v6087_v16 = vpop.f32.mrf.mxu2  ;;  %v6089_v45 = vpop.f32.mrf.mxu3 }
 0x4f7   : > { %v2665_v18 = vsel %vm620_vm1, %v6087_v16, -inf  ;;  %v2668_v4 = vsel %vm620_vm1, %v6089_v45, -inf  ;;  %v6099_v37 = vpop.permute.xlu0 %3303  ;;  %v6101_v6 = vpop.permute.xlu2 %3004 }
 0x4f8   : > { %2666 = vmax.xlane.f32.xlu1 %v2665_v18  ;;  %2669 = vmax.xlane.f32.xlu0 %v2668_v4  ;;  %6926 = vst [vmem:[#allocation3_spill] sm:$0xff] %v6099_v37  ;;  %v6111_v18 = vpop.permute.xlu1 %3301 }
 0x4f9   : > { %6928 = vst [vmem:[#allocation10_spill] sm:$0xff] %v6111_v18 }
 0x4fe   : > { %v2598_v7 = vpop.f32.mrf.mxu2  ;;  %v2621_v29 = vpop.f32.mrf.mxu3 }
 0x4ff   : > { %v6103_v56 = vpop.permute.xlu0 %3278  ;;  %v6107_v31 = vpop.permute.xlu2 %3234 }
 0x500   : > { %6927 = vst [vmem:[#allocation6_spill] sm:$0xff] %v6103_v56  ;;  %v6118_v43 = vpop.permute.xlu1 %3255 }
 0x501   : > { %6931 = vst [vmem:[#allocation8_spill] sm:$0xff] %v6118_v43 }
 0x507   : > { %v6109_v12 = vpop.permute.xlu0 %3257  ;;  %v6113_v4 = vpop.permute.xlu2 %3232 }
 0x508   : > { %6929 = vst [vmem:[#allocation37_spill] sm:$0xff] %v6113_v4 }
 0x50f   : > { %v6115_v28 = vpop.permute.xlu0 %3372 }
 0x510   : > { %6930 = vst [vmem:[#allocation38_spill] sm:$0xff] %v6115_v28 }
 0x517   : > { %v6120_v56 = vpop.permute.xlu0 %3395 }
 0x518   : > { %6932 = vst [vmem:[#allocation9_spill] sm:$0xff] %v6120_v56 }
 0x51f   : > { %v6127_v28 = vpop.permute.xlu0 %3370 }
 0x520   : > { %6933 = vst [vmem:[#allocation39_spill] sm:$0xff] %v6127_v28 }
 0x522   : > { %v2625_v7 = vpop.xlane.xlu2 %2624 }
 0x523   : > { %v2671_v29 = vsub.f32 %v6013_v15, %v2625_v7 }
 0x525   : > { %v2687_v32 = vmul.f32 1.442695, %v2671_v29 }
 0x527   : > { %4662 = vpow2.f32 %v2687_v32 }
 0x52d   : > { %v6122_v48 = vpop.eup %4662  ;;  %v2628_v35 = vpop.xlane.xlu1 %2627 }
 0x52e   : > { %v2672_v40 = vsub.f32 %v6021_v23, %v2628_v35  ;;  %v2719_v18 = vsel %vm620_vm1, %v6122_v48, 0.0 }
 0x52f   : > { %2720 = vadd.xlane.f32.xlu2 %v2719_v18 }
 0x530   : > { %v2689_v4 = vmul.f32 1.442695, %v2672_v40 }
 0x532   : > { %4664 = vpow2.f32 %v2689_v4 }
 0x535   : > { %v2637_v15 = vpop.xlane.xlu1 %2636 }
 0x536   : > { %v2675_v7 = vsub.f32 %v6025_v19, %v2637_v15 }
 0x538   : > { %v6130_v29 = vpop.eup %4664  ;;  %v2695_v32 = vmul.f32 1.442695, %v2675_v7 }
 0x539   : > { %v2722_v56 = vsel %vm620_vm1, %v6130_v29, 0.0 }
 0x53a   : > { %4666 = vpow2.f32 %v2695_v32  ;;  %2723 = vadd.xlane.f32.xlu2 %v2722_v56 }
 0x53d   : > { %v2640_v35 = vpop.xlane.xlu0 %2639  ;;  %v2631_v23 = vpop.xlane.xlu1 %2630 }
 0x53e   : > { %v2676_v43 = vsub.f32 %v6035_v49, %v2640_v35  ;;  %v2673_v4 = vsub.f32 %v6029_v41, %v2631_v23 }
 0x540   : > { %v6135_v18 = vpop.eup %4666  ;;  %v2697_v40 = vmul.f32 1.442695, %v2676_v43  ;;  %v2691_v15 = vmul.f32 1.442695, %v2673_v4 }
 0x541   : > { %v2731_v19 = vsel %vm620_vm1, %v6135_v18, 0.0 }
 0x542   : > { %4668 = vpow2.f32 %v2697_v40  ;;  %2732 = vadd.xlane.f32.xlu1 %v2731_v19 }
 0x543   : > { %4670 = vpow2.f32 %v2691_v15 }
 0x545   : > { %v2634_v7 = vpop.xlane.xlu0 %2633 }
 0x546   : > { %v2674_v28 = vsub.f32 %v6031_v62, %v2634_v7 }
 0x548   : > { %v6141_v32 = vpop.eup %4668  ;;  %v2693_v56 = vmul.f32 1.442695, %v2674_v28 }
 0x549   : > { %v2734_v49 = vsel %vm620_vm1, %v6141_v32, 0.0  ;;  %v6145_v35 = vpop.eup %4670 }
 0x54a   : > { %4672 = vpow2.f32 %v2693_v56  ;;  %2735 = vadd.xlane.f32.xlu2 %v2734_v49  ;;  %v2725_v15 = vsel %vm620_vm1, %v6145_v35, 0.0 }
 0x54d   : > { %v2652_v43 = vpop.xlane.xlu2 %2651  ;;  %v2649_v41 = vpop.xlane.xlu0 %2648 }
 0x54e   : > { %v2680_v23 = vsub.f32 %v6054_v10, %v2652_v43  ;;  %v2679_v40 = vsub.f32 %v6046_v2, %v2649_v41 }
 0x550   : > { %v6149_v4 = vpop.eup %4672  ;;  %v2705_v62 = vmul.f32 1.442695, %v2680_v23  ;;  %v2703_v19 = vmul.f32 1.442695, %v2679_v40 }
 0x551   : > { %v2728_v28 = vsel %vm620_vm1, %v6149_v4, 0.0 }
 0x552   : > { %4674 = vpow2.f32 %v2705_v62  ;;  %2729 = vadd.xlane.f32.xlu1 %v2728_v28  ;;  %2726 = vadd.xlane.f32.xlu2 %v2725_v15  ;;  %v6934_v62 = vld [vmem:[#allocation7_spill] sm:$0xff] }
 0x553   : > { %4676 = vpow2.f32 %v2703_v19 }
 0x555   : > { %v2643_v7 = vpop.xlane.xlu0 %2642 }
 0x556   : > { %v2677_v56 = vsub.f32 %v6048_v60, %v2643_v7  ;;  %v2646_v60 = vpop.xlane.xlu2 %2645 }
 0x557   : > { %v2678_v28 = vsub.f32 %v6050_v8, %v2646_v60 }
 0x558   : > { %v6156_v10 = vpop.eup %4674  ;;  %v2699_v2 = vmul.f32 1.442695, %v2677_v56 }
 0x559   : > { %v6158_v49 = vpop.eup %4676  ;;  %v2746_v43 = vsel %vm620_vm1, %v6156_v10, 0.0  ;;  %v2701_v7 = vmul.f32 1.442695, %v2678_v28 }
 0x55a   : > { %2747 = vadd.xlane.f32.xlu1 %v2746_v43  ;;  %v2743_v41 = vsel %vm620_vm1, %v6158_v49, 0.0  ;;  %4678 = vpow2.f32 %v2699_v2 }
 0x55b   : > { %2744 = vadd.xlane.f32.xlu0 %v2743_v41  ;;  %4680 = vpow2.f32 %v2701_v7  ;;  %v2658_v43 = vpop.xlane.xlu1 %2657 }
 0x55c   : > { %v2682_v58 = vsub.f32 %v6072_v51, %v2658_v43 }
 0x55d   : > { %v2661_v15 = vpop.xlane.xlu0 %2660 }
 0x55e   : > { %v2664_v19 = vpop.xlane.xlu2 %2663  ;;  %v2683_v56 = vsub.f32 %v6068_v13, %v2661_v15  ;;  %v2709_v28 = vmul.f32 1.442695, %v2682_v58 }
 0x560   : > { %v6164_v23 = vpop.eup %4678  ;;  %v2711_v41 = vmul.f32 1.442695, %v2683_v56 }
 0x561   : > { %v2737_v40 = vsel %vm620_vm1, %v6164_v23, 0.0  ;;  %v6178_v37 = vpop.eup %4680 }
 0x562   : > { %2738 = vadd.xlane.f32.xlu2 %v2737_v40  ;;  %v2684_v40 = vsub.f32 %v6078_v59, %v2664_v19  ;;  %4682 = vpow2.f32 %v2711_v41  ;;  %v2740_v13 = vsel %vm620_vm1, %v6178_v37, 0.0 }
 0x566   : > { %v2655_v2 = vpop.xlane.xlu2 %2654 }
 0x568   : > { %v6183_v60 = vpop.eup %4682 }
 0x569   : > { %v2755_v59 = vsel %vm620_vm1, %v6183_v60, 0.0 }
 0x56b   : > { %v2667_v8 = vpop.xlane.xlu1 %2666 }
 0x56f   : > { %3349 = vrot.lane.b32.xlu0 %v6889_v36, %s4800_s27  ;;  %v2681_v36 = vsub.f32 %v6070_v11, %v2655_v2  ;;  %v2685_v11 = vsub.f32 %v6087_v16, %v2667_v8  ;;  %v2989_v8 = vsel %vm816_vm2, %v6105_v47, 0 }
 0x571   : > { %v2715_v15 = vmul.f32 1.442695, %v2685_v11 }
 0x573   : > { %3326 = vrot.lane.b32.xlu1 %v5191_v30, %s4800_s27  ;;  %v2707_v30 = vmul.f32 1.442695, %v2681_v36 }
 0x575   : > { %4684 = vpow2.f32 %v2707_v30 }
 0x57a   : > { %3393 = vrot.lane.b32.xlu2 %v6934_v62, %s4800_s27  ;;  %v2713_v62 = vmul.f32 1.442695, %v2684_v40 }
 0x57b   : > { %v6188_v19 = vpop.eup %4684 }
 0x57c   : > { %4686 = vpow2.f32 %v2713_v62  ;;  %v2749_v7 = vsel %vm620_vm1, %v6188_v19, 0.0 }
 0x57d   : > { %4688 = vpow2.f32 %v2709_v28 }
 0x57e   : > { %4690 = vpow2.f32 %v2715_v15 }
 0x582   : > { %v6190_v51 = vpop.eup %4686 }
 0x583   : > { %v2758_v58 = vsel %vm620_vm1, %v6190_v51, 0.0  ;;  %v6196_v16 = vpop.eup %4688 }
 0x584   : > { %v6198_v2 = vpop.eup %4690  ;;  %v2752_v43 = vsel %vm620_vm1, %v6196_v16, 0.0 }
 0x585   : > { %v2761_v40 = vsel %vm620_vm1, %v6198_v2, 0.0 }
 0x599   : > { %2741 = vadd.xlane.f32.xlu0 %v2740_v13 }
 0x59d   : > { %2756 = vadd.xlane.f32.xlu1 %v2755_v59  ;;  %v3010_v59 = vsel %vm816_vm2, %v6101_v6, 0 }
 0x5a1   : > { %2750 = vadd.xlane.f32.xlu0 %v2749_v7 }
 0x5a2   : > { %v2721_v56 = vpop.xlane.xlu2 %2720 }
 0x5a3   : > { %4692 = vrcp.f32 %v2721_v56  ;;  %2759 = vadd.xlane.f32.xlu2 %v2758_v58  ;;  %v2670_v58 = vpop.xlane.xlu0 %2669 }
 0x5a9   : > { %v4693_v41 = vpop.eup %4692  ;;  %2753 = vadd.xlane.f32.xlu0 %v2752_v43 }
 0x5aa   : > { %v2783_v36 = vmul.f32 %v4693_v41, %v6122_v48 }
 0x5ab   : > { %2762 = vadd.xlane.f32.xlu2 %v2761_v40 }
 0x5ac   : > { %v2799_v30 = vpack.c.bf16 %v2783_v36, %v2783_v36 }
 0x5ad   : > { %v2724_v62 = vpop.xlane.xlu2 %2723 }
 0x5ae   : > { %4694 = vrcp.f32 %v2724_v62  ;;  %4431 = vmatmul.msk.bf16.vlgmr.msra.gmra.mxu0 %vm620_vm1, %v2799_v30  ;;  %v3263_v62 = vsel %vm315_vm0, %v6109_v12, 0 }
 0x5af   : > { %2998 = vmatpush.bf16.msra.mxu0 %v2989_v8 }
 0x5b4   : > { %v4695_v13 = vpop.eup %4694 }
 0x5b5   : > { %v2784_v11 = vmul.f32 %v4695_v13, %v6130_v29  ;;  %v2733_v28 = vpop.xlane.xlu1 %2732  ;;  %v3136_v13 = vsel %vm816_vm2, %v6059_v1, 0 }
 0x5b6   : > { %4696 = vrcp.f32 %v2733_v28  ;;  %3487 = vrot.lane.b32.xlu1 %v6892_v54, %s4800_s27  ;;  %v3073_v54 = vsel %vm816_vm2, %v6066_v14, 0  ;;  %v3094_v14 = vsel %vm816_vm2, %v6083_v21, 0 }
 0x5b7   : > { %v2800_v48 = vpack.c.bf16 %v2784_v11, %v2784_v11 }
 0x5b9   : > { %4432 = vmatmul.msk.bf16.vlgmr.msra.gmra.mxu1 %vm620_vm1, %v2800_v48 }
 0x5ba   : > { %3019 = vmatpush.bf16.msra.mxu1 %v3010_v59 }
 0x5bc   : > { %v4697_v47 = vpop.eup %4696 }
 0x5bd   : > { %v2787_v15 = vmul.f32 %v4697_v47, %v6135_v18  ;;  %3324 = vrot.lane.b32.xlu0 %v6890_v46, %s4800_s27  ;;  %v2736_v7 = vpop.xlane.xlu2 %2735 }
 0x5be   : > { %4698 = vrcp.f32 %v2736_v7  ;;  %3462 = vrot.lane.b32.xlu1 %v6894_v25, %s4800_s27 }
 0x5bf   : > { %v2803_v29 = vpack.c.bf16 %v2787_v15, %v2787_v15 }
 0x5c1   : > { %4435 = vmatmul.msk.bf16.vlgmr.msrb.gmra.mxu0 %vm620_vm1, %v2803_v29  ;;  %v3286_v29 = vsel %vm315_vm0, %v6095_v53, 0  ;;  %v6936_v53 = vld [vmem:[#allocation3_spill] sm:$0xff] }
 0x5c2   : > { %3082 = vmatpush.bf16.msrb.mxu0 %v3073_v54 }
 0x5c3   : > { %3464 = vrot.lane.b32.xlu2 %v6888_v20, %s4800_s27 }
 0x5c4   : > { %v4699_v6 = vpop.eup %4698 }
 0x5c5   : > { %v2788_v18 = vmul.f32 %v4699_v6, %v6141_v32  ;;  %3485 = vrot.lane.b32.xlu0 %v5201_v57, %s4800_s27  ;;  %v2727_v46 = vpop.xlane.xlu2 %2726  ;;  %v2730_v56 = vpop.xlane.xlu1 %2729  ;;  %v6935_v6 = vld [vmem:[#allocation27_spill] sm:$0xff] }
 0x5c6   : > { %4700 = vrcp.f32 %v2727_v46  ;;  %3441 = vrot.lane.b32.xlu1 %v5398_v5, %s4800_s27 }
 0x5c7   : > { %v2804_v25 = vpack.c.bf16 %v2788_v18, %v2788_v18  ;;  %4702 = vrcp.f32 %v2730_v56 }
 0x5c9   : > { %4436 = vmatmul.msk.bf16.vlgmr.msrb.gmra.mxu1 %vm620_vm1, %v2804_v25 }
 0x5ca   : > { %3103 = vmatpush.bf16.msrb.mxu1 %v3094_v14 }
 0x5cb   : > { %3347 = vrot.lane.b32.xlu2 %v6895_v39, %s4800_s27  ;;  %v3031_v39 = vsel %vm816_vm2, %v6097_v17, 0 }
 0x5cc   : > { %v4701_v20 = vpop.eup %4700 }
 0x5cd   : > { %v4703_v57 = vpop.eup %4702  ;;  %v2785_v32 = vmul.f32 %v4701_v20, %v6145_v35  ;;  %3556 = vrot.lane.b32.xlu0 %v5381_v61, %s4800_s27  ;;  %v2748_v43 = vpop.xlane.xlu1 %2747  ;;  %v3052_v35 = vsel %vm816_vm2, %v6033_v50, 0 }
 0x5ce   : > { %v2786_v5 = vmul.f32 %v4703_v57, %v6149_v4  ;;  %4704 = vrcp.f32 %v2748_v43  ;;  %v2745_v41 = vpop.xlane.xlu0 %2744  ;;  %3416 = vrot.lane.b32.xlu1 %v5412_v33, %s4800_s27  ;;  %v6937_v57 = vld [vmem:[#allocation28_spill] sm:$0xff] }
 0x5cf   : > { %v2801_v21 = vpack.c.bf16 %v2785_v32, %v2785_v32  ;;  %4706 = vrcp.f32 %v2745_v41  ;;  %v6939_v41 = vld [vmem:[#allocation38_spill] sm:$0xff] }
 0x5d0   : > { %v2802_v36 = vpack.c.bf16 %v2786_v5, %v2786_v5 }
 0x5d1   : > { %4433 = vmatmul.msk.bf16.vlgmr.msra.gmra.mxu2 %vm620_vm1, %v2801_v21  ;;  %v3378_v21 = vsel %vm315_vm0, %v6939_v41, 0 }
 0x5d2   : > { %4434 = vmatmul.msk.bf16.vlgmr.msra.gmra.mxu3 %vm620_vm1, %v2802_v36  ;;  %3040 = vmatpush.bf16.msra.mxu2 %v3031_v39  ;;  %v6940_v39 = vld [vmem:[#allocation8_spill] sm:$0xff] }
 0x5d3   : > { %3061 = vmatpush.bf16.msra.mxu3 %v3052_v35  ;;  %3418 = vrot.lane.b32.xlu2 %v6897_v63, %s4800_s27  ;;  %v3240_v63 = vsel %vm315_vm0, %v6107_v31, 0  ;;  %v3115_v31 = vsel %vm816_vm2, %v6042_v9, 0  ;;  %v6941_v35 = vld [vmem:[#allocation30_spill] sm:$0xff] }
 0x5d4   : > { %v4705_v61 = vpop.eup %4704 }
 0x5d5   : > { %v4707_v33 = vpop.eup %4706  ;;  %v2792_v4 = vmul.f32 %v4705_v61, %v6156_v10  ;;  %3439 = vrot.lane.b32.xlu0 %v5374_v44, %s4800_s27  ;;  %v2739_v40 = vpop.xlane.xlu2 %2738 }
 0x5d6   : > { %v2791_v17 = vmul.f32 %v4707_v33, %v6158_v49  ;;  %3577 = vrot.lane.b32.xlu1 %v6898_v24, %s4800_s27  ;;  %4708 = vrcp.f32 %v2739_v40 }
 0x5d7   : > { %v2808_v50 = vpack.c.bf16 %v2792_v4, %v2792_v4 }
 0x5d8   : > { %v2807_v30 = vpack.c.bf16 %v2791_v17, %v2791_v17 }
 0x5d9   : > { %4440 = vmatmul.msk.bf16.vlgmr.msra.gmra.mxu1 %vm620_vm1, %v2808_v50 }
 0x5da   : > { %4439 = vmatmul.msk.bf16.vlgmr.msra.gmra.mxu0 %vm620_vm1, %v2807_v30  ;;  %3272 = vmatpush.bf16.xpose.msra.mxu1 %v3263_v62  ;;  %v6942_v30 = vld [vmem:[#allocation34_spill] sm:$0xff] }
 0x5db   : > { %3249 = vmatpush.bf16.xpose.msra.mxu0 %v3240_v63  ;;  %3579 = vrot.lane.b32.xlu2 %v5340_v27, %s4800_s27  ;;  %v2686_v27 = vsub.f32 %v6089_v45, %v2670_v58  ;;  %v3309_v58 = vsel %vm315_vm0, %v6936_v53, 0 }
 0x5dc   : > { %v4709_v44 = vpop.eup %4708 }
 0x5dd   : > { %3510 = vrot.lane.b32.xlu0 %v6900_v52, %s4800_s27  ;;  %v2789_v24 = vmul.f32 %v4709_v44, %v6164_v23 }
 0x5de   : > { %3508 = vrot.lane.b32.xlu1 %v5435_v22, %s4800_s27  ;;  %v2717_v22 = vmul.f32 1.442695, %v2686_v27 }
 0x5df   : > { %v2805_v12 = vpack.c.bf16 %v2789_v24, %v2789_v24 }
 0x5e0   : > { %4710 = vpow2.f32 %v2717_v22 }
 0x5e1   : > { %4437 = vmatmul.msk.bf16.vlgmr.msrb.gmra.mxu2 %vm620_vm1, %v2805_v12  ;;  %v3350_v52 = vpop.permute.xlu0 %3349  ;;  %v6943_v12 = vld [vmem:[#allocation6_spill] sm:$0xff] }
 0x5e2   : > { %3124 = vmatpush.bf16.msrb.mxu2 %v3115_v31  ;;  %v6944_v31 = vld [vmem:[#allocation33_spill] sm:$0xff] }
 0x5e3   : > { %3554 = vrot.lane.b32.xlu2 %v5357_v34, %s4800_s27 }
 0x5e6   : > { %3792 = vrot.lane.b32.xlu1 %v6893_v26, %s4800_s27  ;;  %v6283_v34 = vpop.eup %4710 }
 0x5e7   : > { %v2764_v26 = vsel %vm620_vm1, %v6283_v34, 0.0 }
 0x5eb   : > { %3533 = vrot.lane.b32.xlu2 %v5422_v0, %s4800_s27  ;;  %v3327_v0 = vpop.permute.xlu1 %3326 }
 0x5ec   : > { %v3332_v28 = vsel %vm315_vm0, %v3327_v0, 0 }
 0x5ee   : > { %3939 = vrot.lane.b32.xlu1 %v5544_v3, %s4800_s27  ;;  %v6287_v3 = vpop.permute.xlu2 %3393 }
 0x5f3   : > { %3855 = vrot.lane.b32.xlu2 %v6896_v55, %s4800_s27 }
 0x5fb   : > { %3876 = vrot.lane.b32.xlu2 %v5485_v38, %s4800_s27 }
 0x607   : > { %2765 = vadd.xlane.f32.xlu0 %v2764_v26 }
 0x60c   : > { %v2742_v9 = vpop.xlane.xlu0 %2741 }
 0x60d   : > { %4712 = vrcp.f32 %v2742_v9 }
 0x610   : > { %v2757_v55 = vpop.xlane.xlu1 %2756 }
 0x611   : > { %4714 = vrcp.f32 %v2757_v55 }
 0x613   : > { %v4713_v45 = vpop.eup %4712 }
 0x614   : > { %v2790_v10 = vmul.f32 %v4713_v45, %v6178_v37  ;;  %v2751_v49 = vpop.xlane.xlu0 %2750  ;;  %v6945_v45 = vld [vmem:[#allocation39_spill] sm:$0xff] }
 0x615   : > { %4716 = vrcp.f32 %v2751_v49 }
 0x616   : > { %v2806_v38 = vpack.c.bf16 %v2790_v10, %v2790_v10  ;;  %v2760_v8 = vpop.xlane.xlu2 %2759 }
 0x617   : > { %v4715_v23 = vpop.eup %4714  ;;  %4718 = vrcp.f32 %v2760_v8 }
 0x618   : > { %v2795_v11 = vmul.f32 %v4715_v23, %v6183_v60  ;;  %4438 = vmatmul.msk.bf16.vlgmr.msrb.gmra.mxu3 %vm620_vm1, %v2806_v38 }
 0x619   : > { %3145 = vmatpush.bf16.msrb.mxu3 %v3136_v13 }
 0x61a   : > { %v2811_v48 = vpack.c.bf16 %v2795_v11, %v2795_v11 }
 0x61b   : > { %v4717_v59 = vpop.eup %4716  ;;  %3531 = vrot.lane.b32.xlu0 %v6901_v42, %s4800_s27 }
 0x61c   : > { %v2793_v37 = vmul.f32 %v4717_v59, %v6188_v19  ;;  %v2754_v47 = vpop.xlane.xlu0 %2753  ;;  %4443 = vmatmul.msk.bf16.vlgmr.msrb.gmra.mxu0 %vm620_vm1, %v2811_v48  ;;  %v3355_v19 = vsel %vm315_vm0, %v3350_v52, 0 }
 0x61d   : > { %4720 = vrcp.f32 %v2754_v47  ;;  %3341 = vmatpush.bf16.xpose.msrb.mxu0 %v3332_v28  ;;  %v4719_v1 = vpop.eup %4718 }
 0x61e   : > { %v2809_v60 = vpack.c.bf16 %v2793_v37, %v2793_v37  ;;  %v2796_v15 = vmul.f32 %v4719_v1, %v6190_v51  ;;  %v2763_v7 = vpop.xlane.xlu2 %2762 }
 0x61f   : > { %4722 = vrcp.f32 %v2763_v7 }
 0x620   : > { %4441 = vmatmul.msk.bf16.vlgmr.msra.gmra.mxu2 %vm620_vm1, %v2809_v60  ;;  %v2812_v54 = vpack.c.bf16 %v2796_v15, %v2796_v15 }
 0x621   : > { %3295 = vmatpush.bf16.xpose.msra.mxu2 %v3286_v29 }
 0x622   : > { %4444 = vmatmul.msk.bf16.vlgmr.msrb.gmra.mxu1 %vm620_vm1, %v2812_v54  ;;  %v6946_v54 = vld [vmem:[#allocation9_spill] sm:$0xff] }
 0x623   : > { %v4721_v42 = vpop.eup %4720  ;;  %3834 = vrot.lane.b32.xlu0 %v6935_v6, %s4800_s27  ;;  %3364 = vmatpush.bf16.xpose.msrb.mxu1 %v3355_v19 }
 0x624   : > { %v2794_v18 = vmul.f32 %v4721_v42, %v6196_v16  ;;  %v6938_v16 = vld [vmem:[#allocation37_spill] sm:$0xff]  ;;  %v3401_v42 = vsel %vm315_vm0, %v6946_v54, 0 }
 0x625   : > { %v4723_v46 = vpop.eup %4722 }
 0x626   : > { %v2810_v51 = vpack.c.bf16 %v2794_v18, %v2794_v18  ;;  %v3465_v56 = vpop.permute.xlu2 %3464  ;;  %v2797_v14 = vmul.f32 %v4723_v46, %v6198_v2 }
 0x627   : > { %v3470_v62 = vsel %vm315_vm0, %v3465_v56, 0  ;;  %v6947_v56 = vld [vmem:[#allocation10_spill] sm:$0xff] }
 0x628   : > { %4442 = vmatmul.msk.bf16.vlgmr.msra.gmra.mxu3 %vm620_vm1, %v2810_v51  ;;  %v6311_v25 = vpop.permute.xlu1 %3487  ;;  %v2813_v32 = vpack.c.bf16 %v2797_v14, %v2797_v14 }
 0x629   : > { %3318 = vmatpush.bf16.xpose.msra.mxu3 %v3309_v58 }
 0x62b   : > { %v6314_v20 = vpop.f32.mrf.mxu0  ;;  %3813 = vrot.lane.b32.xlu0 %v6937_v57, %s4800_s27 }
 0x62c   : > { %4447 = vmatmul.msk.bf16.vlgmr.msra.gmra.mxu0 %vm315_vm0, %v6938_v16 }
 0x62e   : > { %v3348_v5 = vpop.permute.xlu2 %3347 }
 0x62f   : > { %v3325_v43 = vpop.permute.xlu0 %3324 }
 0x630   : > { %4445 = vmatmul.msk.bf16.vlgmr.msrb.gmra.mxu2 %vm620_vm1, %v2813_v32  ;;  %v3463_v36 = vpop.permute.xlu1 %3462 }
 0x631   : > { %3387 = vmatpush.bf16.xpose.msrb.mxu2 %v3378_v21 }
 0x632   : > { %4448 = vmatmul.msk.bf16.vlgmr.msra.gmra.mxu1 %vm315_vm0, %v6940_v39 }
 0x633   : > { %v2834_v2 = vpop.f32.mrf.mxu0  ;;  %3918 = vrot.lane.b32.xlu0 %v6941_v35, %s4800_s27 }
 0x636   : > { %v6327_v61 = vpop.f32.mrf.mxu1  ;;  %v3419_v4 = vpop.permute.xlu2 %3418 }
 0x637   : > { %v6329_v33 = vpop.permute.xlu0 %3485  ;;  %v3424_v40 = vsel %vm315_vm0, %v3419_v4, 0 }
 0x638   : > { %v3442_v17 = vpop.permute.xlu1 %3441  ;;  %3433 = vmatpush.bf16.xpose.msra.mxu0 %v3424_v40 }
 0x639   : > { %v3447_v50 = vsel %vm315_vm0, %v3442_v17, 0 }
 0x63a   : > { %3456 = vmatpush.bf16.xpose.msra.mxu1 %v3447_v50 }
 0x63b   : > { %3897 = vrot.lane.b32.xlu0 %v6942_v30, %s4800_s27 }
 0x63c   : > { %4451 = vmatmul.msk.bf16.vlgmr.msrb.gmra.mxu0 %vm315_vm0, %v3325_v43 }
 0x63e   : > { %v2855_v63 = vpop.f32.mrf.mxu1  ;;  %v6337_v44 = vpop.f32.mrf.mxu0 }
 0x63f   : > { %v3557_v24 = vpop.permute.xlu0 %3556  ;;  %v3580_v37 = vpop.permute.xlu2 %3579 }
 0x640   : > { %4449 = vmatmul.msk.bf16.vlgmr.msra.gmra.mxu2 %vm315_vm0, %v6943_v12  ;;  %v3562_v9 = vsel %vm315_vm0, %v3557_v24, 0  ;;  %v3417_v60 = vpop.permute.xlu1 %3416  ;;  %v3585_v43 = vsel %vm315_vm0, %v3580_v37, 0  ;;  %v6949_v37 = vld [vmem:[#allocation29_spill] sm:$0xff] }
 0x641   : > { %3479 = vmatpush.bf16.xpose.msra.mxu2 %v3470_v62  ;;  %v6948_v62 = vld [vmem:[#allocation36_spill] sm:$0xff] }
 0x642   : > { %4452 = vmatmul.msk.bf16.vlgmr.msrb.gmra.mxu1 %vm315_vm0, %v3348_v5 }
 0x643   : > { %4002 = vrot.lane.b32.xlu0 %v6944_v31, %s4800_s27 }
 0x646   : > { %v6344_v27 = vpop.f32.mrf.mxu1  ;;  %v2918_v22 = vpop.f32.mrf.mxu0 }
 0x647   : > { %v3440_v52 = vpop.permute.xlu0 %3439  ;;  %v3555_v1 = vpop.permute.xlu2 %3554 }
 0x648   : > { %v3578_v6 = vpop.permute.xlu1 %3577 }
 0x64c   : > { %4455 = vmatmul.msk.bf16.vlgmr.msra.gmra.mxu0 %vm315_vm0, %v3417_v60 }
 0x64e   : > { %v2939_v26 = vpop.f32.mrf.mxu1 }
 0x64f   : > { %v3511_v0 = vpop.permute.xlu0 %3510  ;;  %v3534_v19 = vpop.permute.xlu2 %3533 }
 0x650   : > { %v3516_v55 = vsel %vm315_vm0, %v3511_v0, 0  ;;  %4453 = vmatmul.msk.bf16.vlgmr.msrb.gmra.mxu2 %vm315_vm0, %v6945_v45  ;;  %v3539_v18 = vsel %vm315_vm0, %v3534_v19, 0  ;;  %v3509_v51 = vpop.permute.xlu1 %3508 }
 0x651   : > { %3571 = vmatpush.bf16.xpose.msrb.mxu2 %v3562_v9  ;;  %3525 = vmatpush.bf16.xpose.msrb.mxu0 %v3516_v55 }
 0x652   : > { %4456 = vmatmul.msk.bf16.vlgmr.msra.gmra.mxu1 %vm315_vm0, %v3440_v52 }
 0x653   : > { %3548 = vmatpush.bf16.xpose.msrb.mxu1 %v3539_v18 }
 0x654   : > { %v6351_v10 = vpop.f32.mrf.mxu2 }
 0x655   : > { %v6353_v49 = vpop.f32.mrf.mxu3 }
 0x656   : > { %v6355_v38 = vpop.f32.mrf.mxu1 }
 0x657   : > { %v6357_v23 = vpop.f32.mrf.mxu0 }
 0x65c   : > { %v2876_v8 = vpop.f32.mrf.mxu2  ;;  %4459 = vmatmul.msk.bf16.vlgmr.msrb.gmra.mxu0 %vm315_vm0, %v3509_v51 }
 0x65d   : > { %v2897_v13 = vpop.f32.mrf.mxu3 }
 0x65e   : > { %v3023_v11 = vpop.f32.mrf.mxu1 }
 0x65f   : > { %v3002_v28 = vpop.f32.mrf.mxu0 }
 0x660   : > { %4457 = vmatmul.msk.bf16.vlgmr.msra.gmra.mxu2 %vm315_vm0, %v3463_v36 }
 0x664   : > { %v6360_v48 = vpop.f32.mrf.mxu2 }
 0x66c   : > { %v2960_v59 = vpop.f32.mrf.mxu2 }
 0x670   : > { %4461 = vmatmul.msk.bf16.vlgmr.msrb.gmra.mxu2 %vm315_vm0, %v3555_v1 }
 0x67a   : > { %v2766_v47 = vpop.xlane.xlu0 %2765 }
 0x67b   : > { %4724 = vrcp.f32 %v2766_v47  ;;  %v6950_v47 = vld [vmem:[#allocation22_spill] sm:$0xff] }
 0x681   : > { %v4725_v15 = vpop.eup %4724 }
 0x682   : > { %v2798_v7 = vmul.f32 %v4725_v15, %v6283_v34  ;;  %v3493_v34 = vsel %vm315_vm0, %v6311_v25, 0 }
 0x684   : > { %v2814_v29 = vpack.c.bf16 %v2798_v7, %v2798_v7 }
 0x686   : > { %4446 = vmatmul.msk.bf16.vlgmr.msrb.gmra.mxu3 %vm620_vm1, %v2814_v29  ;;  %v3856_v29 = vpop.permute.xlu2 %3855 }
 0x687   : > { %3410 = vmatpush.bf16.xpose.msrb.mxu3 %v3401_v42  ;;  %v3861_v54 = vsel %vm816_vm2, %v3856_v29, 0 }
 0x68d   : > { %v3532_v46 = vpop.permute.xlu0 %3531 }
 0x68e   : > { %4460 = vmatmul.msk.bf16.vlgmr.msrb.gmra.mxu1 %vm315_vm0, %v3532_v46  ;;  %v3877_v19 = vpop.permute.xlu2 %3876 }
 0x68f   : > { %v3882_v18 = vsel %vm816_vm2, %v3877_v19, 0 }
 0x695   : > { %v3835_v52 = vpop.permute.xlu0 %3834 }
 0x696   : > { %4450 = vmatmul.msk.bf16.vlgmr.msra.gmra.mxu3 %vm315_vm0, %v6947_v56  ;;  %v3840_v26 = vsel %vm816_vm2, %v3835_v52, 0 }
 0x697   : > { %3502 = vmatpush.bf16.xpose.msra.mxu3 %v3493_v34  ;;  %3849 = vmatpush.bf16.msra.mxu2 %v3840_v26 }
 0x699   : > { %v6375_v53 = vpop.f32.mrf.mxu0 }
 0x69b   : > { %v6377_v58 = vpop.f32.mrf.mxu3 }
 0x69d   : > { %v3814_v55 = vpop.permute.xlu0 %3813 }
 0x69e   : > { %v3819_v45 = vsel %vm816_vm2, %v3814_v55, 0 }
 0x69f   : > { %v6379_v14 = vpop.f32.mrf.mxu1  ;;  %3828 = vmatpush.bf16.msra.mxu1 %v3819_v45 }
 0x6a1   : > { %v3086_v57 = vpop.f32.mrf.mxu0 }
 0x6a3   : > { %v2981_v16 = vpop.f32.mrf.mxu3  ;;  %v6381_v32 = vpop.f32.mrf.mxu2 }
 0x6a5   : > { %v3919_v11 = vpop.permute.xlu0 %3918 }
 0x6a6   : > { %4454 = vmatmul.msk.bf16.vlgmr.msrb.gmra.mxu3 %vm315_vm0, %v6287_v3  ;;  %v3924_v28 = vsel %vm816_vm2, %v3919_v11, 0 }
 0x6a7   : > { %3594 = vmatpush.bf16.xpose.msrb.mxu3 %v3585_v43  ;;  %v3107_v25 = vpop.f32.mrf.mxu1  ;;  %3933 = vmatpush.bf16.msrb.mxu2 %v3924_v28 }
 0x6a9   : > { %v6386_v5 = vpop.f32.mrf.mxu0 }
 0x6aa   : > { %v3600_v41 = vsel %vm620_vm1, %v6386_v5, -inf }
 0x6ab   : > { %v3044_v21 = vpop.f32.mrf.mxu2  ;;  %v6390_v36 = vpop.f32.mrf.mxu3  ;;  %3601 = vmax.xlane.f32.xlu0 %v3600_v41 }
 0x6ad   : > { %v3898_v60 = vpop.permute.xlu0 %3897 }
 0x6ae   : > { %v3903_v15 = vsel %vm816_vm2, %v3898_v60, 0 }
 0x6af   : > { %v6392_v39 = vpop.f32.mrf.mxu1  ;;  %3912 = vmatpush.bf16.msrb.mxu1 %v3903_v15 }
 0x6b0   : > { %v3603_v2 = vsel %vm620_vm1, %v6392_v39, -inf }
 0x6b1   : > { %v3253_v35 = vpop.f32.mrf.mxu0  ;;  %3604 = vmax.xlane.f32.xlu2 %v3603_v2 }
 0x6b3   : > { %v3065_v4 = vpop.f32.mrf.mxu3  ;;  %v6396_v3 = vpop.f32.mrf.mxu2 }
 0x6b6   : > { %4458 = vmatmul.msk.bf16.vlgmr.msra.gmra.mxu3 %vm315_vm0, %v6329_v33 }
 0x6b7   : > { %v3276_v17 = vpop.f32.mrf.mxu1  ;;  %3870 = vmatpush.bf16.msra.mxu3 %v3861_v54 }
 0x6b9   : > { %v6400_v40 = vpop.f32.mrf.mxu0 }
 0x6ba   : > { %v3612_v50 = vsel %vm620_vm1, %v6400_v40, -inf }
 0x6bb   : > { %v3128_v30 = vpop.f32.mrf.mxu2  ;;  %3613 = vmax.xlane.f32.xlu2 %v3612_v50 }
 0x6bf   : > { %3981 = vrot.lane.b32.xlu0 %v6948_v62, %s4800_s27  ;;  %v6406_v63 = vpop.f32.mrf.mxu1 }
 0x6c0   : > { %v3615_v24 = vsel %vm620_vm1, %v6406_v63, -inf }
 0x6c1   : > { %v3345_v12 = vpop.f32.mrf.mxu0  ;;  %3616 = vmax.xlane.f32.xlu1 %v3615_v24 }
 0x6c3   : > { %v6410_v31 = vpop.f32.mrf.mxu2 }
 0x6c4   : > { %v3606_v33 = vsel %vm620_vm1, %v6410_v31, -inf }
 0x6c5   : > { %3607 = vmax.xlane.f32.xlu2 %v3606_v33 }
 0x6c6   : > { %4462 = vmatmul.msk.bf16.vlgmr.msrb.gmra.mxu3 %vm315_vm0, %v3578_v6  ;;  %v3793_v6 = vpop.permute.xlu1 %3792 }
 0x6c7   : > { %v3368_v22 = vpop.f32.mrf.mxu1  ;;  %v3798_v51 = vsel %vm816_vm2, %v3793_v6, 0 }
 0x6c8   : > { %3807 = vmatpush.bf16.msra.mxu0 %v3798_v51  ;;  %v6457_v22 = vpop.permute.xlu0 %4002 }
 0x6c9   : > { %v6434_v46 = vpop.f32.mrf.mxu0 }
 0x6ca   : > { %v3624_v30 = vsel %vm620_vm1, %v6434_v46, -inf }
 0x6cb   : > { %v3299_v0 = vpop.f32.mrf.mxu2 }
 0x6cc   : > { %3891 = vmatpush.bf16.msrb.mxu0 %v3882_v18 }
 0x6ce   : > { %v3940_v56 = vpop.permute.xlu1 %3939 }
 0x6cf   : > { %v6416_v9 = vpop.f32.mrf.mxu1  ;;  %v3945_v16 = vsel %vm816_vm2, %v3940_v56, 0 }
 0x6d0   : > { %v3627_v1 = vsel %vm620_vm1, %v6416_v9, -inf  ;;  %3954 = vmatpush.bf16.msrb.mxu3 %v3945_v16  ;;  %v6951_v16 = vld [vmem:[#allocation35_spill] sm:$0xff] }
 0x6d1   : > { %v3437_v57 = vpop.f32.mrf.mxu0 }
 0x6d3   : > { %v6419_v8 = vpop.f32.mrf.mxu2 }
 0x6d4   : > { %v3618_v33 = vsel %vm620_vm1, %v6419_v8, -inf }
 0x6d7   : > { %v3460_v13 = vpop.f32.mrf.mxu1 }
 0x6d9   : > { %v6441_v41 = vpop.f32.mrf.mxu0 }
 0x6da   : > { %3960 = vrot.lane.b32.xlu1 %v6949_v37, %s4800_s27  ;;  %v3636_v26 = vsel %vm620_vm1, %v6441_v41, -inf }
 0x6db   : > { %v3391_v59 = vpop.f32.mrf.mxu2 }
 0x6dd   : > { %4023 = vrot.lane.b32.xlu2 %v6950_v47, %s4800_s27 }
 0x6e1   : > { %v3529_v35 = vpop.f32.mrf.mxu0 }
 0x6e3   : > { %v6429_v7 = vpop.f32.mrf.mxu2 }
 0x6e4   : > { %v3630_v11 = vsel %vm620_vm1, %v6429_v7, -inf }
 0x6e9   : > { %3628 = vmax.xlane.f32.xlu0 %v3627_v1 }
 0x6eb   : > { %v3483_v42 = vpop.f32.mrf.mxu2 }
 0x6f3   : > { %v6436_v34 = vpop.f32.mrf.mxu2 }
 0x6fb   : > { %v3575_v25 = vpop.f32.mrf.mxu2 }
 0x709   : > { %v6439_v43 = vpop.f32.mrf.mxu3 }
 0x70b   : > { %v6443_v21 = vpop.f32.mrf.mxu1 }
 0x70c   : > { %v3639_v52 = vsel %vm620_vm1, %v6443_v21, -inf }
 0x711   : > { %v3149_v2 = vpop.f32.mrf.mxu3 }
 0x713   : > { %v3552_v4 = vpop.f32.mrf.mxu1 }
 0x719   : > { %v6445_v17 = vpop.f32.mrf.mxu3 }
 0x71a   : > { %v3609_v50 = vsel %vm620_vm1, %v6445_v17, -inf }
 0x71b   : > { %3610 = vmax.xlane.f32.xlu1 %v3609_v50 }
 0x71e   : > { %v3602_v55 = vpop.xlane.xlu0 %3601 }
 0x71f   : > { %v3648_v45 = vsub.f32 %v6386_v5, %v3602_v55  ;;  %v3642_v5 = vsel %vm620_vm1, %v6436_v34, -inf }
 0x721   : > { %v3322_v62 = vpop.f32.mrf.mxu3  ;;  %v3664_v59 = vmul.f32 1.442695, %v3648_v45 }
 0x723   : > { %3625 = vmax.xlane.f32.xlu1 %v3624_v30  ;;  %4726 = vpow2.f32 %v3664_v59 }
 0x724   : > { %v3605_v37 = vpop.xlane.xlu2 %3604 }
 0x725   : > { %v3649_v1 = vsub.f32 %v6392_v39, %v3605_v37 }
 0x727   : > { %v3666_v29 = vmul.f32 1.442695, %v3649_v1 }
 0x729   : > { %v6451_v24 = vpop.f32.mrf.mxu3  ;;  %v6474_v19 = vpop.eup %4726  ;;  %4728 = vpow2.f32 %v3666_v29 }
 0x72a   : > { %v3621_v12 = vsel %vm620_vm1, %v6451_v24, -inf  ;;  %v3696_v39 = vsel %vm620_vm1, %v6474_v19, 0.0 }
 0x72b   : > { %3622 = vmax.xlane.f32.xlu0 %v3621_v12  ;;  %3619 = vmax.xlane.f32.xlu1 %v3618_v33 }
 0x72e   : > { %v3614_v42 = vpop.xlane.xlu2 %3613 }
 0x72f   : > { %v3652_v6 = vsub.f32 %v6400_v40, %v3614_v42  ;;  %v6483_v56 = vpop.eup %4728 }
 0x730   : > { %v3699_v2 = vsel %vm620_vm1, %v6483_v56, 0.0 }
 0x731   : > { %v3414_v0 = vpop.f32.mrf.mxu3  ;;  %v3672_v51 = vmul.f32 1.442695, %v3652_v6  ;;  %v6493_v35 = vpop.permute.xlu0 %3981 }
 0x733   : > { %3640 = vmax.xlane.f32.xlu0 %v3639_v52  ;;  %3637 = vmax.xlane.f32.xlu1 %v3636_v26 }
 0x734   : > { %v3617_v47 = vpop.xlane.xlu1 %3616 }
 0x735   : > { %v3653_v60 = vsub.f32 %v6406_v63, %v3617_v47 }
 0x737   : > { %v3674_v54 = vmul.f32 1.442695, %v3653_v60 }
 0x738   : > { %v3608_v33 = vpop.xlane.xlu2 %3607 }
 0x739   : > { %v6464_v13 = vpop.f32.mrf.mxu3  ;;  %4730 = vpow2.f32 %v3674_v54  ;;  %v3650_v26 = vsub.f32 %v6410_v31, %v3608_v33 }
 0x73a   : > { %v3633_v28 = vsel %vm620_vm1, %v6464_v13, -inf  ;;  %4732 = vpow2.f32 %v3672_v51 }
 0x73b   : > { %3631 = vmax.xlane.f32.xlu0 %v3630_v11  ;;  %3634 = vmax.xlane.f32.xlu2 %v3633_v28  ;;  %v3668_v55 = vmul.f32 1.442695, %v3650_v26 }
 0x73f   : > { %v6485_v57 = vpop.eup %4730 }
 0x740   : > { %v3711_v25 = vsel %vm620_vm1, %v6485_v57, 0.0  ;;  %v6495_v4 = vpop.eup %4732 }
 0x741   : > { %v3506_v15 = vpop.f32.mrf.mxu3  ;;  %v3708_v50 = vsel %vm620_vm1, %v6495_v4, 0.0 }
 0x743   : > { %3643 = vmax.xlane.f32.xlu2 %v3642_v5 }
 0x749   : > { %v6477_v18 = vpop.f32.mrf.mxu3 }
 0x74a   : > { %v3645_v63 = vsel %vm620_vm1, %v6477_v18, -inf }
 0x74b   : > { %3697 = vadd.xlane.f32.xlu2 %v3696_v39  ;;  %3646 = vmax.xlane.f32.xlu1 %v3645_v63  ;;  %v6523_v63 = vpop.permute.xlu2 %4023 }
 0x74f   : > { %4086 = vrot.lane.b32.xlu0 %v6951_v16, %s4800_s27 }
 0x751   : > { %v3598_v40 = vpop.f32.mrf.mxu3 }
 0x753   : > { %3712 = vadd.xlane.f32.xlu2 %v3711_v25  ;;  %3700 = vadd.xlane.f32.xlu1 %v3699_v2 }
 0x75b   : > { %3709 = vadd.xlane.f32.xlu1 %v3708_v50 }
 0x75c   : > { %v3629_v30 = vpop.xlane.xlu0 %3628 }
 0x75d   : > { %v3657_v62 = vsub.f32 %v6416_v9, %v3629_v30  ;;  %v6509_v9 = vpop.permute.xlu1 %3960 }
 0x75f   : > { %v3682_v12 = vmul.f32 1.442695, %v3657_v62 }
 0x761   : > { %4734 = vpow2.f32 %v3682_v12 }
 0x762   : > { %4736 = vpow2.f32 %v3668_v55 }
 0x767   : > { %v6500_v52 = vpop.eup %4734 }
 0x768   : > { %v3723_v0 = vsel %vm620_vm1, %v6500_v52, 0.0  ;;  %v6505_v45 = vpop.eup %4736 }
 0x769   : > { %3724 = vadd.xlane.f32.xlu1 %v3723_v0  ;;  %v3702_v11 = vsel %vm620_vm1, %v6505_v45, 0.0 }
 0x779   : > { %3703 = vadd.xlane.f32.xlu0 %v3702_v11 }
 0x78e   : > { %v3611_v28 = vpop.xlane.xlu1 %3610 }
 0x78f   : > { %v3651_v59 = vsub.f32 %v6445_v17, %v3611_v28 }
 0x791   : > { %v3670_v37 = vmul.f32 1.442695, %v3651_v59 }
 0x793   : > { %4738 = vpow2.f32 %v3670_v37 }
 0x796   : > { %v3626_v31 = vpop.xlane.xlu1 %3625 }
 0x797   : > { %v3656_v47 = vsub.f32 %v6434_v46, %v3626_v31 }
 0x799   : > { %v6513_v1 = vpop.eup %4738  ;;  %v3680_v60 = vmul.f32 1.442695, %v3656_v47 }
 0x79a   : > { %v3705_v15 = vsel %vm620_vm1, %v6513_v1, 0.0 }
 0x79b   : > { %4740 = vpow2.f32 %v3680_v60  ;;  %3706 = vadd.xlane.f32.xlu2 %v3705_v15 }
 0x79e   : > { %v3623_v5 = vpop.xlane.xlu0 %3622  ;;  %v3620_v29 = vpop.xlane.xlu1 %3619 }
 0x79f   : > { %v3655_v54 = vsub.f32 %v6451_v24, %v3623_v5  ;;  %v3654_v42 = vsub.f32 %v6419_v8, %v3620_v29 }
 0x7a1   : > { %v6519_v17 = vpop.eup %4740  ;;  %v3678_v6 = vmul.f32 1.442695, %v3655_v54  ;;  %v3676_v39 = vmul.f32 1.442695, %v3654_v42 }
 0x7a2   : > { %v3720_v46 = vsel %vm620_vm1, %v6519_v17, 0.0 }
 0x7a3   : > { %4742 = vpow2.f32 %v3678_v6  ;;  %3721 = vadd.xlane.f32.xlu2 %v3720_v46 }
 0x7a4   : > { %4744 = vpow2.f32 %v3676_v39 }
 0x7a6   : > { %v3641_v51 = vpop.xlane.xlu0 %3640  ;;  %v3638_v16 = vpop.xlane.xlu1 %3637 }
 0x7a7   : > { %v3661_v40 = vsub.f32 %v6443_v21, %v3641_v51  ;;  %v3660_v24 = vsub.f32 %v6441_v41, %v3638_v16 }
 0x7a9   : > { %v6527_v25 = vpop.eup %4742  ;;  %v3690_v8 = vmul.f32 1.442695, %v3661_v40  ;;  %v3688_v2 = vmul.f32 1.442695, %v3660_v24  ;;  %v3966_v24 = vsel %vm816_vm2, %v6509_v9, 0 }
 0x7aa   : > { %v6529_v50 = vpop.eup %4744  ;;  %v3717_v30 = vsel %vm620_vm1, %v6527_v25, 0.0 }
 0x7ab   : > { %4746 = vpow2.f32 %v3690_v8  ;;  %3718 = vadd.xlane.f32.xlu0 %v3717_v30  ;;  %v3714_v62 = vsel %vm620_vm1, %v6529_v50, 0.0 }
 0x7ac   : > { %4748 = vpow2.f32 %v3688_v2  ;;  %3715 = vadd.xlane.f32.xlu2 %v3714_v62 }
 0x7ae   : > { %v3632_v12 = vpop.xlane.xlu0 %3631  ;;  %v3635_v21 = vpop.xlane.xlu2 %3634 }
 0x7af   : > { %v3658_v41 = vsub.f32 %v6429_v7, %v3632_v12  ;;  %v3659_v33 = vsub.f32 %v6464_v13, %v3635_v21  ;;  %v3987_v12 = vsel %vm816_vm2, %v6493_v35, 0  ;;  %v6952_v21 = vld [vmem:[#allocation24_spill] sm:$0xff]  ;;  %v6954_v35 = vld [vmem:[#allocation23_spill] sm:$0xff] }
 0x7b1   : > { %v6537_v26 = vpop.eup %4746  ;;  %v3684_v0 = vmul.f32 1.442695, %v3658_v41  ;;  %v3686_v55 = vmul.f32 1.442695, %v3659_v33 }
 0x7b2   : > { %v6539_v11 = vpop.eup %4748  ;;  %v3735_v28 = vsel %vm620_vm1, %v6537_v26, 0.0 }
 0x7b3   : > { %4750 = vpow2.f32 %v3684_v0  ;;  %v3732_v59 = vsel %vm620_vm1, %v6539_v11, 0.0 }
 0x7b4   : > { %4752 = vpow2.f32 %v3686_v55  ;;  %3736 = vadd.xlane.f32.xlu2 %v3735_v28  ;;  %3733 = vadd.xlane.f32.xlu1 %v3732_v59  ;;  %v6955_v28 = vld [vmem:[#allocation32_spill] sm:$0xff] }
 0x7b6   : > { %v3644_v37 = vpop.xlane.xlu2 %3643 }
 0x7b7   : > { %v3662_v7 = vsub.f32 %v6436_v34, %v3644_v37 }
 0x7b9   : > { %v6546_v13 = vpop.eup %4750  ;;  %v3692_v31 = vmul.f32 1.442695, %v3662_v7 }
 0x7ba   : > { %v6548_v47 = vpop.eup %4752  ;;  %v3726_v60 = vsel %vm620_vm1, %v6546_v13, 0.0 }
 0x7bb   : > { %4754 = vpow2.f32 %v3692_v31  ;;  %v3729_v15 = vsel %vm620_vm1, %v6548_v47, 0.0  ;;  %v6957_v31 = vld [vmem:[#allocation26_spill] sm:$0xff] }
 0x7bc   : > { %3730 = vadd.xlane.f32.xlu0 %v3729_v15  ;;  %3727 = vadd.xlane.f32.xlu1 %v3726_v60  ;;  %v6959_v15 = vld [vmem:[#allocation11_spill] sm:$0xff] }
 0x7be   : > { %v3698_v5 = vpop.xlane.xlu2 %3697  ;;  %v3647_v29 = vpop.xlane.xlu1 %3646 }
 0x7bf   : > { %4756 = vrcp.f32 %v3698_v5  ;;  %v3663_v54 = vsub.f32 %v6477_v18, %v3647_v29 }
 0x7c1   : > { %v6555_v34 = vpop.eup %4754  ;;  %v3694_v42 = vmul.f32 1.442695, %v3663_v54  ;;  %v6582_v7 = vpop.permute.xlu0 %4086  ;;  %v6960_v54 = vld [vmem:[#allocation21_spill] sm:$0xff] }
 0x7c2   : > { %v3738_v6 = vsel %vm620_vm1, %v6555_v34, 0.0 }
 0x7c3   : > { %4758 = vpow2.f32 %v3694_v42  ;;  %3739 = vadd.xlane.f32.xlu2 %v3738_v6  ;;  %v6961_v42 = vld [vmem:[#allocation25_spill] sm:$0xff] }
 0x7c5   : > { %v4757_v39 = vpop.eup %4756 }
 0x7c6   : > { %v3760_v46 = vmul.f32 %v4757_v39, %v6474_v19  ;;  %v3701_v51 = vpop.xlane.xlu1 %3700  ;;  %v3713_v19 = vpop.xlane.xlu2 %3712 }
 0x7c7   : > { %4760 = vrcp.f32 %v3701_v51 }
 0x7c8   : > { %v3776_v16 = vpack.c.bf16 %v3760_v46, %v3760_v46  ;;  %v6962_v46 = vld [vmem:[#allocation13_spill] sm:$0xff] }
 0x7c9   : > { %v6560_v40 = vpop.eup %4758 }
 0x7ca   : > { %4463 = vmatmul.msk.bf16.vlgmr.msra.gmra.mxu0 %vm620_vm1, %v3776_v16  ;;  %v3741_v18 = vsel %vm620_vm1, %v6560_v40, 0.0  ;;  %v6963_v16 = vld [vmem:[#allocation15_spill] sm:$0xff] }
 0x7cb   : > { %3975 = vmatpush.bf16.msra.mxu0 %v3966_v24  ;;  %3742 = vadd.xlane.f32.xlu0 %v3741_v18  ;;  %v6964_v24 = vld [vmem:[#allocation12_spill] sm:$0xff]  ;;  %v4008_v18 = vsel %vm816_vm2, %v6457_v22, 0 }
 0x7cc   : > { %v6969_v22 = vld [vmem:[#allocation20_spill] sm:$0xff] }
 0x7cd   : > { %v4761_v8 = vpop.eup %4760 }
 0x7ce   : > { %v3710_v2 = vpop.xlane.xlu1 %3709  ;;  %v3761_v30 = vmul.f32 %v4761_v8, %v6483_v56  ;;  %v6953_v56 = vld [vmem:[#allocation31_spill] sm:$0xff]  ;;  %v6965_v8 = vld [vmem:[#allocation16_spill] sm:$0xff] }
 0x7cf   : > { %4762 = vrcp.f32 %v3710_v2  ;;  %v6966_v2 = vld [vmem:[#allocation18_spill] sm:$0xff] }
 0x7d0   : > { %v3777_v62 = vpack.c.bf16 %v3761_v30, %v3761_v30  ;;  %4764 = vrcp.f32 %v3713_v19  ;;  %v6968_v30 = vld [vmem:[#allocation17_spill] sm:$0xff] }
 0x7d2   : > { %4464 = vmatmul.msk.bf16.vlgmr.msra.gmra.mxu1 %vm620_vm1, %v3777_v62  ;;  %v6970_v62 = vld [vmem:[#allocation19_spill] sm:$0xff] }
 0x7d3   : > { %3996 = vmatpush.bf16.msra.mxu1 %v3987_v12 }
 0x7d5   : > { %v4763_v9 = vpop.eup %4762  ;;  %4107 = vrot.lane.b32.xlu1 %v6952_v21, %s4800_s27 }
 0x7d6   : > { %v3764_v41 = vmul.f32 %v4763_v9, %v6495_v4  ;;  %v4765_v0 = vpop.eup %4764  ;;  %v6956_v4 = vld [vmem:[#allocation4_spill] sm:$0xff] }
 0x7d7   : > { %v3765_v55 = vmul.f32 %v4765_v0, %v6485_v57  ;;  %v6958_v57 = vld [vmem:[#allocation5_spill] sm:$0xff] }
 0x7d8   : > { %v3780_v33 = vpack.c.bf16 %v3764_v41, %v3764_v41 }
 0x7d9   : > { %v3781_v59 = vpack.c.bf16 %v3765_v55, %v3765_v55 }
 0x7da   : > { %4467 = vmatmul.msk.bf16.vlgmr.msrb.gmra.mxu0 %vm620_vm1, %v3780_v33 }
 0x7db   : > { %4044 = vrot.lane.b32.xlu2 %v6953_v56, %s4800_s27 }
 0x7dc   : > { %v3725_v37 = vpop.xlane.xlu1 %3724 }
 0x7dd   : > { %2194 = vrot.lane.b32.xlu1 %v6954_v35, %s4801_s28  ;;  %4766 = vrcp.f32 %v3725_v37 }
 0x7df   : > { %4065 = vrot.lane.b32.xlu0 %v6955_v28, %s4800_s27 }
 0x7e2   : > { %4468 = vmatmul.msk.bf16.vlgmr.msrb.gmra.mxu1 %vm620_vm1, %v3781_v59 }
 0x7e3   : > { %2192 = vrot.lane.b32.xlu2 %v6956_v4, %s4801_s28  ;;  %v4767_v60 = vpop.eup %4766 }
 0x7e4   : > { %v3769_v29 = vmul.f32 %v4767_v60, %v6500_v52 }
 0x7e5   : > { %2200 = vrot.lane.b32.xlu1 %v6957_v31, %s4801_s28 }
 0x7e6   : > { %v3785_v6 = vpack.c.bf16 %v3769_v29, %v3769_v29 }
 0x7e7   : > { %2190 = vrot.lane.b32.xlu0 %v6958_v57, %s4801_s28 }
 0x7eb   : > { %2198 = vrot.lane.b32.xlu2 %v6959_v15, %s4801_s28 }
 0x7ec   : > { %v3704_v5 = vpop.xlane.xlu0 %3703 }
 0x7ed   : > { %4768 = vrcp.f32 %v3704_v5  ;;  %2206 = vrot.lane.b32.xlu1 %v6960_v54, %s4801_s28 }
 0x7ef   : > { %2196 = vrot.lane.b32.xlu0 %v6961_v42, %s4801_s28 }
 0x7f2   : > { %4472 = vmatmul.msk.bf16.vlgmr.msra.gmra.mxu1 %vm620_vm1, %v3785_v6 }
 0x7f3   : > { %v4769_v39 = vpop.eup %4768  ;;  %2204 = vrot.lane.b32.xlu2 %v6962_v46, %s4801_s28 }
 0x7f4   : > { %v3762_v51 = vmul.f32 %v4769_v39, %v6505_v45  ;;  %v6967_v45 = vld [vmem:[#allocation14_spill] sm:$0xff] }
 0x7f5   : > { %2212 = vrot.lane.b32.xlu1 %v6963_v16, %s4801_s28 }
 0x7f6   : > { %v3778_v52 = vpack.c.bf16 %v3762_v51, %v3762_v51 }
 0x7f7   : > { %2202 = vrot.lane.b32.xlu0 %v6964_v24, %s4801_s28 }
 0x7f8   : > { %4465 = vmatmul.msk.bf16.vlgmr.msra.gmra.mxu2 %vm620_vm1, %v3778_v52 }
 0x7f9   : > { %4017 = vmatpush.bf16.msra.mxu2 %v4008_v18 }
 0x7fb   : > { %2210 = vrot.lane.b32.xlu2 %v6965_v8, %s4801_s28 }
 0x7fd   : > { %2218 = vrot.lane.b32.xlu1 %v6966_v2, %s4801_s28 }
 0x7ff   : > { %2208 = vrot.lane.b32.xlu0 %v6967_v45, %s4801_s28 }
 0x803   : > { %2216 = vrot.lane.b32.xlu2 %v6968_v30, %s4801_s28 }
 0x805   : > { %3169 = vrot.lane.b32.xlu1 %v6327_v61, %s4802_s29 }
 0x807   : > { %2214 = vrot.lane.b32.xlu0 %v6969_v22, %s4801_s28 }
 0x80b   : > { %3167 = vrot.lane.b32.xlu2 %v6314_v20, %s4802_s29 }
 0x80d   : > { %3175 = vrot.lane.b32.xlu1 %v6337_v44, %s4802_s29  ;;  %v4029_v44 = vsel %vm816_vm2, %v6523_v63, 0 }
 0x80e   : > { %v3707_v19 = vpop.xlane.xlu2 %3706 }
 0x80f   : > { %4770 = vrcp.f32 %v3707_v19  ;;  %2220 = vrot.lane.b32.xlu0 %v6970_v62, %s4801_s28 }
 0x813   : > { %3173 = vrot.lane.b32.xlu2 %v6353_v49, %s4802_s29 }
 0x815   : > { %v4771_v12 = vpop.eup %4770  ;;  %3181 = vrot.lane.b32.xlu1 %v6377_v58, %s4802_s29 }
 0x816   : > { %v3763_v61 = vmul.f32 %v4771_v12, %v6513_v1  ;;  %v3722_v9 = vpop.xlane.xlu2 %3721 }
 0x817   : > { %4772 = vrcp.f32 %v3722_v9  ;;  %3171 = vrot.lane.b32.xlu0 %v6351_v10, %s4802_s29 }
 0x818   : > { %v3779_v20 = vpack.c.bf16 %v3763_v61, %v3763_v61 }
 0x81a   : > { %4466 = vmatmul.msk.bf16.vlgmr.msra.gmra.mxu3 %vm620_vm1, %v3779_v20 }
 0x81b   : > { %4038 = vmatpush.bf16.msra.mxu3 %v4029_v44  ;;  %3179 = vrot.lane.b32.xlu2 %v6360_v48, %s4802_s29 }
 0x81d   : > { %v4773_v49 = vpop.eup %4772  ;;  %3187 = vrot.lane.b32.xlu1 %v6381_v32, %s4802_s29 }
 0x81e   : > { %v3768_v58 = vmul.f32 %v4773_v49, %v6519_v17  ;;  %v3719_v1 = vpop.xlane.xlu0 %3718 }
 0x81f   : > { %4774 = vrcp.f32 %v3719_v1  ;;  %v3716_v21 = vpop.xlane.xlu2 %3715  ;;  %3177 = vrot.lane.b32.xlu0 %v6344_v27, %s4802_s29 }
 0x820   : > { %v3784_v10 = vpack.c.bf16 %v3768_v58, %v3768_v58  ;;  %4776 = vrcp.f32 %v3716_v21 }
 0x822   : > { %4471 = vmatmul.msk.bf16.vlgmr.msra.gmra.mxu0 %vm620_vm1, %v3784_v10 }
 0x823   : > { %3185 = vrot.lane.b32.xlu2 %v6355_v38, %s4802_s29  ;;  %v4092_v38 = vsel %vm816_vm2, %v6582_v7, 0 }
 0x825   : > { %v4775_v48 = vpop.eup %4774  ;;  %3193 = vrot.lane.b32.xlu1 %v6379_v14, %s4802_s29 }
 0x826   : > { %v4777_v32 = vpop.eup %4776  ;;  %v3767_v17 = vmul.f32 %v4775_v48, %v6527_v25 }
 0x827   : > { %v3766_v63 = vmul.f32 %v4777_v32, %v6529_v50  ;;  %v3734_v41 = vpop.xlane.xlu1 %3733  ;;  %3183 = vrot.lane.b32.xlu0 %v6357_v23, %s4802_s29  ;;  %v3737_v14 = vpop.xlane.xlu2 %3736 }
 0x828   : > { %v3783_v27 = vpack.c.bf16 %v3767_v17, %v3767_v17 }
 0x829   : > { %v3782_v33 = vpack.c.bf16 %v3766_v63, %v3766_v63 }
 0x82a   : > { %4470 = vmatmul.msk.bf16.vlgmr.msrb.gmra.mxu3 %vm620_vm1, %v3783_v27 }
 0x82b   : > { %4469 = vmatmul.msk.bf16.vlgmr.msrb.gmra.mxu2 %vm620_vm1, %v3782_v33  ;;  %3191 = vrot.lane.b32.xlu2 %v6375_v53, %s4802_s29 }
 0x82c   : > { %4101 = vmatpush.bf16.msrb.mxu2 %v4092_v38 }
 0x82f   : > { %v3731_v25 = vpop.xlane.xlu0 %3730  ;;  %v3728_v50 = vpop.xlane.xlu1 %3727  ;;  %3189 = vrot.lane.b32.xlu0 %v6390_v36, %s4802_s29 }
 0x830   : > { %4778 = vrcp.f32 %v3731_v25 }
 0x831   : > { %4780 = vrcp.f32 %v3728_v50 }
 0x832   : > { %4782 = vrcp.f32 %v3734_v41 }
 0x833   : > { %3197 = vrot.lane.b32.xlu2 %v6439_v43, %s4802_s29 }
 0x836   : > { %v4779_v23 = vpop.eup %4778  ;;  %v3740_v0 = vpop.xlane.xlu2 %3739 }
 0x837   : > { %v4781_v56 = vpop.eup %4780  ;;  %v3771_v55 = vmul.f32 %v4779_v23, %v6548_v47  ;;  %3195 = vrot.lane.b32.xlu0 %v6396_v3, %s4802_s29  ;;  %4784 = vrcp.f32 %v3740_v0 }
 0x838   : > { %v3770_v53 = vmul.f32 %v4781_v56, %v6546_v13  ;;  %v4783_v28 = vpop.eup %4782 }
 0x839   : > { %v3787_v35 = vpack.c.bf16 %v3771_v55, %v3771_v55  ;;  %v3772_v36 = vmul.f32 %v4783_v28, %v6539_v11 }
 0x83a   : > { %v3786_v59 = vpack.c.bf16 %v3770_v53, %v3770_v53 }
 0x83b   : > { %4474 = vmatmul.msk.bf16.vlgmr.msra.gmra.mxu3 %vm620_vm1, %v3787_v35  ;;  %v3788_v47 = vpack.c.bf16 %v3772_v36, %v3772_v36 }
 0x83c   : > { %4473 = vmatmul.msk.bf16.vlgmr.msra.gmra.mxu2 %vm620_vm1, %v3786_v59 }
 0x83d   : > { %v4785_v3 = vpop.eup %4784 }
 0x83e   : > { %v4045_v43 = vpop.permute.xlu2 %4044  ;;  %v3743_v37 = vpop.xlane.xlu0 %3742  ;;  %v3774_v4 = vmul.f32 %v4785_v3, %v6555_v34 }
 0x83f   : > { %v4050_v7 = vsel %vm816_vm2, %v4045_v43, 0  ;;  %4786 = vrcp.f32 %v3743_v37 }
 0x840   : > { %4059 = vmatpush.bf16.msrb.mxu0 %v4050_v7  ;;  %4788 = vrcp.f32 %v3737_v14  ;;  %v3790_v29 = vpack.c.bf16 %v3774_v4, %v3774_v4 }
 0x843   : > { %4475 = vmatmul.msk.bf16.vlgmr.msrb.gmra.mxu0 %vm620_vm1, %v3788_v47 }
 0x845   : > { %v4787_v13 = vpop.eup %4786 }
 0x846   : > { %v3775_v31 = vmul.f32 %v4787_v13, %v6560_v40  ;;  %v2193_v57 = vpop.permute.xlu2 %2192  ;;  %v4789_v34 = vpop.eup %4788 }
 0x847   : > { %2240 = vst.msk [vmem:[#allocation2 + $0x8] sm:$0xff] %vm2238_vm3, %v2193_v57  ;;  %v4108_v11 = vpop.permute.xlu1 %4107  ;;  %v3809_v60 = vpop.f32.mrf.mxu0  ;;  %v3773_v6 = vmul.f32 %v4789_v34, %v6537_v26 }
 0x848   : > { %v3791_v15 = vpack.c.bf16 %v3775_v31, %v3775_v31  ;;  %v4113_v5 = vsel %vm816_vm2, %v4108_v11, 0  ;;  %4144 = vrot.lane.b32.xlu1 %v3809_v60, %s4803_s30 }
 0x849   : > { %4122 = vmatpush.bf16.msrb.mxu3 %v4113_v5  ;;  %v3789_v16 = vpack.c.bf16 %v3773_v6, %v3773_v6 }
 0x84c   : > { %4477 = vmatmul.msk.bf16.vlgmr.msrb.gmra.mxu2 %vm620_vm1, %v3790_v29  ;;  %4478 = vmatmul.msk.bf16.vlgmr.msrb.gmra.mxu3 %vm620_vm1, %v3791_v15 }
 0x84e   : > { %v2199_v40 = vpop.permute.xlu2 %2198 }
 0x84f   : > { %2243 = vst.msk [vmem:[#allocation2 + $0x20] sm:$0xff] %vm2238_vm3, %v2199_v40  ;;  %v2195_v54 = vpop.permute.xlu1 %2194  ;;  %v3811_v42 = vpop.f32.mrf.mxu0 }
 0x850   : > { %2241 = vst.msk [vmem:[#allocation2 + $0x10] sm:$0xff] %vm2238_vm3, %v2195_v54  ;;  %v3830_v39 = vpop.f32.mrf.mxu1 }
 0x851   : > { %4146 = vrot.lane.b32.xlu0 %v3830_v39, %s4803_s30  ;;  %v4066_v46 = vpop.permute.xlu0 %4065 }
 0x852   : > { %v4071_v51 = vsel %vm816_vm2, %v4066_v46, 0 }
 0x853   : > { %4080 = vmatpush.bf16.msrb.mxu1 %v4071_v51 }
 0x856   : > { %v2205_v52 = vpop.permute.xlu2 %2204  ;;  %4476 = vmatmul.msk.bf16.vlgmr.msrb.gmra.mxu1 %vm620_vm1, %v3789_v16 }
 0x857   : > { %2246 = vst.msk [vmem:[#allocation2 + $0x38] sm:$0xff] %vm2238_vm3, %v2205_v52  ;;  %v2201_v24 = vpop.permute.xlu1 %2200  ;;  %v3893_v18 = vpop.f32.mrf.mxu0 }
 0x858   : > { %2244 = vst.msk [vmem:[#allocation2 + $0x28] sm:$0xff] %vm2238_vm3, %v2201_v24  ;;  %v3832_v26 = vpop.f32.mrf.mxu1 }
 0x859   : > { %4152 = vrot.lane.b32.xlu0 %v3893_v18, %s4803_s30  ;;  %v2191_v8 = vpop.permute.xlu0 %2190 }
 0x85a   : > { %2239 = vst.msk [vmem:[#allocation2] sm:$0xff] %vm2238_vm3, %v2191_v8 }
 0x85e   : > { %v2211_v2 = vpop.permute.xlu2 %2210 }
 0x85f   : > { %2249 = vst.msk [vmem:[#allocation2 + $0x50] sm:$0xff] %vm2238_vm3, %v2211_v2  ;;  %v2207_v45 = vpop.permute.xlu1 %2206  ;;  %v3895_v30 = vpop.f32.mrf.mxu0 }
 0x860   : > { %2247 = vst.msk [vmem:[#allocation2 + $0x40] sm:$0xff] %vm2238_vm3, %v2207_v45  ;;  %v3914_v22 = vpop.f32.mrf.mxu1 }
 0x861   : > { %4154 = vrot.lane.b32.xlu2 %v3914_v22, %s4803_s30  ;;  %v2197_v19 = vpop.permute.xlu0 %2196 }
 0x862   : > { %2242 = vst.msk [vmem:[#allocation2 + $0x18] sm:$0xff] %vm2238_vm3, %v2197_v19 }
 0x866   : > { %v2217_v62 = vpop.permute.xlu2 %2216 }
 0x867   : > { %2252 = vst.msk [vmem:[#allocation2 + $0x68] sm:$0xff] %vm2238_vm3, %v2217_v62  ;;  %v2213_v12 = vpop.permute.xlu1 %2212 }
 0x868   : > { %2250 = vst.msk [vmem:[#allocation2 + $0x58] sm:$0xff] %vm2238_vm3, %v2213_v12  ;;  %v3916_v61 = vpop.f32.mrf.mxu1 }
 0x869   : > { %v2203_v9 = vpop.permute.xlu0 %2202 }
 0x86a   : > { %2245 = vst.msk [vmem:[#allocation2 + $0x30] sm:$0xff] %vm2238_vm3, %v2203_v9 }
 0x86e   : > { %v3168_v20 = vpop.permute.xlu2 %3167 }
 0x86f   : > { %3216 = vst.msk [vmem:[#allocation2] sm:$0xff] %vm3215_vm4, %v3168_v20  ;;  %v2219_v44 = vpop.permute.xlu1 %2218 }
 0x870   : > { %2253 = vst.msk [vmem:[#allocation2 + $0x70] sm:$0xff] %vm2238_vm3, %v2219_v44  ;;  %v3998_v49 = vpop.f32.mrf.mxu1 }
 0x871   : > { %v2209_v58 = vpop.permute.xlu0 %2208 }
 0x872   : > { %2248 = vst.msk [vmem:[#allocation2 + $0x48] sm:$0xff] %vm2238_vm3, %v2209_v58 }
 0x876   : > { %v3174_v1 = vpop.permute.xlu2 %3173 }
 0x877   : > { %3219 = vst.msk [vmem:[#allocation2 + $0x18] sm:$0xff] %vm3215_vm4, %v3174_v1  ;;  %v3170_v21 = vpop.permute.xlu1 %3169 }
 0x878   : > { %3217 = vst.msk [vmem:[#allocation2 + $0x8] sm:$0xff] %vm3215_vm4, %v3170_v21  ;;  %v4000_v10 = vpop.f32.mrf.mxu1 }
 0x879   : > { %v2215_v48 = vpop.permute.xlu0 %2214 }
 0x87a   : > { %2251 = vst.msk [vmem:[#allocation2 + $0x60] sm:$0xff] %vm2238_vm3, %v2215_v48 }
 0x87b   : > { %v3851_v32 = vpop.f32.mrf.mxu2 }
 0x87c   : > { %4148 = vrot.lane.b32.xlu2 %v3851_v32, %s4803_s30 }
 0x87e   : > { %v3180_v17 = vpop.permute.xlu2 %3179 }
 0x87f   : > { %3222 = vst.msk [vmem:[#allocation2 + $0x30] sm:$0xff] %vm3215_vm4, %v3180_v17  ;;  %v3176_v63 = vpop.permute.xlu1 %3175 }
 0x880   : > { %3220 = vst.msk [vmem:[#allocation2 + $0x20] sm:$0xff] %vm3215_vm4, %v3176_v63 }
 0x881   : > { %v2221_v41 = vpop.permute.xlu0 %2220 }
 0x882   : > { %2254 = vst.msk [vmem:[#allocation2 + $0x78] sm:$0xff] %vm2238_vm3, %v2221_v41 }
 0x883   : > { %v3853_v27 = vpop.f32.mrf.mxu2 }
 0x886   : > { %v3186_v33 = vpop.permute.xlu2 %3185 }
 0x887   : > { %3225 = vst.msk [vmem:[#allocation2 + $0x48] sm:$0xff] %vm3215_vm4, %v3186_v33  ;;  %v3182_v38 = vpop.permute.xlu1 %3181 }
 0x888   : > { %3223 = vst.msk [vmem:[#allocation2 + $0x38] sm:$0xff] %vm3215_vm4, %v3182_v38 }
 0x889   : > { %v3172_v14 = vpop.permute.xlu0 %3171 }
 0x88a   : > { %3218 = vst.msk [vmem:[#allocation2 + $0x10] sm:$0xff] %vm3215_vm4, %v3172_v14 }
 0x88e   : > { %v3192_v25 = vpop.permute.xlu2 %3191 }
 0x88f   : > { %3228 = vst.msk [vmem:[#allocation2 + $0x60] sm:$0xff] %vm3215_vm4, %v3192_v25  ;;  %v3188_v50 = vpop.permute.xlu1 %3187 }
 0x890   : > { %3226 = vst.msk [vmem:[#allocation2 + $0x50] sm:$0xff] %vm3215_vm4, %v3188_v50 }
 0x891   : > { %v3178_v23 = vpop.permute.xlu0 %3177 }
 0x892   : > { %3221 = vst.msk [vmem:[#allocation2 + $0x28] sm:$0xff] %vm3215_vm4, %v3178_v23 }
 0x896   : > { %v3198_v0 = vpop.permute.xlu2 %3197 }
 0x897   : > { %3231 = vst.msk [vmem:[#allocation2 + $0x78] sm:$0xff] %vm3215_vm4, %v3198_v0  ;;  %v3194_v56 = vpop.permute.xlu1 %3193 }
 0x898   : > { %3229 = vst.msk [vmem:[#allocation2 + $0x68] sm:$0xff] %vm3215_vm4, %v3194_v56 }
 0x899   : > { %v3184_v55 = vpop.permute.xlu0 %3183 }
 0x89a   : > { %3224 = vst.msk [vmem:[#allocation2 + $0x40] sm:$0xff] %vm3215_vm4, %v3184_v55 }
 0x89d   : > { %v3872_v53 = vpop.f32.mrf.mxu3 }
 0x89e   : > { %4150 = vrot.lane.b32.xlu1 %v3872_v53, %s4803_s30 }
 0x89f   : > { %v3977_v35 = vpop.f32.mrf.mxu0 }
 0x8a0   : > { %4160 = vrot.lane.b32.xlu2 %v3977_v35, %s4803_s30 }
 0x8a1   : > { %v3190_v28 = vpop.permute.xlu0 %3189 }
 0x8a2   : > { %3227 = vst.msk [vmem:[#allocation2 + $0x58] sm:$0xff] %vm3215_vm4, %v3190_v28 }
 0x8a5   : > { %v3874_v59 = vpop.f32.mrf.mxu3 }
 0x8a6   : > { %4162 = vrot.lane.b32.xlu1 %v3998_v49, %s4803_s30 }
 0x8a7   : > { %v3979_v36 = vpop.f32.mrf.mxu0 }
 0x8a9   : > { %v3196_v43 = vpop.permute.xlu0 %3195 }
 0x8aa   : > { %3230 = vst.msk [vmem:[#allocation2 + $0x70] sm:$0xff] %vm3215_vm4, %v3196_v43 }
 0x8ad   : > { %v3956_v37 = vpop.f32.mrf.mxu3 }
 0x8ae   : > { %v3935_v7 = vpop.f32.mrf.mxu2  ;;  %4158 = vrot.lane.b32.xlu0 %v3956_v37, %s4803_s30 }
 0x8af   : > { %4156 = vrot.lane.b32.xlu1 %v3935_v7, %s4803_s30 }
 0x8b5   : > { %v3958_v47 = vpop.f32.mrf.mxu3 }
 0x8b6   : > { %v3937_v3 = vpop.f32.mrf.mxu2 }
 0x8ba   : > { %v4145_v13 = vpop.permute.xlu1 %4144 }
 0x8bb   : > { %v4155_v4 = vpop.permute.xlu2 %4154  ;;  %4193 = vst.msk [vmem:[#allocation2] sm:$0xff] %vm4192_vm5, %v4145_v13 }
 0x8bc   : > { %4198 = vst.msk [vmem:[#allocation2 + $0x28] sm:$0xff] %vm4192_vm5, %v4155_v4 }
 0x8be   : > { %v4040_v31 = vpop.f32.mrf.mxu3 }
 0x8bf   : > { %v4019_v57 = vpop.f32.mrf.mxu2  ;;  %4166 = vrot.lane.b32.xlu2 %v4040_v31, %s4803_s30 }
 0x8c0   : > { %4164 = vrot.lane.b32.xlu0 %v4019_v57, %s4803_s30  ;;  %v4061_v11 = vpop.f32.mrf.mxu0 }
 0x8c1   : > { %4168 = vrot.lane.b32.xlu1 %v4061_v11, %s4803_s30 }
 0x8c2   : > { %v4209_v60 = vld [vmem:[#allocation2] sm:$0xff] }
 0x8c3   : > { %v4214_v15 = vld [vmem:[#allocation2 + $0x28] sm:$0xff]  ;;  %v4225_v5 = vpack.c.bf16 %v4209_v60, %v4209_v60  ;;  %v4147_v29 = vpop.permute.xlu0 %4146 }
 0x8c4   : > { %v4230_v34 = vpack.c.bf16 %v4214_v15, %v4214_v15  ;;  %4194 = vst.msk [vmem:[#allocation2 + $0x8] sm:$0xff] %vm4192_vm5, %v4147_v29 }
 0x8c5   : > { %4242 = vst.msk [vmem:[%s6731_s6] sm:$0xf] %vm4241_vm6, %v4225_v5 }
 0x8c6   : > { %4247 = vst.msk [vmem:[%s6731_s6 + $0x14] sm:$0xf] %vm4241_vm6, %v4230_v34  ;;  %v4042_v40 = vpop.f32.mrf.mxu3 }
 0x8c7   : > { %v4021_v54 = vpop.f32.mrf.mxu2 }
 0x8c8   : > { %v4063_v42 = vpop.f32.mrf.mxu0 }
 0x8cb   : > { %v4210_v6 = vld [vmem:[#allocation2 + $0x8] sm:$0xff]  ;;  %v4153_v39 = vpop.permute.xlu0 %4152 }
 0x8cc   : > { %v4226_v46 = vpack.c.bf16 %v4210_v6, %v4210_v6  ;;  %4197 = vst.msk [vmem:[#allocation2 + $0x20] sm:$0xff] %vm4192_vm5, %v4153_v39 }
 0x8ce   : > { %4243 = vst.msk [vmem:[%s6731_s6 + $0x4] sm:$0xf] %vm4241_vm6, %v4226_v46 }
 0x8cf   : > { %v4103_v51 = vpop.f32.mrf.mxu2  ;;  %v4124_v16 = vpop.f32.mrf.mxu3 }
 0x8d0   : > { %4172 = vrot.lane.b32.xlu2 %v4103_v51, %s4803_s30  ;;  %4174 = vrot.lane.b32.xlu1 %v4124_v16, %s4803_s30 }
 0x8d3   : > { %v4213_v52 = vld [vmem:[#allocation2 + $0x20] sm:$0xff]  ;;  %v4082_v24 = vpop.f32.mrf.mxu1 }
 0x8d4   : > { %v4229_v18 = vpack.c.bf16 %v4213_v52, %v4213_v52  ;;  %4170 = vrot.lane.b32.xlu0 %v4082_v24, %s4803_s30 }
 0x8d6   : > { %4246 = vst.msk [vmem:[%s6731_s6 + $0x10] sm:$0xf] %vm4241_vm6, %v4229_v18  ;;  %v4149_v26 = vpop.permute.xlu2 %4148 }
 0x8d7   : > { %v4105_v8 = vpop.f32.mrf.mxu2  ;;  %4195 = vst.msk [vmem:[#allocation2 + $0x10] sm:$0xff] %vm4192_vm5, %v4149_v26  ;;  %v4126_v2 = vpop.f32.mrf.mxu3 }
 0x8db   : > { %v4084_v45 = vpop.f32.mrf.mxu1 }
 0x8de   : > { %v4211_v30 = vld [vmem:[#allocation2 + $0x10] sm:$0xff] }
 0x8df   : > { %v4227_v22 = vpack.c.bf16 %v4211_v30, %v4211_v30 }
 0x8e1   : > { %4244 = vst.msk [vmem:[%s6731_s6 + $0x8] sm:$0xf] %vm4241_vm6, %v4227_v22 }
 0x8fa   : > { %v4161_v19 = vpop.permute.xlu2 %4160 }
 0x8fb   : > { %4201 = vst.msk [vmem:[#allocation2 + $0x40] sm:$0xff] %vm4192_vm5, %v4161_v19 }
 0x902   : > { %v4217_v62 = vld [vmem:[#allocation2 + $0x40] sm:$0xff] }
 0x903   : > { %v4233_v12 = vpack.c.bf16 %v4217_v62, %v4217_v62 }
 0x905   : > { %4250 = vst.msk [vmem:[%s6731_s6 + $0x20] sm:$0xf] %vm4241_vm6, %v4233_v12 }
 0x910   : > { %v4151_v61 = vpop.permute.xlu1 %4150 }
 0x911   : > { %4196 = vst.msk [vmem:[#allocation2 + $0x18] sm:$0xff] %vm4192_vm5, %v4151_v61 }
 0x918   : > { %v4212_v9 = vld [vmem:[#allocation2 + $0x18] sm:$0xff]  ;;  %v4163_v20 = vpop.permute.xlu1 %4162 }
 0x919   : > { %v4228_v44 = vpack.c.bf16 %v4212_v9, %v4212_v9  ;;  %4202 = vst.msk [vmem:[#allocation2 + $0x48] sm:$0xff] %vm4192_vm5, %v4163_v20  ;;  %v4167_v49 = vpop.permute.xlu2 %4166 }
 0x91a   : > { %4204 = vst.msk [vmem:[#allocation2 + $0x58] sm:$0xff] %vm4192_vm5, %v4167_v49 }
 0x91b   : > { %4245 = vst.msk [vmem:[%s6731_s6 + $0xc] sm:$0xf] %vm4241_vm6, %v4228_v44 }
 0x920   : > { %v4218_v58 = vld [vmem:[#allocation2 + $0x48] sm:$0xff]  ;;  %v4159_v1 = vpop.permute.xlu0 %4158 }
 0x921   : > { %v4234_v21 = vpack.c.bf16 %v4218_v58, %v4218_v58  ;;  %v4220_v10 = vld [vmem:[#allocation2 + $0x58] sm:$0xff]  ;;  %v4157_v48 = vpop.permute.xlu1 %4156  ;;  %4200 = vst.msk [vmem:[#allocation2 + $0x38] sm:$0xff] %vm4192_vm5, %v4159_v1 }
 0x922   : > { %v4236_v32 = vpack.c.bf16 %v4220_v10, %v4220_v10  ;;  %4199 = vst.msk [vmem:[#allocation2 + $0x30] sm:$0xff] %vm4192_vm5, %v4157_v48 }
 0x923   : > { %4251 = vst.msk [vmem:[%s6731_s6 + $0x24] sm:$0xf] %vm4241_vm6, %v4234_v21 }
 0x924   : > { %4253 = vst.msk [vmem:[%s6731_s6 + $0x2c] sm:$0xf] %vm4241_vm6, %v4236_v32 }
 0x928   : > { %v4216_v17 = vld [vmem:[#allocation2 + $0x38] sm:$0xff] }
 0x929   : > { %v4215_v63 = vld [vmem:[#allocation2 + $0x30] sm:$0xff]  ;;  %v4232_v41 = vpack.c.bf16 %v4216_v17, %v4216_v17 }
 0x92a   : > { %v4231_v27 = vpack.c.bf16 %v4215_v63, %v4215_v63  ;;  %v4173_v33 = vpop.permute.xlu2 %4172 }
 0x92b   : > { %4249 = vst.msk [vmem:[%s6731_s6 + $0x1c] sm:$0xf] %vm4241_vm6, %v4232_v41 }
 0x92c   : > { %4248 = vst.msk [vmem:[%s6731_s6 + $0x18] sm:$0xf] %vm4241_vm6, %v4231_v27 }
 0x92d   : > { %4207 = vst.msk [vmem:[#allocation2 + $0x70] sm:$0xff] %vm4192_vm5, %v4173_v33 }
 0x932   : > { %v4165_v38 = vpop.permute.xlu0 %4164 }
 0x933   : > { %4203 = vst.msk [vmem:[#allocation2 + $0x50] sm:$0xff] %vm4192_vm5, %v4165_v38  ;;  %v4169_v14 = vpop.permute.xlu1 %4168 }
 0x934   : > { %v4223_v25 = vld [vmem:[#allocation2 + $0x70] sm:$0xff]  ;;  %4205 = vst.msk [vmem:[#allocation2 + $0x60] sm:$0xff] %vm4192_vm5, %v4169_v14 }
 0x935   : > { %v4239_v50 = vpack.c.bf16 %v4223_v25, %v4223_v25 }
 0x937   : > { %4256 = vst.msk [vmem:[%s6731_s6 + $0x38] sm:$0xf] %vm4241_vm6, %v4239_v50 }
 0x93a   : > { %v4219_v23 = vld [vmem:[#allocation2 + $0x50] sm:$0xff] }
 0x93b   : > { %v4235_v0 = vpack.c.bf16 %v4219_v23, %v4219_v23  ;;  %v4221_v56 = vld [vmem:[#allocation2 + $0x60] sm:$0xff] }
 0x93c   : > { %v4237_v55 = vpack.c.bf16 %v4221_v56, %v4221_v56 }
 0x93d   : > { %4252 = vst.msk [vmem:[%s6731_s6 + $0x28] sm:$0xf] %vm4241_vm6, %v4235_v0 }
 0x93e   : > { %4254 = vst.msk [vmem:[%s6731_s6 + $0x30] sm:$0xf] %vm4241_vm6, %v4237_v55 }
 0x942   : > { %v4175_v53 = vpop.permute.xlu1 %4174 }
 0x943   : > { %4208 = vst.msk [vmem:[#allocation2 + $0x78] sm:$0xff] %vm4192_vm5, %v4175_v53 }
 0x946   : > { %v4171_v35 = vpop.permute.xlu0 %4170 }
 0x947   : > { %4206 = vst.msk [vmem:[#allocation2 + $0x68] sm:$0xff] %vm4192_vm5, %v4171_v35 }
 0x94a   : > { %v4224_v28 = vld [vmem:[#allocation2 + $0x78] sm:$0xff] }
 0x94b   : > { %v4240_v59 = vpack.c.bf16 %v4224_v28, %v4224_v28 }
 0x94d   : > { %4257 = vst.msk [vmem:[%s6731_s6 + $0x3c] sm:$0xf] %vm4241_vm6, %v4240_v59 }
 0x94e   : > { %v4222_v36 = vld [vmem:[#allocation2 + $0x68] sm:$0xff] }
 0x94f   : > { %v4238_v43 = vpack.c.bf16 %v4222_v36, %v4222_v36 }
 0x951   : > { %4255 = vst.msk [vmem:[%s6731_s6 + $0x34] sm:$0xf] %vm4241_vm6, %v4238_v43 }
 0x952 PF: > { %s13_s12 = sadd.s32 1, %s4796_s12  }
 0x953   : > { %p10_p4 = scmp.ge.s32.totalorder %s13_s12, 4  }
 0x955   :  { %12 = sbr.rel (!%p10_p4) target bundleno = 1 (0x1), region = 68 }

</bundles_post_ra>
